<compile_context>
chip_gen: v6e
topology: v6e:2x2x1
jax: 0.10.0
libtpu: 0.0.40
codegen_flags: <defaults>
</compile_context>

<pallas_src>
import numpy as np
import jax
import jax.numpy as jnp
from jax.experimental import pallas as pl
from jax.experimental.pallas import tpu as pltpu

EPS = 1e-5  # torch.nn.GroupNorm default

# tap order: dh outer, dw inner  ->  t = (dh+1)*3 + (dw+1)
_TAPS = [(dh, dw) for dh in (-1, 0, 1) for dw in (-1, 0, 1)]


# -----------------------------------------------------------------------------
# Static architecture description (mirrors pytorch-3dunet channel bookkeeping)
# -----------------------------------------------------------------------------
def build_config(in_channels, out_channels, f_maps, num_levels, num_groups, H, W):
    assert H % (2 ** (num_levels - 1)) == 0 and W % (2 ** (num_levels - 1)) == 0
    fmaps = [f_maps * 2 ** k for k in range(num_levels)]
    sizes = [(H >> k, W >> k) for k in range(num_levels)]

    def ng(c):
        g = num_groups if c >= num_groups else 1  # pytorch-3dunet rule
        assert c % g == 0
        return g

    convs = []  # (cin, cout, groups, h, w) per SingleConv, execution order
    prev = in_channels
    for lev, cout in enumerate(fmaps):
        h, w = sizes[lev]
        c1o = max(cout // 2, prev)  # encoder DoubleConv, conv_upscale=2
        convs.append((prev, c1o, ng(prev), h, w))
        convs.append((c1o, cout, ng(c1o), h, w))
        prev = cout
    rev = list(reversed(fmaps))
    for d in range(num_levels - 1):
        h, w = sizes[num_levels - 2 - d]
        cin = rev[d] + rev[d + 1]   # concat(skip, upsampled x)
        cout = rev[d + 1]
        convs.append((cin, cout, ng(cin), h, w))
        convs.append((cout, cout, ng(cout), h, w))

    return dict(in_channels=in_channels, out_channels=out_channels, fmaps=fmaps,
                num_levels=num_levels, num_groups=num_groups, H=H, W=W,
                sizes=sizes, convs=convs)


# -----------------------------------------------------------------------------
# Host-side precomputed constants (masks, pooling / upsampling matrices)
# -----------------------------------------------------------------------------
def _make_masks(sizes):
    """(n_res, 9, maxHW) 0/1 validity mask for each 3x3 tap, per resolution."""
    max_hw = max(h * w for h, w in sizes)
    m = np.zeros((len(sizes), 9, max_hw), np.float32)
    for r, (h, w) in enumerate(sizes):
        hh, ww = np.meshgrid(np.arange(h), np.arange(w), indexing="ij")
        hh = hh.reshape(-1)
        ww = ww.reshape(-1)
        for t, (dh, dw) in enumerate(_TAPS):
            valid = (hh + dh >= 0) & (hh + dh < h) & (ww + dw >= 0) & (ww + dw < w)
            m[r, t, : h * w] = valid.astype(np.float32)
    return m


def _avgpool_matrix(h, w):
    h2, w2 = h // 2, w // 2
    m = np.zeros((h * w, h2 * w2), np.float32)
    for hh in range(h):
        for ww in range(w):
            m[hh * w + ww, (hh // 2) * w2 + (ww // 2)] = 0.25
    return m


def _upsample_nearest_matrix(hc, wc):
    hf, wf = 2 * hc, 2 * wc
    m = np.zeros((hc * wc, hf * wf), np.float32)
    for hh in range(hf):
        for ww in range(wf):
            m[(hh // 2) * wc + (ww // 2), hh * wf + ww] = 1.0
    return m


# -----------------------------------------------------------------------------
# Deterministic synthetic parameters, packed into a handful of slabs
# -----------------------------------------------------------------------------
def make_params(cfg, seed=0):
    rng = np.random.default_rng(seed)
    convs = cfg["convs"]
    sizes = cfg["sizes"]
    n = len(convs)
    max_cin = max(c[0] for c in convs)
    max_cout = max(c[1] for c in convs)
    max_hw = max(h * w for *_, h, w in convs)

    masks = _make_masks(sizes)                               # (L, 9, maxHW)
    WT = np.zeros((n * 9, max_cout, max_cin), np.float32)    # gamma-folded taps
    BETA = np.zeros((n, max_cout, max_hw), np.float32)       # conv(beta) images
    GM = np.zeros((n, max_cin, max_cin), np.float32)         # group-avg matrices
    raw_convs = []

    for li, (cin, cout, groups, h, w) in enumerate(convs):
        hw = h * w
        r = sizes.index((h, w))
        scale = 1.0 / np.sqrt(9.0 * cin)
        w3 = (scale * rng.standard_normal((3, 3, cin, cout))).astype(np.float32)
        gamma = (1.0 + 0.1 * rng.standard_normal(cin)).astype(np.float32)
        beta = (0.1 * rng.standard_normal(cin)).astype(np.float32)
        raw_convs.append(dict(w3=w3, gamma=gamma, beta=beta))

        # fold GroupNorm gamma into the conv weights: (9, cout, cin)
        wg = (w3 * gamma[None, None, :, None]).reshape(9, cin, cout)
        WT[li * 9:(li + 1) * 9, :cout, :cin] = np.transpose(wg, (0, 2, 1))
        # beta border-response image: conv(beta constant image, zero padding)
        wb = np.einsum("tio,i->to", w3.reshape(9, cin, cout), beta)   # (9, cout)
        BETA[li, :cout, :hw] = wb.T @ masks[r, :, :hw]
        # group-average matrix (mean over channels-of-group and HW)
        cg = cin // groups
        gm = np.zeros((cin, cin), np.float32)
        for i in range(cin):
            g0 = (i // cg) * cg
            gm[i, g0:g0 + cg] = 1.0 / (cg * hw)
        GM[li, :cin, :cin] = gm

    f0 = cfg["fmaps"][0]
    oc = cfg["out_channels"]
    fw = (rng.standard_normal((oc, f0)) / np.sqrt(f0)).astype(np.float32)
    fb = (0.1 * rng.standard_normal(oc)).astype(np.float32)
    FIN = np.concatenate([fw, fb[:, None]], axis=1)          # (oc, f0+1)

    pools = [_avgpool_matrix(*sizes[lev - 1]) for lev in range(1, cfg["num_levels"])]
    ups = [_upsample_nearest_matrix(*sizes[cfg["num_levels"] - 1 - d])
           for d in range(cfg["num_levels"] - 1)]

    weights = [jnp.asarray(a) for a in [WT, BETA, GM, masks, FIN] + pools + ups]
    raw = dict(convs=raw_convs, fw=jnp.asarray(fw), fb=jnp.asarray(fb))
    return weights, raw


# -----------------------------------------------------------------------------
# Fused Pallas kernel (whole UNet forward for one batch element)
# -----------------------------------------------------------------------------
def build_kernel(cfg):
    convs = cfg["convs"]
    sizes = cfg["sizes"]
    num_levels = cfg["num_levels"]
    f0 = cfg["fmaps"][0]

    def single_conv(x, li, wt_ref, beta_ref, gm_ref, mask_ref):
        # SingleConv 'gcr': GroupNorm -> Conv3x3(pad=1, no bias) -> ReLU
        cin, cout, _, H, W = convs[li]
        HW = H * W
        r = sizes.index((H, W))

        # ---- GroupNorm stats: one (Cin,Cin)x(Cin,2) matmul for [mean, E[x^2]]
        s1 = jnp.sum(x, axis=1, keepdims=True)               # (cin, 1)
        s2 = jnp.sum(x * x, axis=1, keepdims=True)           # (cin, 1)
        s12 = jnp.concatenate([s1, s2], axis=1)              # (cin, 2)
        gm = gm_ref[li][:cin, :cin]
        stats = jnp.dot(gm, s12, preferred_element_type=jnp.float32)
        mean_c = stats[:, 0:1]
        var_c = jnp.maximum(stats[:, 1:2] - mean_c * mean_c, 0.0)  # cancellation guard
        xn = (x - mean_c) * jax.lax.rsqrt(var_c + EPS)        # gamma/beta folded out

        # ---- 3x3 conv: 9 accumulating (Cout,Cin)x(Cin,HW) dots, no im2col slab
        mask9 = mask_ref[r][:, :HW]                           # (9, HW) precomputed
        y = beta_ref[li][:cout, :HW]                          # start with beta image
        for t, (dh, dw) in enumerate(_TAPS):
            off = dh * W + dw
            if off == 0:
                tap = xn
            else:
                if HW % 128 == 0:   # lane-aligned: XLU roll (free slot)
                    tap = pltpu.roll(xn, shift=(-off) % HW, axis=1)
                else:               # sub-vreg width: fall back to static slices
                    tap = jnp.roll(xn, -off, axis=1)
                tap = tap * mask9[t:t + 1, :]                 # zero the wrapped lanes
            w_t = wt_ref[li * 9 + t][:cout, :cin]
            y = y + jnp.dot(w_t, tap, preferred_element_type=jnp.float32)
        return jnp.maximum(y, 0.0)                            # ReLU

    def kernel(*refs):
        x_ref = refs[0]
        wt_ref, beta_ref, gm_ref, mask_ref, fin_ref = refs[1:6]
        pool_refs = refs[6:6 + (num_levels - 1)]
        up_refs = refs[6 + (num_levels - 1):6 + 2 * (num_levels - 1)]
        o_ref = refs[-1]

        x = x_ref[0]                                          # (Cin0, H*W) f32
        li = 0
        skips = []
        # -------- encoder --------
        for lev in range(num_levels):
            if lev > 0:                                       # AvgPool2d(2)
                x = jnp.dot(x, pool_refs[lev - 1][...],
                            preferred_element_type=jnp.float32)
            x = single_conv(x, li, wt_ref, beta_ref, gm_ref, mask_ref); li += 1
            x = single_conv(x, li, wt_ref, beta_ref, gm_ref, mask_ref); li += 1
            skips.append(x)
        skips = skips[:-1][::-1]                              # deepest skip dropped

        # -------- decoder --------
        for d in range(num_levels - 1):
            x = jnp.dot(x, up_refs[d][...],                   # nearest 2x upsample
                        preferred_element_type=jnp.float32)
            x = jnp.concatenate([skips[d], x], axis=0)        # cat((enc, x), dim=1)
            x = single_conv(x, li, wt_ref, beta_ref, gm_ref, mask_ref); li += 1
            x = single_conv(x, li, wt_ref, beta_ref, gm_ref, mask_ref); li += 1

        # -------- final 1x1 conv (+bias) + sigmoid --------
        fin = fin_ref[...]
        y = jnp.dot(fin[:, :f0], x, preferred_element_type=jnp.float32) \
            + fin[:, f0:f0 + 1]
        o_ref[0] = jax.nn.sigmoid(y)

    return kernel


# -----------------------------------------------------------------------------
# Forward wrapper: one pallas_call for the whole network
# -----------------------------------------------------------------------------
def make_forward(cfg):
    kernel = build_kernel(cfg)
    out_c = cfg["out_channels"]

    def _const_spec(w):
        nd = w.ndim
        return pl.BlockSpec(w.shape, lambda n, _nd=nd: (0,) * _nd)

    def forward(weights, x_nchw):
        N, C, H, W = x_nchw.shape
        HW = H * W
        x = x_nchw.reshape(N, C, HW).astype(jnp.float32)      # NCHW -> (N, C, HW)
        in_specs = [pl.BlockSpec((1, C, HW), lambda n: (n, 0, 0))]
        in_specs += [_const_spec(w) for w in weights]         # resident weight slabs
        out = pl.pallas_call(
            kernel,
            out_shape=jax.ShapeDtypeStruct((N, out_c, HW), jnp.float32),
            grid=(N,),
            in_specs=in_specs,
            out_specs=pl.BlockSpec((1, out_c, HW), lambda n: (n, 0, 0)),
            compiler_params=pltpu.CompilerParams(
                dimension_semantics=("parallel",),
                vmem_limit_bytes=32 * 1024 * 1024),
        )(x, *weights)
        return out.reshape(N, out_c, H, W)                    # back to NCHW

    return forward


# -----------------------------------------------------------------------------
# Pure-JAX reference of the same forward (unfolded params) for a sanity check
# -----------------------------------------------------------------------------
def reference_forward(cfg, raw, x):
    convs = cfg["convs"]
    num_levels = cfg["num_levels"]

    def gn(x, gamma, beta, groups):
        N, C, H, W = x.shape
        xg = x.reshape(N, groups, C // groups, H * W)
        mean = jnp.mean(xg, axis=(2, 3), keepdims=True)
        var = jnp.mean((xg - mean) ** 2, axis=(2, 3), keepdims=True)
        xh = ((xg - mean) * jax.lax.rsqrt(var + EPS)).reshape(N, C, H, W)
        return xh * gamma[None, :, None, None] + beta[None, :, None, None]

    def sconv(x, li):
        p = raw["convs"][li]
        groups = convs[li][2]
        y = gn(x, jnp.asarray(p["gamma"]), jnp.asarray(p["beta"]), groups)
        y = jax.lax.conv_general_dilated(
            y, jnp.asarray(p["w3"]), (1, 1), ((1, 1), (1, 1)),
            dimension_numbers=("NCHW", "HWIO", "NCHW"),
            precision=jax.lax.Precision.HIGHEST)
        return jnp.maximum(y, 0.0)

    li = 0
    skips = []
    for lev in range(num_levels):
        if lev > 0:
            N, C, H, W = x.shape
            x = x.reshape(N, C, H // 2, 2, W // 2, 2).mean(axis=(3, 5))
        x = sconv(x, li); li += 1
        x = sconv(x, li); li += 1
        skips.append(x)
    skips = skips[:-1][::-1]
    for d in range(num_levels - 1):
        x = jnp.repeat(jnp.repeat(x, 2, axis=2), 2, axis=3)
        x = jnp.concatenate([skips[d], x], axis=1)
        x = sconv(x, li); li += 1
        x = sconv(x, li); li += 1
    y = jnp.einsum("oc,nchw->nohw", raw["fw"], x,
                   precision=jax.lax.Precision.HIGHEST) \
        + raw["fb"][None, :, None, None]
    return jax.nn.sigmoid(y)


# -----------------------------------------------------------------------------
if __name__ == "__main__":
    N, C, H, W = 2, 4, 16, 16
    cfg = build_config(in_channels=C, out_channels=2, f_maps=8,
                       num_levels=3, num_groups=4, H=H, W=W)
    weights, raw = make_params(cfg, seed=0)

    x = jax.random.normal(jax.random.PRNGKey(0), (N, C, H, W), jnp.float32)

    forward = jax.jit(make_forward(cfg))
    out = jax.block_until_ready(forward(weights, x))

    assert out.shape == (N, 2, H, W), out.shape
    assert bool(jnp.all(jnp.isfinite(out)))
    assert bool(jnp.all((out >= 0.0) & (out <= 1.0)))         # sigmoid range

    # Structural check against a pure-JAX/XLA reference of the same forward
    # (tolerance absorbs MXU f32 multi-pass matmul differences).
    ref = jax.block_until_ready(
        jax.jit(lambda xx: reference_forward(cfg, raw, xx))(x))
    max_err = float(jnp.max(jnp.abs(out - ref)))
    assert max_err < 5e-2, f"kernel deviates from reference: max|diff|={max_err}"

    print("KERNEL_OK")
</pallas_src>

<mosaic_0001>
module attributes {stable_mosaic.version = 11 : i64} {
  func.func @kernel(%arg0: i32, %arg1: memref<1x4x256xf32, #tpu.memory_space<vmem>>, %arg2: memref<90x32x48xf32, #tpu.memory_space<vmem>>, %arg3: memref<10x32x256xf32, #tpu.memory_space<vmem>>, %arg4: memref<10x48x48xf32, #tpu.memory_space<vmem>>, %arg5: memref<3x9x256xf32, #tpu.memory_space<vmem>>, %arg6: memref<2x9xf32, #tpu.memory_space<vmem>>, %arg7: memref<256x64xf32, #tpu.memory_space<vmem>>, %arg8: memref<64x16xf32, #tpu.memory_space<vmem>>, %arg9: memref<16x64xf32, #tpu.memory_space<vmem>>, %arg10: memref<64x256xf32, #tpu.memory_space<vmem>>, %arg11: memref<1x2x256xf32, #tpu.memory_space<vmem>>) attributes {dimension_semantics = [#tpu.dimension_semantics<parallel>], iteration_bounds = array<i64: 2>, scalar_prefetch = 0 : i64, scratch_operands = 0 : i64, tpu.core_type = #tpu.core_type<tc>, window_params = [{transform_indices = @transform_0, window_bounds = array<i64: 1, 4, 256>}, {pipeline_mode = #tpu.pipeline_mode<synchronous>, transform_indices = @transform_1, window_bounds = array<i64: 90, 32, 48>}, {pipeline_mode = #tpu.pipeline_mode<synchronous>, transform_indices = @transform_2, window_bounds = array<i64: 10, 32, 256>}, {pipeline_mode = #tpu.pipeline_mode<synchronous>, transform_indices = @transform_3, window_bounds = array<i64: 10, 48, 48>}, {pipeline_mode = #tpu.pipeline_mode<synchronous>, transform_indices = @transform_4, window_bounds = array<i64: 3, 9, 256>}, {pipeline_mode = #tpu.pipeline_mode<synchronous>, transform_indices = @transform_5, window_bounds = array<i64: 2, 9>}, {pipeline_mode = #tpu.pipeline_mode<synchronous>, transform_indices = @transform_6, window_bounds = array<i64: 256, 64>}, {pipeline_mode = #tpu.pipeline_mode<synchronous>, transform_indices = @transform_7, window_bounds = array<i64: 64, 16>}, {pipeline_mode = #tpu.pipeline_mode<synchronous>, transform_indices = @transform_8, window_bounds = array<i64: 16, 64>}, {pipeline_mode = #tpu.pipeline_mode<synchronous>, transform_indices = @transform_9, window_bounds = array<i64: 64, 256>}, {transform_indices = @transform_10, window_bounds = array<i64: 1, 2, 256>}]} {
    %c0 = arith.constant 0 : index
    %c0_0 = arith.constant 0 : index
    %c0_1 = arith.constant 0 : index
    %0 = vector.load %arg1[%c0, %c0_0, %c0_1] : memref<1x4x256xf32, #tpu.memory_space<vmem>>, vector<1x4x256xf32>
    %1 = vector.shape_cast %0 : vector<1x4x256xf32> to vector<4x256xf32>
    %cst = arith.constant dense<0.000000e+00> : vector<4xf32>
    %2 = vector.multi_reduction <add>, %1, %cst [1] : vector<4x256xf32> to vector<4xf32>
    %3 = vector.shape_cast %2 : vector<4xf32> to vector<4x1xf32>
    %4 = arith.mulf %1, %1 : vector<4x256xf32>
    %cst_2 = arith.constant dense<0.000000e+00> : vector<4xf32>
    %5 = vector.multi_reduction <add>, %4, %cst_2 [1] : vector<4x256xf32> to vector<4xf32>
    %6 = vector.shape_cast %5 : vector<4xf32> to vector<4x1xf32>
    %7 = tpu.concatenate %3, %6 in 1 : vector<4x1xf32>, vector<4x1xf32> -> vector<4x2xf32>
    %c0_3 = arith.constant 0 : index
    %c0_4 = arith.constant 0 : index
    %c0_5 = arith.constant 0 : index
    %8 = vector.load %arg4[%c0_3, %c0_4, %c0_5] : memref<10x48x48xf32, #tpu.memory_space<vmem>>, vector<1x48x48xf32>
    %9 = vector.shape_cast %8 : vector<1x48x48xf32> to vector<48x48xf32>
    %10 = vector.extract_strided_slice %9 {offsets = [0, 0], sizes = [4, 4], strides = [1, 1]} : vector<48x48xf32> to vector<4x4xf32>
    %cst_6 = arith.constant dense<0.000000e+00> : vector<4x2xf32>
    %11 = tpu.matmul %10, %7, %cst_6 {dimension_numbers = #tpu.dot_dimension_numbers<[1], [0], [0], [1], [0, 0, 1, 1], [], []>} : vector<4x4xf32>, vector<4x2xf32>, vector<4x2xf32> -> vector<4x2xf32>
    %12 = vector.extract_strided_slice %11 {offsets = [0, 0], sizes = [4, 1], strides = [1, 1]} : vector<4x2xf32> to vector<4x1xf32>
    %13 = vector.extract_strided_slice %11 {offsets = [0, 1], sizes = [4, 1], strides = [1, 1]} : vector<4x2xf32> to vector<4x1xf32>
    %14 = arith.mulf %12, %12 : vector<4x1xf32>
    %15 = arith.subf %13, %14 : vector<4x1xf32>
    %cst_7 = arith.constant 0.000000e+00 : f32
    %16 = vector.broadcast %cst_7 : f32 to vector<4x1xf32>
    %17 = arith.maximumf %15, %16 : vector<4x1xf32>
    %18 = vector.broadcast %12 : vector<4x1xf32> to vector<4x256xf32>
    %19 = arith.subf %1, %18 : vector<4x256xf32>
    %cst_8 = arith.constant 9.99999974E-6 : f32
    %20 = vector.broadcast %cst_8 : f32 to vector<4x1xf32>
    %21 = arith.addf %17, %20 : vector<4x1xf32>
    %22 = math.rsqrt %21 : vector<4x1xf32>
    %23 = vector.broadcast %22 : vector<4x1xf32> to vector<4x256xf32>
    %24 = arith.mulf %19, %23 : vector<4x256xf32>
    %c0_9 = arith.constant 0 : index
    %c0_10 = arith.constant 0 : index
    %c0_11 = arith.constant 0 : index
    %25 = vector.load %arg5[%c0_9, %c0_10, %c0_11] : memref<3x9x256xf32, #tpu.memory_space<vmem>>, vector<1x9x256xf32>
    %26 = vector.shape_cast %25 : vector<1x9x256xf32> to vector<9x256xf32>
    %c0_12 = arith.constant 0 : index
    %c0_13 = arith.constant 0 : index
    %c0_14 = arith.constant 0 : index
    %27 = vector.load %arg3[%c0_12, %c0_13, %c0_14] : memref<10x32x256xf32, #tpu.memory_space<vmem>>, vector<1x32x256xf32>
    %28 = vector.shape_cast %27 : vector<1x32x256xf32> to vector<32x256xf32>
    %29 = vector.extract_strided_slice %28 {offsets = [0, 0], sizes = [4, 256], strides = [1, 1]} : vector<32x256xf32> to vector<4x256xf32>
    %c17_i32 = arith.constant 17 : i32
    %30 = tpu.dynamic_rotate %24 by %c17_i32 dim 1 : vector<4x256xf32>, i32 -> vector<4x256xf32>
    %31 = vector.extract_strided_slice %26 {offsets = [0, 0], sizes = [1, 256], strides = [1, 1]} : vector<9x256xf32> to vector<1x256xf32>
    %32 = vector.broadcast %31 : vector<1x256xf32> to vector<4x256xf32>
    %33 = arith.mulf %30, %32 : vector<4x256xf32>
    %c0_15 = arith.constant 0 : index
    %c0_16 = arith.constant 0 : index
    %c0_17 = arith.constant 0 : index
    %34 = vector.load %arg2[%c0_15, %c0_16, %c0_17] : memref<90x32x48xf32, #tpu.memory_space<vmem>>, vector<1x32x48xf32>
    %35 = vector.shape_cast %34 : vector<1x32x48xf32> to vector<32x48xf32>
    %36 = vector.extract_strided_slice %35 {offsets = [0, 0], sizes = [4, 4], strides = [1, 1]} : vector<32x48xf32> to vector<4x4xf32>
    %cst_18 = arith.constant dense<0.000000e+00> : vector<4x256xf32>
    %37 = tpu.matmul %36, %33, %cst_18 {dimension_numbers = #tpu.dot_dimension_numbers<[1], [0], [0], [1], [0, 0, 1, 1], [], []>} : vector<4x4xf32>, vector<4x256xf32>, vector<4x256xf32> -> vector<4x256xf32>
    %38 = arith.addf %29, %37 : vector<4x256xf32>
    %c16_i32 = arith.constant 16 : i32
    %39 = tpu.dynamic_rotate %24 by %c16_i32 dim 1 : vector<4x256xf32>, i32 -> vector<4x256xf32>
    %40 = vector.extract_strided_slice %26 {offsets = [1, 0], sizes = [1, 256], strides = [1, 1]} : vector<9x256xf32> to vector<1x256xf32>
    %41 = vector.broadcast %40 : vector<1x256xf32> to vector<4x256xf32>
    %42 = arith.mulf %39, %41 : vector<4x256xf32>
    %c1 = arith.constant 1 : index
    %c0_19 = arith.constant 0 : index
    %c0_20 = arith.constant 0 : index
    %43 = vector.load %arg2[%c1, %c0_19, %c0_20] : memref<90x32x48xf32, #tpu.memory_space<vmem>>, vector<1x32x48xf32>
    %44 = vector.shape_cast %43 : vector<1x32x48xf32> to vector<32x48xf32>
    %45 = vector.extract_strided_slice %44 {offsets = [0, 0], sizes = [4, 4], strides = [1, 1]} : vector<32x48xf32> to vector<4x4xf32>
    %cst_21 = arith.constant dense<0.000000e+00> : vector<4x256xf32>
    %46 = tpu.matmul %45, %42, %cst_21 {dimension_numbers = #tpu.dot_dimension_numbers<[1], [0], [0], [1], [0, 0, 1, 1], [], []>} : vector<4x4xf32>, vector<4x256xf32>, vector<4x256xf32> -> vector<4x256xf32>
    %47 = arith.addf %38, %46 : vector<4x256xf32>
    %c15_i32 = arith.constant 15 : i32
    %48 = tpu.dynamic_rotate %24 by %c15_i32 dim 1 : vector<4x256xf32>, i32 -> vector<4x256xf32>
    %49 = vector.extract_strided_slice %26 {offsets = [2, 0], sizes = [1, 256], strides = [1, 1]} : vector<9x256xf32> to vector<1x256xf32>
    %50 = vector.broadcast %49 : vector<1x256xf32> to vector<4x256xf32>
    %51 = arith.mulf %48, %50 : vector<4x256xf32>
    %c2 = arith.constant 2 : index
    %c0_22 = arith.constant 0 : index
    %c0_23 = arith.constant 0 : index
    %52 = vector.load %arg2[%c2, %c0_22, %c0_23] : memref<90x32x48xf32, #tpu.memory_space<vmem>>, vector<1x32x48xf32>
    %53 = vector.shape_cast %52 : vector<1x32x48xf32> to vector<32x48xf32>
    %54 = vector.extract_strided_slice %53 {offsets = [0, 0], sizes = [4, 4], strides = [1, 1]} : vector<32x48xf32> to vector<4x4xf32>
    %cst_24 = arith.constant dense<0.000000e+00> : vector<4x256xf32>
    %55 = tpu.matmul %54, %51, %cst_24 {dimension_numbers = #tpu.dot_dimension_numbers<[1], [0], [0], [1], [0, 0, 1, 1], [], []>} : vector<4x4xf32>, vector<4x256xf32>, vector<4x256xf32> -> vector<4x256xf32>
    %56 = arith.addf %47, %55 : vector<4x256xf32>
    %c1_i32 = arith.constant 1 : i32
    %57 = tpu.dynamic_rotate %24 by %c1_i32 dim 1 : vector<4x256xf32>, i32 -> vector<4x256xf32>
    %58 = vector.extract_strided_slice %26 {offsets = [3, 0], sizes = [1, 256], strides = [1, 1]} : vector<9x256xf32> to vector<1x256xf32>
    %59 = vector.broadcast %58 : vector<1x256xf32> to vector<4x256xf32>
    %60 = arith.mulf %57, %59 : vector<4x256xf32>
    %c3 = arith.constant 3 : index
    %c0_25 = arith.constant 0 : index
    %c0_26 = arith.constant 0 : index
    %61 = vector.load %arg2[%c3, %c0_25, %c0_26] : memref<90x32x48xf32, #tpu.memory_space<vmem>>, vector<1x32x48xf32>
    %62 = vector.shape_cast %61 : vector<1x32x48xf32> to vector<32x48xf32>
    %63 = vector.extract_strided_slice %62 {offsets = [0, 0], sizes = [4, 4], strides = [1, 1]} : vector<32x48xf32> to vector<4x4xf32>
    %cst_27 = arith.constant dense<0.000000e+00> : vector<4x256xf32>
    %64 = tpu.matmul %63, %60, %cst_27 {dimension_numbers = #tpu.dot_dimension_numbers<[1], [0], [0], [1], [0, 0, 1, 1], [], []>} : vector<4x4xf32>, vector<4x256xf32>, vector<4x256xf32> -> vector<4x256xf32>
    %65 = arith.addf %56, %64 : vector<4x256xf32>
    %c4 = arith.constant 4 : index
    %c0_28 = arith.constant 0 : index
    %c0_29 = arith.constant 0 : index
    %66 = vector.load %arg2[%c4, %c0_28, %c0_29] : memref<90x32x48xf32, #tpu.memory_space<vmem>>, vector<1x32x48xf32>
    %67 = vector.shape_cast %66 : vector<1x32x48xf32> to vector<32x48xf32>
    %68 = vector.extract_strided_slice %67 {offsets = [0, 0], sizes = [4, 4], strides = [1, 1]} : vector<32x48xf32> to vector<4x4xf32>
    %cst_30 = arith.constant dense<0.000000e+00> : vector<4x256xf32>
    %69 = tpu.matmul %68, %24, %cst_30 {dimension_numbers = #tpu.dot_dimension_numbers<[1], [0], [0], [1], [0, 0, 1, 1], [], []>} : vector<4x4xf32>, vector<4x256xf32>, vector<4x256xf32> -> vector<4x256xf32>
    %70 = arith.addf %65, %69 : vector<4x256xf32>
    %c255_i32 = arith.constant 255 : i32
    %71 = tpu.dynamic_rotate %24 by %c255_i32 dim 1 : vector<4x256xf32>, i32 -> vector<4x256xf32>
    %72 = vector.extract_strided_slice %26 {offsets = [5, 0], sizes = [1, 256], strides = [1, 1]} : vector<9x256xf32> to vector<1x256xf32>
    %73 = vector.broadcast %72 : vector<1x256xf32> to vector<4x256xf32>
    %74 = arith.mulf %71, %73 : vector<4x256xf32>
    %c5 = arith.constant 5 : index
    %c0_31 = arith.constant 0 : index
    %c0_32 = arith.constant 0 : index
    %75 = vector.load %arg2[%c5, %c0_31, %c0_32] : memref<90x32x48xf32, #tpu.memory_space<vmem>>, vector<1x32x48xf32>
    %76 = vector.shape_cast %75 : vector<1x32x48xf32> to vector<32x48xf32>
    %77 = vector.extract_strided_slice %76 {offsets = [0, 0], sizes = [4, 4], strides = [1, 1]} : vector<32x48xf32> to vector<4x4xf32>
    %cst_33 = arith.constant dense<0.000000e+00> : vector<4x256xf32>
    %78 = tpu.matmul %77, %74, %cst_33 {dimension_numbers = #tpu.dot_dimension_numbers<[1], [0], [0], [1], [0, 0, 1, 1], [], []>} : vector<4x4xf32>, vector<4x256xf32>, vector<4x256xf32> -> vector<4x256xf32>
    %79 = arith.addf %70, %78 : vector<4x256xf32>
    %c241_i32 = arith.constant 241 : i32
    %80 = tpu.dynamic_rotate %24 by %c241_i32 dim 1 : vector<4x256xf32>, i32 -> vector<4x256xf32>
    %81 = vector.extract_strided_slice %26 {offsets = [6, 0], sizes = [1, 256], strides = [1, 1]} : vector<9x256xf32> to vector<1x256xf32>
    %82 = vector.broadcast %81 : vector<1x256xf32> to vector<4x256xf32>
    %83 = arith.mulf %80, %82 : vector<4x256xf32>
    %c6 = arith.constant 6 : index
    %c0_34 = arith.constant 0 : index
    %c0_35 = arith.constant 0 : index
    %84 = vector.load %arg2[%c6, %c0_34, %c0_35] : memref<90x32x48xf32, #tpu.memory_space<vmem>>, vector<1x32x48xf32>
    %85 = vector.shape_cast %84 : vector<1x32x48xf32> to vector<32x48xf32>
    %86 = vector.extract_strided_slice %85 {offsets = [0, 0], sizes = [4, 4], strides = [1, 1]} : vector<32x48xf32> to vector<4x4xf32>
    %cst_36 = arith.constant dense<0.000000e+00> : vector<4x256xf32>
    %87 = tpu.matmul %86, %83, %cst_36 {dimension_numbers = #tpu.dot_dimension_numbers<[1], [0], [0], [1], [0, 0, 1, 1], [], []>} : vector<4x4xf32>, vector<4x256xf32>, vector<4x256xf32> -> vector<4x256xf32>
    %88 = arith.addf %79, %87 : vector<4x256xf32>
    %c240_i32 = arith.constant 240 : i32
    %89 = tpu.dynamic_rotate %24 by %c240_i32 dim 1 : vector<4x256xf32>, i32 -> vector<4x256xf32>
    %90 = vector.extract_strided_slice %26 {offsets = [7, 0], sizes = [1, 256], strides = [1, 1]} : vector<9x256xf32> to vector<1x256xf32>
    %91 = vector.broadcast %90 : vector<1x256xf32> to vector<4x256xf32>
    %92 = arith.mulf %89, %91 : vector<4x256xf32>
    %c7 = arith.constant 7 : index
    %c0_37 = arith.constant 0 : index
    %c0_38 = arith.constant 0 : index
    %93 = vector.load %arg2[%c7, %c0_37, %c0_38] : memref<90x32x48xf32, #tpu.memory_space<vmem>>, vector<1x32x48xf32>
    %94 = vector.shape_cast %93 : vector<1x32x48xf32> to vector<32x48xf32>
    %95 = vector.extract_strided_slice %94 {offsets = [0, 0], sizes = [4, 4], strides = [1, 1]} : vector<32x48xf32> to vector<4x4xf32>
    %cst_39 = arith.constant dense<0.000000e+00> : vector<4x256xf32>
    %96 = tpu.matmul %95, %92, %cst_39 {dimension_numbers = #tpu.dot_dimension_numbers<[1], [0], [0], [1], [0, 0, 1, 1], [], []>} : vector<4x4xf32>, vector<4x256xf32>, vector<4x256xf32> -> vector<4x256xf32>
    %97 = arith.addf %88, %96 : vector<4x256xf32>
    %c239_i32 = arith.constant 239 : i32
    %98 = tpu.dynamic_rotate %24 by %c239_i32 dim 1 : vector<4x256xf32>, i32 -> vector<4x256xf32>
    %99 = vector.extract_strided_slice %26 {offsets = [8, 0], sizes = [1, 256], strides = [1, 1]} : vector<9x256xf32> to vector<1x256xf32>
    %100 = vector.broadcast %99 : vector<1x256xf32> to vector<4x256xf32>
    %101 = arith.mulf %98, %100 : vector<4x256xf32>
    %c8 = arith.constant 8 : index
    %c0_40 = arith.constant 0 : index
    %c0_41 = arith.constant 0 : index
    %102 = vector.load %arg2[%c8, %c0_40, %c0_41] : memref<90x32x48xf32, #tpu.memory_space<vmem>>, vector<1x32x48xf32>
    %103 = vector.shape_cast %102 : vector<1x32x48xf32> to vector<32x48xf32>
    %104 = vector.extract_strided_slice %103 {offsets = [0, 0], sizes = [4, 4], strides = [1, 1]} : vector<32x48xf32> to vector<4x4xf32>
    %cst_42 = arith.constant dense<0.000000e+00> : vector<4x256xf32>
    %105 = tpu.matmul %104, %101, %cst_42 {dimension_numbers = #tpu.dot_dimension_numbers<[1], [0], [0], [1], [0, 0, 1, 1], [], []>} : vector<4x4xf32>, vector<4x256xf32>, vector<4x256xf32> -> vector<4x256xf32>
    %106 = arith.addf %97, %105 : vector<4x256xf32>
    %cst_43 = arith.constant 0.000000e+00 : f32
    %107 = vector.broadcast %cst_43 : f32 to vector<4x256xf32>
    %108 = arith.maximumf %106, %107 : vector<4x256xf32>
    %cst_44 = arith.constant dense<0.000000e+00> : vector<4xf32>
    %109 = vector.multi_reduction <add>, %108, %cst_44 [1] : vector<4x256xf32> to vector<4xf32>
    %110 = vector.shape_cast %109 : vector<4xf32> to vector<4x1xf32>
    %111 = arith.mulf %108, %108 : vector<4x256xf32>
    %cst_45 = arith.constant dense<0.000000e+00> : vector<4xf32>
    %112 = vector.multi_reduction <add>, %111, %cst_45 [1] : vector<4x256xf32> to vector<4xf32>
    %113 = vector.shape_cast %112 : vector<4xf32> to vector<4x1xf32>
    %114 = tpu.concatenate %110, %113 in 1 : vector<4x1xf32>, vector<4x1xf32> -> vector<4x2xf32>
    %c1_46 = arith.constant 1 : index
    %c0_47 = arith.constant 0 : index
    %c0_48 = arith.constant 0 : index
    %115 = vector.load %arg4[%c1_46, %c0_47, %c0_48] : memref<10x48x48xf32, #tpu.memory_space<vmem>>, vector<1x48x48xf32>
    %116 = vector.shape_cast %115 : vector<1x48x48xf32> to vector<48x48xf32>
    %117 = vector.extract_strided_slice %116 {offsets = [0, 0], sizes = [4, 4], strides = [1, 1]} : vector<48x48xf32> to vector<4x4xf32>
    %cst_49 = arith.constant dense<0.000000e+00> : vector<4x2xf32>
    %118 = tpu.matmul %117, %114, %cst_49 {dimension_numbers = #tpu.dot_dimension_numbers<[1], [0], [0], [1], [0, 0, 1, 1], [], []>} : vector<4x4xf32>, vector<4x2xf32>, vector<4x2xf32> -> vector<4x2xf32>
    %119 = vector.extract_strided_slice %118 {offsets = [0, 0], sizes = [4, 1], strides = [1, 1]} : vector<4x2xf32> to vector<4x1xf32>
    %120 = vector.extract_strided_slice %118 {offsets = [0, 1], sizes = [4, 1], strides = [1, 1]} : vector<4x2xf32> to vector<4x1xf32>
    %121 = arith.mulf %119, %119 : vector<4x1xf32>
    %122 = arith.subf %120, %121 : vector<4x1xf32>
    %cst_50 = arith.constant 0.000000e+00 : f32
    %123 = vector.broadcast %cst_50 : f32 to vector<4x1xf32>
    %124 = arith.maximumf %122, %123 : vector<4x1xf32>
    %125 = vector.broadcast %119 : vector<4x1xf32> to vector<4x256xf32>
    %126 = arith.subf %108, %125 : vector<4x256xf32>
    %cst_51 = arith.constant 9.99999974E-6 : f32
    %127 = vector.broadcast %cst_51 : f32 to vector<4x1xf32>
    %128 = arith.addf %124, %127 : vector<4x1xf32>
    %129 = math.rsqrt %128 : vector<4x1xf32>
    %130 = vector.broadcast %129 : vector<4x1xf32> to vector<4x256xf32>
    %131 = arith.mulf %126, %130 : vector<4x256xf32>
    %c0_52 = arith.constant 0 : index
    %c0_53 = arith.constant 0 : index
    %c0_54 = arith.constant 0 : index
    %132 = vector.load %arg5[%c0_52, %c0_53, %c0_54] : memref<3x9x256xf32, #tpu.memory_space<vmem>>, vector<1x9x256xf32>
    %133 = vector.shape_cast %132 : vector<1x9x256xf32> to vector<9x256xf32>
    %c1_55 = arith.constant 1 : index
    %c0_56 = arith.constant 0 : index
    %c0_57 = arith.constant 0 : index
    %134 = vector.load %arg3[%c1_55, %c0_56, %c0_57] : memref<10x32x256xf32, #tpu.memory_space<vmem>>, vector<1x32x256xf32>
    %135 = vector.shape_cast %134 : vector<1x32x256xf32> to vector<32x256xf32>
    %136 = vector.extract_strided_slice %135 {offsets = [0, 0], sizes = [8, 256], strides = [1, 1]} : vector<32x256xf32> to vector<8x256xf32>
    %c17_i32_58 = arith.constant 17 : i32
    %137 = tpu.dynamic_rotate %131 by %c17_i32_58 dim 1 : vector<4x256xf32>, i32 -> vector<4x256xf32>
    %138 = vector.extract_strided_slice %133 {offsets = [0, 0], sizes = [1, 256], strides = [1, 1]} : vector<9x256xf32> to vector<1x256xf32>
    %139 = vector.broadcast %138 : vector<1x256xf32> to vector<4x256xf32>
    %140 = arith.mulf %137, %139 : vector<4x256xf32>
    %c9 = arith.constant 9 : index
    %c0_59 = arith.constant 0 : index
    %c0_60 = arith.constant 0 : index
    %141 = vector.load %arg2[%c9, %c0_59, %c0_60] : memref<90x32x48xf32, #tpu.memory_space<vmem>>, vector<1x32x48xf32>
    %142 = vector.shape_cast %141 : vector<1x32x48xf32> to vector<32x48xf32>
    %143 = vector.extract_strided_slice %142 {offsets = [0, 0], sizes = [8, 4], strides = [1, 1]} : vector<32x48xf32> to vector<8x4xf32>
    %cst_61 = arith.constant dense<0.000000e+00> : vector<8x256xf32>
    %144 = tpu.matmul %143, %140, %cst_61 {dimension_numbers = #tpu.dot_dimension_numbers<[1], [0], [0], [1], [0, 0, 1, 1], [], []>} : vector<8x4xf32>, vector<4x256xf32>, vector<8x256xf32> -> vector<8x256xf32>
    %145 = arith.addf %136, %144 : vector<8x256xf32>
    %c16_i32_62 = arith.constant 16 : i32
    %146 = tpu.dynamic_rotate %131 by %c16_i32_62 dim 1 : vector<4x256xf32>, i32 -> vector<4x256xf32>
    %147 = vector.extract_strided_slice %133 {offsets = [1, 0], sizes = [1, 256], strides = [1, 1]} : vector<9x256xf32> to vector<1x256xf32>
    %148 = vector.broadcast %147 : vector<1x256xf32> to vector<4x256xf32>
    %149 = arith.mulf %146, %148 : vector<4x256xf32>
    %c10 = arith.constant 10 : index
    %c0_63 = arith.constant 0 : index
    %c0_64 = arith.constant 0 : index
    %150 = vector.load %arg2[%c10, %c0_63, %c0_64] : memref<90x32x48xf32, #tpu.memory_space<vmem>>, vector<1x32x48xf32>
    %151 = vector.shape_cast %150 : vector<1x32x48xf32> to vector<32x48xf32>
    %152 = vector.extract_strided_slice %151 {offsets = [0, 0], sizes = [8, 4], strides = [1, 1]} : vector<32x48xf32> to vector<8x4xf32>
    %cst_65 = arith.constant dense<0.000000e+00> : vector<8x256xf32>
    %153 = tpu.matmul %152, %149, %cst_65 {dimension_numbers = #tpu.dot_dimension_numbers<[1], [0], [0], [1], [0, 0, 1, 1], [], []>} : vector<8x4xf32>, vector<4x256xf32>, vector<8x256xf32> -> vector<8x256xf32>
    %154 = arith.addf %145, %153 : vector<8x256xf32>
    %c15_i32_66 = arith.constant 15 : i32
    %155 = tpu.dynamic_rotate %131 by %c15_i32_66 dim 1 : vector<4x256xf32>, i32 -> vector<4x256xf32>
    %156 = vector.extract_strided_slice %133 {offsets = [2, 0], sizes = [1, 256], strides = [1, 1]} : vector<9x256xf32> to vector<1x256xf32>
    %157 = vector.broadcast %156 : vector<1x256xf32> to vector<4x256xf32>
    %158 = arith.mulf %155, %157 : vector<4x256xf32>
    %c11 = arith.constant 11 : index
    %c0_67 = arith.constant 0 : index
    %c0_68 = arith.constant 0 : index
    %159 = vector.load %arg2[%c11, %c0_67, %c0_68] : memref<90x32x48xf32, #tpu.memory_space<vmem>>, vector<1x32x48xf32>
    %160 = vector.shape_cast %159 : vector<1x32x48xf32> to vector<32x48xf32>
    %161 = vector.extract_strided_slice %160 {offsets = [0, 0], sizes = [8, 4], strides = [1, 1]} : vector<32x48xf32> to vector<8x4xf32>
    %cst_69 = arith.constant dense<0.000000e+00> : vector<8x256xf32>
    %162 = tpu.matmul %161, %158, %cst_69 {dimension_numbers = #tpu.dot_dimension_numbers<[1], [0], [0], [1], [0, 0, 1, 1], [], []>} : vector<8x4xf32>, vector<4x256xf32>, vector<8x256xf32> -> vector<8x256xf32>
    %163 = arith.addf %154, %162 : vector<8x256xf32>
    %c1_i32_70 = arith.constant 1 : i32
    %164 = tpu.dynamic_rotate %131 by %c1_i32_70 dim 1 : vector<4x256xf32>, i32 -> vector<4x256xf32>
    %165 = vector.extract_strided_slice %133 {offsets = [3, 0], sizes = [1, 256], strides = [1, 1]} : vector<9x256xf32> to vector<1x256xf32>
    %166 = vector.broadcast %165 : vector<1x256xf32> to vector<4x256xf32>
    %167 = arith.mulf %164, %166 : vector<4x256xf32>
    %c12 = arith.constant 12 : index
    %c0_71 = arith.constant 0 : index
    %c0_72 = arith.constant 0 : index
    %168 = vector.load %arg2[%c12, %c0_71, %c0_72] : memref<90x32x48xf32, #tpu.memory_space<vmem>>, vector<1x32x48xf32>
    %169 = vector.shape_cast %168 : vector<1x32x48xf32> to vector<32x48xf32>
    %170 = vector.extract_strided_slice %169 {offsets = [0, 0], sizes = [8, 4], strides = [1, 1]} : vector<32x48xf32> to vector<8x4xf32>
    %cst_73 = arith.constant dense<0.000000e+00> : vector<8x256xf32>
    %171 = tpu.matmul %170, %167, %cst_73 {dimension_numbers = #tpu.dot_dimension_numbers<[1], [0], [0], [1], [0, 0, 1, 1], [], []>} : vector<8x4xf32>, vector<4x256xf32>, vector<8x256xf32> -> vector<8x256xf32>
    %172 = arith.addf %163, %171 : vector<8x256xf32>
    %c13 = arith.constant 13 : index
    %c0_74 = arith.constant 0 : index
    %c0_75 = arith.constant 0 : index
    %173 = vector.load %arg2[%c13, %c0_74, %c0_75] : memref<90x32x48xf32, #tpu.memory_space<vmem>>, vector<1x32x48xf32>
    %174 = vector.shape_cast %173 : vector<1x32x48xf32> to vector<32x48xf32>
    %175 = vector.extract_strided_slice %174 {offsets = [0, 0], sizes = [8, 4], strides = [1, 1]} : vector<32x48xf32> to vector<8x4xf32>
    %cst_76 = arith.constant dense<0.000000e+00> : vector<8x256xf32>
    %176 = tpu.matmul %175, %131, %cst_76 {dimension_numbers = #tpu.dot_dimension_numbers<[1], [0], [0], [1], [0, 0, 1, 1], [], []>} : vector<8x4xf32>, vector<4x256xf32>, vector<8x256xf32> -> vector<8x256xf32>
    %177 = arith.addf %172, %176 : vector<8x256xf32>
    %c255_i32_77 = arith.constant 255 : i32
    %178 = tpu.dynamic_rotate %131 by %c255_i32_77 dim 1 : vector<4x256xf32>, i32 -> vector<4x256xf32>
    %179 = vector.extract_strided_slice %133 {offsets = [5, 0], sizes = [1, 256], strides = [1, 1]} : vector<9x256xf32> to vector<1x256xf32>
    %180 = vector.broadcast %179 : vector<1x256xf32> to vector<4x256xf32>
    %181 = arith.mulf %178, %180 : vector<4x256xf32>
    %c14 = arith.constant 14 : index
    %c0_78 = arith.constant 0 : index
    %c0_79 = arith.constant 0 : index
    %182 = vector.load %arg2[%c14, %c0_78, %c0_79] : memref<90x32x48xf32, #tpu.memory_space<vmem>>, vector<1x32x48xf32>
    %183 = vector.shape_cast %182 : vector<1x32x48xf32> to vector<32x48xf32>
    %184 = vector.extract_strided_slice %183 {offsets = [0, 0], sizes = [8, 4], strides = [1, 1]} : vector<32x48xf32> to vector<8x4xf32>
    %cst_80 = arith.constant dense<0.000000e+00> : vector<8x256xf32>
    %185 = tpu.matmul %184, %181, %cst_80 {dimension_numbers = #tpu.dot_dimension_numbers<[1], [0], [0], [1], [0, 0, 1, 1], [], []>} : vector<8x4xf32>, vector<4x256xf32>, vector<8x256xf32> -> vector<8x256xf32>
    %186 = arith.addf %177, %185 : vector<8x256xf32>
    %c241_i32_81 = arith.constant 241 : i32
    %187 = tpu.dynamic_rotate %131 by %c241_i32_81 dim 1 : vector<4x256xf32>, i32 -> vector<4x256xf32>
    %188 = vector.extract_strided_slice %133 {offsets = [6, 0], sizes = [1, 256], strides = [1, 1]} : vector<9x256xf32> to vector<1x256xf32>
    %189 = vector.broadcast %188 : vector<1x256xf32> to vector<4x256xf32>
    %190 = arith.mulf %187, %189 : vector<4x256xf32>
    %c15 = arith.constant 15 : index
    %c0_82 = arith.constant 0 : index
    %c0_83 = arith.constant 0 : index
    %191 = vector.load %arg2[%c15, %c0_82, %c0_83] : memref<90x32x48xf32, #tpu.memory_space<vmem>>, vector<1x32x48xf32>
    %192 = vector.shape_cast %191 : vector<1x32x48xf32> to vector<32x48xf32>
    %193 = vector.extract_strided_slice %192 {offsets = [0, 0], sizes = [8, 4], strides = [1, 1]} : vector<32x48xf32> to vector<8x4xf32>
    %cst_84 = arith.constant dense<0.000000e+00> : vector<8x256xf32>
    %194 = tpu.matmul %193, %190, %cst_84 {dimension_numbers = #tpu.dot_dimension_numbers<[1], [0], [0], [1], [0, 0, 1, 1], [], []>} : vector<8x4xf32>, vector<4x256xf32>, vector<8x256xf32> -> vector<8x256xf32>
    %195 = arith.addf %186, %194 : vector<8x256xf32>
    %c240_i32_85 = arith.constant 240 : i32
    %196 = tpu.dynamic_rotate %131 by %c240_i32_85 dim 1 : vector<4x256xf32>, i32 -> vector<4x256xf32>
    %197 = vector.extract_strided_slice %133 {offsets = [7, 0], sizes = [1, 256], strides = [1, 1]} : vector<9x256xf32> to vector<1x256xf32>
    %198 = vector.broadcast %197 : vector<1x256xf32> to vector<4x256xf32>
    %199 = arith.mulf %196, %198 : vector<4x256xf32>
    %c16 = arith.constant 16 : index
    %c0_86 = arith.constant 0 : index
    %c0_87 = arith.constant 0 : index
    %200 = vector.load %arg2[%c16, %c0_86, %c0_87] : memref<90x32x48xf32, #tpu.memory_space<vmem>>, vector<1x32x48xf32>
    %201 = vector.shape_cast %200 : vector<1x32x48xf32> to vector<32x48xf32>
    %202 = vector.extract_strided_slice %201 {offsets = [0, 0], sizes = [8, 4], strides = [1, 1]} : vector<32x48xf32> to vector<8x4xf32>
    %cst_88 = arith.constant dense<0.000000e+00> : vector<8x256xf32>
    %203 = tpu.matmul %202, %199, %cst_88 {dimension_numbers = #tpu.dot_dimension_numbers<[1], [0], [0], [1], [0, 0, 1, 1], [], []>} : vector<8x4xf32>, vector<4x256xf32>, vector<8x256xf32> -> vector<8x256xf32>
    %204 = arith.addf %195, %203 : vector<8x256xf32>
    %c239_i32_89 = arith.constant 239 : i32
    %205 = tpu.dynamic_rotate %131 by %c239_i32_89 dim 1 : vector<4x256xf32>, i32 -> vector<4x256xf32>
    %206 = vector.extract_strided_slice %133 {offsets = [8, 0], sizes = [1, 256], strides = [1, 1]} : vector<9x256xf32> to vector<1x256xf32>
    %207 = vector.broadcast %206 : vector<1x256xf32> to vector<4x256xf32>
    %208 = arith.mulf %205, %207 : vector<4x256xf32>
    %c17 = arith.constant 17 : index
    %c0_90 = arith.constant 0 : index
    %c0_91 = arith.constant 0 : index
    %209 = vector.load %arg2[%c17, %c0_90, %c0_91] : memref<90x32x48xf32, #tpu.memory_space<vmem>>, vector<1x32x48xf32>
    %210 = vector.shape_cast %209 : vector<1x32x48xf32> to vector<32x48xf32>
    %211 = vector.extract_strided_slice %210 {offsets = [0, 0], sizes = [8, 4], strides = [1, 1]} : vector<32x48xf32> to vector<8x4xf32>
    %cst_92 = arith.constant dense<0.000000e+00> : vector<8x256xf32>
    %212 = tpu.matmul %211, %208, %cst_92 {dimension_numbers = #tpu.dot_dimension_numbers<[1], [0], [0], [1], [0, 0, 1, 1], [], []>} : vector<8x4xf32>, vector<4x256xf32>, vector<8x256xf32> -> vector<8x256xf32>
    %213 = arith.addf %204, %212 : vector<8x256xf32>
    %cst_93 = arith.constant 0.000000e+00 : f32
    %214 = vector.broadcast %cst_93 : f32 to vector<8x256xf32>
    %215 = arith.maximumf %213, %214 : vector<8x256xf32>
    %c0_94 = arith.constant 0 : index
    %c0_95 = arith.constant 0 : index
    %216 = vector.load %arg7[%c0_94, %c0_95] : memref<256x64xf32, #tpu.memory_space<vmem>>, vector<256x64xf32>
    %cst_96 = arith.constant dense<0.000000e+00> : vector<8x64xf32>
    %217 = tpu.matmul %215, %216, %cst_96 {dimension_numbers = #tpu.dot_dimension_numbers<[1], [0], [0], [1], [0, 0, 1, 1], [], []>} : vector<8x256xf32>, vector<256x64xf32>, vector<8x64xf32> -> vector<8x64xf32>
    %cst_97 = arith.constant dense<0.000000e+00> : vector<8xf32>
    %218 = vector.multi_reduction <add>, %217, %cst_97 [1] : vector<8x64xf32> to vector<8xf32>
    %219 = vector.shape_cast %218 : vector<8xf32> to vector<8x1xf32>
    %220 = arith.mulf %217, %217 : vector<8x64xf32>
    %cst_98 = arith.constant dense<0.000000e+00> : vector<8xf32>
    %221 = vector.multi_reduction <add>, %220, %cst_98 [1] : vector<8x64xf32> to vector<8xf32>
    %222 = vector.shape_cast %221 : vector<8xf32> to vector<8x1xf32>
    %223 = tpu.concatenate %219, %222 in 1 : vector<8x1xf32>, vector<8x1xf32> -> vector<8x2xf32>
    %c2_99 = arith.constant 2 : index
    %c0_100 = arith.constant 0 : index
    %c0_101 = arith.constant 0 : index
    %224 = vector.load %arg4[%c2_99, %c0_100, %c0_101] : memref<10x48x48xf32, #tpu.memory_space<vmem>>, vector<1x48x48xf32>
    %225 = vector.shape_cast %224 : vector<1x48x48xf32> to vector<48x48xf32>
    %226 = vector.extract_strided_slice %225 {offsets = [0, 0], sizes = [8, 8], strides = [1, 1]} : vector<48x48xf32> to vector<8x8xf32>
    %cst_102 = arith.constant dense<0.000000e+00> : vector<8x2xf32>
    %227 = tpu.matmul %226, %223, %cst_102 {dimension_numbers = #tpu.dot_dimension_numbers<[1], [0], [0], [1], [0, 0, 1, 1], [], []>} : vector<8x8xf32>, vector<8x2xf32>, vector<8x2xf32> -> vector<8x2xf32>
    %228 = vector.extract_strided_slice %227 {offsets = [0, 0], sizes = [8, 1], strides = [1, 1]} : vector<8x2xf32> to vector<8x1xf32>
    %229 = vector.extract_strided_slice %227 {offsets = [0, 1], sizes = [8, 1], strides = [1, 1]} : vector<8x2xf32> to vector<8x1xf32>
    %230 = arith.mulf %228, %228 : vector<8x1xf32>
    %231 = arith.subf %229, %230 : vector<8x1xf32>
    %cst_103 = arith.constant 0.000000e+00 : f32
    %232 = vector.broadcast %cst_103 : f32 to vector<8x1xf32>
    %233 = arith.maximumf %231, %232 : vector<8x1xf32>
    %234 = vector.broadcast %228 : vector<8x1xf32> to vector<8x64xf32>
    %235 = arith.subf %217, %234 : vector<8x64xf32>
    %cst_104 = arith.constant 9.99999974E-6 : f32
    %236 = vector.broadcast %cst_104 : f32 to vector<8x1xf32>
    %237 = arith.addf %233, %236 : vector<8x1xf32>
    %238 = math.rsqrt %237 : vector<8x1xf32>
    %239 = vector.broadcast %238 : vector<8x1xf32> to vector<8x64xf32>
    %240 = arith.mulf %235, %239 : vector<8x64xf32>
    %c1_105 = arith.constant 1 : index
    %c0_106 = arith.constant 0 : index
    %c0_107 = arith.constant 0 : index
    %241 = vector.load %arg5[%c1_105, %c0_106, %c0_107] : memref<3x9x256xf32, #tpu.memory_space<vmem>>, vector<1x9x256xf32>
    %242 = vector.shape_cast %241 : vector<1x9x256xf32> to vector<9x256xf32>
    %243 = vector.extract_strided_slice %242 {offsets = [0, 0], sizes = [9, 64], strides = [1, 1]} : vector<9x256xf32> to vector<9x64xf32>
    %c2_108 = arith.constant 2 : index
    %c0_109 = arith.constant 0 : index
    %c0_110 = arith.constant 0 : index
    %244 = vector.load %arg3[%c2_108, %c0_109, %c0_110] : memref<10x32x256xf32, #tpu.memory_space<vmem>>, vector<1x32x256xf32>
    %245 = vector.shape_cast %244 : vector<1x32x256xf32> to vector<32x256xf32>
    %246 = vector.extract_strided_slice %245 {offsets = [0, 0], sizes = [8, 64], strides = [1, 1]} : vector<32x256xf32> to vector<8x64xf32>
    %247 = vector.extract_strided_slice %240 {offsets = [0, 55], sizes = [8, 9], strides = [1, 1]} : vector<8x64xf32> to vector<8x9xf32>
    %248 = vector.extract_strided_slice %240 {offsets = [0, 0], sizes = [8, 55], strides = [1, 1]} : vector<8x64xf32> to vector<8x55xf32>
    %249 = tpu.concatenate %247, %248 in 1 : vector<8x9xf32>, vector<8x55xf32> -> vector<8x64xf32>
    %250 = vector.extract_strided_slice %243 {offsets = [0, 0], sizes = [1, 64], strides = [1, 1]} : vector<9x64xf32> to vector<1x64xf32>
    %251 = vector.broadcast %250 : vector<1x64xf32> to vector<8x64xf32>
    %252 = arith.mulf %249, %251 : vector<8x64xf32>
    %c18 = arith.constant 18 : index
    %c0_111 = arith.constant 0 : index
    %c0_112 = arith.constant 0 : index
    %253 = vector.load %arg2[%c18, %c0_111, %c0_112] : memref<90x32x48xf32, #tpu.memory_space<vmem>>, vector<1x32x48xf32>
    %254 = vector.shape_cast %253 : vector<1x32x48xf32> to vector<32x48xf32>
    %255 = vector.extract_strided_slice %254 {offsets = [0, 0], sizes = [8, 8], strides = [1, 1]} : vector<32x48xf32> to vector<8x8xf32>
    %cst_113 = arith.constant dense<0.000000e+00> : vector<8x64xf32>
    %256 = tpu.matmul %255, %252, %cst_113 {dimension_numbers = #tpu.dot_dimension_numbers<[1], [0], [0], [1], [0, 0, 1, 1], [], []>} : vector<8x8xf32>, vector<8x64xf32>, vector<8x64xf32> -> vector<8x64xf32>
    %257 = arith.addf %246, %256 : vector<8x64xf32>
    %258 = vector.extract_strided_slice %240 {offsets = [0, 56], sizes = [8, 8], strides = [1, 1]} : vector<8x64xf32> to vector<8x8xf32>
    %259 = vector.extract_strided_slice %240 {offsets = [0, 0], sizes = [8, 56], strides = [1, 1]} : vector<8x64xf32> to vector<8x56xf32>
    %260 = tpu.concatenate %258, %259 in 1 : vector<8x8xf32>, vector<8x56xf32> -> vector<8x64xf32>
    %261 = vector.extract_strided_slice %243 {offsets = [1, 0], sizes = [1, 64], strides = [1, 1]} : vector<9x64xf32> to vector<1x64xf32>
    %262 = vector.broadcast %261 : vector<1x64xf32> to vector<8x64xf32>
    %263 = arith.mulf %260, %262 : vector<8x64xf32>
    %c19 = arith.constant 19 : index
    %c0_114 = arith.constant 0 : index
    %c0_115 = arith.constant 0 : index
    %264 = vector.load %arg2[%c19, %c0_114, %c0_115] : memref<90x32x48xf32, #tpu.memory_space<vmem>>, vector<1x32x48xf32>
    %265 = vector.shape_cast %264 : vector<1x32x48xf32> to vector<32x48xf32>
    %266 = vector.extract_strided_slice %265 {offsets = [0, 0], sizes = [8, 8], strides = [1, 1]} : vector<32x48xf32> to vector<8x8xf32>
    %cst_116 = arith.constant dense<0.000000e+00> : vector<8x64xf32>
    %267 = tpu.matmul %266, %263, %cst_116 {dimension_numbers = #tpu.dot_dimension_numbers<[1], [0], [0], [1], [0, 0, 1, 1], [], []>} : vector<8x8xf32>, vector<8x64xf32>, vector<8x64xf32> -> vector<8x64xf32>
    %268 = arith.addf %257, %267 : vector<8x64xf32>
    %269 = vector.extract_strided_slice %240 {offsets = [0, 57], sizes = [8, 7], strides = [1, 1]} : vector<8x64xf32> to vector<8x7xf32>
    %270 = vector.extract_strided_slice %240 {offsets = [0, 0], sizes = [8, 57], strides = [1, 1]} : vector<8x64xf32> to vector<8x57xf32>
    %271 = tpu.concatenate %269, %270 in 1 : vector<8x7xf32>, vector<8x57xf32> -> vector<8x64xf32>
    %272 = vector.extract_strided_slice %243 {offsets = [2, 0], sizes = [1, 64], strides = [1, 1]} : vector<9x64xf32> to vector<1x64xf32>
    %273 = vector.broadcast %272 : vector<1x64xf32> to vector<8x64xf32>
    %274 = arith.mulf %271, %273 : vector<8x64xf32>
    %c20 = arith.constant 20 : index
    %c0_117 = arith.constant 0 : index
    %c0_118 = arith.constant 0 : index
    %275 = vector.load %arg2[%c20, %c0_117, %c0_118] : memref<90x32x48xf32, #tpu.memory_space<vmem>>, vector<1x32x48xf32>
    %276 = vector.shape_cast %275 : vector<1x32x48xf32> to vector<32x48xf32>
    %277 = vector.extract_strided_slice %276 {offsets = [0, 0], sizes = [8, 8], strides = [1, 1]} : vector<32x48xf32> to vector<8x8xf32>
    %cst_119 = arith.constant dense<0.000000e+00> : vector<8x64xf32>
    %278 = tpu.matmul %277, %274, %cst_119 {dimension_numbers = #tpu.dot_dimension_numbers<[1], [0], [0], [1], [0, 0, 1, 1], [], []>} : vector<8x8xf32>, vector<8x64xf32>, vector<8x64xf32> -> vector<8x64xf32>
    %279 = arith.addf %268, %278 : vector<8x64xf32>
    %280 = vector.extract_strided_slice %240 {offsets = [0, 63], sizes = [8, 1], strides = [1, 1]} : vector<8x64xf32> to vector<8x1xf32>
    %281 = vector.extract_strided_slice %240 {offsets = [0, 0], sizes = [8, 63], strides = [1, 1]} : vector<8x64xf32> to vector<8x63xf32>
    %282 = tpu.concatenate %280, %281 in 1 : vector<8x1xf32>, vector<8x63xf32> -> vector<8x64xf32>
    %283 = vector.extract_strided_slice %243 {offsets = [3, 0], sizes = [1, 64], strides = [1, 1]} : vector<9x64xf32> to vector<1x64xf32>
    %284 = vector.broadcast %283 : vector<1x64xf32> to vector<8x64xf32>
    %285 = arith.mulf %282, %284 : vector<8x64xf32>
    %c21 = arith.constant 21 : index
    %c0_120 = arith.constant 0 : index
    %c0_121 = arith.constant 0 : index
    %286 = vector.load %arg2[%c21, %c0_120, %c0_121] : memref<90x32x48xf32, #tpu.memory_space<vmem>>, vector<1x32x48xf32>
    %287 = vector.shape_cast %286 : vector<1x32x48xf32> to vector<32x48xf32>
    %288 = vector.extract_strided_slice %287 {offsets = [0, 0], sizes = [8, 8], strides = [1, 1]} : vector<32x48xf32> to vector<8x8xf32>
    %cst_122 = arith.constant dense<0.000000e+00> : vector<8x64xf32>
    %289 = tpu.matmul %288, %285, %cst_122 {dimension_numbers = #tpu.dot_dimension_numbers<[1], [0], [0], [1], [0, 0, 1, 1], [], []>} : vector<8x8xf32>, vector<8x64xf32>, vector<8x64xf32> -> vector<8x64xf32>
    %290 = arith.addf %279, %289 : vector<8x64xf32>
    %c22 = arith.constant 22 : index
    %c0_123 = arith.constant 0 : index
    %c0_124 = arith.constant 0 : index
    %291 = vector.load %arg2[%c22, %c0_123, %c0_124] : memref<90x32x48xf32, #tpu.memory_space<vmem>>, vector<1x32x48xf32>
    %292 = vector.shape_cast %291 : vector<1x32x48xf32> to vector<32x48xf32>
    %293 = vector.extract_strided_slice %292 {offsets = [0, 0], sizes = [8, 8], strides = [1, 1]} : vector<32x48xf32> to vector<8x8xf32>
    %cst_125 = arith.constant dense<0.000000e+00> : vector<8x64xf32>
    %294 = tpu.matmul %293, %240, %cst_125 {dimension_numbers = #tpu.dot_dimension_numbers<[1], [0], [0], [1], [0, 0, 1, 1], [], []>} : vector<8x8xf32>, vector<8x64xf32>, vector<8x64xf32> -> vector<8x64xf32>
    %295 = arith.addf %290, %294 : vector<8x64xf32>
    %296 = vector.extract_strided_slice %240 {offsets = [0, 1], sizes = [8, 63], strides = [1, 1]} : vector<8x64xf32> to vector<8x63xf32>
    %297 = vector.extract_strided_slice %240 {offsets = [0, 0], sizes = [8, 1], strides = [1, 1]} : vector<8x64xf32> to vector<8x1xf32>
    %298 = tpu.concatenate %296, %297 in 1 : vector<8x63xf32>, vector<8x1xf32> -> vector<8x64xf32>
    %299 = vector.extract_strided_slice %243 {offsets = [5, 0], sizes = [1, 64], strides = [1, 1]} : vector<9x64xf32> to vector<1x64xf32>
    %300 = vector.broadcast %299 : vector<1x64xf32> to vector<8x64xf32>
    %301 = arith.mulf %298, %300 : vector<8x64xf32>
    %c23 = arith.constant 23 : index
    %c0_126 = arith.constant 0 : index
    %c0_127 = arith.constant 0 : index
    %302 = vector.load %arg2[%c23, %c0_126, %c0_127] : memref<90x32x48xf32, #tpu.memory_space<vmem>>, vector<1x32x48xf32>
    %303 = vector.shape_cast %302 : vector<1x32x48xf32> to vector<32x48xf32>
    %304 = vector.extract_strided_slice %303 {offsets = [0, 0], sizes = [8, 8], strides = [1, 1]} : vector<32x48xf32> to vector<8x8xf32>
    %cst_128 = arith.constant dense<0.000000e+00> : vector<8x64xf32>
    %305 = tpu.matmul %304, %301, %cst_128 {dimension_numbers = #tpu.dot_dimension_numbers<[1], [0], [0], [1], [0, 0, 1, 1], [], []>} : vector<8x8xf32>, vector<8x64xf32>, vector<8x64xf32> -> vector<8x64xf32>
    %306 = arith.addf %295, %305 : vector<8x64xf32>
    %307 = vector.extract_strided_slice %240 {offsets = [0, 7], sizes = [8, 57], strides = [1, 1]} : vector<8x64xf32> to vector<8x57xf32>
    %308 = vector.extract_strided_slice %240 {offsets = [0, 0], sizes = [8, 7], strides = [1, 1]} : vector<8x64xf32> to vector<8x7xf32>
    %309 = tpu.concatenate %307, %308 in 1 : vector<8x57xf32>, vector<8x7xf32> -> vector<8x64xf32>
    %310 = vector.extract_strided_slice %243 {offsets = [6, 0], sizes = [1, 64], strides = [1, 1]} : vector<9x64xf32> to vector<1x64xf32>
    %311 = vector.broadcast %310 : vector<1x64xf32> to vector<8x64xf32>
    %312 = arith.mulf %309, %311 : vector<8x64xf32>
    %c24 = arith.constant 24 : index
    %c0_129 = arith.constant 0 : index
    %c0_130 = arith.constant 0 : index
    %313 = vector.load %arg2[%c24, %c0_129, %c0_130] : memref<90x32x48xf32, #tpu.memory_space<vmem>>, vector<1x32x48xf32>
    %314 = vector.shape_cast %313 : vector<1x32x48xf32> to vector<32x48xf32>
    %315 = vector.extract_strided_slice %314 {offsets = [0, 0], sizes = [8, 8], strides = [1, 1]} : vector<32x48xf32> to vector<8x8xf32>
    %cst_131 = arith.constant dense<0.000000e+00> : vector<8x64xf32>
    %316 = tpu.matmul %315, %312, %cst_131 {dimension_numbers = #tpu.dot_dimension_numbers<[1], [0], [0], [1], [0, 0, 1, 1], [], []>} : vector<8x8xf32>, vector<8x64xf32>, vector<8x64xf32> -> vector<8x64xf32>
    %317 = arith.addf %306, %316 : vector<8x64xf32>
    %318 = vector.extract_strided_slice %240 {offsets = [0, 8], sizes = [8, 56], strides = [1, 1]} : vector<8x64xf32> to vector<8x56xf32>
    %319 = vector.extract_strided_slice %240 {offsets = [0, 0], sizes = [8, 8], strides = [1, 1]} : vector<8x64xf32> to vector<8x8xf32>
    %320 = tpu.concatenate %318, %319 in 1 : vector<8x56xf32>, vector<8x8xf32> -> vector<8x64xf32>
    %321 = vector.extract_strided_slice %243 {offsets = [7, 0], sizes = [1, 64], strides = [1, 1]} : vector<9x64xf32> to vector<1x64xf32>
    %322 = vector.broadcast %321 : vector<1x64xf32> to vector<8x64xf32>
    %323 = arith.mulf %320, %322 : vector<8x64xf32>
    %c25 = arith.constant 25 : index
    %c0_132 = arith.constant 0 : index
    %c0_133 = arith.constant 0 : index
    %324 = vector.load %arg2[%c25, %c0_132, %c0_133] : memref<90x32x48xf32, #tpu.memory_space<vmem>>, vector<1x32x48xf32>
    %325 = vector.shape_cast %324 : vector<1x32x48xf32> to vector<32x48xf32>
    %326 = vector.extract_strided_slice %325 {offsets = [0, 0], sizes = [8, 8], strides = [1, 1]} : vector<32x48xf32> to vector<8x8xf32>
    %cst_134 = arith.constant dense<0.000000e+00> : vector<8x64xf32>
    %327 = tpu.matmul %326, %323, %cst_134 {dimension_numbers = #tpu.dot_dimension_numbers<[1], [0], [0], [1], [0, 0, 1, 1], [], []>} : vector<8x8xf32>, vector<8x64xf32>, vector<8x64xf32> -> vector<8x64xf32>
    %328 = arith.addf %317, %327 : vector<8x64xf32>
    %329 = vector.extract_strided_slice %240 {offsets = [0, 9], sizes = [8, 55], strides = [1, 1]} : vector<8x64xf32> to vector<8x55xf32>
    %330 = vector.extract_strided_slice %240 {offsets = [0, 0], sizes = [8, 9], strides = [1, 1]} : vector<8x64xf32> to vector<8x9xf32>
    %331 = tpu.concatenate %329, %330 in 1 : vector<8x55xf32>, vector<8x9xf32> -> vector<8x64xf32>
    %332 = vector.extract_strided_slice %243 {offsets = [8, 0], sizes = [1, 64], strides = [1, 1]} : vector<9x64xf32> to vector<1x64xf32>
    %333 = vector.broadcast %332 : vector<1x64xf32> to vector<8x64xf32>
    %334 = arith.mulf %331, %333 : vector<8x64xf32>
    %c26 = arith.constant 26 : index
    %c0_135 = arith.constant 0 : index
    %c0_136 = arith.constant 0 : index
    %335 = vector.load %arg2[%c26, %c0_135, %c0_136] : memref<90x32x48xf32, #tpu.memory_space<vmem>>, vector<1x32x48xf32>
    %336 = vector.shape_cast %335 : vector<1x32x48xf32> to vector<32x48xf32>
    %337 = vector.extract_strided_slice %336 {offsets = [0, 0], sizes = [8, 8], strides = [1, 1]} : vector<32x48xf32> to vector<8x8xf32>
    %cst_137 = arith.constant dense<0.000000e+00> : vector<8x64xf32>
    %338 = tpu.matmul %337, %334, %cst_137 {dimension_numbers = #tpu.dot_dimension_numbers<[1], [0], [0], [1], [0, 0, 1, 1], [], []>} : vector<8x8xf32>, vector<8x64xf32>, vector<8x64xf32> -> vector<8x64xf32>
    %339 = arith.addf %328, %338 : vector<8x64xf32>
    %cst_138 = arith.constant 0.000000e+00 : f32
    %340 = vector.broadcast %cst_138 : f32 to vector<8x64xf32>
    %341 = arith.maximumf %339, %340 : vector<8x64xf32>
    %cst_139 = arith.constant dense<0.000000e+00> : vector<8xf32>
    %342 = vector.multi_reduction <add>, %341, %cst_139 [1] : vector<8x64xf32> to vector<8xf32>
    %343 = vector.shape_cast %342 : vector<8xf32> to vector<8x1xf32>
    %344 = arith.mulf %341, %341 : vector<8x64xf32>
    %cst_140 = arith.constant dense<0.000000e+00> : vector<8xf32>
    %345 = vector.multi_reduction <add>, %344, %cst_140 [1] : vector<8x64xf32> to vector<8xf32>
    %346 = vector.shape_cast %345 : vector<8xf32> to vector<8x1xf32>
    %347 = tpu.concatenate %343, %346 in 1 : vector<8x1xf32>, vector<8x1xf32> -> vector<8x2xf32>
    %c3_141 = arith.constant 3 : index
    %c0_142 = arith.constant 0 : index
    %c0_143 = arith.constant 0 : index
    %348 = vector.load %arg4[%c3_141, %c0_142, %c0_143] : memref<10x48x48xf32, #tpu.memory_space<vmem>>, vector<1x48x48xf32>
    %349 = vector.shape_cast %348 : vector<1x48x48xf32> to vector<48x48xf32>
    %350 = vector.extract_strided_slice %349 {offsets = [0, 0], sizes = [8, 8], strides = [1, 1]} : vector<48x48xf32> to vector<8x8xf32>
    %cst_144 = arith.constant dense<0.000000e+00> : vector<8x2xf32>
    %351 = tpu.matmul %350, %347, %cst_144 {dimension_numbers = #tpu.dot_dimension_numbers<[1], [0], [0], [1], [0, 0, 1, 1], [], []>} : vector<8x8xf32>, vector<8x2xf32>, vector<8x2xf32> -> vector<8x2xf32>
    %352 = vector.extract_strided_slice %351 {offsets = [0, 0], sizes = [8, 1], strides = [1, 1]} : vector<8x2xf32> to vector<8x1xf32>
    %353 = vector.extract_strided_slice %351 {offsets = [0, 1], sizes = [8, 1], strides = [1, 1]} : vector<8x2xf32> to vector<8x1xf32>
    %354 = arith.mulf %352, %352 : vector<8x1xf32>
    %355 = arith.subf %353, %354 : vector<8x1xf32>
    %cst_145 = arith.constant 0.000000e+00 : f32
    %356 = vector.broadcast %cst_145 : f32 to vector<8x1xf32>
    %357 = arith.maximumf %355, %356 : vector<8x1xf32>
    %358 = vector.broadcast %352 : vector<8x1xf32> to vector<8x64xf32>
    %359 = arith.subf %341, %358 : vector<8x64xf32>
    %cst_146 = arith.constant 9.99999974E-6 : f32
    %360 = vector.broadcast %cst_146 : f32 to vector<8x1xf32>
    %361 = arith.addf %357, %360 : vector<8x1xf32>
    %362 = math.rsqrt %361 : vector<8x1xf32>
    %363 = vector.broadcast %362 : vector<8x1xf32> to vector<8x64xf32>
    %364 = arith.mulf %359, %363 : vector<8x64xf32>
    %c1_147 = arith.constant 1 : index
    %c0_148 = arith.constant 0 : index
    %c0_149 = arith.constant 0 : index
    %365 = vector.load %arg5[%c1_147, %c0_148, %c0_149] : memref<3x9x256xf32, #tpu.memory_space<vmem>>, vector<1x9x256xf32>
    %366 = vector.shape_cast %365 : vector<1x9x256xf32> to vector<9x256xf32>
    %367 = vector.extract_strided_slice %366 {offsets = [0, 0], sizes = [9, 64], strides = [1, 1]} : vector<9x256xf32> to vector<9x64xf32>
    %c3_150 = arith.constant 3 : index
    %c0_151 = arith.constant 0 : index
    %c0_152 = arith.constant 0 : index
    %368 = vector.load %arg3[%c3_150, %c0_151, %c0_152] : memref<10x32x256xf32, #tpu.memory_space<vmem>>, vector<1x32x256xf32>
    %369 = vector.shape_cast %368 : vector<1x32x256xf32> to vector<32x256xf32>
    %370 = vector.extract_strided_slice %369 {offsets = [0, 0], sizes = [16, 64], strides = [1, 1]} : vector<32x256xf32> to vector<16x64xf32>
    %371 = vector.extract_strided_slice %364 {offsets = [0, 55], sizes = [8, 9], strides = [1, 1]} : vector<8x64xf32> to vector<8x9xf32>
    %372 = vector.extract_strided_slice %364 {offsets = [0, 0], sizes = [8, 55], strides = [1, 1]} : vector<8x64xf32> to vector<8x55xf32>
    %373 = tpu.concatenate %371, %372 in 1 : vector<8x9xf32>, vector<8x55xf32> -> vector<8x64xf32>
    %374 = vector.extract_strided_slice %367 {offsets = [0, 0], sizes = [1, 64], strides = [1, 1]} : vector<9x64xf32> to vector<1x64xf32>
    %375 = vector.broadcast %374 : vector<1x64xf32> to vector<8x64xf32>
    %376 = arith.mulf %373, %375 : vector<8x64xf32>
    %c27 = arith.constant 27 : index
    %c0_153 = arith.constant 0 : index
    %c0_154 = arith.constant 0 : index
    %377 = vector.load %arg2[%c27, %c0_153, %c0_154] : memref<90x32x48xf32, #tpu.memory_space<vmem>>, vector<1x32x48xf32>
    %378 = vector.shape_cast %377 : vector<1x32x48xf32> to vector<32x48xf32>
    %379 = vector.extract_strided_slice %378 {offsets = [0, 0], sizes = [16, 8], strides = [1, 1]} : vector<32x48xf32> to vector<16x8xf32>
    %cst_155 = arith.constant dense<0.000000e+00> : vector<16x64xf32>
    %380 = tpu.matmul %379, %376, %cst_155 {dimension_numbers = #tpu.dot_dimension_numbers<[1], [0], [0], [1], [0, 0, 1, 1], [], []>} : vector<16x8xf32>, vector<8x64xf32>, vector<16x64xf32> -> vector<16x64xf32>
    %381 = arith.addf %370, %380 : vector<16x64xf32>
    %382 = vector.extract_strided_slice %364 {offsets = [0, 56], sizes = [8, 8], strides = [1, 1]} : vector<8x64xf32> to vector<8x8xf32>
    %383 = vector.extract_strided_slice %364 {offsets = [0, 0], sizes = [8, 56], strides = [1, 1]} : vector<8x64xf32> to vector<8x56xf32>
    %384 = tpu.concatenate %382, %383 in 1 : vector<8x8xf32>, vector<8x56xf32> -> vector<8x64xf32>
    %385 = vector.extract_strided_slice %367 {offsets = [1, 0], sizes = [1, 64], strides = [1, 1]} : vector<9x64xf32> to vector<1x64xf32>
    %386 = vector.broadcast %385 : vector<1x64xf32> to vector<8x64xf32>
    %387 = arith.mulf %384, %386 : vector<8x64xf32>
    %c28 = arith.constant 28 : index
    %c0_156 = arith.constant 0 : index
    %c0_157 = arith.constant 0 : index
    %388 = vector.load %arg2[%c28, %c0_156, %c0_157] : memref<90x32x48xf32, #tpu.memory_space<vmem>>, vector<1x32x48xf32>
    %389 = vector.shape_cast %388 : vector<1x32x48xf32> to vector<32x48xf32>
    %390 = vector.extract_strided_slice %389 {offsets = [0, 0], sizes = [16, 8], strides = [1, 1]} : vector<32x48xf32> to vector<16x8xf32>
    %cst_158 = arith.constant dense<0.000000e+00> : vector<16x64xf32>
    %391 = tpu.matmul %390, %387, %cst_158 {dimension_numbers = #tpu.dot_dimension_numbers<[1], [0], [0], [1], [0, 0, 1, 1], [], []>} : vector<16x8xf32>, vector<8x64xf32>, vector<16x64xf32> -> vector<16x64xf32>
    %392 = arith.addf %381, %391 : vector<16x64xf32>
    %393 = vector.extract_strided_slice %364 {offsets = [0, 57], sizes = [8, 7], strides = [1, 1]} : vector<8x64xf32> to vector<8x7xf32>
    %394 = vector.extract_strided_slice %364 {offsets = [0, 0], sizes = [8, 57], strides = [1, 1]} : vector<8x64xf32> to vector<8x57xf32>
    %395 = tpu.concatenate %393, %394 in 1 : vector<8x7xf32>, vector<8x57xf32> -> vector<8x64xf32>
    %396 = vector.extract_strided_slice %367 {offsets = [2, 0], sizes = [1, 64], strides = [1, 1]} : vector<9x64xf32> to vector<1x64xf32>
    %397 = vector.broadcast %396 : vector<1x64xf32> to vector<8x64xf32>
    %398 = arith.mulf %395, %397 : vector<8x64xf32>
    %c29 = arith.constant 29 : index
    %c0_159 = arith.constant 0 : index
    %c0_160 = arith.constant 0 : index
    %399 = vector.load %arg2[%c29, %c0_159, %c0_160] : memref<90x32x48xf32, #tpu.memory_space<vmem>>, vector<1x32x48xf32>
    %400 = vector.shape_cast %399 : vector<1x32x48xf32> to vector<32x48xf32>
    %401 = vector.extract_strided_slice %400 {offsets = [0, 0], sizes = [16, 8], strides = [1, 1]} : vector<32x48xf32> to vector<16x8xf32>
    %cst_161 = arith.constant dense<0.000000e+00> : vector<16x64xf32>
    %402 = tpu.matmul %401, %398, %cst_161 {dimension_numbers = #tpu.dot_dimension_numbers<[1], [0], [0], [1], [0, 0, 1, 1], [], []>} : vector<16x8xf32>, vector<8x64xf32>, vector<16x64xf32> -> vector<16x64xf32>
    %403 = arith.addf %392, %402 : vector<16x64xf32>
    %404 = vector.extract_strided_slice %364 {offsets = [0, 63], sizes = [8, 1], strides = [1, 1]} : vector<8x64xf32> to vector<8x1xf32>
    %405 = vector.extract_strided_slice %364 {offsets = [0, 0], sizes = [8, 63], strides = [1, 1]} : vector<8x64xf32> to vector<8x63xf32>
    %406 = tpu.concatenate %404, %405 in 1 : vector<8x1xf32>, vector<8x63xf32> -> vector<8x64xf32>
    %407 = vector.extract_strided_slice %367 {offsets = [3, 0], sizes = [1, 64], strides = [1, 1]} : vector<9x64xf32> to vector<1x64xf32>
    %408 = vector.broadcast %407 : vector<1x64xf32> to vector<8x64xf32>
    %409 = arith.mulf %406, %408 : vector<8x64xf32>
    %c30 = arith.constant 30 : index
    %c0_162 = arith.constant 0 : index
    %c0_163 = arith.constant 0 : index
    %410 = vector.load %arg2[%c30, %c0_162, %c0_163] : memref<90x32x48xf32, #tpu.memory_space<vmem>>, vector<1x32x48xf32>
    %411 = vector.shape_cast %410 : vector<1x32x48xf32> to vector<32x48xf32>
    %412 = vector.extract_strided_slice %411 {offsets = [0, 0], sizes = [16, 8], strides = [1, 1]} : vector<32x48xf32> to vector<16x8xf32>
    %cst_164 = arith.constant dense<0.000000e+00> : vector<16x64xf32>
    %413 = tpu.matmul %412, %409, %cst_164 {dimension_numbers = #tpu.dot_dimension_numbers<[1], [0], [0], [1], [0, 0, 1, 1], [], []>} : vector<16x8xf32>, vector<8x64xf32>, vector<16x64xf32> -> vector<16x64xf32>
    %414 = arith.addf %403, %413 : vector<16x64xf32>
    %c31 = arith.constant 31 : index
    %c0_165 = arith.constant 0 : index
    %c0_166 = arith.constant 0 : index
    %415 = vector.load %arg2[%c31, %c0_165, %c0_166] : memref<90x32x48xf32, #tpu.memory_space<vmem>>, vector<1x32x48xf32>
    %416 = vector.shape_cast %415 : vector<1x32x48xf32> to vector<32x48xf32>
    %417 = vector.extract_strided_slice %416 {offsets = [0, 0], sizes = [16, 8], strides = [1, 1]} : vector<32x48xf32> to vector<16x8xf32>
    %cst_167 = arith.constant dense<0.000000e+00> : vector<16x64xf32>
    %418 = tpu.matmul %417, %364, %cst_167 {dimension_numbers = #tpu.dot_dimension_numbers<[1], [0], [0], [1], [0, 0, 1, 1], [], []>} : vector<16x8xf32>, vector<8x64xf32>, vector<16x64xf32> -> vector<16x64xf32>
    %419 = arith.addf %414, %418 : vector<16x64xf32>
    %420 = vector.extract_strided_slice %364 {offsets = [0, 1], sizes = [8, 63], strides = [1, 1]} : vector<8x64xf32> to vector<8x63xf32>
    %421 = vector.extract_strided_slice %364 {offsets = [0, 0], sizes = [8, 1], strides = [1, 1]} : vector<8x64xf32> to vector<8x1xf32>
    %422 = tpu.concatenate %420, %421 in 1 : vector<8x63xf32>, vector<8x1xf32> -> vector<8x64xf32>
    %423 = vector.extract_strided_slice %367 {offsets = [5, 0], sizes = [1, 64], strides = [1, 1]} : vector<9x64xf32> to vector<1x64xf32>
    %424 = vector.broadcast %423 : vector<1x64xf32> to vector<8x64xf32>
    %425 = arith.mulf %422, %424 : vector<8x64xf32>
    %c32 = arith.constant 32 : index
    %c0_168 = arith.constant 0 : index
    %c0_169 = arith.constant 0 : index
    %426 = vector.load %arg2[%c32, %c0_168, %c0_169] : memref<90x32x48xf32, #tpu.memory_space<vmem>>, vector<1x32x48xf32>
    %427 = vector.shape_cast %426 : vector<1x32x48xf32> to vector<32x48xf32>
    %428 = vector.extract_strided_slice %427 {offsets = [0, 0], sizes = [16, 8], strides = [1, 1]} : vector<32x48xf32> to vector<16x8xf32>
    %cst_170 = arith.constant dense<0.000000e+00> : vector<16x64xf32>
    %429 = tpu.matmul %428, %425, %cst_170 {dimension_numbers = #tpu.dot_dimension_numbers<[1], [0], [0], [1], [0, 0, 1, 1], [], []>} : vector<16x8xf32>, vector<8x64xf32>, vector<16x64xf32> -> vector<16x64xf32>
    %430 = arith.addf %419, %429 : vector<16x64xf32>
    %431 = vector.extract_strided_slice %364 {offsets = [0, 7], sizes = [8, 57], strides = [1, 1]} : vector<8x64xf32> to vector<8x57xf32>
    %432 = vector.extract_strided_slice %364 {offsets = [0, 0], sizes = [8, 7], strides = [1, 1]} : vector<8x64xf32> to vector<8x7xf32>
    %433 = tpu.concatenate %431, %432 in 1 : vector<8x57xf32>, vector<8x7xf32> -> vector<8x64xf32>
    %434 = vector.extract_strided_slice %367 {offsets = [6, 0], sizes = [1, 64], strides = [1, 1]} : vector<9x64xf32> to vector<1x64xf32>
    %435 = vector.broadcast %434 : vector<1x64xf32> to vector<8x64xf32>
    %436 = arith.mulf %433, %435 : vector<8x64xf32>
    %c33 = arith.constant 33 : index
    %c0_171 = arith.constant 0 : index
    %c0_172 = arith.constant 0 : index
    %437 = vector.load %arg2[%c33, %c0_171, %c0_172] : memref<90x32x48xf32, #tpu.memory_space<vmem>>, vector<1x32x48xf32>
    %438 = vector.shape_cast %437 : vector<1x32x48xf32> to vector<32x48xf32>
    %439 = vector.extract_strided_slice %438 {offsets = [0, 0], sizes = [16, 8], strides = [1, 1]} : vector<32x48xf32> to vector<16x8xf32>
    %cst_173 = arith.constant dense<0.000000e+00> : vector<16x64xf32>
    %440 = tpu.matmul %439, %436, %cst_173 {dimension_numbers = #tpu.dot_dimension_numbers<[1], [0], [0], [1], [0, 0, 1, 1], [], []>} : vector<16x8xf32>, vector<8x64xf32>, vector<16x64xf32> -> vector<16x64xf32>
    %441 = arith.addf %430, %440 : vector<16x64xf32>
    %442 = vector.extract_strided_slice %364 {offsets = [0, 8], sizes = [8, 56], strides = [1, 1]} : vector<8x64xf32> to vector<8x56xf32>
    %443 = vector.extract_strided_slice %364 {offsets = [0, 0], sizes = [8, 8], strides = [1, 1]} : vector<8x64xf32> to vector<8x8xf32>
    %444 = tpu.concatenate %442, %443 in 1 : vector<8x56xf32>, vector<8x8xf32> -> vector<8x64xf32>
    %445 = vector.extract_strided_slice %367 {offsets = [7, 0], sizes = [1, 64], strides = [1, 1]} : vector<9x64xf32> to vector<1x64xf32>
    %446 = vector.broadcast %445 : vector<1x64xf32> to vector<8x64xf32>
    %447 = arith.mulf %444, %446 : vector<8x64xf32>
    %c34 = arith.constant 34 : index
    %c0_174 = arith.constant 0 : index
    %c0_175 = arith.constant 0 : index
    %448 = vector.load %arg2[%c34, %c0_174, %c0_175] : memref<90x32x48xf32, #tpu.memory_space<vmem>>, vector<1x32x48xf32>
    %449 = vector.shape_cast %448 : vector<1x32x48xf32> to vector<32x48xf32>
    %450 = vector.extract_strided_slice %449 {offsets = [0, 0], sizes = [16, 8], strides = [1, 1]} : vector<32x48xf32> to vector<16x8xf32>
    %cst_176 = arith.constant dense<0.000000e+00> : vector<16x64xf32>
    %451 = tpu.matmul %450, %447, %cst_176 {dimension_numbers = #tpu.dot_dimension_numbers<[1], [0], [0], [1], [0, 0, 1, 1], [], []>} : vector<16x8xf32>, vector<8x64xf32>, vector<16x64xf32> -> vector<16x64xf32>
    %452 = arith.addf %441, %451 : vector<16x64xf32>
    %453 = vector.extract_strided_slice %364 {offsets = [0, 9], sizes = [8, 55], strides = [1, 1]} : vector<8x64xf32> to vector<8x55xf32>
    %454 = vector.extract_strided_slice %364 {offsets = [0, 0], sizes = [8, 9], strides = [1, 1]} : vector<8x64xf32> to vector<8x9xf32>
    %455 = tpu.concatenate %453, %454 in 1 : vector<8x55xf32>, vector<8x9xf32> -> vector<8x64xf32>
    %456 = vector.extract_strided_slice %367 {offsets = [8, 0], sizes = [1, 64], strides = [1, 1]} : vector<9x64xf32> to vector<1x64xf32>
    %457 = vector.broadcast %456 : vector<1x64xf32> to vector<8x64xf32>
    %458 = arith.mulf %455, %457 : vector<8x64xf32>
    %c35 = arith.constant 35 : index
    %c0_177 = arith.constant 0 : index
    %c0_178 = arith.constant 0 : index
    %459 = vector.load %arg2[%c35, %c0_177, %c0_178] : memref<90x32x48xf32, #tpu.memory_space<vmem>>, vector<1x32x48xf32>
    %460 = vector.shape_cast %459 : vector<1x32x48xf32> to vector<32x48xf32>
    %461 = vector.extract_strided_slice %460 {offsets = [0, 0], sizes = [16, 8], strides = [1, 1]} : vector<32x48xf32> to vector<16x8xf32>
    %cst_179 = arith.constant dense<0.000000e+00> : vector<16x64xf32>
    %462 = tpu.matmul %461, %458, %cst_179 {dimension_numbers = #tpu.dot_dimension_numbers<[1], [0], [0], [1], [0, 0, 1, 1], [], []>} : vector<16x8xf32>, vector<8x64xf32>, vector<16x64xf32> -> vector<16x64xf32>
    %463 = arith.addf %452, %462 : vector<16x64xf32>
    %cst_180 = arith.constant 0.000000e+00 : f32
    %464 = vector.broadcast %cst_180 : f32 to vector<16x64xf32>
    %465 = arith.maximumf %463, %464 : vector<16x64xf32>
    %c0_181 = arith.constant 0 : index
    %c0_182 = arith.constant 0 : index
    %466 = vector.load %arg8[%c0_181, %c0_182] : memref<64x16xf32, #tpu.memory_space<vmem>>, vector<64x16xf32>
    %cst_183 = arith.constant dense<0.000000e+00> : vector<16x16xf32>
    %467 = tpu.matmul %465, %466, %cst_183 {dimension_numbers = #tpu.dot_dimension_numbers<[1], [0], [0], [1], [0, 0, 1, 1], [], []>} : vector<16x64xf32>, vector<64x16xf32>, vector<16x16xf32> -> vector<16x16xf32>
    %cst_184 = arith.constant dense<0.000000e+00> : vector<16xf32>
    %468 = vector.multi_reduction <add>, %467, %cst_184 [1] : vector<16x16xf32> to vector<16xf32>
    %469 = vector.shape_cast %468 : vector<16xf32> to vector<16x1xf32>
    %470 = arith.mulf %467, %467 : vector<16x16xf32>
    %cst_185 = arith.constant dense<0.000000e+00> : vector<16xf32>
    %471 = vector.multi_reduction <add>, %470, %cst_185 [1] : vector<16x16xf32> to vector<16xf32>
    %472 = vector.shape_cast %471 : vector<16xf32> to vector<16x1xf32>
    %473 = tpu.concatenate %469, %472 in 1 : vector<16x1xf32>, vector<16x1xf32> -> vector<16x2xf32>
    %c4_186 = arith.constant 4 : index
    %c0_187 = arith.constant 0 : index
    %c0_188 = arith.constant 0 : index
    %474 = vector.load %arg4[%c4_186, %c0_187, %c0_188] : memref<10x48x48xf32, #tpu.memory_space<vmem>>, vector<1x48x48xf32>
    %475 = vector.shape_cast %474 : vector<1x48x48xf32> to vector<48x48xf32>
    %476 = vector.extract_strided_slice %475 {offsets = [0, 0], sizes = [16, 16], strides = [1, 1]} : vector<48x48xf32> to vector<16x16xf32>
    %cst_189 = arith.constant dense<0.000000e+00> : vector<16x2xf32>
    %477 = tpu.matmul %476, %473, %cst_189 {dimension_numbers = #tpu.dot_dimension_numbers<[1], [0], [0], [1], [0, 0, 1, 1], [], []>} : vector<16x16xf32>, vector<16x2xf32>, vector<16x2xf32> -> vector<16x2xf32>
    %478 = vector.extract_strided_slice %477 {offsets = [0, 0], sizes = [16, 1], strides = [1, 1]} : vector<16x2xf32> to vector<16x1xf32>
    %479 = vector.extract_strided_slice %477 {offsets = [0, 1], sizes = [16, 1], strides = [1, 1]} : vector<16x2xf32> to vector<16x1xf32>
    %480 = arith.mulf %478, %478 : vector<16x1xf32>
    %481 = arith.subf %479, %480 : vector<16x1xf32>
    %cst_190 = arith.constant 0.000000e+00 : f32
    %482 = vector.broadcast %cst_190 : f32 to vector<16x1xf32>
    %483 = arith.maximumf %481, %482 : vector<16x1xf32>
    %484 = vector.broadcast %478 : vector<16x1xf32> to vector<16x16xf32>
    %485 = arith.subf %467, %484 : vector<16x16xf32>
    %cst_191 = arith.constant 9.99999974E-6 : f32
    %486 = vector.broadcast %cst_191 : f32 to vector<16x1xf32>
    %487 = arith.addf %483, %486 : vector<16x1xf32>
    %488 = math.rsqrt %487 : vector<16x1xf32>
    %489 = vector.broadcast %488 : vector<16x1xf32> to vector<16x16xf32>
    %490 = arith.mulf %485, %489 : vector<16x16xf32>
    %c2_192 = arith.constant 2 : index
    %c0_193 = arith.constant 0 : index
    %c0_194 = arith.constant 0 : index
    %491 = vector.load %arg5[%c2_192, %c0_193, %c0_194] : memref<3x9x256xf32, #tpu.memory_space<vmem>>, vector<1x9x256xf32>
    %492 = vector.shape_cast %491 : vector<1x9x256xf32> to vector<9x256xf32>
    %493 = vector.extract_strided_slice %492 {offsets = [0, 0], sizes = [9, 16], strides = [1, 1]} : vector<9x256xf32> to vector<9x16xf32>
    %c4_195 = arith.constant 4 : index
    %c0_196 = arith.constant 0 : index
    %c0_197 = arith.constant 0 : index
    %494 = vector.load %arg3[%c4_195, %c0_196, %c0_197] : memref<10x32x256xf32, #tpu.memory_space<vmem>>, vector<1x32x256xf32>
    %495 = vector.shape_cast %494 : vector<1x32x256xf32> to vector<32x256xf32>
    %496 = vector.extract_strided_slice %495 {offsets = [0, 0], sizes = [16, 16], strides = [1, 1]} : vector<32x256xf32> to vector<16x16xf32>
    %497 = vector.extract_strided_slice %490 {offsets = [0, 11], sizes = [16, 5], strides = [1, 1]} : vector<16x16xf32> to vector<16x5xf32>
    %498 = vector.extract_strided_slice %490 {offsets = [0, 0], sizes = [16, 11], strides = [1, 1]} : vector<16x16xf32> to vector<16x11xf32>
    %499 = tpu.concatenate %497, %498 in 1 : vector<16x5xf32>, vector<16x11xf32> -> vector<16x16xf32>
    %500 = vector.extract_strided_slice %493 {offsets = [0, 0], sizes = [1, 16], strides = [1, 1]} : vector<9x16xf32> to vector<1x16xf32>
    %501 = vector.broadcast %500 : vector<1x16xf32> to vector<16x16xf32>
    %502 = arith.mulf %499, %501 : vector<16x16xf32>
    %c36 = arith.constant 36 : index
    %c0_198 = arith.constant 0 : index
    %c0_199 = arith.constant 0 : index
    %503 = vector.load %arg2[%c36, %c0_198, %c0_199] : memref<90x32x48xf32, #tpu.memory_space<vmem>>, vector<1x32x48xf32>
    %504 = vector.shape_cast %503 : vector<1x32x48xf32> to vector<32x48xf32>
    %505 = vector.extract_strided_slice %504 {offsets = [0, 0], sizes = [16, 16], strides = [1, 1]} : vector<32x48xf32> to vector<16x16xf32>
    %cst_200 = arith.constant dense<0.000000e+00> : vector<16x16xf32>
    %506 = tpu.matmul %505, %502, %cst_200 {dimension_numbers = #tpu.dot_dimension_numbers<[1], [0], [0], [1], [0, 0, 1, 1], [], []>} : vector<16x16xf32>, vector<16x16xf32>, vector<16x16xf32> -> vector<16x16xf32>
    %507 = arith.addf %496, %506 : vector<16x16xf32>
    %508 = vector.extract_strided_slice %490 {offsets = [0, 12], sizes = [16, 4], strides = [1, 1]} : vector<16x16xf32> to vector<16x4xf32>
    %509 = vector.extract_strided_slice %490 {offsets = [0, 0], sizes = [16, 12], strides = [1, 1]} : vector<16x16xf32> to vector<16x12xf32>
    %510 = tpu.concatenate %508, %509 in 1 : vector<16x4xf32>, vector<16x12xf32> -> vector<16x16xf32>
    %511 = vector.extract_strided_slice %493 {offsets = [1, 0], sizes = [1, 16], strides = [1, 1]} : vector<9x16xf32> to vector<1x16xf32>
    %512 = vector.broadcast %511 : vector<1x16xf32> to vector<16x16xf32>
    %513 = arith.mulf %510, %512 : vector<16x16xf32>
    %c37 = arith.constant 37 : index
    %c0_201 = arith.constant 0 : index
    %c0_202 = arith.constant 0 : index
    %514 = vector.load %arg2[%c37, %c0_201, %c0_202] : memref<90x32x48xf32, #tpu.memory_space<vmem>>, vector<1x32x48xf32>
    %515 = vector.shape_cast %514 : vector<1x32x48xf32> to vector<32x48xf32>
    %516 = vector.extract_strided_slice %515 {offsets = [0, 0], sizes = [16, 16], strides = [1, 1]} : vector<32x48xf32> to vector<16x16xf32>
    %cst_203 = arith.constant dense<0.000000e+00> : vector<16x16xf32>
    %517 = tpu.matmul %516, %513, %cst_203 {dimension_numbers = #tpu.dot_dimension_numbers<[1], [0], [0], [1], [0, 0, 1, 1], [], []>} : vector<16x16xf32>, vector<16x16xf32>, vector<16x16xf32> -> vector<16x16xf32>
    %518 = arith.addf %507, %517 : vector<16x16xf32>
    %519 = vector.extract_strided_slice %490 {offsets = [0, 13], sizes = [16, 3], strides = [1, 1]} : vector<16x16xf32> to vector<16x3xf32>
    %520 = vector.extract_strided_slice %490 {offsets = [0, 0], sizes = [16, 13], strides = [1, 1]} : vector<16x16xf32> to vector<16x13xf32>
    %521 = tpu.concatenate %519, %520 in 1 : vector<16x3xf32>, vector<16x13xf32> -> vector<16x16xf32>
    %522 = vector.extract_strided_slice %493 {offsets = [2, 0], sizes = [1, 16], strides = [1, 1]} : vector<9x16xf32> to vector<1x16xf32>
    %523 = vector.broadcast %522 : vector<1x16xf32> to vector<16x16xf32>
    %524 = arith.mulf %521, %523 : vector<16x16xf32>
    %c38 = arith.constant 38 : index
    %c0_204 = arith.constant 0 : index
    %c0_205 = arith.constant 0 : index
    %525 = vector.load %arg2[%c38, %c0_204, %c0_205] : memref<90x32x48xf32, #tpu.memory_space<vmem>>, vector<1x32x48xf32>
    %526 = vector.shape_cast %525 : vector<1x32x48xf32> to vector<32x48xf32>
    %527 = vector.extract_strided_slice %526 {offsets = [0, 0], sizes = [16, 16], strides = [1, 1]} : vector<32x48xf32> to vector<16x16xf32>
    %cst_206 = arith.constant dense<0.000000e+00> : vector<16x16xf32>
    %528 = tpu.matmul %527, %524, %cst_206 {dimension_numbers = #tpu.dot_dimension_numbers<[1], [0], [0], [1], [0, 0, 1, 1], [], []>} : vector<16x16xf32>, vector<16x16xf32>, vector<16x16xf32> -> vector<16x16xf32>
    %529 = arith.addf %518, %528 : vector<16x16xf32>
    %530 = vector.extract_strided_slice %490 {offsets = [0, 15], sizes = [16, 1], strides = [1, 1]} : vector<16x16xf32> to vector<16x1xf32>
    %531 = vector.extract_strided_slice %490 {offsets = [0, 0], sizes = [16, 15], strides = [1, 1]} : vector<16x16xf32> to vector<16x15xf32>
    %532 = tpu.concatenate %530, %531 in 1 : vector<16x1xf32>, vector<16x15xf32> -> vector<16x16xf32>
    %533 = vector.extract_strided_slice %493 {offsets = [3, 0], sizes = [1, 16], strides = [1, 1]} : vector<9x16xf32> to vector<1x16xf32>
    %534 = vector.broadcast %533 : vector<1x16xf32> to vector<16x16xf32>
    %535 = arith.mulf %532, %534 : vector<16x16xf32>
    %c39 = arith.constant 39 : index
    %c0_207 = arith.constant 0 : index
    %c0_208 = arith.constant 0 : index
    %536 = vector.load %arg2[%c39, %c0_207, %c0_208] : memref<90x32x48xf32, #tpu.memory_space<vmem>>, vector<1x32x48xf32>
    %537 = vector.shape_cast %536 : vector<1x32x48xf32> to vector<32x48xf32>
    %538 = vector.extract_strided_slice %537 {offsets = [0, 0], sizes = [16, 16], strides = [1, 1]} : vector<32x48xf32> to vector<16x16xf32>
    %cst_209 = arith.constant dense<0.000000e+00> : vector<16x16xf32>
    %539 = tpu.matmul %538, %535, %cst_209 {dimension_numbers = #tpu.dot_dimension_numbers<[1], [0], [0], [1], [0, 0, 1, 1], [], []>} : vector<16x16xf32>, vector<16x16xf32>, vector<16x16xf32> -> vector<16x16xf32>
    %540 = arith.addf %529, %539 : vector<16x16xf32>
    %c40 = arith.constant 40 : index
    %c0_210 = arith.constant 0 : index
    %c0_211 = arith.constant 0 : index
    %541 = vector.load %arg2[%c40, %c0_210, %c0_211] : memref<90x32x48xf32, #tpu.memory_space<vmem>>, vector<1x32x48xf32>
    %542 = vector.shape_cast %541 : vector<1x32x48xf32> to vector<32x48xf32>
    %543 = vector.extract_strided_slice %542 {offsets = [0, 0], sizes = [16, 16], strides = [1, 1]} : vector<32x48xf32> to vector<16x16xf32>
    %cst_212 = arith.constant dense<0.000000e+00> : vector<16x16xf32>
    %544 = tpu.matmul %543, %490, %cst_212 {dimension_numbers = #tpu.dot_dimension_numbers<[1], [0], [0], [1], [0, 0, 1, 1], [], []>} : vector<16x16xf32>, vector<16x16xf32>, vector<16x16xf32> -> vector<16x16xf32>
    %545 = arith.addf %540, %544 : vector<16x16xf32>
    %546 = vector.extract_strided_slice %490 {offsets = [0, 1], sizes = [16, 15], strides = [1, 1]} : vector<16x16xf32> to vector<16x15xf32>
    %547 = vector.extract_strided_slice %490 {offsets = [0, 0], sizes = [16, 1], strides = [1, 1]} : vector<16x16xf32> to vector<16x1xf32>
    %548 = tpu.concatenate %546, %547 in 1 : vector<16x15xf32>, vector<16x1xf32> -> vector<16x16xf32>
    %549 = vector.extract_strided_slice %493 {offsets = [5, 0], sizes = [1, 16], strides = [1, 1]} : vector<9x16xf32> to vector<1x16xf32>
    %550 = vector.broadcast %549 : vector<1x16xf32> to vector<16x16xf32>
    %551 = arith.mulf %548, %550 : vector<16x16xf32>
    %c41 = arith.constant 41 : index
    %c0_213 = arith.constant 0 : index
    %c0_214 = arith.constant 0 : index
    %552 = vector.load %arg2[%c41, %c0_213, %c0_214] : memref<90x32x48xf32, #tpu.memory_space<vmem>>, vector<1x32x48xf32>
    %553 = vector.shape_cast %552 : vector<1x32x48xf32> to vector<32x48xf32>
    %554 = vector.extract_strided_slice %553 {offsets = [0, 0], sizes = [16, 16], strides = [1, 1]} : vector<32x48xf32> to vector<16x16xf32>
    %cst_215 = arith.constant dense<0.000000e+00> : vector<16x16xf32>
    %555 = tpu.matmul %554, %551, %cst_215 {dimension_numbers = #tpu.dot_dimension_numbers<[1], [0], [0], [1], [0, 0, 1, 1], [], []>} : vector<16x16xf32>, vector<16x16xf32>, vector<16x16xf32> -> vector<16x16xf32>
    %556 = arith.addf %545, %555 : vector<16x16xf32>
    %557 = vector.extract_strided_slice %490 {offsets = [0, 3], sizes = [16, 13], strides = [1, 1]} : vector<16x16xf32> to vector<16x13xf32>
    %558 = vector.extract_strided_slice %490 {offsets = [0, 0], sizes = [16, 3], strides = [1, 1]} : vector<16x16xf32> to vector<16x3xf32>
    %559 = tpu.concatenate %557, %558 in 1 : vector<16x13xf32>, vector<16x3xf32> -> vector<16x16xf32>
    %560 = vector.extract_strided_slice %493 {offsets = [6, 0], sizes = [1, 16], strides = [1, 1]} : vector<9x16xf32> to vector<1x16xf32>
    %561 = vector.broadcast %560 : vector<1x16xf32> to vector<16x16xf32>
    %562 = arith.mulf %559, %561 : vector<16x16xf32>
    %c42 = arith.constant 42 : index
    %c0_216 = arith.constant 0 : index
    %c0_217 = arith.constant 0 : index
    %563 = vector.load %arg2[%c42, %c0_216, %c0_217] : memref<90x32x48xf32, #tpu.memory_space<vmem>>, vector<1x32x48xf32>
    %564 = vector.shape_cast %563 : vector<1x32x48xf32> to vector<32x48xf32>
    %565 = vector.extract_strided_slice %564 {offsets = [0, 0], sizes = [16, 16], strides = [1, 1]} : vector<32x48xf32> to vector<16x16xf32>
    %cst_218 = arith.constant dense<0.000000e+00> : vector<16x16xf32>
    %566 = tpu.matmul %565, %562, %cst_218 {dimension_numbers = #tpu.dot_dimension_numbers<[1], [0], [0], [1], [0, 0, 1, 1], [], []>} : vector<16x16xf32>, vector<16x16xf32>, vector<16x16xf32> -> vector<16x16xf32>
    %567 = arith.addf %556, %566 : vector<16x16xf32>
    %568 = vector.extract_strided_slice %490 {offsets = [0, 4], sizes = [16, 12], strides = [1, 1]} : vector<16x16xf32> to vector<16x12xf32>
    %569 = vector.extract_strided_slice %490 {offsets = [0, 0], sizes = [16, 4], strides = [1, 1]} : vector<16x16xf32> to vector<16x4xf32>
    %570 = tpu.concatenate %568, %569 in 1 : vector<16x12xf32>, vector<16x4xf32> -> vector<16x16xf32>
    %571 = vector.extract_strided_slice %493 {offsets = [7, 0], sizes = [1, 16], strides = [1, 1]} : vector<9x16xf32> to vector<1x16xf32>
    %572 = vector.broadcast %571 : vector<1x16xf32> to vector<16x16xf32>
    %573 = arith.mulf %570, %572 : vector<16x16xf32>
    %c43 = arith.constant 43 : index
    %c0_219 = arith.constant 0 : index
    %c0_220 = arith.constant 0 : index
    %574 = vector.load %arg2[%c43, %c0_219, %c0_220] : memref<90x32x48xf32, #tpu.memory_space<vmem>>, vector<1x32x48xf32>
    %575 = vector.shape_cast %574 : vector<1x32x48xf32> to vector<32x48xf32>
    %576 = vector.extract_strided_slice %575 {offsets = [0, 0], sizes = [16, 16], strides = [1, 1]} : vector<32x48xf32> to vector<16x16xf32>
    %cst_221 = arith.constant dense<0.000000e+00> : vector<16x16xf32>
    %577 = tpu.matmul %576, %573, %cst_221 {dimension_numbers = #tpu.dot_dimension_numbers<[1], [0], [0], [1], [0, 0, 1, 1], [], []>} : vector<16x16xf32>, vector<16x16xf32>, vector<16x16xf32> -> vector<16x16xf32>
    %578 = arith.addf %567, %577 : vector<16x16xf32>
    %579 = vector.extract_strided_slice %490 {offsets = [0, 5], sizes = [16, 11], strides = [1, 1]} : vector<16x16xf32> to vector<16x11xf32>
    %580 = vector.extract_strided_slice %490 {offsets = [0, 0], sizes = [16, 5], strides = [1, 1]} : vector<16x16xf32> to vector<16x5xf32>
    %581 = tpu.concatenate %579, %580 in 1 : vector<16x11xf32>, vector<16x5xf32> -> vector<16x16xf32>
    %582 = vector.extract_strided_slice %493 {offsets = [8, 0], sizes = [1, 16], strides = [1, 1]} : vector<9x16xf32> to vector<1x16xf32>
    %583 = vector.broadcast %582 : vector<1x16xf32> to vector<16x16xf32>
    %584 = arith.mulf %581, %583 : vector<16x16xf32>
    %c44 = arith.constant 44 : index
    %c0_222 = arith.constant 0 : index
    %c0_223 = arith.constant 0 : index
    %585 = vector.load %arg2[%c44, %c0_222, %c0_223] : memref<90x32x48xf32, #tpu.memory_space<vmem>>, vector<1x32x48xf32>
    %586 = vector.shape_cast %585 : vector<1x32x48xf32> to vector<32x48xf32>
    %587 = vector.extract_strided_slice %586 {offsets = [0, 0], sizes = [16, 16], strides = [1, 1]} : vector<32x48xf32> to vector<16x16xf32>
    %cst_224 = arith.constant dense<0.000000e+00> : vector<16x16xf32>
    %588 = tpu.matmul %587, %584, %cst_224 {dimension_numbers = #tpu.dot_dimension_numbers<[1], [0], [0], [1], [0, 0, 1, 1], [], []>} : vector<16x16xf32>, vector<16x16xf32>, vector<16x16xf32> -> vector<16x16xf32>
    %589 = arith.addf %578, %588 : vector<16x16xf32>
    %cst_225 = arith.constant 0.000000e+00 : f32
    %590 = vector.broadcast %cst_225 : f32 to vector<16x16xf32>
    %591 = arith.maximumf %589, %590 : vector<16x16xf32>
    %cst_226 = arith.constant dense<0.000000e+00> : vector<16xf32>
    %592 = vector.multi_reduction <add>, %591, %cst_226 [1] : vector<16x16xf32> to vector<16xf32>
    %593 = vector.shape_cast %592 : vector<16xf32> to vector<16x1xf32>
    %594 = arith.mulf %591, %591 : vector<16x16xf32>
    %cst_227 = arith.constant dense<0.000000e+00> : vector<16xf32>
    %595 = vector.multi_reduction <add>, %594, %cst_227 [1] : vector<16x16xf32> to vector<16xf32>
    %596 = vector.shape_cast %595 : vector<16xf32> to vector<16x1xf32>
    %597 = tpu.concatenate %593, %596 in 1 : vector<16x1xf32>, vector<16x1xf32> -> vector<16x2xf32>
    %c5_228 = arith.constant 5 : index
    %c0_229 = arith.constant 0 : index
    %c0_230 = arith.constant 0 : index
    %598 = vector.load %arg4[%c5_228, %c0_229, %c0_230] : memref<10x48x48xf32, #tpu.memory_space<vmem>>, vector<1x48x48xf32>
    %599 = vector.shape_cast %598 : vector<1x48x48xf32> to vector<48x48xf32>
    %600 = vector.extract_strided_slice %599 {offsets = [0, 0], sizes = [16, 16], strides = [1, 1]} : vector<48x48xf32> to vector<16x16xf32>
    %cst_231 = arith.constant dense<0.000000e+00> : vector<16x2xf32>
    %601 = tpu.matmul %600, %597, %cst_231 {dimension_numbers = #tpu.dot_dimension_numbers<[1], [0], [0], [1], [0, 0, 1, 1], [], []>} : vector<16x16xf32>, vector<16x2xf32>, vector<16x2xf32> -> vector<16x2xf32>
    %602 = vector.extract_strided_slice %601 {offsets = [0, 0], sizes = [16, 1], strides = [1, 1]} : vector<16x2xf32> to vector<16x1xf32>
    %603 = vector.extract_strided_slice %601 {offsets = [0, 1], sizes = [16, 1], strides = [1, 1]} : vector<16x2xf32> to vector<16x1xf32>
    %604 = arith.mulf %602, %602 : vector<16x1xf32>
    %605 = arith.subf %603, %604 : vector<16x1xf32>
    %cst_232 = arith.constant 0.000000e+00 : f32
    %606 = vector.broadcast %cst_232 : f32 to vector<16x1xf32>
    %607 = arith.maximumf %605, %606 : vector<16x1xf32>
    %608 = vector.broadcast %602 : vector<16x1xf32> to vector<16x16xf32>
    %609 = arith.subf %591, %608 : vector<16x16xf32>
    %cst_233 = arith.constant 9.99999974E-6 : f32
    %610 = vector.broadcast %cst_233 : f32 to vector<16x1xf32>
    %611 = arith.addf %607, %610 : vector<16x1xf32>
    %612 = math.rsqrt %611 : vector<16x1xf32>
    %613 = vector.broadcast %612 : vector<16x1xf32> to vector<16x16xf32>
    %614 = arith.mulf %609, %613 : vector<16x16xf32>
    %c2_234 = arith.constant 2 : index
    %c0_235 = arith.constant 0 : index
    %c0_236 = arith.constant 0 : index
    %615 = vector.load %arg5[%c2_234, %c0_235, %c0_236] : memref<3x9x256xf32, #tpu.memory_space<vmem>>, vector<1x9x256xf32>
    %616 = vector.shape_cast %615 : vector<1x9x256xf32> to vector<9x256xf32>
    %617 = vector.extract_strided_slice %616 {offsets = [0, 0], sizes = [9, 16], strides = [1, 1]} : vector<9x256xf32> to vector<9x16xf32>
    %c5_237 = arith.constant 5 : index
    %c0_238 = arith.constant 0 : index
    %c0_239 = arith.constant 0 : index
    %618 = vector.load %arg3[%c5_237, %c0_238, %c0_239] : memref<10x32x256xf32, #tpu.memory_space<vmem>>, vector<1x32x256xf32>
    %619 = vector.shape_cast %618 : vector<1x32x256xf32> to vector<32x256xf32>
    %620 = vector.extract_strided_slice %619 {offsets = [0, 0], sizes = [32, 16], strides = [1, 1]} : vector<32x256xf32> to vector<32x16xf32>
    %621 = vector.extract_strided_slice %614 {offsets = [0, 11], sizes = [16, 5], strides = [1, 1]} : vector<16x16xf32> to vector<16x5xf32>
    %622 = vector.extract_strided_slice %614 {offsets = [0, 0], sizes = [16, 11], strides = [1, 1]} : vector<16x16xf32> to vector<16x11xf32>
    %623 = tpu.concatenate %621, %622 in 1 : vector<16x5xf32>, vector<16x11xf32> -> vector<16x16xf32>
    %624 = vector.extract_strided_slice %617 {offsets = [0, 0], sizes = [1, 16], strides = [1, 1]} : vector<9x16xf32> to vector<1x16xf32>
    %625 = vector.broadcast %624 : vector<1x16xf32> to vector<16x16xf32>
    %626 = arith.mulf %623, %625 : vector<16x16xf32>
    %c45 = arith.constant 45 : index
    %c0_240 = arith.constant 0 : index
    %c0_241 = arith.constant 0 : index
    %627 = vector.load %arg2[%c45, %c0_240, %c0_241] : memref<90x32x48xf32, #tpu.memory_space<vmem>>, vector<1x32x48xf32>
    %628 = vector.shape_cast %627 : vector<1x32x48xf32> to vector<32x48xf32>
    %629 = vector.extract_strided_slice %628 {offsets = [0, 0], sizes = [32, 16], strides = [1, 1]} : vector<32x48xf32> to vector<32x16xf32>
    %cst_242 = arith.constant dense<0.000000e+00> : vector<32x16xf32>
    %630 = tpu.matmul %629, %626, %cst_242 {dimension_numbers = #tpu.dot_dimension_numbers<[1], [0], [0], [1], [0, 0, 1, 1], [], []>} : vector<32x16xf32>, vector<16x16xf32>, vector<32x16xf32> -> vector<32x16xf32>
    %631 = arith.addf %620, %630 : vector<32x16xf32>
    %632 = vector.extract_strided_slice %614 {offsets = [0, 12], sizes = [16, 4], strides = [1, 1]} : vector<16x16xf32> to vector<16x4xf32>
    %633 = vector.extract_strided_slice %614 {offsets = [0, 0], sizes = [16, 12], strides = [1, 1]} : vector<16x16xf32> to vector<16x12xf32>
    %634 = tpu.concatenate %632, %633 in 1 : vector<16x4xf32>, vector<16x12xf32> -> vector<16x16xf32>
    %635 = vector.extract_strided_slice %617 {offsets = [1, 0], sizes = [1, 16], strides = [1, 1]} : vector<9x16xf32> to vector<1x16xf32>
    %636 = vector.broadcast %635 : vector<1x16xf32> to vector<16x16xf32>
    %637 = arith.mulf %634, %636 : vector<16x16xf32>
    %c46 = arith.constant 46 : index
    %c0_243 = arith.constant 0 : index
    %c0_244 = arith.constant 0 : index
    %638 = vector.load %arg2[%c46, %c0_243, %c0_244] : memref<90x32x48xf32, #tpu.memory_space<vmem>>, vector<1x32x48xf32>
    %639 = vector.shape_cast %638 : vector<1x32x48xf32> to vector<32x48xf32>
    %640 = vector.extract_strided_slice %639 {offsets = [0, 0], sizes = [32, 16], strides = [1, 1]} : vector<32x48xf32> to vector<32x16xf32>
    %cst_245 = arith.constant dense<0.000000e+00> : vector<32x16xf32>
    %641 = tpu.matmul %640, %637, %cst_245 {dimension_numbers = #tpu.dot_dimension_numbers<[1], [0], [0], [1], [0, 0, 1, 1], [], []>} : vector<32x16xf32>, vector<16x16xf32>, vector<32x16xf32> -> vector<32x16xf32>
    %642 = arith.addf %631, %641 : vector<32x16xf32>
    %643 = vector.extract_strided_slice %614 {offsets = [0, 13], sizes = [16, 3], strides = [1, 1]} : vector<16x16xf32> to vector<16x3xf32>
    %644 = vector.extract_strided_slice %614 {offsets = [0, 0], sizes = [16, 13], strides = [1, 1]} : vector<16x16xf32> to vector<16x13xf32>
    %645 = tpu.concatenate %643, %644 in 1 : vector<16x3xf32>, vector<16x13xf32> -> vector<16x16xf32>
    %646 = vector.extract_strided_slice %617 {offsets = [2, 0], sizes = [1, 16], strides = [1, 1]} : vector<9x16xf32> to vector<1x16xf32>
    %647 = vector.broadcast %646 : vector<1x16xf32> to vector<16x16xf32>
    %648 = arith.mulf %645, %647 : vector<16x16xf32>
    %c47 = arith.constant 47 : index
    %c0_246 = arith.constant 0 : index
    %c0_247 = arith.constant 0 : index
    %649 = vector.load %arg2[%c47, %c0_246, %c0_247] : memref<90x32x48xf32, #tpu.memory_space<vmem>>, vector<1x32x48xf32>
    %650 = vector.shape_cast %649 : vector<1x32x48xf32> to vector<32x48xf32>
    %651 = vector.extract_strided_slice %650 {offsets = [0, 0], sizes = [32, 16], strides = [1, 1]} : vector<32x48xf32> to vector<32x16xf32>
    %cst_248 = arith.constant dense<0.000000e+00> : vector<32x16xf32>
    %652 = tpu.matmul %651, %648, %cst_248 {dimension_numbers = #tpu.dot_dimension_numbers<[1], [0], [0], [1], [0, 0, 1, 1], [], []>} : vector<32x16xf32>, vector<16x16xf32>, vector<32x16xf32> -> vector<32x16xf32>
    %653 = arith.addf %642, %652 : vector<32x16xf32>
    %654 = vector.extract_strided_slice %614 {offsets = [0, 15], sizes = [16, 1], strides = [1, 1]} : vector<16x16xf32> to vector<16x1xf32>
    %655 = vector.extract_strided_slice %614 {offsets = [0, 0], sizes = [16, 15], strides = [1, 1]} : vector<16x16xf32> to vector<16x15xf32>
    %656 = tpu.concatenate %654, %655 in 1 : vector<16x1xf32>, vector<16x15xf32> -> vector<16x16xf32>
    %657 = vector.extract_strided_slice %617 {offsets = [3, 0], sizes = [1, 16], strides = [1, 1]} : vector<9x16xf32> to vector<1x16xf32>
    %658 = vector.broadcast %657 : vector<1x16xf32> to vector<16x16xf32>
    %659 = arith.mulf %656, %658 : vector<16x16xf32>
    %c48 = arith.constant 48 : index
    %c0_249 = arith.constant 0 : index
    %c0_250 = arith.constant 0 : index
    %660 = vector.load %arg2[%c48, %c0_249, %c0_250] : memref<90x32x48xf32, #tpu.memory_space<vmem>>, vector<1x32x48xf32>
    %661 = vector.shape_cast %660 : vector<1x32x48xf32> to vector<32x48xf32>
    %662 = vector.extract_strided_slice %661 {offsets = [0, 0], sizes = [32, 16], strides = [1, 1]} : vector<32x48xf32> to vector<32x16xf32>
    %cst_251 = arith.constant dense<0.000000e+00> : vector<32x16xf32>
    %663 = tpu.matmul %662, %659, %cst_251 {dimension_numbers = #tpu.dot_dimension_numbers<[1], [0], [0], [1], [0, 0, 1, 1], [], []>} : vector<32x16xf32>, vector<16x16xf32>, vector<32x16xf32> -> vector<32x16xf32>
    %664 = arith.addf %653, %663 : vector<32x16xf32>
    %c49 = arith.constant 49 : index
    %c0_252 = arith.constant 0 : index
    %c0_253 = arith.constant 0 : index
    %665 = vector.load %arg2[%c49, %c0_252, %c0_253] : memref<90x32x48xf32, #tpu.memory_space<vmem>>, vector<1x32x48xf32>
    %666 = vector.shape_cast %665 : vector<1x32x48xf32> to vector<32x48xf32>
    %667 = vector.extract_strided_slice %666 {offsets = [0, 0], sizes = [32, 16], strides = [1, 1]} : vector<32x48xf32> to vector<32x16xf32>
    %cst_254 = arith.constant dense<0.000000e+00> : vector<32x16xf32>
    %668 = tpu.matmul %667, %614, %cst_254 {dimension_numbers = #tpu.dot_dimension_numbers<[1], [0], [0], [1], [0, 0, 1, 1], [], []>} : vector<32x16xf32>, vector<16x16xf32>, vector<32x16xf32> -> vector<32x16xf32>
    %669 = arith.addf %664, %668 : vector<32x16xf32>
    %670 = vector.extract_strided_slice %614 {offsets = [0, 1], sizes = [16, 15], strides = [1, 1]} : vector<16x16xf32> to vector<16x15xf32>
    %671 = vector.extract_strided_slice %614 {offsets = [0, 0], sizes = [16, 1], strides = [1, 1]} : vector<16x16xf32> to vector<16x1xf32>
    %672 = tpu.concatenate %670, %671 in 1 : vector<16x15xf32>, vector<16x1xf32> -> vector<16x16xf32>
    %673 = vector.extract_strided_slice %617 {offsets = [5, 0], sizes = [1, 16], strides = [1, 1]} : vector<9x16xf32> to vector<1x16xf32>
    %674 = vector.broadcast %673 : vector<1x16xf32> to vector<16x16xf32>
    %675 = arith.mulf %672, %674 : vector<16x16xf32>
    %c50 = arith.constant 50 : index
    %c0_255 = arith.constant 0 : index
    %c0_256 = arith.constant 0 : index
    %676 = vector.load %arg2[%c50, %c0_255, %c0_256] : memref<90x32x48xf32, #tpu.memory_space<vmem>>, vector<1x32x48xf32>
    %677 = vector.shape_cast %676 : vector<1x32x48xf32> to vector<32x48xf32>
    %678 = vector.extract_strided_slice %677 {offsets = [0, 0], sizes = [32, 16], strides = [1, 1]} : vector<32x48xf32> to vector<32x16xf32>
    %cst_257 = arith.constant dense<0.000000e+00> : vector<32x16xf32>
    %679 = tpu.matmul %678, %675, %cst_257 {dimension_numbers = #tpu.dot_dimension_numbers<[1], [0], [0], [1], [0, 0, 1, 1], [], []>} : vector<32x16xf32>, vector<16x16xf32>, vector<32x16xf32> -> vector<32x16xf32>
    %680 = arith.addf %669, %679 : vector<32x16xf32>
    %681 = vector.extract_strided_slice %614 {offsets = [0, 3], sizes = [16, 13], strides = [1, 1]} : vector<16x16xf32> to vector<16x13xf32>
    %682 = vector.extract_strided_slice %614 {offsets = [0, 0], sizes = [16, 3], strides = [1, 1]} : vector<16x16xf32> to vector<16x3xf32>
    %683 = tpu.concatenate %681, %682 in 1 : vector<16x13xf32>, vector<16x3xf32> -> vector<16x16xf32>
    %684 = vector.extract_strided_slice %617 {offsets = [6, 0], sizes = [1, 16], strides = [1, 1]} : vector<9x16xf32> to vector<1x16xf32>
    %685 = vector.broadcast %684 : vector<1x16xf32> to vector<16x16xf32>
    %686 = arith.mulf %683, %685 : vector<16x16xf32>
    %c51 = arith.constant 51 : index
    %c0_258 = arith.constant 0 : index
    %c0_259 = arith.constant 0 : index
    %687 = vector.load %arg2[%c51, %c0_258, %c0_259] : memref<90x32x48xf32, #tpu.memory_space<vmem>>, vector<1x32x48xf32>
    %688 = vector.shape_cast %687 : vector<1x32x48xf32> to vector<32x48xf32>
    %689 = vector.extract_strided_slice %688 {offsets = [0, 0], sizes = [32, 16], strides = [1, 1]} : vector<32x48xf32> to vector<32x16xf32>
    %cst_260 = arith.constant dense<0.000000e+00> : vector<32x16xf32>
    %690 = tpu.matmul %689, %686, %cst_260 {dimension_numbers = #tpu.dot_dimension_numbers<[1], [0], [0], [1], [0, 0, 1, 1], [], []>} : vector<32x16xf32>, vector<16x16xf32>, vector<32x16xf32> -> vector<32x16xf32>
    %691 = arith.addf %680, %690 : vector<32x16xf32>
    %692 = vector.extract_strided_slice %614 {offsets = [0, 4], sizes = [16, 12], strides = [1, 1]} : vector<16x16xf32> to vector<16x12xf32>
    %693 = vector.extract_strided_slice %614 {offsets = [0, 0], sizes = [16, 4], strides = [1, 1]} : vector<16x16xf32> to vector<16x4xf32>
    %694 = tpu.concatenate %692, %693 in 1 : vector<16x12xf32>, vector<16x4xf32> -> vector<16x16xf32>
    %695 = vector.extract_strided_slice %617 {offsets = [7, 0], sizes = [1, 16], strides = [1, 1]} : vector<9x16xf32> to vector<1x16xf32>
    %696 = vector.broadcast %695 : vector<1x16xf32> to vector<16x16xf32>
    %697 = arith.mulf %694, %696 : vector<16x16xf32>
    %c52 = arith.constant 52 : index
    %c0_261 = arith.constant 0 : index
    %c0_262 = arith.constant 0 : index
    %698 = vector.load %arg2[%c52, %c0_261, %c0_262] : memref<90x32x48xf32, #tpu.memory_space<vmem>>, vector<1x32x48xf32>
    %699 = vector.shape_cast %698 : vector<1x32x48xf32> to vector<32x48xf32>
    %700 = vector.extract_strided_slice %699 {offsets = [0, 0], sizes = [32, 16], strides = [1, 1]} : vector<32x48xf32> to vector<32x16xf32>
    %cst_263 = arith.constant dense<0.000000e+00> : vector<32x16xf32>
    %701 = tpu.matmul %700, %697, %cst_263 {dimension_numbers = #tpu.dot_dimension_numbers<[1], [0], [0], [1], [0, 0, 1, 1], [], []>} : vector<32x16xf32>, vector<16x16xf32>, vector<32x16xf32> -> vector<32x16xf32>
    %702 = arith.addf %691, %701 : vector<32x16xf32>
    %703 = vector.extract_strided_slice %614 {offsets = [0, 5], sizes = [16, 11], strides = [1, 1]} : vector<16x16xf32> to vector<16x11xf32>
    %704 = vector.extract_strided_slice %614 {offsets = [0, 0], sizes = [16, 5], strides = [1, 1]} : vector<16x16xf32> to vector<16x5xf32>
    %705 = tpu.concatenate %703, %704 in 1 : vector<16x11xf32>, vector<16x5xf32> -> vector<16x16xf32>
    %706 = vector.extract_strided_slice %617 {offsets = [8, 0], sizes = [1, 16], strides = [1, 1]} : vector<9x16xf32> to vector<1x16xf32>
    %707 = vector.broadcast %706 : vector<1x16xf32> to vector<16x16xf32>
    %708 = arith.mulf %705, %707 : vector<16x16xf32>
    %c53 = arith.constant 53 : index
    %c0_264 = arith.constant 0 : index
    %c0_265 = arith.constant 0 : index
    %709 = vector.load %arg2[%c53, %c0_264, %c0_265] : memref<90x32x48xf32, #tpu.memory_space<vmem>>, vector<1x32x48xf32>
    %710 = vector.shape_cast %709 : vector<1x32x48xf32> to vector<32x48xf32>
    %711 = vector.extract_strided_slice %710 {offsets = [0, 0], sizes = [32, 16], strides = [1, 1]} : vector<32x48xf32> to vector<32x16xf32>
    %cst_266 = arith.constant dense<0.000000e+00> : vector<32x16xf32>
    %712 = tpu.matmul %711, %708, %cst_266 {dimension_numbers = #tpu.dot_dimension_numbers<[1], [0], [0], [1], [0, 0, 1, 1], [], []>} : vector<32x16xf32>, vector<16x16xf32>, vector<32x16xf32> -> vector<32x16xf32>
    %713 = arith.addf %702, %712 : vector<32x16xf32>
    %cst_267 = arith.constant 0.000000e+00 : f32
    %714 = vector.broadcast %cst_267 : f32 to vector<32x16xf32>
    %715 = arith.maximumf %713, %714 : vector<32x16xf32>
    %c0_268 = arith.constant 0 : index
    %c0_269 = arith.constant 0 : index
    %716 = vector.load %arg9[%c0_268, %c0_269] : memref<16x64xf32, #tpu.memory_space<vmem>>, vector<16x64xf32>
    %cst_270 = arith.constant dense<0.000000e+00> : vector<32x64xf32>
    %717 = tpu.matmul %715, %716, %cst_270 {dimension_numbers = #tpu.dot_dimension_numbers<[1], [0], [0], [1], [0, 0, 1, 1], [], []>} : vector<32x16xf32>, vector<16x64xf32>, vector<32x64xf32> -> vector<32x64xf32>
    %718 = tpu.concatenate %465, %717 in 0 : vector<16x64xf32>, vector<32x64xf32> -> vector<48x64xf32>
    %cst_271 = arith.constant dense<0.000000e+00> : vector<48xf32>
    %719 = vector.multi_reduction <add>, %718, %cst_271 [1] : vector<48x64xf32> to vector<48xf32>
    %720 = vector.shape_cast %719 : vector<48xf32> to vector<48x1xf32>
    %721 = arith.mulf %718, %718 : vector<48x64xf32>
    %cst_272 = arith.constant dense<0.000000e+00> : vector<48xf32>
    %722 = vector.multi_reduction <add>, %721, %cst_272 [1] : vector<48x64xf32> to vector<48xf32>
    %723 = vector.shape_cast %722 : vector<48xf32> to vector<48x1xf32>
    %724 = tpu.concatenate %720, %723 in 1 : vector<48x1xf32>, vector<48x1xf32> -> vector<48x2xf32>
    %c6_273 = arith.constant 6 : index
    %c0_274 = arith.constant 0 : index
    %c0_275 = arith.constant 0 : index
    %725 = vector.load %arg4[%c6_273, %c0_274, %c0_275] : memref<10x48x48xf32, #tpu.memory_space<vmem>>, vector<1x48x48xf32>
    %726 = vector.shape_cast %725 : vector<1x48x48xf32> to vector<48x48xf32>
    %cst_276 = arith.constant dense<0.000000e+00> : vector<48x2xf32>
    %727 = tpu.matmul %726, %724, %cst_276 {dimension_numbers = #tpu.dot_dimension_numbers<[1], [0], [0], [1], [0, 0, 1, 1], [], []>} : vector<48x48xf32>, vector<48x2xf32>, vector<48x2xf32> -> vector<48x2xf32>
    %728 = vector.extract_strided_slice %727 {offsets = [0, 0], sizes = [48, 1], strides = [1, 1]} : vector<48x2xf32> to vector<48x1xf32>
    %729 = vector.extract_strided_slice %727 {offsets = [0, 1], sizes = [48, 1], strides = [1, 1]} : vector<48x2xf32> to vector<48x1xf32>
    %730 = arith.mulf %728, %728 : vector<48x1xf32>
    %731 = arith.subf %729, %730 : vector<48x1xf32>
    %cst_277 = arith.constant 0.000000e+00 : f32
    %732 = vector.broadcast %cst_277 : f32 to vector<48x1xf32>
    %733 = arith.maximumf %731, %732 : vector<48x1xf32>
    %734 = vector.broadcast %728 : vector<48x1xf32> to vector<48x64xf32>
    %735 = arith.subf %718, %734 : vector<48x64xf32>
    %cst_278 = arith.constant 9.99999974E-6 : f32
    %736 = vector.broadcast %cst_278 : f32 to vector<48x1xf32>
    %737 = arith.addf %733, %736 : vector<48x1xf32>
    %738 = math.rsqrt %737 : vector<48x1xf32>
    %739 = vector.broadcast %738 : vector<48x1xf32> to vector<48x64xf32>
    %740 = arith.mulf %735, %739 : vector<48x64xf32>
    %c1_279 = arith.constant 1 : index
    %c0_280 = arith.constant 0 : index
    %c0_281 = arith.constant 0 : index
    %741 = vector.load %arg5[%c1_279, %c0_280, %c0_281] : memref<3x9x256xf32, #tpu.memory_space<vmem>>, vector<1x9x256xf32>
    %742 = vector.shape_cast %741 : vector<1x9x256xf32> to vector<9x256xf32>
    %743 = vector.extract_strided_slice %742 {offsets = [0, 0], sizes = [9, 64], strides = [1, 1]} : vector<9x256xf32> to vector<9x64xf32>
    %c6_282 = arith.constant 6 : index
    %c0_283 = arith.constant 0 : index
    %c0_284 = arith.constant 0 : index
    %744 = vector.load %arg3[%c6_282, %c0_283, %c0_284] : memref<10x32x256xf32, #tpu.memory_space<vmem>>, vector<1x32x256xf32>
    %745 = vector.shape_cast %744 : vector<1x32x256xf32> to vector<32x256xf32>
    %746 = vector.extract_strided_slice %745 {offsets = [0, 0], sizes = [16, 64], strides = [1, 1]} : vector<32x256xf32> to vector<16x64xf32>
    %747 = vector.extract_strided_slice %740 {offsets = [0, 55], sizes = [48, 9], strides = [1, 1]} : vector<48x64xf32> to vector<48x9xf32>
    %748 = vector.extract_strided_slice %740 {offsets = [0, 0], sizes = [48, 55], strides = [1, 1]} : vector<48x64xf32> to vector<48x55xf32>
    %749 = tpu.concatenate %747, %748 in 1 : vector<48x9xf32>, vector<48x55xf32> -> vector<48x64xf32>
    %750 = vector.extract_strided_slice %743 {offsets = [0, 0], sizes = [1, 64], strides = [1, 1]} : vector<9x64xf32> to vector<1x64xf32>
    %751 = vector.broadcast %750 : vector<1x64xf32> to vector<48x64xf32>
    %752 = arith.mulf %749, %751 : vector<48x64xf32>
    %c54 = arith.constant 54 : index
    %c0_285 = arith.constant 0 : index
    %c0_286 = arith.constant 0 : index
    %753 = vector.load %arg2[%c54, %c0_285, %c0_286] : memref<90x32x48xf32, #tpu.memory_space<vmem>>, vector<1x32x48xf32>
    %754 = vector.shape_cast %753 : vector<1x32x48xf32> to vector<32x48xf32>
    %755 = vector.extract_strided_slice %754 {offsets = [0, 0], sizes = [16, 48], strides = [1, 1]} : vector<32x48xf32> to vector<16x48xf32>
    %cst_287 = arith.constant dense<0.000000e+00> : vector<16x64xf32>
    %756 = tpu.matmul %755, %752, %cst_287 {dimension_numbers = #tpu.dot_dimension_numbers<[1], [0], [0], [1], [0, 0, 1, 1], [], []>} : vector<16x48xf32>, vector<48x64xf32>, vector<16x64xf32> -> vector<16x64xf32>
    %757 = arith.addf %746, %756 : vector<16x64xf32>
    %758 = vector.extract_strided_slice %740 {offsets = [0, 56], sizes = [48, 8], strides = [1, 1]} : vector<48x64xf32> to vector<48x8xf32>
    %759 = vector.extract_strided_slice %740 {offsets = [0, 0], sizes = [48, 56], strides = [1, 1]} : vector<48x64xf32> to vector<48x56xf32>
    %760 = tpu.concatenate %758, %759 in 1 : vector<48x8xf32>, vector<48x56xf32> -> vector<48x64xf32>
    %761 = vector.extract_strided_slice %743 {offsets = [1, 0], sizes = [1, 64], strides = [1, 1]} : vector<9x64xf32> to vector<1x64xf32>
    %762 = vector.broadcast %761 : vector<1x64xf32> to vector<48x64xf32>
    %763 = arith.mulf %760, %762 : vector<48x64xf32>
    %c55 = arith.constant 55 : index
    %c0_288 = arith.constant 0 : index
    %c0_289 = arith.constant 0 : index
    %764 = vector.load %arg2[%c55, %c0_288, %c0_289] : memref<90x32x48xf32, #tpu.memory_space<vmem>>, vector<1x32x48xf32>
    %765 = vector.shape_cast %764 : vector<1x32x48xf32> to vector<32x48xf32>
    %766 = vector.extract_strided_slice %765 {offsets = [0, 0], sizes = [16, 48], strides = [1, 1]} : vector<32x48xf32> to vector<16x48xf32>
    %cst_290 = arith.constant dense<0.000000e+00> : vector<16x64xf32>
    %767 = tpu.matmul %766, %763, %cst_290 {dimension_numbers = #tpu.dot_dimension_numbers<[1], [0], [0], [1], [0, 0, 1, 1], [], []>} : vector<16x48xf32>, vector<48x64xf32>, vector<16x64xf32> -> vector<16x64xf32>
    %768 = arith.addf %757, %767 : vector<16x64xf32>
    %769 = vector.extract_strided_slice %740 {offsets = [0, 57], sizes = [48, 7], strides = [1, 1]} : vector<48x64xf32> to vector<48x7xf32>
    %770 = vector.extract_strided_slice %740 {offsets = [0, 0], sizes = [48, 57], strides = [1, 1]} : vector<48x64xf32> to vector<48x57xf32>
    %771 = tpu.concatenate %769, %770 in 1 : vector<48x7xf32>, vector<48x57xf32> -> vector<48x64xf32>
    %772 = vector.extract_strided_slice %743 {offsets = [2, 0], sizes = [1, 64], strides = [1, 1]} : vector<9x64xf32> to vector<1x64xf32>
    %773 = vector.broadcast %772 : vector<1x64xf32> to vector<48x64xf32>
    %774 = arith.mulf %771, %773 : vector<48x64xf32>
    %c56 = arith.constant 56 : index
    %c0_291 = arith.constant 0 : index
    %c0_292 = arith.constant 0 : index
    %775 = vector.load %arg2[%c56, %c0_291, %c0_292] : memref<90x32x48xf32, #tpu.memory_space<vmem>>, vector<1x32x48xf32>
    %776 = vector.shape_cast %775 : vector<1x32x48xf32> to vector<32x48xf32>
    %777 = vector.extract_strided_slice %776 {offsets = [0, 0], sizes = [16, 48], strides = [1, 1]} : vector<32x48xf32> to vector<16x48xf32>
    %cst_293 = arith.constant dense<0.000000e+00> : vector<16x64xf32>
    %778 = tpu.matmul %777, %774, %cst_293 {dimension_numbers = #tpu.dot_dimension_numbers<[1], [0], [0], [1], [0, 0, 1, 1], [], []>} : vector<16x48xf32>, vector<48x64xf32>, vector<16x64xf32> -> vector<16x64xf32>
    %779 = arith.addf %768, %778 : vector<16x64xf32>
    %780 = vector.extract_strided_slice %740 {offsets = [0, 63], sizes = [48, 1], strides = [1, 1]} : vector<48x64xf32> to vector<48x1xf32>
    %781 = vector.extract_strided_slice %740 {offsets = [0, 0], sizes = [48, 63], strides = [1, 1]} : vector<48x64xf32> to vector<48x63xf32>
    %782 = tpu.concatenate %780, %781 in 1 : vector<48x1xf32>, vector<48x63xf32> -> vector<48x64xf32>
    %783 = vector.extract_strided_slice %743 {offsets = [3, 0], sizes = [1, 64], strides = [1, 1]} : vector<9x64xf32> to vector<1x64xf32>
    %784 = vector.broadcast %783 : vector<1x64xf32> to vector<48x64xf32>
    %785 = arith.mulf %782, %784 : vector<48x64xf32>
    %c57 = arith.constant 57 : index
    %c0_294 = arith.constant 0 : index
    %c0_295 = arith.constant 0 : index
    %786 = vector.load %arg2[%c57, %c0_294, %c0_295] : memref<90x32x48xf32, #tpu.memory_space<vmem>>, vector<1x32x48xf32>
    %787 = vector.shape_cast %786 : vector<1x32x48xf32> to vector<32x48xf32>
    %788 = vector.extract_strided_slice %787 {offsets = [0, 0], sizes = [16, 48], strides = [1, 1]} : vector<32x48xf32> to vector<16x48xf32>
    %cst_296 = arith.constant dense<0.000000e+00> : vector<16x64xf32>
    %789 = tpu.matmul %788, %785, %cst_296 {dimension_numbers = #tpu.dot_dimension_numbers<[1], [0], [0], [1], [0, 0, 1, 1], [], []>} : vector<16x48xf32>, vector<48x64xf32>, vector<16x64xf32> -> vector<16x64xf32>
    %790 = arith.addf %779, %789 : vector<16x64xf32>
    %c58 = arith.constant 58 : index
    %c0_297 = arith.constant 0 : index
    %c0_298 = arith.constant 0 : index
    %791 = vector.load %arg2[%c58, %c0_297, %c0_298] : memref<90x32x48xf32, #tpu.memory_space<vmem>>, vector<1x32x48xf32>
    %792 = vector.shape_cast %791 : vector<1x32x48xf32> to vector<32x48xf32>
    %793 = vector.extract_strided_slice %792 {offsets = [0, 0], sizes = [16, 48], strides = [1, 1]} : vector<32x48xf32> to vector<16x48xf32>
    %cst_299 = arith.constant dense<0.000000e+00> : vector<16x64xf32>
    %794 = tpu.matmul %793, %740, %cst_299 {dimension_numbers = #tpu.dot_dimension_numbers<[1], [0], [0], [1], [0, 0, 1, 1], [], []>} : vector<16x48xf32>, vector<48x64xf32>, vector<16x64xf32> -> vector<16x64xf32>
    %795 = arith.addf %790, %794 : vector<16x64xf32>
    %796 = vector.extract_strided_slice %740 {offsets = [0, 1], sizes = [48, 63], strides = [1, 1]} : vector<48x64xf32> to vector<48x63xf32>
    %797 = vector.extract_strided_slice %740 {offsets = [0, 0], sizes = [48, 1], strides = [1, 1]} : vector<48x64xf32> to vector<48x1xf32>
    %798 = tpu.concatenate %796, %797 in 1 : vector<48x63xf32>, vector<48x1xf32> -> vector<48x64xf32>
    %799 = vector.extract_strided_slice %743 {offsets = [5, 0], sizes = [1, 64], strides = [1, 1]} : vector<9x64xf32> to vector<1x64xf32>
    %800 = vector.broadcast %799 : vector<1x64xf32> to vector<48x64xf32>
    %801 = arith.mulf %798, %800 : vector<48x64xf32>
    %c59 = arith.constant 59 : index
    %c0_300 = arith.constant 0 : index
    %c0_301 = arith.constant 0 : index
    %802 = vector.load %arg2[%c59, %c0_300, %c0_301] : memref<90x32x48xf32, #tpu.memory_space<vmem>>, vector<1x32x48xf32>
    %803 = vector.shape_cast %802 : vector<1x32x48xf32> to vector<32x48xf32>
    %804 = vector.extract_strided_slice %803 {offsets = [0, 0], sizes = [16, 48], strides = [1, 1]} : vector<32x48xf32> to vector<16x48xf32>
    %cst_302 = arith.constant dense<0.000000e+00> : vector<16x64xf32>
    %805 = tpu.matmul %804, %801, %cst_302 {dimension_numbers = #tpu.dot_dimension_numbers<[1], [0], [0], [1], [0, 0, 1, 1], [], []>} : vector<16x48xf32>, vector<48x64xf32>, vector<16x64xf32> -> vector<16x64xf32>
    %806 = arith.addf %795, %805 : vector<16x64xf32>
    %807 = vector.extract_strided_slice %740 {offsets = [0, 7], sizes = [48, 57], strides = [1, 1]} : vector<48x64xf32> to vector<48x57xf32>
    %808 = vector.extract_strided_slice %740 {offsets = [0, 0], sizes = [48, 7], strides = [1, 1]} : vector<48x64xf32> to vector<48x7xf32>
    %809 = tpu.concatenate %807, %808 in 1 : vector<48x57xf32>, vector<48x7xf32> -> vector<48x64xf32>
    %810 = vector.extract_strided_slice %743 {offsets = [6, 0], sizes = [1, 64], strides = [1, 1]} : vector<9x64xf32> to vector<1x64xf32>
    %811 = vector.broadcast %810 : vector<1x64xf32> to vector<48x64xf32>
    %812 = arith.mulf %809, %811 : vector<48x64xf32>
    %c60 = arith.constant 60 : index
    %c0_303 = arith.constant 0 : index
    %c0_304 = arith.constant 0 : index
    %813 = vector.load %arg2[%c60, %c0_303, %c0_304] : memref<90x32x48xf32, #tpu.memory_space<vmem>>, vector<1x32x48xf32>
    %814 = vector.shape_cast %813 : vector<1x32x48xf32> to vector<32x48xf32>
    %815 = vector.extract_strided_slice %814 {offsets = [0, 0], sizes = [16, 48], strides = [1, 1]} : vector<32x48xf32> to vector<16x48xf32>
    %cst_305 = arith.constant dense<0.000000e+00> : vector<16x64xf32>
    %816 = tpu.matmul %815, %812, %cst_305 {dimension_numbers = #tpu.dot_dimension_numbers<[1], [0], [0], [1], [0, 0, 1, 1], [], []>} : vector<16x48xf32>, vector<48x64xf32>, vector<16x64xf32> -> vector<16x64xf32>
    %817 = arith.addf %806, %816 : vector<16x64xf32>
    %818 = vector.extract_strided_slice %740 {offsets = [0, 8], sizes = [48, 56], strides = [1, 1]} : vector<48x64xf32> to vector<48x56xf32>
    %819 = vector.extract_strided_slice %740 {offsets = [0, 0], sizes = [48, 8], strides = [1, 1]} : vector<48x64xf32> to vector<48x8xf32>
    %820 = tpu.concatenate %818, %819 in 1 : vector<48x56xf32>, vector<48x8xf32> -> vector<48x64xf32>
    %821 = vector.extract_strided_slice %743 {offsets = [7, 0], sizes = [1, 64], strides = [1, 1]} : vector<9x64xf32> to vector<1x64xf32>
    %822 = vector.broadcast %821 : vector<1x64xf32> to vector<48x64xf32>
    %823 = arith.mulf %820, %822 : vector<48x64xf32>
    %c61 = arith.constant 61 : index
    %c0_306 = arith.constant 0 : index
    %c0_307 = arith.constant 0 : index
    %824 = vector.load %arg2[%c61, %c0_306, %c0_307] : memref<90x32x48xf32, #tpu.memory_space<vmem>>, vector<1x32x48xf32>
    %825 = vector.shape_cast %824 : vector<1x32x48xf32> to vector<32x48xf32>
    %826 = vector.extract_strided_slice %825 {offsets = [0, 0], sizes = [16, 48], strides = [1, 1]} : vector<32x48xf32> to vector<16x48xf32>
    %cst_308 = arith.constant dense<0.000000e+00> : vector<16x64xf32>
    %827 = tpu.matmul %826, %823, %cst_308 {dimension_numbers = #tpu.dot_dimension_numbers<[1], [0], [0], [1], [0, 0, 1, 1], [], []>} : vector<16x48xf32>, vector<48x64xf32>, vector<16x64xf32> -> vector<16x64xf32>
    %828 = arith.addf %817, %827 : vector<16x64xf32>
    %829 = vector.extract_strided_slice %740 {offsets = [0, 9], sizes = [48, 55], strides = [1, 1]} : vector<48x64xf32> to vector<48x55xf32>
    %830 = vector.extract_strided_slice %740 {offsets = [0, 0], sizes = [48, 9], strides = [1, 1]} : vector<48x64xf32> to vector<48x9xf32>
    %831 = tpu.concatenate %829, %830 in 1 : vector<48x55xf32>, vector<48x9xf32> -> vector<48x64xf32>
    %832 = vector.extract_strided_slice %743 {offsets = [8, 0], sizes = [1, 64], strides = [1, 1]} : vector<9x64xf32> to vector<1x64xf32>
    %833 = vector.broadcast %832 : vector<1x64xf32> to vector<48x64xf32>
    %834 = arith.mulf %831, %833 : vector<48x64xf32>
    %c62 = arith.constant 62 : index
    %c0_309 = arith.constant 0 : index
    %c0_310 = arith.constant 0 : index
    %835 = vector.load %arg2[%c62, %c0_309, %c0_310] : memref<90x32x48xf32, #tpu.memory_space<vmem>>, vector<1x32x48xf32>
    %836 = vector.shape_cast %835 : vector<1x32x48xf32> to vector<32x48xf32>
    %837 = vector.extract_strided_slice %836 {offsets = [0, 0], sizes = [16, 48], strides = [1, 1]} : vector<32x48xf32> to vector<16x48xf32>
    %cst_311 = arith.constant dense<0.000000e+00> : vector<16x64xf32>
    %838 = tpu.matmul %837, %834, %cst_311 {dimension_numbers = #tpu.dot_dimension_numbers<[1], [0], [0], [1], [0, 0, 1, 1], [], []>} : vector<16x48xf32>, vector<48x64xf32>, vector<16x64xf32> -> vector<16x64xf32>
    %839 = arith.addf %828, %838 : vector<16x64xf32>
    %cst_312 = arith.constant 0.000000e+00 : f32
    %840 = vector.broadcast %cst_312 : f32 to vector<16x64xf32>
    %841 = arith.maximumf %839, %840 : vector<16x64xf32>
    %cst_313 = arith.constant dense<0.000000e+00> : vector<16xf32>
    %842 = vector.multi_reduction <add>, %841, %cst_313 [1] : vector<16x64xf32> to vector<16xf32>
    %843 = vector.shape_cast %842 : vector<16xf32> to vector<16x1xf32>
    %844 = arith.mulf %841, %841 : vector<16x64xf32>
    %cst_314 = arith.constant dense<0.000000e+00> : vector<16xf32>
    %845 = vector.multi_reduction <add>, %844, %cst_314 [1] : vector<16x64xf32> to vector<16xf32>
    %846 = vector.shape_cast %845 : vector<16xf32> to vector<16x1xf32>
    %847 = tpu.concatenate %843, %846 in 1 : vector<16x1xf32>, vector<16x1xf32> -> vector<16x2xf32>
    %c7_315 = arith.constant 7 : index
    %c0_316 = arith.constant 0 : index
    %c0_317 = arith.constant 0 : index
    %848 = vector.load %arg4[%c7_315, %c0_316, %c0_317] : memref<10x48x48xf32, #tpu.memory_space<vmem>>, vector<1x48x48xf32>
    %849 = vector.shape_cast %848 : vector<1x48x48xf32> to vector<48x48xf32>
    %850 = vector.extract_strided_slice %849 {offsets = [0, 0], sizes = [16, 16], strides = [1, 1]} : vector<48x48xf32> to vector<16x16xf32>
    %cst_318 = arith.constant dense<0.000000e+00> : vector<16x2xf32>
    %851 = tpu.matmul %850, %847, %cst_318 {dimension_numbers = #tpu.dot_dimension_numbers<[1], [0], [0], [1], [0, 0, 1, 1], [], []>} : vector<16x16xf32>, vector<16x2xf32>, vector<16x2xf32> -> vector<16x2xf32>
    %852 = vector.extract_strided_slice %851 {offsets = [0, 0], sizes = [16, 1], strides = [1, 1]} : vector<16x2xf32> to vector<16x1xf32>
    %853 = vector.extract_strided_slice %851 {offsets = [0, 1], sizes = [16, 1], strides = [1, 1]} : vector<16x2xf32> to vector<16x1xf32>
    %854 = arith.mulf %852, %852 : vector<16x1xf32>
    %855 = arith.subf %853, %854 : vector<16x1xf32>
    %cst_319 = arith.constant 0.000000e+00 : f32
    %856 = vector.broadcast %cst_319 : f32 to vector<16x1xf32>
    %857 = arith.maximumf %855, %856 : vector<16x1xf32>
    %858 = vector.broadcast %852 : vector<16x1xf32> to vector<16x64xf32>
    %859 = arith.subf %841, %858 : vector<16x64xf32>
    %cst_320 = arith.constant 9.99999974E-6 : f32
    %860 = vector.broadcast %cst_320 : f32 to vector<16x1xf32>
    %861 = arith.addf %857, %860 : vector<16x1xf32>
    %862 = math.rsqrt %861 : vector<16x1xf32>
    %863 = vector.broadcast %862 : vector<16x1xf32> to vector<16x64xf32>
    %864 = arith.mulf %859, %863 : vector<16x64xf32>
    %c1_321 = arith.constant 1 : index
    %c0_322 = arith.constant 0 : index
    %c0_323 = arith.constant 0 : index
    %865 = vector.load %arg5[%c1_321, %c0_322, %c0_323] : memref<3x9x256xf32, #tpu.memory_space<vmem>>, vector<1x9x256xf32>
    %866 = vector.shape_cast %865 : vector<1x9x256xf32> to vector<9x256xf32>
    %867 = vector.extract_strided_slice %866 {offsets = [0, 0], sizes = [9, 64], strides = [1, 1]} : vector<9x256xf32> to vector<9x64xf32>
    %c7_324 = arith.constant 7 : index
    %c0_325 = arith.constant 0 : index
    %c0_326 = arith.constant 0 : index
    %868 = vector.load %arg3[%c7_324, %c0_325, %c0_326] : memref<10x32x256xf32, #tpu.memory_space<vmem>>, vector<1x32x256xf32>
    %869 = vector.shape_cast %868 : vector<1x32x256xf32> to vector<32x256xf32>
    %870 = vector.extract_strided_slice %869 {offsets = [0, 0], sizes = [16, 64], strides = [1, 1]} : vector<32x256xf32> to vector<16x64xf32>
    %871 = vector.extract_strided_slice %864 {offsets = [0, 55], sizes = [16, 9], strides = [1, 1]} : vector<16x64xf32> to vector<16x9xf32>
    %872 = vector.extract_strided_slice %864 {offsets = [0, 0], sizes = [16, 55], strides = [1, 1]} : vector<16x64xf32> to vector<16x55xf32>
    %873 = tpu.concatenate %871, %872 in 1 : vector<16x9xf32>, vector<16x55xf32> -> vector<16x64xf32>
    %874 = vector.extract_strided_slice %867 {offsets = [0, 0], sizes = [1, 64], strides = [1, 1]} : vector<9x64xf32> to vector<1x64xf32>
    %875 = vector.broadcast %874 : vector<1x64xf32> to vector<16x64xf32>
    %876 = arith.mulf %873, %875 : vector<16x64xf32>
    %c63 = arith.constant 63 : index
    %c0_327 = arith.constant 0 : index
    %c0_328 = arith.constant 0 : index
    %877 = vector.load %arg2[%c63, %c0_327, %c0_328] : memref<90x32x48xf32, #tpu.memory_space<vmem>>, vector<1x32x48xf32>
    %878 = vector.shape_cast %877 : vector<1x32x48xf32> to vector<32x48xf32>
    %879 = vector.extract_strided_slice %878 {offsets = [0, 0], sizes = [16, 16], strides = [1, 1]} : vector<32x48xf32> to vector<16x16xf32>
    %cst_329 = arith.constant dense<0.000000e+00> : vector<16x64xf32>
    %880 = tpu.matmul %879, %876, %cst_329 {dimension_numbers = #tpu.dot_dimension_numbers<[1], [0], [0], [1], [0, 0, 1, 1], [], []>} : vector<16x16xf32>, vector<16x64xf32>, vector<16x64xf32> -> vector<16x64xf32>
    %881 = arith.addf %870, %880 : vector<16x64xf32>
    %882 = vector.extract_strided_slice %864 {offsets = [0, 56], sizes = [16, 8], strides = [1, 1]} : vector<16x64xf32> to vector<16x8xf32>
    %883 = vector.extract_strided_slice %864 {offsets = [0, 0], sizes = [16, 56], strides = [1, 1]} : vector<16x64xf32> to vector<16x56xf32>
    %884 = tpu.concatenate %882, %883 in 1 : vector<16x8xf32>, vector<16x56xf32> -> vector<16x64xf32>
    %885 = vector.extract_strided_slice %867 {offsets = [1, 0], sizes = [1, 64], strides = [1, 1]} : vector<9x64xf32> to vector<1x64xf32>
    %886 = vector.broadcast %885 : vector<1x64xf32> to vector<16x64xf32>
    %887 = arith.mulf %884, %886 : vector<16x64xf32>
    %c64 = arith.constant 64 : index
    %c0_330 = arith.constant 0 : index
    %c0_331 = arith.constant 0 : index
    %888 = vector.load %arg2[%c64, %c0_330, %c0_331] : memref<90x32x48xf32, #tpu.memory_space<vmem>>, vector<1x32x48xf32>
    %889 = vector.shape_cast %888 : vector<1x32x48xf32> to vector<32x48xf32>
    %890 = vector.extract_strided_slice %889 {offsets = [0, 0], sizes = [16, 16], strides = [1, 1]} : vector<32x48xf32> to vector<16x16xf32>
    %cst_332 = arith.constant dense<0.000000e+00> : vector<16x64xf32>
    %891 = tpu.matmul %890, %887, %cst_332 {dimension_numbers = #tpu.dot_dimension_numbers<[1], [0], [0], [1], [0, 0, 1, 1], [], []>} : vector<16x16xf32>, vector<16x64xf32>, vector<16x64xf32> -> vector<16x64xf32>
    %892 = arith.addf %881, %891 : vector<16x64xf32>
    %893 = vector.extract_strided_slice %864 {offsets = [0, 57], sizes = [16, 7], strides = [1, 1]} : vector<16x64xf32> to vector<16x7xf32>
    %894 = vector.extract_strided_slice %864 {offsets = [0, 0], sizes = [16, 57], strides = [1, 1]} : vector<16x64xf32> to vector<16x57xf32>
    %895 = tpu.concatenate %893, %894 in 1 : vector<16x7xf32>, vector<16x57xf32> -> vector<16x64xf32>
    %896 = vector.extract_strided_slice %867 {offsets = [2, 0], sizes = [1, 64], strides = [1, 1]} : vector<9x64xf32> to vector<1x64xf32>
    %897 = vector.broadcast %896 : vector<1x64xf32> to vector<16x64xf32>
    %898 = arith.mulf %895, %897 : vector<16x64xf32>
    %c65 = arith.constant 65 : index
    %c0_333 = arith.constant 0 : index
    %c0_334 = arith.constant 0 : index
    %899 = vector.load %arg2[%c65, %c0_333, %c0_334] : memref<90x32x48xf32, #tpu.memory_space<vmem>>, vector<1x32x48xf32>
    %900 = vector.shape_cast %899 : vector<1x32x48xf32> to vector<32x48xf32>
    %901 = vector.extract_strided_slice %900 {offsets = [0, 0], sizes = [16, 16], strides = [1, 1]} : vector<32x48xf32> to vector<16x16xf32>
    %cst_335 = arith.constant dense<0.000000e+00> : vector<16x64xf32>
    %902 = tpu.matmul %901, %898, %cst_335 {dimension_numbers = #tpu.dot_dimension_numbers<[1], [0], [0], [1], [0, 0, 1, 1], [], []>} : vector<16x16xf32>, vector<16x64xf32>, vector<16x64xf32> -> vector<16x64xf32>
    %903 = arith.addf %892, %902 : vector<16x64xf32>
    %904 = vector.extract_strided_slice %864 {offsets = [0, 63], sizes = [16, 1], strides = [1, 1]} : vector<16x64xf32> to vector<16x1xf32>
    %905 = vector.extract_strided_slice %864 {offsets = [0, 0], sizes = [16, 63], strides = [1, 1]} : vector<16x64xf32> to vector<16x63xf32>
    %906 = tpu.concatenate %904, %905 in 1 : vector<16x1xf32>, vector<16x63xf32> -> vector<16x64xf32>
    %907 = vector.extract_strided_slice %867 {offsets = [3, 0], sizes = [1, 64], strides = [1, 1]} : vector<9x64xf32> to vector<1x64xf32>
    %908 = vector.broadcast %907 : vector<1x64xf32> to vector<16x64xf32>
    %909 = arith.mulf %906, %908 : vector<16x64xf32>
    %c66 = arith.constant 66 : index
    %c0_336 = arith.constant 0 : index
    %c0_337 = arith.constant 0 : index
    %910 = vector.load %arg2[%c66, %c0_336, %c0_337] : memref<90x32x48xf32, #tpu.memory_space<vmem>>, vector<1x32x48xf32>
    %911 = vector.shape_cast %910 : vector<1x32x48xf32> to vector<32x48xf32>
    %912 = vector.extract_strided_slice %911 {offsets = [0, 0], sizes = [16, 16], strides = [1, 1]} : vector<32x48xf32> to vector<16x16xf32>
    %cst_338 = arith.constant dense<0.000000e+00> : vector<16x64xf32>
    %913 = tpu.matmul %912, %909, %cst_338 {dimension_numbers = #tpu.dot_dimension_numbers<[1], [0], [0], [1], [0, 0, 1, 1], [], []>} : vector<16x16xf32>, vector<16x64xf32>, vector<16x64xf32> -> vector<16x64xf32>
    %914 = arith.addf %903, %913 : vector<16x64xf32>
    %c67 = arith.constant 67 : index
    %c0_339 = arith.constant 0 : index
    %c0_340 = arith.constant 0 : index
    %915 = vector.load %arg2[%c67, %c0_339, %c0_340] : memref<90x32x48xf32, #tpu.memory_space<vmem>>, vector<1x32x48xf32>
    %916 = vector.shape_cast %915 : vector<1x32x48xf32> to vector<32x48xf32>
    %917 = vector.extract_strided_slice %916 {offsets = [0, 0], sizes = [16, 16], strides = [1, 1]} : vector<32x48xf32> to vector<16x16xf32>
    %cst_341 = arith.constant dense<0.000000e+00> : vector<16x64xf32>
    %918 = tpu.matmul %917, %864, %cst_341 {dimension_numbers = #tpu.dot_dimension_numbers<[1], [0], [0], [1], [0, 0, 1, 1], [], []>} : vector<16x16xf32>, vector<16x64xf32>, vector<16x64xf32> -> vector<16x64xf32>
    %919 = arith.addf %914, %918 : vector<16x64xf32>
    %920 = vector.extract_strided_slice %864 {offsets = [0, 1], sizes = [16, 63], strides = [1, 1]} : vector<16x64xf32> to vector<16x63xf32>
    %921 = vector.extract_strided_slice %864 {offsets = [0, 0], sizes = [16, 1], strides = [1, 1]} : vector<16x64xf32> to vector<16x1xf32>
    %922 = tpu.concatenate %920, %921 in 1 : vector<16x63xf32>, vector<16x1xf32> -> vector<16x64xf32>
    %923 = vector.extract_strided_slice %867 {offsets = [5, 0], sizes = [1, 64], strides = [1, 1]} : vector<9x64xf32> to vector<1x64xf32>
    %924 = vector.broadcast %923 : vector<1x64xf32> to vector<16x64xf32>
    %925 = arith.mulf %922, %924 : vector<16x64xf32>
    %c68 = arith.constant 68 : index
    %c0_342 = arith.constant 0 : index
    %c0_343 = arith.constant 0 : index
    %926 = vector.load %arg2[%c68, %c0_342, %c0_343] : memref<90x32x48xf32, #tpu.memory_space<vmem>>, vector<1x32x48xf32>
    %927 = vector.shape_cast %926 : vector<1x32x48xf32> to vector<32x48xf32>
    %928 = vector.extract_strided_slice %927 {offsets = [0, 0], sizes = [16, 16], strides = [1, 1]} : vector<32x48xf32> to vector<16x16xf32>
    %cst_344 = arith.constant dense<0.000000e+00> : vector<16x64xf32>
    %929 = tpu.matmul %928, %925, %cst_344 {dimension_numbers = #tpu.dot_dimension_numbers<[1], [0], [0], [1], [0, 0, 1, 1], [], []>} : vector<16x16xf32>, vector<16x64xf32>, vector<16x64xf32> -> vector<16x64xf32>
    %930 = arith.addf %919, %929 : vector<16x64xf32>
    %931 = vector.extract_strided_slice %864 {offsets = [0, 7], sizes = [16, 57], strides = [1, 1]} : vector<16x64xf32> to vector<16x57xf32>
    %932 = vector.extract_strided_slice %864 {offsets = [0, 0], sizes = [16, 7], strides = [1, 1]} : vector<16x64xf32> to vector<16x7xf32>
    %933 = tpu.concatenate %931, %932 in 1 : vector<16x57xf32>, vector<16x7xf32> -> vector<16x64xf32>
    %934 = vector.extract_strided_slice %867 {offsets = [6, 0], sizes = [1, 64], strides = [1, 1]} : vector<9x64xf32> to vector<1x64xf32>
    %935 = vector.broadcast %934 : vector<1x64xf32> to vector<16x64xf32>
    %936 = arith.mulf %933, %935 : vector<16x64xf32>
    %c69 = arith.constant 69 : index
    %c0_345 = arith.constant 0 : index
    %c0_346 = arith.constant 0 : index
    %937 = vector.load %arg2[%c69, %c0_345, %c0_346] : memref<90x32x48xf32, #tpu.memory_space<vmem>>, vector<1x32x48xf32>
    %938 = vector.shape_cast %937 : vector<1x32x48xf32> to vector<32x48xf32>
    %939 = vector.extract_strided_slice %938 {offsets = [0, 0], sizes = [16, 16], strides = [1, 1]} : vector<32x48xf32> to vector<16x16xf32>
    %cst_347 = arith.constant dense<0.000000e+00> : vector<16x64xf32>
    %940 = tpu.matmul %939, %936, %cst_347 {dimension_numbers = #tpu.dot_dimension_numbers<[1], [0], [0], [1], [0, 0, 1, 1], [], []>} : vector<16x16xf32>, vector<16x64xf32>, vector<16x64xf32> -> vector<16x64xf32>
    %941 = arith.addf %930, %940 : vector<16x64xf32>
    %942 = vector.extract_strided_slice %864 {offsets = [0, 8], sizes = [16, 56], strides = [1, 1]} : vector<16x64xf32> to vector<16x56xf32>
    %943 = vector.extract_strided_slice %864 {offsets = [0, 0], sizes = [16, 8], strides = [1, 1]} : vector<16x64xf32> to vector<16x8xf32>
    %944 = tpu.concatenate %942, %943 in 1 : vector<16x56xf32>, vector<16x8xf32> -> vector<16x64xf32>
    %945 = vector.extract_strided_slice %867 {offsets = [7, 0], sizes = [1, 64], strides = [1, 1]} : vector<9x64xf32> to vector<1x64xf32>
    %946 = vector.broadcast %945 : vector<1x64xf32> to vector<16x64xf32>
    %947 = arith.mulf %944, %946 : vector<16x64xf32>
    %c70 = arith.constant 70 : index
    %c0_348 = arith.constant 0 : index
    %c0_349 = arith.constant 0 : index
    %948 = vector.load %arg2[%c70, %c0_348, %c0_349] : memref<90x32x48xf32, #tpu.memory_space<vmem>>, vector<1x32x48xf32>
    %949 = vector.shape_cast %948 : vector<1x32x48xf32> to vector<32x48xf32>
    %950 = vector.extract_strided_slice %949 {offsets = [0, 0], sizes = [16, 16], strides = [1, 1]} : vector<32x48xf32> to vector<16x16xf32>
    %cst_350 = arith.constant dense<0.000000e+00> : vector<16x64xf32>
    %951 = tpu.matmul %950, %947, %cst_350 {dimension_numbers = #tpu.dot_dimension_numbers<[1], [0], [0], [1], [0, 0, 1, 1], [], []>} : vector<16x16xf32>, vector<16x64xf32>, vector<16x64xf32> -> vector<16x64xf32>
    %952 = arith.addf %941, %951 : vector<16x64xf32>
    %953 = vector.extract_strided_slice %864 {offsets = [0, 9], sizes = [16, 55], strides = [1, 1]} : vector<16x64xf32> to vector<16x55xf32>
    %954 = vector.extract_strided_slice %864 {offsets = [0, 0], sizes = [16, 9], strides = [1, 1]} : vector<16x64xf32> to vector<16x9xf32>
    %955 = tpu.concatenate %953, %954 in 1 : vector<16x55xf32>, vector<16x9xf32> -> vector<16x64xf32>
    %956 = vector.extract_strided_slice %867 {offsets = [8, 0], sizes = [1, 64], strides = [1, 1]} : vector<9x64xf32> to vector<1x64xf32>
    %957 = vector.broadcast %956 : vector<1x64xf32> to vector<16x64xf32>
    %958 = arith.mulf %955, %957 : vector<16x64xf32>
    %c71 = arith.constant 71 : index
    %c0_351 = arith.constant 0 : index
    %c0_352 = arith.constant 0 : index
    %959 = vector.load %arg2[%c71, %c0_351, %c0_352] : memref<90x32x48xf32, #tpu.memory_space<vmem>>, vector<1x32x48xf32>
    %960 = vector.shape_cast %959 : vector<1x32x48xf32> to vector<32x48xf32>
    %961 = vector.extract_strided_slice %960 {offsets = [0, 0], sizes = [16, 16], strides = [1, 1]} : vector<32x48xf32> to vector<16x16xf32>
    %cst_353 = arith.constant dense<0.000000e+00> : vector<16x64xf32>
    %962 = tpu.matmul %961, %958, %cst_353 {dimension_numbers = #tpu.dot_dimension_numbers<[1], [0], [0], [1], [0, 0, 1, 1], [], []>} : vector<16x16xf32>, vector<16x64xf32>, vector<16x64xf32> -> vector<16x64xf32>
    %963 = arith.addf %952, %962 : vector<16x64xf32>
    %cst_354 = arith.constant 0.000000e+00 : f32
    %964 = vector.broadcast %cst_354 : f32 to vector<16x64xf32>
    %965 = arith.maximumf %963, %964 : vector<16x64xf32>
    %c0_355 = arith.constant 0 : index
    %c0_356 = arith.constant 0 : index
    %966 = vector.load %arg10[%c0_355, %c0_356] : memref<64x256xf32, #tpu.memory_space<vmem>>, vector<64x256xf32>
    %cst_357 = arith.constant dense<0.000000e+00> : vector<16x256xf32>
    %967 = tpu.matmul %965, %966, %cst_357 {dimension_numbers = #tpu.dot_dimension_numbers<[1], [0], [0], [1], [0, 0, 1, 1], [], []>} : vector<16x64xf32>, vector<64x256xf32>, vector<16x256xf32> -> vector<16x256xf32>
    %968 = tpu.concatenate %215, %967 in 0 : vector<8x256xf32>, vector<16x256xf32> -> vector<24x256xf32>
    %cst_358 = arith.constant dense<0.000000e+00> : vector<24xf32>
    %969 = vector.multi_reduction <add>, %968, %cst_358 [1] : vector<24x256xf32> to vector<24xf32>
    %970 = vector.shape_cast %969 : vector<24xf32> to vector<24x1xf32>
    %971 = arith.mulf %968, %968 : vector<24x256xf32>
    %cst_359 = arith.constant dense<0.000000e+00> : vector<24xf32>
    %972 = vector.multi_reduction <add>, %971, %cst_359 [1] : vector<24x256xf32> to vector<24xf32>
    %973 = vector.shape_cast %972 : vector<24xf32> to vector<24x1xf32>
    %974 = tpu.concatenate %970, %973 in 1 : vector<24x1xf32>, vector<24x1xf32> -> vector<24x2xf32>
    %c8_360 = arith.constant 8 : index
    %c0_361 = arith.constant 0 : index
    %c0_362 = arith.constant 0 : index
    %975 = vector.load %arg4[%c8_360, %c0_361, %c0_362] : memref<10x48x48xf32, #tpu.memory_space<vmem>>, vector<1x48x48xf32>
    %976 = vector.shape_cast %975 : vector<1x48x48xf32> to vector<48x48xf32>
    %977 = vector.extract_strided_slice %976 {offsets = [0, 0], sizes = [24, 24], strides = [1, 1]} : vector<48x48xf32> to vector<24x24xf32>
    %cst_363 = arith.constant dense<0.000000e+00> : vector<24x2xf32>
    %978 = tpu.matmul %977, %974, %cst_363 {dimension_numbers = #tpu.dot_dimension_numbers<[1], [0], [0], [1], [0, 0, 1, 1], [], []>} : vector<24x24xf32>, vector<24x2xf32>, vector<24x2xf32> -> vector<24x2xf32>
    %979 = vector.extract_strided_slice %978 {offsets = [0, 0], sizes = [24, 1], strides = [1, 1]} : vector<24x2xf32> to vector<24x1xf32>
    %980 = vector.extract_strided_slice %978 {offsets = [0, 1], sizes = [24, 1], strides = [1, 1]} : vector<24x2xf32> to vector<24x1xf32>
    %981 = arith.mulf %979, %979 : vector<24x1xf32>
    %982 = arith.subf %980, %981 : vector<24x1xf32>
    %cst_364 = arith.constant 0.000000e+00 : f32
    %983 = vector.broadcast %cst_364 : f32 to vector<24x1xf32>
    %984 = arith.maximumf %982, %983 : vector<24x1xf32>
    %985 = vector.broadcast %979 : vector<24x1xf32> to vector<24x256xf32>
    %986 = arith.subf %968, %985 : vector<24x256xf32>
    %cst_365 = arith.constant 9.99999974E-6 : f32
    %987 = vector.broadcast %cst_365 : f32 to vector<24x1xf32>
    %988 = arith.addf %984, %987 : vector<24x1xf32>
    %989 = math.rsqrt %988 : vector<24x1xf32>
    %990 = vector.broadcast %989 : vector<24x1xf32> to vector<24x256xf32>
    %991 = arith.mulf %986, %990 : vector<24x256xf32>
    %c0_366 = arith.constant 0 : index
    %c0_367 = arith.constant 0 : index
    %c0_368 = arith.constant 0 : index
    %992 = vector.load %arg5[%c0_366, %c0_367, %c0_368] : memref<3x9x256xf32, #tpu.memory_space<vmem>>, vector<1x9x256xf32>
    %993 = vector.shape_cast %992 : vector<1x9x256xf32> to vector<9x256xf32>
    %c8_369 = arith.constant 8 : index
    %c0_370 = arith.constant 0 : index
    %c0_371 = arith.constant 0 : index
    %994 = vector.load %arg3[%c8_369, %c0_370, %c0_371] : memref<10x32x256xf32, #tpu.memory_space<vmem>>, vector<1x32x256xf32>
    %995 = vector.shape_cast %994 : vector<1x32x256xf32> to vector<32x256xf32>
    %996 = vector.extract_strided_slice %995 {offsets = [0, 0], sizes = [8, 256], strides = [1, 1]} : vector<32x256xf32> to vector<8x256xf32>
    %c17_i32_372 = arith.constant 17 : i32
    %997 = tpu.dynamic_rotate %991 by %c17_i32_372 dim 1 : vector<24x256xf32>, i32 -> vector<24x256xf32>
    %998 = vector.extract_strided_slice %993 {offsets = [0, 0], sizes = [1, 256], strides = [1, 1]} : vector<9x256xf32> to vector<1x256xf32>
    %999 = vector.broadcast %998 : vector<1x256xf32> to vector<24x256xf32>
    %1000 = arith.mulf %997, %999 : vector<24x256xf32>
    %c72 = arith.constant 72 : index
    %c0_373 = arith.constant 0 : index
    %c0_374 = arith.constant 0 : index
    %1001 = vector.load %arg2[%c72, %c0_373, %c0_374] : memref<90x32x48xf32, #tpu.memory_space<vmem>>, vector<1x32x48xf32>
    %1002 = vector.shape_cast %1001 : vector<1x32x48xf32> to vector<32x48xf32>
    %1003 = vector.extract_strided_slice %1002 {offsets = [0, 0], sizes = [8, 24], strides = [1, 1]} : vector<32x48xf32> to vector<8x24xf32>
    %cst_375 = arith.constant dense<0.000000e+00> : vector<8x256xf32>
    %1004 = tpu.matmul %1003, %1000, %cst_375 {dimension_numbers = #tpu.dot_dimension_numbers<[1], [0], [0], [1], [0, 0, 1, 1], [], []>} : vector<8x24xf32>, vector<24x256xf32>, vector<8x256xf32> -> vector<8x256xf32>
    %1005 = arith.addf %996, %1004 : vector<8x256xf32>
    %c16_i32_376 = arith.constant 16 : i32
    %1006 = tpu.dynamic_rotate %991 by %c16_i32_376 dim 1 : vector<24x256xf32>, i32 -> vector<24x256xf32>
    %1007 = vector.extract_strided_slice %993 {offsets = [1, 0], sizes = [1, 256], strides = [1, 1]} : vector<9x256xf32> to vector<1x256xf32>
    %1008 = vector.broadcast %1007 : vector<1x256xf32> to vector<24x256xf32>
    %1009 = arith.mulf %1006, %1008 : vector<24x256xf32>
    %c73 = arith.constant 73 : index
    %c0_377 = arith.constant 0 : index
    %c0_378 = arith.constant 0 : index
    %1010 = vector.load %arg2[%c73, %c0_377, %c0_378] : memref<90x32x48xf32, #tpu.memory_space<vmem>>, vector<1x32x48xf32>
    %1011 = vector.shape_cast %1010 : vector<1x32x48xf32> to vector<32x48xf32>
    %1012 = vector.extract_strided_slice %1011 {offsets = [0, 0], sizes = [8, 24], strides = [1, 1]} : vector<32x48xf32> to vector<8x24xf32>
    %cst_379 = arith.constant dense<0.000000e+00> : vector<8x256xf32>
    %1013 = tpu.matmul %1012, %1009, %cst_379 {dimension_numbers = #tpu.dot_dimension_numbers<[1], [0], [0], [1], [0, 0, 1, 1], [], []>} : vector<8x24xf32>, vector<24x256xf32>, vector<8x256xf32> -> vector<8x256xf32>
    %1014 = arith.addf %1005, %1013 : vector<8x256xf32>
    %c15_i32_380 = arith.constant 15 : i32
    %1015 = tpu.dynamic_rotate %991 by %c15_i32_380 dim 1 : vector<24x256xf32>, i32 -> vector<24x256xf32>
    %1016 = vector.extract_strided_slice %993 {offsets = [2, 0], sizes = [1, 256], strides = [1, 1]} : vector<9x256xf32> to vector<1x256xf32>
    %1017 = vector.broadcast %1016 : vector<1x256xf32> to vector<24x256xf32>
    %1018 = arith.mulf %1015, %1017 : vector<24x256xf32>
    %c74 = arith.constant 74 : index
    %c0_381 = arith.constant 0 : index
    %c0_382 = arith.constant 0 : index
    %1019 = vector.load %arg2[%c74, %c0_381, %c0_382] : memref<90x32x48xf32, #tpu.memory_space<vmem>>, vector<1x32x48xf32>
    %1020 = vector.shape_cast %1019 : vector<1x32x48xf32> to vector<32x48xf32>
    %1021 = vector.extract_strided_slice %1020 {offsets = [0, 0], sizes = [8, 24], strides = [1, 1]} : vector<32x48xf32> to vector<8x24xf32>
    %cst_383 = arith.constant dense<0.000000e+00> : vector<8x256xf32>
    %1022 = tpu.matmul %1021, %1018, %cst_383 {dimension_numbers = #tpu.dot_dimension_numbers<[1], [0], [0], [1], [0, 0, 1, 1], [], []>} : vector<8x24xf32>, vector<24x256xf32>, vector<8x256xf32> -> vector<8x256xf32>
    %1023 = arith.addf %1014, %1022 : vector<8x256xf32>
    %c1_i32_384 = arith.constant 1 : i32
    %1024 = tpu.dynamic_rotate %991 by %c1_i32_384 dim 1 : vector<24x256xf32>, i32 -> vector<24x256xf32>
    %1025 = vector.extract_strided_slice %993 {offsets = [3, 0], sizes = [1, 256], strides = [1, 1]} : vector<9x256xf32> to vector<1x256xf32>
    %1026 = vector.broadcast %1025 : vector<1x256xf32> to vector<24x256xf32>
    %1027 = arith.mulf %1024, %1026 : vector<24x256xf32>
    %c75 = arith.constant 75 : index
    %c0_385 = arith.constant 0 : index
    %c0_386 = arith.constant 0 : index
    %1028 = vector.load %arg2[%c75, %c0_385, %c0_386] : memref<90x32x48xf32, #tpu.memory_space<vmem>>, vector<1x32x48xf32>
    %1029 = vector.shape_cast %1028 : vector<1x32x48xf32> to vector<32x48xf32>
    %1030 = vector.extract_strided_slice %1029 {offsets = [0, 0], sizes = [8, 24], strides = [1, 1]} : vector<32x48xf32> to vector<8x24xf32>
    %cst_387 = arith.constant dense<0.000000e+00> : vector<8x256xf32>
    %1031 = tpu.matmul %1030, %1027, %cst_387 {dimension_numbers = #tpu.dot_dimension_numbers<[1], [0], [0], [1], [0, 0, 1, 1], [], []>} : vector<8x24xf32>, vector<24x256xf32>, vector<8x256xf32> -> vector<8x256xf32>
    %1032 = arith.addf %1023, %1031 : vector<8x256xf32>
    %c76 = arith.constant 76 : index
    %c0_388 = arith.constant 0 : index
    %c0_389 = arith.constant 0 : index
    %1033 = vector.load %arg2[%c76, %c0_388, %c0_389] : memref<90x32x48xf32, #tpu.memory_space<vmem>>, vector<1x32x48xf32>
    %1034 = vector.shape_cast %1033 : vector<1x32x48xf32> to vector<32x48xf32>
    %1035 = vector.extract_strided_slice %1034 {offsets = [0, 0], sizes = [8, 24], strides = [1, 1]} : vector<32x48xf32> to vector<8x24xf32>
    %cst_390 = arith.constant dense<0.000000e+00> : vector<8x256xf32>
    %1036 = tpu.matmul %1035, %991, %cst_390 {dimension_numbers = #tpu.dot_dimension_numbers<[1], [0], [0], [1], [0, 0, 1, 1], [], []>} : vector<8x24xf32>, vector<24x256xf32>, vector<8x256xf32> -> vector<8x256xf32>
    %1037 = arith.addf %1032, %1036 : vector<8x256xf32>
    %c255_i32_391 = arith.constant 255 : i32
    %1038 = tpu.dynamic_rotate %991 by %c255_i32_391 dim 1 : vector<24x256xf32>, i32 -> vector<24x256xf32>
    %1039 = vector.extract_strided_slice %993 {offsets = [5, 0], sizes = [1, 256], strides = [1, 1]} : vector<9x256xf32> to vector<1x256xf32>
    %1040 = vector.broadcast %1039 : vector<1x256xf32> to vector<24x256xf32>
    %1041 = arith.mulf %1038, %1040 : vector<24x256xf32>
    %c77 = arith.constant 77 : index
    %c0_392 = arith.constant 0 : index
    %c0_393 = arith.constant 0 : index
    %1042 = vector.load %arg2[%c77, %c0_392, %c0_393] : memref<90x32x48xf32, #tpu.memory_space<vmem>>, vector<1x32x48xf32>
    %1043 = vector.shape_cast %1042 : vector<1x32x48xf32> to vector<32x48xf32>
    %1044 = vector.extract_strided_slice %1043 {offsets = [0, 0], sizes = [8, 24], strides = [1, 1]} : vector<32x48xf32> to vector<8x24xf32>
    %cst_394 = arith.constant dense<0.000000e+00> : vector<8x256xf32>
    %1045 = tpu.matmul %1044, %1041, %cst_394 {dimension_numbers = #tpu.dot_dimension_numbers<[1], [0], [0], [1], [0, 0, 1, 1], [], []>} : vector<8x24xf32>, vector<24x256xf32>, vector<8x256xf32> -> vector<8x256xf32>
    %1046 = arith.addf %1037, %1045 : vector<8x256xf32>
    %c241_i32_395 = arith.constant 241 : i32
    %1047 = tpu.dynamic_rotate %991 by %c241_i32_395 dim 1 : vector<24x256xf32>, i32 -> vector<24x256xf32>
    %1048 = vector.extract_strided_slice %993 {offsets = [6, 0], sizes = [1, 256], strides = [1, 1]} : vector<9x256xf32> to vector<1x256xf32>
    %1049 = vector.broadcast %1048 : vector<1x256xf32> to vector<24x256xf32>
    %1050 = arith.mulf %1047, %1049 : vector<24x256xf32>
    %c78 = arith.constant 78 : index
    %c0_396 = arith.constant 0 : index
    %c0_397 = arith.constant 0 : index
    %1051 = vector.load %arg2[%c78, %c0_396, %c0_397] : memref<90x32x48xf32, #tpu.memory_space<vmem>>, vector<1x32x48xf32>
    %1052 = vector.shape_cast %1051 : vector<1x32x48xf32> to vector<32x48xf32>
    %1053 = vector.extract_strided_slice %1052 {offsets = [0, 0], sizes = [8, 24], strides = [1, 1]} : vector<32x48xf32> to vector<8x24xf32>
    %cst_398 = arith.constant dense<0.000000e+00> : vector<8x256xf32>
    %1054 = tpu.matmul %1053, %1050, %cst_398 {dimension_numbers = #tpu.dot_dimension_numbers<[1], [0], [0], [1], [0, 0, 1, 1], [], []>} : vector<8x24xf32>, vector<24x256xf32>, vector<8x256xf32> -> vector<8x256xf32>
    %1055 = arith.addf %1046, %1054 : vector<8x256xf32>
    %c240_i32_399 = arith.constant 240 : i32
    %1056 = tpu.dynamic_rotate %991 by %c240_i32_399 dim 1 : vector<24x256xf32>, i32 -> vector<24x256xf32>
    %1057 = vector.extract_strided_slice %993 {offsets = [7, 0], sizes = [1, 256], strides = [1, 1]} : vector<9x256xf32> to vector<1x256xf32>
    %1058 = vector.broadcast %1057 : vector<1x256xf32> to vector<24x256xf32>
    %1059 = arith.mulf %1056, %1058 : vector<24x256xf32>
    %c79 = arith.constant 79 : index
    %c0_400 = arith.constant 0 : index
    %c0_401 = arith.constant 0 : index
    %1060 = vector.load %arg2[%c79, %c0_400, %c0_401] : memref<90x32x48xf32, #tpu.memory_space<vmem>>, vector<1x32x48xf32>
    %1061 = vector.shape_cast %1060 : vector<1x32x48xf32> to vector<32x48xf32>
    %1062 = vector.extract_strided_slice %1061 {offsets = [0, 0], sizes = [8, 24], strides = [1, 1]} : vector<32x48xf32> to vector<8x24xf32>
    %cst_402 = arith.constant dense<0.000000e+00> : vector<8x256xf32>
    %1063 = tpu.matmul %1062, %1059, %cst_402 {dimension_numbers = #tpu.dot_dimension_numbers<[1], [0], [0], [1], [0, 0, 1, 1], [], []>} : vector<8x24xf32>, vector<24x256xf32>, vector<8x256xf32> -> vector<8x256xf32>
    %1064 = arith.addf %1055, %1063 : vector<8x256xf32>
    %c239_i32_403 = arith.constant 239 : i32
    %1065 = tpu.dynamic_rotate %991 by %c239_i32_403 dim 1 : vector<24x256xf32>, i32 -> vector<24x256xf32>
    %1066 = vector.extract_strided_slice %993 {offsets = [8, 0], sizes = [1, 256], strides = [1, 1]} : vector<9x256xf32> to vector<1x256xf32>
    %1067 = vector.broadcast %1066 : vector<1x256xf32> to vector<24x256xf32>
    %1068 = arith.mulf %1065, %1067 : vector<24x256xf32>
    %c80 = arith.constant 80 : index
    %c0_404 = arith.constant 0 : index
    %c0_405 = arith.constant 0 : index
    %1069 = vector.load %arg2[%c80, %c0_404, %c0_405] : memref<90x32x48xf32, #tpu.memory_space<vmem>>, vector<1x32x48xf32>
    %1070 = vector.shape_cast %1069 : vector<1x32x48xf32> to vector<32x48xf32>
    %1071 = vector.extract_strided_slice %1070 {offsets = [0, 0], sizes = [8, 24], strides = [1, 1]} : vector<32x48xf32> to vector<8x24xf32>
    %cst_406 = arith.constant dense<0.000000e+00> : vector<8x256xf32>
    %1072 = tpu.matmul %1071, %1068, %cst_406 {dimension_numbers = #tpu.dot_dimension_numbers<[1], [0], [0], [1], [0, 0, 1, 1], [], []>} : vector<8x24xf32>, vector<24x256xf32>, vector<8x256xf32> -> vector<8x256xf32>
    %1073 = arith.addf %1064, %1072 : vector<8x256xf32>
    %cst_407 = arith.constant 0.000000e+00 : f32
    %1074 = vector.broadcast %cst_407 : f32 to vector<8x256xf32>
    %1075 = arith.maximumf %1073, %1074 : vector<8x256xf32>
    %cst_408 = arith.constant dense<0.000000e+00> : vector<8xf32>
    %1076 = vector.multi_reduction <add>, %1075, %cst_408 [1] : vector<8x256xf32> to vector<8xf32>
    %1077 = vector.shape_cast %1076 : vector<8xf32> to vector<8x1xf32>
    %1078 = arith.mulf %1075, %1075 : vector<8x256xf32>
    %cst_409 = arith.constant dense<0.000000e+00> : vector<8xf32>
    %1079 = vector.multi_reduction <add>, %1078, %cst_409 [1] : vector<8x256xf32> to vector<8xf32>
    %1080 = vector.shape_cast %1079 : vector<8xf32> to vector<8x1xf32>
    %1081 = tpu.concatenate %1077, %1080 in 1 : vector<8x1xf32>, vector<8x1xf32> -> vector<8x2xf32>
    %c9_410 = arith.constant 9 : index
    %c0_411 = arith.constant 0 : index
    %c0_412 = arith.constant 0 : index
    %1082 = vector.load %arg4[%c9_410, %c0_411, %c0_412] : memref<10x48x48xf32, #tpu.memory_space<vmem>>, vector<1x48x48xf32>
    %1083 = vector.shape_cast %1082 : vector<1x48x48xf32> to vector<48x48xf32>
    %1084 = vector.extract_strided_slice %1083 {offsets = [0, 0], sizes = [8, 8], strides = [1, 1]} : vector<48x48xf32> to vector<8x8xf32>
    %cst_413 = arith.constant dense<0.000000e+00> : vector<8x2xf32>
    %1085 = tpu.matmul %1084, %1081, %cst_413 {dimension_numbers = #tpu.dot_dimension_numbers<[1], [0], [0], [1], [0, 0, 1, 1], [], []>} : vector<8x8xf32>, vector<8x2xf32>, vector<8x2xf32> -> vector<8x2xf32>
    %1086 = vector.extract_strided_slice %1085 {offsets = [0, 0], sizes = [8, 1], strides = [1, 1]} : vector<8x2xf32> to vector<8x1xf32>
    %1087 = vector.extract_strided_slice %1085 {offsets = [0, 1], sizes = [8, 1], strides = [1, 1]} : vector<8x2xf32> to vector<8x1xf32>
    %1088 = arith.mulf %1086, %1086 : vector<8x1xf32>
    %1089 = arith.subf %1087, %1088 : vector<8x1xf32>
    %cst_414 = arith.constant 0.000000e+00 : f32
    %1090 = vector.broadcast %cst_414 : f32 to vector<8x1xf32>
    %1091 = arith.maximumf %1089, %1090 : vector<8x1xf32>
    %1092 = vector.broadcast %1086 : vector<8x1xf32> to vector<8x256xf32>
    %1093 = arith.subf %1075, %1092 : vector<8x256xf32>
    %cst_415 = arith.constant 9.99999974E-6 : f32
    %1094 = vector.broadcast %cst_415 : f32 to vector<8x1xf32>
    %1095 = arith.addf %1091, %1094 : vector<8x1xf32>
    %1096 = math.rsqrt %1095 : vector<8x1xf32>
    %1097 = vector.broadcast %1096 : vector<8x1xf32> to vector<8x256xf32>
    %1098 = arith.mulf %1093, %1097 : vector<8x256xf32>
    %c0_416 = arith.constant 0 : index
    %c0_417 = arith.constant 0 : index
    %c0_418 = arith.constant 0 : index
    %1099 = vector.load %arg5[%c0_416, %c0_417, %c0_418] : memref<3x9x256xf32, #tpu.memory_space<vmem>>, vector<1x9x256xf32>
    %1100 = vector.shape_cast %1099 : vector<1x9x256xf32> to vector<9x256xf32>
    %c9_419 = arith.constant 9 : index
    %c0_420 = arith.constant 0 : index
    %c0_421 = arith.constant 0 : index
    %1101 = vector.load %arg3[%c9_419, %c0_420, %c0_421] : memref<10x32x256xf32, #tpu.memory_space<vmem>>, vector<1x32x256xf32>
    %1102 = vector.shape_cast %1101 : vector<1x32x256xf32> to vector<32x256xf32>
    %1103 = vector.extract_strided_slice %1102 {offsets = [0, 0], sizes = [8, 256], strides = [1, 1]} : vector<32x256xf32> to vector<8x256xf32>
    %c17_i32_422 = arith.constant 17 : i32
    %1104 = tpu.dynamic_rotate %1098 by %c17_i32_422 dim 1 : vector<8x256xf32>, i32 -> vector<8x256xf32>
    %1105 = vector.extract_strided_slice %1100 {offsets = [0, 0], sizes = [1, 256], strides = [1, 1]} : vector<9x256xf32> to vector<1x256xf32>
    %1106 = vector.broadcast %1105 : vector<1x256xf32> to vector<8x256xf32>
    %1107 = arith.mulf %1104, %1106 : vector<8x256xf32>
    %c81 = arith.constant 81 : index
    %c0_423 = arith.constant 0 : index
    %c0_424 = arith.constant 0 : index
    %1108 = vector.load %arg2[%c81, %c0_423, %c0_424] : memref<90x32x48xf32, #tpu.memory_space<vmem>>, vector<1x32x48xf32>
    %1109 = vector.shape_cast %1108 : vector<1x32x48xf32> to vector<32x48xf32>
    %1110 = vector.extract_strided_slice %1109 {offsets = [0, 0], sizes = [8, 8], strides = [1, 1]} : vector<32x48xf32> to vector<8x8xf32>
    %cst_425 = arith.constant dense<0.000000e+00> : vector<8x256xf32>
    %1111 = tpu.matmul %1110, %1107, %cst_425 {dimension_numbers = #tpu.dot_dimension_numbers<[1], [0], [0], [1], [0, 0, 1, 1], [], []>} : vector<8x8xf32>, vector<8x256xf32>, vector<8x256xf32> -> vector<8x256xf32>
    %1112 = arith.addf %1103, %1111 : vector<8x256xf32>
    %c16_i32_426 = arith.constant 16 : i32
    %1113 = tpu.dynamic_rotate %1098 by %c16_i32_426 dim 1 : vector<8x256xf32>, i32 -> vector<8x256xf32>
    %1114 = vector.extract_strided_slice %1100 {offsets = [1, 0], sizes = [1, 256], strides = [1, 1]} : vector<9x256xf32> to vector<1x256xf32>
    %1115 = vector.broadcast %1114 : vector<1x256xf32> to vector<8x256xf32>
    %1116 = arith.mulf %1113, %1115 : vector<8x256xf32>
    %c82 = arith.constant 82 : index
    %c0_427 = arith.constant 0 : index
    %c0_428 = arith.constant 0 : index
    %1117 = vector.load %arg2[%c82, %c0_427, %c0_428] : memref<90x32x48xf32, #tpu.memory_space<vmem>>, vector<1x32x48xf32>
    %1118 = vector.shape_cast %1117 : vector<1x32x48xf32> to vector<32x48xf32>
    %1119 = vector.extract_strided_slice %1118 {offsets = [0, 0], sizes = [8, 8], strides = [1, 1]} : vector<32x48xf32> to vector<8x8xf32>
    %cst_429 = arith.constant dense<0.000000e+00> : vector<8x256xf32>
    %1120 = tpu.matmul %1119, %1116, %cst_429 {dimension_numbers = #tpu.dot_dimension_numbers<[1], [0], [0], [1], [0, 0, 1, 1], [], []>} : vector<8x8xf32>, vector<8x256xf32>, vector<8x256xf32> -> vector<8x256xf32>
    %1121 = arith.addf %1112, %1120 : vector<8x256xf32>
    %c15_i32_430 = arith.constant 15 : i32
    %1122 = tpu.dynamic_rotate %1098 by %c15_i32_430 dim 1 : vector<8x256xf32>, i32 -> vector<8x256xf32>
    %1123 = vector.extract_strided_slice %1100 {offsets = [2, 0], sizes = [1, 256], strides = [1, 1]} : vector<9x256xf32> to vector<1x256xf32>
    %1124 = vector.broadcast %1123 : vector<1x256xf32> to vector<8x256xf32>
    %1125 = arith.mulf %1122, %1124 : vector<8x256xf32>
    %c83 = arith.constant 83 : index
    %c0_431 = arith.constant 0 : index
    %c0_432 = arith.constant 0 : index
    %1126 = vector.load %arg2[%c83, %c0_431, %c0_432] : memref<90x32x48xf32, #tpu.memory_space<vmem>>, vector<1x32x48xf32>
    %1127 = vector.shape_cast %1126 : vector<1x32x48xf32> to vector<32x48xf32>
    %1128 = vector.extract_strided_slice %1127 {offsets = [0, 0], sizes = [8, 8], strides = [1, 1]} : vector<32x48xf32> to vector<8x8xf32>
    %cst_433 = arith.constant dense<0.000000e+00> : vector<8x256xf32>
    %1129 = tpu.matmul %1128, %1125, %cst_433 {dimension_numbers = #tpu.dot_dimension_numbers<[1], [0], [0], [1], [0, 0, 1, 1], [], []>} : vector<8x8xf32>, vector<8x256xf32>, vector<8x256xf32> -> vector<8x256xf32>
    %1130 = arith.addf %1121, %1129 : vector<8x256xf32>
    %c1_i32_434 = arith.constant 1 : i32
    %1131 = tpu.dynamic_rotate %1098 by %c1_i32_434 dim 1 : vector<8x256xf32>, i32 -> vector<8x256xf32>
    %1132 = vector.extract_strided_slice %1100 {offsets = [3, 0], sizes = [1, 256], strides = [1, 1]} : vector<9x256xf32> to vector<1x256xf32>
    %1133 = vector.broadcast %1132 : vector<1x256xf32> to vector<8x256xf32>
    %1134 = arith.mulf %1131, %1133 : vector<8x256xf32>
    %c84 = arith.constant 84 : index
    %c0_435 = arith.constant 0 : index
    %c0_436 = arith.constant 0 : index
    %1135 = vector.load %arg2[%c84, %c0_435, %c0_436] : memref<90x32x48xf32, #tpu.memory_space<vmem>>, vector<1x32x48xf32>
    %1136 = vector.shape_cast %1135 : vector<1x32x48xf32> to vector<32x48xf32>
    %1137 = vector.extract_strided_slice %1136 {offsets = [0, 0], sizes = [8, 8], strides = [1, 1]} : vector<32x48xf32> to vector<8x8xf32>
    %cst_437 = arith.constant dense<0.000000e+00> : vector<8x256xf32>
    %1138 = tpu.matmul %1137, %1134, %cst_437 {dimension_numbers = #tpu.dot_dimension_numbers<[1], [0], [0], [1], [0, 0, 1, 1], [], []>} : vector<8x8xf32>, vector<8x256xf32>, vector<8x256xf32> -> vector<8x256xf32>
    %1139 = arith.addf %1130, %1138 : vector<8x256xf32>
    %c85 = arith.constant 85 : index
    %c0_438 = arith.constant 0 : index
    %c0_439 = arith.constant 0 : index
    %1140 = vector.load %arg2[%c85, %c0_438, %c0_439] : memref<90x32x48xf32, #tpu.memory_space<vmem>>, vector<1x32x48xf32>
    %1141 = vector.shape_cast %1140 : vector<1x32x48xf32> to vector<32x48xf32>
    %1142 = vector.extract_strided_slice %1141 {offsets = [0, 0], sizes = [8, 8], strides = [1, 1]} : vector<32x48xf32> to vector<8x8xf32>
    %cst_440 = arith.constant dense<0.000000e+00> : vector<8x256xf32>
    %1143 = tpu.matmul %1142, %1098, %cst_440 {dimension_numbers = #tpu.dot_dimension_numbers<[1], [0], [0], [1], [0, 0, 1, 1], [], []>} : vector<8x8xf32>, vector<8x256xf32>, vector<8x256xf32> -> vector<8x256xf32>
    %1144 = arith.addf %1139, %1143 : vector<8x256xf32>
    %c255_i32_441 = arith.constant 255 : i32
    %1145 = tpu.dynamic_rotate %1098 by %c255_i32_441 dim 1 : vector<8x256xf32>, i32 -> vector<8x256xf32>
    %1146 = vector.extract_strided_slice %1100 {offsets = [5, 0], sizes = [1, 256], strides = [1, 1]} : vector<9x256xf32> to vector<1x256xf32>
    %1147 = vector.broadcast %1146 : vector<1x256xf32> to vector<8x256xf32>
    %1148 = arith.mulf %1145, %1147 : vector<8x256xf32>
    %c86 = arith.constant 86 : index
    %c0_442 = arith.constant 0 : index
    %c0_443 = arith.constant 0 : index
    %1149 = vector.load %arg2[%c86, %c0_442, %c0_443] : memref<90x32x48xf32, #tpu.memory_space<vmem>>, vector<1x32x48xf32>
    %1150 = vector.shape_cast %1149 : vector<1x32x48xf32> to vector<32x48xf32>
    %1151 = vector.extract_strided_slice %1150 {offsets = [0, 0], sizes = [8, 8], strides = [1, 1]} : vector<32x48xf32> to vector<8x8xf32>
    %cst_444 = arith.constant dense<0.000000e+00> : vector<8x256xf32>
    %1152 = tpu.matmul %1151, %1148, %cst_444 {dimension_numbers = #tpu.dot_dimension_numbers<[1], [0], [0], [1], [0, 0, 1, 1], [], []>} : vector<8x8xf32>, vector<8x256xf32>, vector<8x256xf32> -> vector<8x256xf32>
    %1153 = arith.addf %1144, %1152 : vector<8x256xf32>
    %c241_i32_445 = arith.constant 241 : i32
    %1154 = tpu.dynamic_rotate %1098 by %c241_i32_445 dim 1 : vector<8x256xf32>, i32 -> vector<8x256xf32>
    %1155 = vector.extract_strided_slice %1100 {offsets = [6, 0], sizes = [1, 256], strides = [1, 1]} : vector<9x256xf32> to vector<1x256xf32>
    %1156 = vector.broadcast %1155 : vector<1x256xf32> to vector<8x256xf32>
    %1157 = arith.mulf %1154, %1156 : vector<8x256xf32>
    %c87 = arith.constant 87 : index
    %c0_446 = arith.constant 0 : index
    %c0_447 = arith.constant 0 : index
    %1158 = vector.load %arg2[%c87, %c0_446, %c0_447] : memref<90x32x48xf32, #tpu.memory_space<vmem>>, vector<1x32x48xf32>
    %1159 = vector.shape_cast %1158 : vector<1x32x48xf32> to vector<32x48xf32>
    %1160 = vector.extract_strided_slice %1159 {offsets = [0, 0], sizes = [8, 8], strides = [1, 1]} : vector<32x48xf32> to vector<8x8xf32>
    %cst_448 = arith.constant dense<0.000000e+00> : vector<8x256xf32>
    %1161 = tpu.matmul %1160, %1157, %cst_448 {dimension_numbers = #tpu.dot_dimension_numbers<[1], [0], [0], [1], [0, 0, 1, 1], [], []>} : vector<8x8xf32>, vector<8x256xf32>, vector<8x256xf32> -> vector<8x256xf32>
    %1162 = arith.addf %1153, %1161 : vector<8x256xf32>
    %c240_i32_449 = arith.constant 240 : i32
    %1163 = tpu.dynamic_rotate %1098 by %c240_i32_449 dim 1 : vector<8x256xf32>, i32 -> vector<8x256xf32>
    %1164 = vector.extract_strided_slice %1100 {offsets = [7, 0], sizes = [1, 256], strides = [1, 1]} : vector<9x256xf32> to vector<1x256xf32>
    %1165 = vector.broadcast %1164 : vector<1x256xf32> to vector<8x256xf32>
    %1166 = arith.mulf %1163, %1165 : vector<8x256xf32>
    %c88 = arith.constant 88 : index
    %c0_450 = arith.constant 0 : index
    %c0_451 = arith.constant 0 : index
    %1167 = vector.load %arg2[%c88, %c0_450, %c0_451] : memref<90x32x48xf32, #tpu.memory_space<vmem>>, vector<1x32x48xf32>
    %1168 = vector.shape_cast %1167 : vector<1x32x48xf32> to vector<32x48xf32>
    %1169 = vector.extract_strided_slice %1168 {offsets = [0, 0], sizes = [8, 8], strides = [1, 1]} : vector<32x48xf32> to vector<8x8xf32>
    %cst_452 = arith.constant dense<0.000000e+00> : vector<8x256xf32>
    %1170 = tpu.matmul %1169, %1166, %cst_452 {dimension_numbers = #tpu.dot_dimension_numbers<[1], [0], [0], [1], [0, 0, 1, 1], [], []>} : vector<8x8xf32>, vector<8x256xf32>, vector<8x256xf32> -> vector<8x256xf32>
    %1171 = arith.addf %1162, %1170 : vector<8x256xf32>
    %c239_i32_453 = arith.constant 239 : i32
    %1172 = tpu.dynamic_rotate %1098 by %c239_i32_453 dim 1 : vector<8x256xf32>, i32 -> vector<8x256xf32>
    %1173 = vector.extract_strided_slice %1100 {offsets = [8, 0], sizes = [1, 256], strides = [1, 1]} : vector<9x256xf32> to vector<1x256xf32>
    %1174 = vector.broadcast %1173 : vector<1x256xf32> to vector<8x256xf32>
    %1175 = arith.mulf %1172, %1174 : vector<8x256xf32>
    %c89 = arith.constant 89 : index
    %c0_454 = arith.constant 0 : index
    %c0_455 = arith.constant 0 : index
    %1176 = vector.load %arg2[%c89, %c0_454, %c0_455] : memref<90x32x48xf32, #tpu.memory_space<vmem>>, vector<1x32x48xf32>
    %1177 = vector.shape_cast %1176 : vector<1x32x48xf32> to vector<32x48xf32>
    %1178 = vector.extract_strided_slice %1177 {offsets = [0, 0], sizes = [8, 8], strides = [1, 1]} : vector<32x48xf32> to vector<8x8xf32>
    %cst_456 = arith.constant dense<0.000000e+00> : vector<8x256xf32>
    %1179 = tpu.matmul %1178, %1175, %cst_456 {dimension_numbers = #tpu.dot_dimension_numbers<[1], [0], [0], [1], [0, 0, 1, 1], [], []>} : vector<8x8xf32>, vector<8x256xf32>, vector<8x256xf32> -> vector<8x256xf32>
    %1180 = arith.addf %1171, %1179 : vector<8x256xf32>
    %cst_457 = arith.constant 0.000000e+00 : f32
    %1181 = vector.broadcast %cst_457 : f32 to vector<8x256xf32>
    %1182 = arith.maximumf %1180, %1181 : vector<8x256xf32>
    %c0_458 = arith.constant 0 : index
    %c0_459 = arith.constant 0 : index
    %1183 = vector.load %arg6[%c0_458, %c0_459] : memref<2x9xf32, #tpu.memory_space<vmem>>, vector<2x9xf32>
    %1184 = vector.extract_strided_slice %1183 {offsets = [0, 0], sizes = [2, 8], strides = [1, 1]} : vector<2x9xf32> to vector<2x8xf32>
    %cst_460 = arith.constant dense<0.000000e+00> : vector<2x256xf32>
    %1185 = tpu.matmul %1184, %1182, %cst_460 {dimension_numbers = #tpu.dot_dimension_numbers<[1], [0], [0], [1], [0, 0, 1, 1], [], []>} : vector<2x8xf32>, vector<8x256xf32>, vector<2x256xf32> -> vector<2x256xf32>
    %1186 = vector.extract_strided_slice %1183 {offsets = [0, 8], sizes = [2, 1], strides = [1, 1]} : vector<2x9xf32> to vector<2x1xf32>
    %1187 = vector.broadcast %1186 : vector<2x1xf32> to vector<2x256xf32>
    %1188 = arith.addf %1185, %1187 : vector<2x256xf32>
    %1189 = arith.negf %1188 : vector<2x256xf32>
    %1190 = math.exp %1189 : vector<2x256xf32>
    %cst_461 = arith.constant 1.000000e+00 : f32
    %1191 = vector.broadcast %cst_461 : f32 to vector<2x256xf32>
    %1192 = arith.addf %1191, %1190 : vector<2x256xf32>
    %1193 = arith.divf %1191, %1192 : vector<2x256xf32>
    %c0_462 = arith.constant 0 : index
    %c0_463 = arith.constant 0 : index
    %c0_464 = arith.constant 0 : index
    %1194 = vector.load %arg11[%c0_462, %c0_463, %c0_464] : memref<1x2x256xf32, #tpu.memory_space<vmem>>, vector<1x2x256xf32>
    %1195 = vector.shape_cast %1194 : vector<1x2x256xf32> to vector<2x256xf32>
    %1196 = vector.shape_cast %1193 : vector<2x256xf32> to vector<1x2x256xf32>
    tpu.vector_store %arg11[%c0_462, %c0_463, %c0_464], %1196 {strides = array<i32>} : memref<1x2x256xf32, #tpu.memory_space<vmem>>, vector<1x2x256xf32>,
    return
  }
  func.func @transform_0(%arg0: i32) -> (i32, i32, i32) {
    %c0_i32 = arith.constant 0 : i32
    %c0_i32_0 = arith.constant 0 : i32
    %c0_i32_1 = arith.constant 0 : i32
    return %arg0, %c0_i32, %c0_i32_0 : i32, i32, i32
  }
  func.func @transform_1(%arg0: i32) -> (i32, i32, i32) {
    %c0_i32 = arith.constant 0 : i32
    %c0_i32_0 = arith.constant 0 : i32
    %c0_i32_1 = arith.constant 0 : i32
    %c0_i32_2 = arith.constant 0 : i32
    return %c0_i32, %c0_i32_0, %c0_i32_1 : i32, i32, i32
  }
  func.func @transform_2(%arg0: i32) -> (i32, i32, i32) {
    %c0_i32 = arith.constant 0 : i32
    %c0_i32_0 = arith.constant 0 : i32
    %c0_i32_1 = arith.constant 0 : i32
    %c0_i32_2 = arith.constant 0 : i32
    return %c0_i32, %c0_i32_0, %c0_i32_1 : i32, i32, i32
  }
  func.func @transform_3(%arg0: i32) -> (i32, i32, i32) {
    %c0_i32 = arith.constant 0 : i32
    %c0_i32_0 = arith.constant 0 : i32
    %c0_i32_1 = arith.constant 0 : i32
    %c0_i32_2 = arith.constant 0 : i32
    return %c0_i32, %c0_i32_0, %c0_i32_1 : i32, i32, i32
  }
  func.func @transform_4(%arg0: i32) -> (i32, i32, i32) {
    %c0_i32 = arith.constant 0 : i32
    %c0_i32_0 = arith.constant 0 : i32
    %c0_i32_1 = arith.constant 0 : i32
    %c0_i32_2 = arith.constant 0 : i32
    return %c0_i32, %c0_i32_0, %c0_i32_1 : i32, i32, i32
  }
  func.func @transform_5(%arg0: i32) -> (i32, i32) {
    %c0_i32 = arith.constant 0 : i32
    %c0_i32_0 = arith.constant 0 : i32
    %c0_i32_1 = arith.constant 0 : i32
    return %c0_i32, %c0_i32_0 : i32, i32
  }
  func.func @transform_6(%arg0: i32) -> (i32, i32) {
    %c0_i32 = arith.constant 0 : i32
    %c0_i32_0 = arith.constant 0 : i32
    %c0_i32_1 = arith.constant 0 : i32
    return %c0_i32, %c0_i32_0 : i32, i32
  }
  func.func @transform_7(%arg0: i32) -> (i32, i32) {
    %c0_i32 = arith.constant 0 : i32
    %c0_i32_0 = arith.constant 0 : i32
    %c0_i32_1 = arith.constant 0 : i32
    return %c0_i32, %c0_i32_0 : i32, i32
  }
  func.func @transform_8(%arg0: i32) -> (i32, i32) {
    %c0_i32 = arith.constant 0 : i32
    %c0_i32_0 = arith.constant 0 : i32
    %c0_i32_1 = arith.constant 0 : i32
    return %c0_i32, %c0_i32_0 : i32, i32
  }
  func.func @transform_9(%arg0: i32) -> (i32, i32) {
    %c0_i32 = arith.constant 0 : i32
    %c0_i32_0 = arith.constant 0 : i32
    %c0_i32_1 = arith.constant 0 : i32
    return %c0_i32, %c0_i32_0 : i32, i32
  }
  func.func @transform_10(%arg0: i32) -> (i32, i32, i32) {
    %c0_i32 = arith.constant 0 : i32
    %c0_i32_0 = arith.constant 0 : i32
    %c0_i32_1 = arith.constant 0 : i32
    return %arg0, %c0_i32, %c0_i32_0 : i32, i32, i32
  }
}

</mosaic_0001>

<bundles_post_ra>
// kernel: forward.1
= control target key start
LH: loop header
LB: loop body
LE: loop exit
PB: predicated region body
PF: predicated region fallthrough
CT: control target
= control target key end

     0   :  { %s13084_s13 = smov 0   ;;  %s16061_s0 = inlined_call_operand.vmem [shape: f32[2,4,256], index: 0, kind: input, shape index: {}]   ;;  %s16062_s1 = inlined_call_operand.vmem [shape: f32[90,32,48], index: 1, kind: input, shape index: {}]   ;;  %s16063_s2 = inlined_call_operand.vmem [shape: f32[10,32,256], index: 2, kind: input, shape index: {}]   ;;  %s16064_s3 = inlined_call_operand.vmem [shape: f32[10,48,48], index: 3, kind: input, shape index: {}]   ;;  %s16065_s4 = inlined_call_operand.vmem [shape: f32[3,9,256], index: 4, kind: input, shape index: {}]   ;;  %s16066_s5 = inlined_call_operand.vmem [shape: f32[2,9], index: 5, kind: input, shape index: {}]   ;;  %s16067_s6 = inlined_call_operand.vmem [shape: f32[256,64], index: 6, kind: input, shape index: {}]   ;;  %s16068_s7 = inlined_call_operand.vmem [shape: f32[64,16], index: 7, kind: input, shape index: {}]   ;;  %s16069_s8 = inlined_call_operand.vmem [shape: f32[16,64], index: 8, kind: input, shape index: {}]   ;;  %s16070_s9 = inlined_call_operand.vmem [shape: f32[64,256], index: 9, kind: input, shape index: {}]   ;;  %s16071_s10 = inlined_call_operand.vmem [shape: f32[2,2,256], index: 10, kind: output, shape index: {}]  }
   0x1   :  { %16199 = sst [smem:[#allocation44_spill]] %s16061_s0 }
   0x2   :  { %16200 = sst [smem:[#allocation45_spill]] %s16067_s6 }
   0x3   :  { %16201 = sst [smem:[#allocation46_spill]] %s16068_s7 }
   0x4   :  { %16202 = sst [smem:[#allocation47_spill]] %s16069_s8 }
   0x5   :  { %16203 = sst [smem:[#allocation48_spill]] %s16071_s10 }
   0x6 LB: > { %16204 = sst [smem:[#allocation2_spill]] %s12987_s13  ;;  %s11539_s14 = sadd.s32 4294967295, %s12987_s13   ;;  %s12987_s13 = sphi %s13084_s13, %s20_s13  }
   0x7   : > { %p11543_p0 = scmp.ge.s32.totalorder %s12987_s13, 1  ;;  %p312_p1 = scmp.lt.s32.totalorder %s12987_s13, 3 }
   0x9   : > { %p313_p2 = pnand %p11543_p0, %p312_p1 }
   0xb   : > { %316 = sbr.rel (%p313_p2) target bundleno = 10938 (0x2aba), region = 60 }
  0x10   : > { %p350_p3 = scmp.lt.s32.totalorder %s11539_s14, 1  ;;  %vm364_vm0 = vcmask 1043456   ;;  %s16205_s0 = sld [smem:[#allocation44_spill]]  ;;  %v16152_v10 = vmov 0.0   ;;  %vm16142_vm1 = vmmov 0   ;;  %vm379_vm2 = vcmask 7168  }
  0x11   : > { %12307 = vmatprep.subr.mxu0 %v16152_v10  ;;  %596 = vmatprep.mubr.f32.mxu1 %v16152_v10  ;;  %v381_v13 = vld [vmem:[%s16064_s3] sm:$0xff]  ;;  %vm382_vm3 = vcmask 31744   ;;  %v16154_v15 = vmov 0   ;;  %s16116_s21 = smov 1   ;;  %v16156_v19 = vmov 1   ;;  %v473_v27 = vlaneseq  ;;  %s16078_s22 = smov 17  }
  0x12   : > { %s16405_s14 = smov (!%p350_p3, %s11539_s14), 1  ;;  %12309 = vmatprep.mubr.msk.f32.mxu0 %vm16142_vm1, %v16152_v10  ;;  %12907 = vset.pattern.permute.xlu1 %v16154_v15  ;;  %v12994_v25 = vmov 839922192   ;;  %s16082_s23 = smov 113   ;;  %v13167_v46 = vld [vmem:[%s16065_s4] sm:$0xff]  ;;  %v13172_v47 = vld [vmem:[%s16065_s4 + $0x8] sm:$0xff] }
  0x13   : > { %s11971_s15 = sshll.u32 %s16405_s14, 3  ;;  %12908 = vset.pattern.permute.xlu0 %v16156_v19  ;;  %v471_v26 = vunpack.c.l.s4 %v12994_v25  ;;  %v13116_v29 = vshrl.u32 %v473_v27, 7  ;;  %s16076_s24 = smov 16   ;;  %v13162_v44 = vand.u32 127, %v473_v27  ;;  %v522_v59 = vld [vmem:[%s16062_s1] sm:$0xff]  ;;  %vm2437_vm12 = vcmask 523264  }
  0x14   : > { %s16074_s25 = smov 112   ;;  %s16080_s26 = smov 15   ;;  %vm2448_vm13 = vcmask 64512   ;;  %vm2555_vm14 = vcmask 72704   ;;  %vm2732_vm15 = vcmask 56320  }
  0x15   : > { %v472_v28 = vunpack.c.0.s8 %v471_v26  ;;  %s16072_s27 = smov 111   ;;  %s16132_s28 = smov 127   ;;  %v13160_v43 = vsub.s32 0, %v13116_v29  ;;  %16206 = vst [vmem:[#allocation3_spill] sm:$0xff] %v13162_v44  ;;  %vm16141_vm4 = vcmp.lt.s32.totalorder %v13162_v44, 17  ;;  %v13180_v49 = vsub.s32 1, %v13116_v29 }
  0x16   : > { %s354_s18 = scalar_lea.vmem %s16205_s0, %s11971_s15  ;;  %vm16140_vm5 = vcmp.lt.s32.totalorder %v13162_v44, 16  ;;  %v13192_v54 = vsub.s32 2, %v13116_v29  ;;  %v13208_v60 = vsub.s32 6, %v13116_v29  ;;  %vm16135_vm6 = vcmp.lt.s32.totalorder %v13162_v44, 15  ;;  %s16221_s6 = sld [smem:[#allocation45_spill]] }
  0x17   : > { %v360_v0 = vld [vmem:[%s354_s18] sm:$0xff]  ;;  %v475_v30 = vsub.s32 %v472_v28, %v13116_v29  ;;  %v13177_v48 = vrot.slane %v13172_v47, %v13160_v43  ;;  %v13184_v50 = vrot.slane %v13167_v46, %v13160_v43  ;;  %v13197_v56 = vrot.slane %v13167_v46, %v13180_v49  ;;  %s16112_s29 = smov 9   ;;  %s16114_s30 = smov 73  }
  0x18   : > { %v362_v1 = vcombine.high %v360_v0, %v360_v0  ;;  %v365_v2 = vsel %vm364_vm0, %v360_v0, 0.0  ;;  %v370_v3 = vmul.f32 %v360_v0, %v360_v0  ;;  %v13201_v57 = vrot.slane %v13172_v47, %v13180_v49  ;;  %s16108_s11 = smov 8   ;;  %s16110_s12 = smov 72  }
  0x19   : > { %16207 = vst [vmem:[#allocation4_spill] sm:$0xff] %v13177_v48  ;;  %16208 = vst [vmem:[#allocation5_spill] sm:$0xff] %v13184_v50  ;;  %vm16090_vm7 = vcmp.lt.s32.totalorder %v13162_v44, 113  ;;  %vm16134_vm8 = vcmp.lt.s32.totalorder %v13162_v44, 1  ;;  %v13288_v28 = vsub.s32 7, %v13116_v29  ;;  %vm16107_vm9 = vcmp.lt.s32.totalorder %v13162_v44, 127 }
  0x1a   : > { %v366_v4 = vsel %vm364_vm0, %v362_v1, 0.0  ;;  %v372_v5 = vcombine.high %v370_v3, %v370_v3  ;;  %v374_v6 = vsel %vm364_vm0, %v370_v3, 0.0  ;;  %16209 = vst [vmem:[#allocation6_spill] sm:$0xff] %v13197_v56  ;;  %16210 = vst [vmem:[#allocation7_spill] sm:$0xff] %v13201_v57  ;;  %v13225_v3 = vrot.slane %v13172_v47, %v13192_v54  ;;  %s16103_s15 = smov 7   ;;  %s16105_s16 = smov 71  }
  0x1b   : > { %v367_v7 = vadd.f32 %v366_v4, %v365_v2  ;;  %v13229_v4 = vsub.s32 3, %v13116_v29  ;;  %vm16089_vm10 = vcmp.lt.s32.totalorder %v13162_v44, 112  ;;  %vm16088_vm11 = vcmp.lt.s32.totalorder %v13162_v44, 111  ;;  %s16101_s17 = smov 65   ;;  %s16099_s18 = smov 63  }
  0x1c   : > { %v375_v8 = vsel %vm364_vm0, %v372_v5, 0.0  ;;  %16212 = vst [vmem:[#allocation9_spill] sm:$0xff] %v13225_v3  ;;  %v11553_v5 = vld [vmem:[%s16062_s1 + $0x20] sm:$0xff]  ;;  %s16095_s19 = smov 57   ;;  %s16097_s20 = smov 121  }
  0x1d   : > { %368 = vadd.xlane.f32.xlu0 %v367_v7  ;;  %v376_v9 = vadd.f32 %v375_v8, %v374_v6  ;;  %v13238_v7 = vsub.s32 5, %v13116_v29  ;;  %v13242_v8 = vrot.slane %v13172_v47, %v13208_v60  ;;  %v11561_v29 = vld [vmem:[%s16062_s1 + $0x60] sm:$0xff]  ;;  %s16230_s7 = sld [smem:[#allocation46_spill]]  ;;  %s16244_s13 = smov 12  }
  0x1e   : > { %s16245_s0 = smov 124   ;;  %s16247_s8 = sld [smem:[#allocation47_spill]] }
  0x1f   : > { %16213 = vst [vmem:[#allocation10_spill] sm:$0xff] %v13242_v8 }
  0x21   : > { %377 = vadd.xlane.f32.xlu0 %v376_v9 }
  0xa6   : > { %v369_v11 = vpop.xlane.xlu0 %368 }
  0xaa   : > { %v378_v12 = vpop.xlane.xlu0 %377 }
  0xab   : > { %v380_v14 = vsel %vm379_vm2, %v369_v11, %v378_v12 }
  0xac   : > { %12308 = vmatpush3.msk.msra.mxu0 %vm364_vm0, %v380_v14 }
  0xad   : > { %12310 = vmatmul.mubr.msk.f32.vlgmr.msra.gmra.mxu0 %vm382_vm3, %v381_v13 }
  0xae   : > { %697 = vmatprep.mubr.f32.mxu0 %v16152_v10 }
 0x16d   : > { %v455_v16 = vpop.f32.mrf.mxu0 }
 0x16e   : > { %v459_v17 = vmul.f32 %v455_v16, %v455_v16 }
 0x16f   : > { %v12311_v18 = vpop.f32.mrf.mxu0 }
 0x170   : > { %461 = vrot.lane.b32.xlu1 %v459_v17, %s16116_s21  ;;  %v13258_v17 = vrot.slane %v13172_v47, %v13229_v4 }
 0x172   : > { %16215 = vst [vmem:[#allocation12_spill] sm:$0xff] %v13258_v17 }
 0x174   : > { %468 = vperm.xlu1 %12907, %v455_v16  }
 0x1e2   : > { %v462_v20 = vpop.permute.xlu1 %461 }
 0x1e3   : > { %v464_v21 = vsub.f32 %v455_v16, %v462_v20  ;;  %v13254_v16 = vrot.slane %v13167_v46, %v13229_v4  ;;  %v11557_v20 = vld [vmem:[%s16062_s1 + $0x40] sm:$0xff] }
 0x1e5   : > { %v465_v22 = vmax.f32 %v464_v21, 0.0  ;;  %16214 = vst [vmem:[#allocation11_spill] sm:$0xff] %v13254_v16  ;;  %v13269_v21 = vrot.slane %v13167_v46, %v13208_v60 }
 0x1e7   : > { %v479_v23 = vadd.f32 1e-05, %v465_v22  ;;  %16216 = vst [vmem:[#allocation13_spill] sm:$0xff] %v13269_v21 }
 0x1e9   : > { %12930 = vrsqrt.f32 %v479_v23  ;;  %v13274_v23 = vrot.slane %v13167_v46, %v13238_v7 }
 0x1eb   : > { %16217 = vst [vmem:[#allocation14_spill] sm:$0xff] %v13274_v23 }
 0x1ef   : > { %v469_v31 = vpop.permute.xlu1 %468 }
 0x1f0   : > { %v476_v32 = vrot.slane %v469_v31, %v475_v30 }
 0x1f2   : > { %v478_v34 = vsub.f32 %v360_v0, %v476_v32  ;;  %v13219_v0 = vrot.slane %v13167_v46, %v13192_v54 }
 0x1f4   : > { %16211 = vst [vmem:[#allocation8_spill] sm:$0xff] %v13219_v0 }
 0x1f6   : > { %v12931_v24 = vpop.eup %12930 }
 0x1f7   : > { %483 = vperm.xlu0 %12908, %v12931_v24   ;;  %v13278_v24 = vrot.slane %v13172_v47, %v13238_v7 }
 0x1f9   : > { %16218 = vst [vmem:[#allocation15_spill] sm:$0xff] %v13278_v24 }
 0x272   : > { %v484_v33 = vpop.permute.xlu0 %483 }
 0x273   : > { %v491_v35 = vrot.slane %v484_v33, %v475_v30  ;;  %v11565_v33 = vld [vmem:[%s16062_s1 + $0x80] sm:$0xff] }
 0x275   : > { %v13119_v36 = vmul.f32 %v491_v35, %v478_v34 }
 0x277   : > { %503 = vrot.lane.b32.xlu1 %v13119_v36, %s16078_s22  ;;  %v13125_v37 = vcombine.high %v13119_v36, %v13119_v36 }
 0x279   : > { %1093 = vrot.lane.b32.xlu0 %v13125_v37, %s16082_s23 }
 0x27b   : > { %605 = vrot.lane.b32.xlu1 %v13119_v36, %s16076_s24 }
 0x27d   : > { %1194 = vrot.lane.b32.xlu0 %v13125_v37, %s16074_s25 }
 0x27f   : > { %706 = vrot.lane.b32.xlu1 %v13119_v36, %s16080_s26 }
 0x281   : > { %1295 = vrot.lane.b32.xlu0 %v13125_v37, %s16072_s27 }
 0x283   : > { %807 = vrot.lane.b32.xlu1 %v13119_v36, %s16116_s21 }
 0x287   : > { %990 = vrot.lane.b32.xlu1 %v13119_v36, %s16132_s28 }
 0x28b   : > { %1091 = vrot.lane.b32.xlu1 %v13119_v36, %s16082_s23 }
 0x28f   : > { %505 = vrot.lane.b32.xlu1 %v13125_v37, %s16078_s22 }
 0x293   : > { %607 = vrot.lane.b32.xlu1 %v13125_v37, %s16076_s24 }
 0x297   : > { %708 = vrot.lane.b32.xlu1 %v13125_v37, %s16080_s26 }
 0x29b   : > { %809 = vrot.lane.b32.xlu1 %v13125_v37, %s16116_s21 }
 0x29f   : > { %992 = vrot.lane.b32.xlu1 %v13125_v37, %s16132_s28 }
 0x2a3   : > { %1192 = vrot.lane.b32.xlu1 %v13119_v36, %s16074_s25 }
 0x2a7   : > { %1293 = vrot.lane.b32.xlu1 %v13119_v36, %s16072_s27 }
 0x2e9   : > { %v504_v38 = vpop.permute.xlu1 %503 }
 0x2eb   : > { %v1094_v12 = vpop.permute.xlu0 %1093 }
 0x2ed   : > { %v606_v39 = vpop.permute.xlu1 %605 }
 0x2f1   : > { %v707_v40 = vpop.permute.xlu1 %706 }
 0x2f5   : > { %v808_v41 = vpop.permute.xlu1 %807 }
 0x2f9   : > { %v13157_v42 = vpop.permute.xlu1 %990 }
 0x2fd   : > { %v1092_v45 = vpop.permute.xlu1 %1091 }
 0x2fe   : > { %v1097_v18 = vsel %vm16090_vm7, %v1094_v12, %v1092_v45  ;;  %v1096_v25 = vsel %vm16090_vm7, %v1092_v45, %v1094_v12  ;;  %v11569_v45 = vld [vmem:[%s16062_s1 + $0xa0] sm:$0xff] }
 0x2ff   : > { %v1107_v30 = vmul.f32 %v13242_v8, %v1097_v18  ;;  %v1106_v35 = vmul.f32 %v13269_v21, %v1096_v25 }
 0x301   : > { %v506_v51 = vpop.permute.xlu1 %505 }
 0x302   : > { %v511_v52 = vsel %vm16141_vm4, %v506_v51, %v504_v38  ;;  %v510_v53 = vsel %vm16141_vm4, %v504_v38, %v506_v51  ;;  %v13318_v38 = vrot.slane %v13167_v46, %v13288_v28  ;;  %v11573_v46 = vld [vmem:[%s16062_s1 + $0xc0] sm:$0xff] }
 0x303   : > { %v521_v55 = vmul.f32 %v13177_v48, %v510_v53  ;;  %v520_v58 = vmul.f32 %v13184_v50, %v511_v52 }
 0x304   : > { %16219 = vst [vmem:[#allocation16_spill] sm:$0xff] %v13318_v38 }
 0x305   : > { %11550 = vmatprep.subr.msk.mxu1 %vm364_vm0, %v521_v55  ;;  %v608_v61 = vpop.permute.xlu1 %607 }
 0x306   : > { %v610_v62 = vsel %vm16140_vm5, %v606_v39, %v608_v61  ;;  %v611_v63 = vsel %vm16140_vm5, %v608_v61, %v606_v39  ;;  %11551 = vmatpush1.msk.msra.mxu1 %vm364_vm0, %v520_v58  ;;  %v1195_v39 = vpop.permute.xlu0 %1194  ;;  %v13352_v58 = vld [vmem:[%s16065_s4 + $0x10] ss:$0 sm:$0xff]  ;;  %v11577_v61 = vld [vmem:[%s16062_s1 + $0xe0] sm:$0xff] }
 0x307   : > { %v620_v1 = vmul.f32 %v13197_v56, %v611_v63  ;;  %v621_v2 = vmul.f32 %v13201_v57, %v610_v62  ;;  %11552 = vmatmul.mubr.msk.f32.vlgmr.msra.gmra.mxu1 %vm382_vm3, %v522_v59  ;;  %v13357_v59 = vld [vmem:[%s16065_s4 + $0x18] ss:$0 sm:$0xff] }
 0x308   : > { %798 = vmatprep.mubr.f32.mxu1 %v16152_v10 }
 0x309   : > { %11554 = vmatprep.subr.msk.mxu0 %vm364_vm0, %v621_v2  ;;  %v709_v6 = vpop.permute.xlu1 %708 }
 0x30a   : > { %v711_v9 = vsel %vm16135_vm6, %v707_v40, %v709_v6  ;;  %v712_v11 = vsel %vm16135_vm6, %v709_v6, %v707_v40  ;;  %11555 = vmatpush1.msk.msra.mxu0 %vm364_vm0, %v620_v1  ;;  %v1296_v62 = vpop.permute.xlu0 %1295 }
 0x30b   : > { %v721_v13 = vmul.f32 %v13219_v0, %v712_v11  ;;  %v722_v14 = vmul.f32 %v13225_v3, %v711_v9  ;;  %11556 = vmatmul.mubr.msk.f32.vlgmr.msra.gmra.mxu0 %vm382_vm3, %v11553_v5  ;;  %v11583_v9 = vld [vmem:[%s16062_s1 + $0x100] sm:$0xff] }
 0x30c   : > { %899 = vmatprep.mubr.f32.mxu0 %v16152_v10  ;;  %v498_v11 = vld [vmem:[%s16063_s2] sm:$0xff] }
 0x30d   : > { %11558 = vmatprep.subr.msk.mxu1 %vm364_vm0, %v722_v14  ;;  %v810_v22 = vpop.permute.xlu1 %809 }
 0x30e   : > { %v812_v26 = vsel %vm16134_vm8, %v808_v41, %v810_v22  ;;  %v813_v27 = vsel %vm16134_vm8, %v810_v22, %v808_v41  ;;  %11559 = vmatpush1.msk.msra.mxu1 %vm364_vm0, %v721_v13  ;;  %v499_v13 = vld [vmem:[%s16063_s2 + $0x8] sm:$0xff] }
 0x30f   : > { %v822_v31 = vmul.f32 %v13254_v16, %v813_v27  ;;  %v823_v32 = vmul.f32 %v13258_v17, %v812_v26  ;;  %11560 = vmatmul.mubr.msk.f32.vlgmr.msra.gmra.mxu1 %vm382_vm3, %v11557_v20  ;;  %11566 = vmatprep.subr.msk.mxu1 %vm364_vm0, %v13125_v37 }
 0x310   : > { %11567 = vmatpush1.msk.msra.mxu1 %vm364_vm0, %v13119_v36  ;;  %981 = vmatprep.mubr.f32.mxu1 %v16152_v10 }
 0x311   : > { %11562 = vmatprep.subr.msk.mxu0 %vm364_vm0, %v823_v32  ;;  %11574 = vmatprep.subr.msk.mxu1 %vm364_vm0, %v1107_v30  ;;  %v993_v34 = vpop.permute.xlu1 %992 }
 0x312   : > { %v995_v36 = vsel %vm16107_vm9, %v13157_v42, %v993_v34  ;;  %v996_v37 = vsel %vm16107_vm9, %v993_v34, %v13157_v42  ;;  %11563 = vmatpush1.msk.msra.mxu0 %vm364_vm0, %v822_v31  ;;  %v13327_v42 = vrot.slane %v13172_v47, %v13288_v28 }
 0x313   : > { %v1005_v40 = vmul.f32 %v13274_v23, %v995_v36  ;;  %v1006_v41 = vmul.f32 %v13278_v24, %v996_v37  ;;  %11564 = vmatmul.mubr.msk.f32.vlgmr.msra.gmra.mxu0 %vm382_vm3, %v11561_v29  ;;  %11568 = vmatmul.mubr.msk.f32.vlgmr.msra.gmra.mxu1 %vm382_vm3, %v11565_v33 }
 0x314   : > { %16220 = vst [vmem:[#allocation17_spill] sm:$0xff] %v13327_v42  ;;  %11575 = vmatpush1.msk.msra.mxu1 %vm364_vm0, %v1106_v35  ;;  %1082 = vmatprep.mubr.f32.mxu0 %v16152_v10 }
 0x315   : > { %11570 = vmatprep.subr.msk.mxu0 %vm364_vm0, %v1006_v41  ;;  %v1193_v51 = vpop.permute.xlu1 %1192  ;;  %1183 = vmatprep.mubr.f32.mxu1 %v16152_v10 }
 0x316   : > { %v1197_v47 = vsel %vm16089_vm10, %v1193_v51, %v1195_v39  ;;  %v1198_v52 = vsel %vm16089_vm10, %v1195_v39, %v1193_v51  ;;  %11571 = vmatpush1.msk.msra.mxu0 %vm364_vm0, %v1005_v40 }
 0x317   : > { %v1207_v53 = vmul.f32 %v13318_v38, %v1197_v47  ;;  %v1208_v55 = vmul.f32 %v13327_v42, %v1198_v52  ;;  %11572 = vmatmul.mubr.msk.f32.vlgmr.msra.gmra.mxu0 %vm382_vm3, %v11569_v45  ;;  %11576 = vmatmul.mubr.msk.f32.vlgmr.msra.gmra.mxu1 %vm382_vm3, %v11573_v46 }
 0x318   : > { %1284 = vmatprep.mubr.f32.mxu0 %v16152_v10  ;;  %1385 = vmatprep.mubr.f32.mxu1 %v16152_v10 }
 0x319   : > { %11578 = vmatprep.subr.msk.mxu0 %vm364_vm0, %v1208_v55  ;;  %v1294_v63 = vpop.permute.xlu1 %1293 }
 0x31a   : > { %v1298_v1 = vsel %vm16088_vm11, %v1294_v63, %v1296_v62  ;;  %v1299_v2 = vsel %vm16088_vm11, %v1296_v62, %v1294_v63  ;;  %11579 = vmatpush1.msk.msra.mxu0 %vm364_vm0, %v1207_v53 }
 0x31b   : > { %v1308_v5 = vmul.f32 %v13352_v58, %v1298_v1  ;;  %v1309_v6 = vmul.f32 %v13357_v59, %v1299_v2  ;;  %11580 = vmatmul.mubr.msk.f32.vlgmr.msra.gmra.mxu0 %vm382_vm3, %v11577_v61  ;;  %12312 = vmatprep.subr.mxu0 %v16152_v10 }
 0x31c   : > { %12314 = vmatprep.mubr.msk.f32.mxu0 %vm16142_vm1, %v16152_v10 }
 0x31d   : > { %11584 = vmatprep.subr.msk.mxu1 %vm364_vm0, %v1309_v6 }
 0x31e   : > { %11585 = vmatpush1.msk.msra.mxu1 %vm364_vm0, %v1308_v5 }
 0x31f   : > { %11586 = vmatmul.mubr.msk.f32.vlgmr.msra.gmra.mxu1 %vm382_vm3, %v11583_v9 }
 0x320   : > { %1596 = vmatprep.mubr.f32.mxu1 %v16152_v10 }
 0x3c7   : > { %v598_v12 = vpop.f32.mrf.mxu1 }
 0x3c8   : > { %v603_v14 = vadd.f32 %v598_v12, %v498_v11 }
 0x3c9   : > { %v600_v18 = vpop.f32.mrf.mxu1 }
 0x3ca   : > { %v604_v20 = vadd.f32 %v600_v18, %v499_v13 }
 0x3cb   : > { %v699_v22 = vpop.f32.mrf.mxu0 }
 0x3cc   : > { %v704_v25 = vadd.f32 %v699_v22, %v603_v14 }
 0x3cd   : > { %v701_v26 = vpop.f32.mrf.mxu0 }
 0x3ce   : > { %v705_v27 = vadd.f32 %v701_v26, %v604_v20 }
 0x3cf   : > { %v800_v30 = vpop.f32.mrf.mxu1 }
 0x3d0   : > { %v805_v31 = vadd.f32 %v800_v30, %v704_v25 }
 0x3d1   : > { %v802_v32 = vpop.f32.mrf.mxu1 }
 0x3d2   : > { %v806_v29 = vadd.f32 %v802_v32, %v705_v27 }
 0x3d3   : > { %v901_v33 = vpop.f32.mrf.mxu0  ;;  %v983_v34 = vpop.f32.mrf.mxu1 }
 0x3d4   : > { %v906_v35 = vadd.f32 %v901_v33, %v805_v31 }
 0x3d5   : > { %v903_v36 = vpop.f32.mrf.mxu0  ;;  %v985_v37 = vpop.f32.mrf.mxu1 }
 0x3d6   : > { %v907_v39 = vadd.f32 %v903_v36, %v806_v29  ;;  %v988_v40 = vadd.f32 %v983_v34, %v906_v35  ;;  %v11587_v29 = vld [vmem:[%s16064_s3 + $0x30] sm:$0xff] }
 0x3d7   : > { %v1084_v41 = vpop.f32.mrf.mxu0  ;;  %v1185_v45 = vpop.f32.mrf.mxu1 }
 0x3d8   : > { %v989_v46 = vadd.f32 %v985_v37, %v907_v39  ;;  %v1089_v51 = vadd.f32 %v1084_v41, %v988_v40 }
 0x3d9   : > { %v1086_v47 = vpop.f32.mrf.mxu0  ;;  %v1187_v52 = vpop.f32.mrf.mxu1 }
 0x3da   : > { %v1090_v53 = vadd.f32 %v1086_v47, %v989_v46  ;;  %v1190_v55 = vadd.f32 %v1185_v45, %v1089_v51 }
 0x3db   : > { %v1286_v61 = vpop.f32.mrf.mxu0 }
 0x3dc   : > { %v1191_v62 = vadd.f32 %v1187_v52, %v1090_v53  ;;  %v1291_v63 = vadd.f32 %v1286_v61, %v1190_v55 }
 0x3dd   : > { %v1288_v1 = vpop.f32.mrf.mxu0 }
 0x3de   : > { %v1292_v5 = vadd.f32 %v1288_v1, %v1191_v62 }
 0x3df   : > { %v1387_v2 = vpop.f32.mrf.mxu1 }
 0x3e0   : > { %v1392_v6 = vadd.f32 %v1387_v2, %v1291_v63 }
 0x3e1   : > { %v1389_v9 = vpop.f32.mrf.mxu1 }
 0x3e2   : > { %v1394_v11 = vmax.f32 %v1392_v6, 0.0  ;;  %v1393_v12 = vadd.f32 %v1389_v9, %v1292_v5  ;;  %v11592_v6 = vld [vmem:[%s16062_s1 + $0x120] sm:$0xff] }
 0x3e4   : > { %v1395_v13 = vmax.f32 %v1393_v12, 0.0  ;;  %v1401_v14 = vmul.f32 %v1394_v11, %v1394_v11  ;;  %v1396_v18 = vsel %vm364_vm0, %v1394_v11, 0.0 }
 0x3e6   : > { %v1397_v20 = vsel %vm364_vm0, %v1395_v13, 0.0  ;;  %v1402_v22 = vmul.f32 %v1395_v13, %v1395_v13  ;;  %v1403_v26 = vsel %vm364_vm0, %v1401_v14, 0.0 }
 0x3e7   : > { %v1398_v25 = vadd.f32 %v1397_v20, %v1396_v18  ;;  %v11596_v20 = vld [vmem:[%s16062_s1 + $0x140] sm:$0xff] }
 0x3e8   : > { %v1404_v27 = vsel %vm364_vm0, %v1402_v22, 0.0 }
 0x3e9   : > { %1399 = vadd.xlane.f32.xlu1 %v1398_v25  ;;  %v1405_v30 = vadd.f32 %v1404_v27, %v1403_v26 }
 0x3eb   : > { %1406 = vadd.xlane.f32.xlu0 %v1405_v30 }
 0x472   : > { %v1400_v31 = vpop.xlane.xlu1 %1399 }
 0x474   : > { %v1407_v32 = vpop.xlane.xlu0 %1406 }
 0x475   : > { %v1408_v33 = vsel %vm379_vm2, %v1400_v31, %v1407_v32  ;;  %v11600_v32 = vld [vmem:[%s16062_s1 + $0x160] sm:$0xff] }
 0x476   : > { %12313 = vmatpush3.msk.msra.mxu0 %vm364_vm0, %v1408_v33 }
 0x477   : > { %12315 = vmatmul.mubr.msk.f32.vlgmr.msra.gmra.mxu0 %vm382_vm3, %v11587_v29 }
 0x478   : > { %1688 = vmatprep.mubr.f32.mxu0 %v16152_v10 }
 0x537   : > { %v1483_v34 = vpop.f32.mrf.mxu0 }
 0x538   : > { %v1487_v35 = vmul.f32 %v1483_v34, %v1483_v34  ;;  %1496 = vperm.xlu1 %12907, %v1483_v34  }
 0x539   : > { %v12316_v36 = vpop.f32.mrf.mxu0 }
 0x53a   : > { %1489 = vrot.lane.b32.xlu0 %v1487_v35, %s16116_s21 }
 0x53c   : > { %12909 = vset.pattern.permute.xlu1 %v16156_v19 }
 0x5ac   : > { %v1490_v37 = vpop.permute.xlu0 %1489 }
 0x5ad   : > { %v1492_v39 = vsub.f32 %v1483_v34, %v1490_v37 }
 0x5af   : > { %v1493_v40 = vmax.f32 %v1492_v39, 0.0  ;;  %v11604_v39 = vld [vmem:[%s16062_s1 + $0x180] sm:$0xff] }
 0x5b1   : > { %v1501_v41 = vadd.f32 1e-05, %v1493_v40  ;;  %v11608_v40 = vld [vmem:[%s16062_s1 + $0x1a0] sm:$0xff] }
 0x5b3   : > { %12932 = vrsqrt.f32 %v1501_v41  ;;  %v1497_v46 = vpop.permute.xlu1 %1496 }
 0x5b4   : > { %v1499_v51 = vsub.f32 %v1394_v11, %v1497_v46  ;;  %v1500_v47 = vsub.f32 %v1395_v13, %v1497_v46 }
 0x5c0   : > { %v12933_v45 = vpop.eup %12932 }
 0x5c1   : > { %1505 = vperm.xlu1 %12909, %v12933_v45  }
 0x5c5   : > { %12910 = vset.pattern.permute.xlu1 %v16154_v15 }
 0x63c   : > { %v1506_v52 = vpop.permute.xlu1 %1505 }
 0x63d   : > { %v1508_v53 = vmul.f32 %v1506_v52, %v1499_v51  ;;  %v1509_v55 = vmul.f32 %v1506_v52, %v1500_v47 }
 0x63f   : > { %1515 = vrot.lane.b32.xlu1 %v1509_v55, %s16078_s22  ;;  %1513 = vrot.lane.b32.xlu0 %v1508_v53, %s16078_s22  ;;  %s16091_s22 = smov 119  }
 0x643   : > { %1607 = vrot.lane.b32.xlu1 %v1509_v55, %s16076_s24  ;;  %1605 = vrot.lane.b32.xlu0 %v1508_v53, %s16076_s24  ;;  %s16084_s24 = smov 55  }
 0x647   : > { %1699 = vrot.lane.b32.xlu1 %v1509_v55, %s16080_s26  ;;  %1697 = vrot.lane.b32.xlu0 %v1508_v53, %s16080_s26  ;;  %s16118_s26 = smov 115  }
 0x64b   : > { %1791 = vrot.lane.b32.xlu1 %v1509_v55, %s16116_s21  ;;  %1789 = vrot.lane.b32.xlu0 %v1508_v53, %s16116_s21 }
 0x64f   : > { %1967 = vrot.lane.b32.xlu1 %v1509_v55, %s16132_s28  ;;  %1965 = vrot.lane.b32.xlu0 %v1508_v53, %s16132_s28 }
 0x653   : > { %2059 = vrot.lane.b32.xlu1 %v1509_v55, %s16082_s23  ;;  %2057 = vrot.lane.b32.xlu0 %v1508_v53, %s16082_s23  ;;  %s16226_s23 = smov 56  }
 0x657   : > { %2151 = vrot.lane.b32.xlu1 %v1509_v55, %s16074_s25  ;;  %2149 = vrot.lane.b32.xlu0 %v1508_v53, %s16074_s25  ;;  %s16086_s25 = smov 120  }
 0x65b   : > { %2243 = vrot.lane.b32.xlu1 %v1509_v55, %s16072_s27  ;;  %2241 = vrot.lane.b32.xlu0 %v1508_v53, %s16072_s27  ;;  %s16093_s27 = smov 56  }
 0x6b1   : > { %v1516_v61 = vpop.permute.xlu1 %1515  ;;  %v1514_v62 = vpop.permute.xlu0 %1513 }
 0x6b2   : > { %v1517_v63 = vsel %vm16141_vm4, %v1514_v62, %v1516_v61  ;;  %v1518_v1 = vsel %vm16141_vm4, %v1516_v61, %v1514_v62  ;;  %vm5155_vm4 = vcmask 105472  }
 0x6b3   : > { %v1519_v2 = vmul.f32 %v1518_v1, %v13184_v50  ;;  %v1520_v5 = vmul.f32 %v1517_v63, %v13177_v48 }
 0x6b5   : > { %v1608_v9 = vpop.permute.xlu1 %1607  ;;  %11593 = vmatprep.subr.msk.mxu1 %vm364_vm0, %v1520_v5  ;;  %v1606_v11 = vpop.permute.xlu0 %1605  ;;  %v11616_v5 = vld [vmem:[%s16062_s1 + $0x1e0] sm:$0xff] }
 0x6b6   : > { %v1609_v12 = vsel %vm16140_vm5, %v1606_v11, %v1608_v9  ;;  %v1610_v13 = vsel %vm16140_vm5, %v1608_v9, %v1606_v11  ;;  %11594 = vmatpush1.msk.msra.mxu1 %vm364_vm0, %v1519_v2  ;;  %vm5048_vm5 = vcmask 121856  }
 0x6b7   : > { %v1611_v14 = vmul.f32 %v1610_v13, %v13197_v56  ;;  %v1612_v18 = vmul.f32 %v1609_v12, %v13201_v57  ;;  %11595 = vmatmul.mubr.msk.f32.vlgmr.msra.gmra.mxu1 %vm382_vm3, %v11592_v6 }
 0x6b8   : > { %1780 = vmatprep.mubr.f32.mxu1 %v16152_v10 }
 0x6b9   : > { %v1700_v22 = vpop.permute.xlu1 %1699  ;;  %11597 = vmatprep.subr.msk.mxu0 %vm364_vm0, %v1612_v18  ;;  %v1698_v25 = vpop.permute.xlu0 %1697  ;;  %v11620_v18 = vld [vmem:[%s16062_s1 + $0x200] sm:$0xff] }
 0x6ba   : > { %v1701_v26 = vsel %vm16135_vm6, %v1698_v25, %v1700_v22  ;;  %v1702_v27 = vsel %vm16135_vm6, %v1700_v22, %v1698_v25  ;;  %11598 = vmatpush1.msk.msra.mxu0 %vm364_vm0, %v1611_v14  ;;  %vm4749_vm6 = vcmask 23552  }
 0x6bb   : > { %v1703_v30 = vmul.f32 %v1702_v27, %v13219_v0  ;;  %v1704_v31 = vmul.f32 %v1701_v26, %v13225_v3  ;;  %11599 = vmatmul.mubr.msk.f32.vlgmr.msra.gmra.mxu0 %vm382_vm3, %v11596_v20  ;;  %v2366_v20 = vld [vmem:[%s16221_s6 + $0xf8] sm:$0xff] }
 0x6bc   : > { %1872 = vmatprep.mubr.f32.mxu0 %v16152_v10  ;;  %v2350_v26 = vld [vmem:[%s16221_s6 + $0x78] sm:$0xff] }
 0x6bd   : > { %v1792_v29 = vpop.permute.xlu1 %1791  ;;  %11601 = vmatprep.subr.msk.mxu1 %vm364_vm0, %v1704_v31  ;;  %v1790_v33 = vpop.permute.xlu0 %1789  ;;  %v2365_v31 = vld [vmem:[%s16221_s6 + $0xf0] sm:$0xff] }
 0x6be   : > { %v1793_v34 = vsel %vm16134_vm8, %v1790_v33, %v1792_v29  ;;  %v1794_v35 = vsel %vm16134_vm8, %v1792_v29, %v1790_v33  ;;  %11602 = vmatpush1.msk.msra.mxu1 %vm364_vm0, %v1703_v30  ;;  %v2349_v33 = vld [vmem:[%s16221_s6 + $0x70] sm:$0xff]  ;;  %vm4536_vm8 = vcmask 39936  }
 0x6bf   : > { %v1795_v36 = vmul.f32 %v1794_v35, %v13254_v16  ;;  %v1796_v37 = vmul.f32 %v1793_v34, %v13258_v17  ;;  %11609 = vmatprep.subr.msk.mxu1 %vm364_vm0, %v1509_v55  ;;  %11603 = vmatmul.mubr.msk.f32.vlgmr.msra.gmra.mxu1 %vm382_vm3, %v11600_v32  ;;  %v11624_v34 = vld [vmem:[%s16062_s1 + $0x220] sm:$0xff]  ;;  %v2364_v35 = vld [vmem:[%s16221_s6 + $0xe8] sm:$0xff] }
 0x6c0   : > { %11610 = vmatpush1.msk.msra.mxu1 %vm364_vm0, %v1508_v53  ;;  %1956 = vmatprep.mubr.f32.mxu1 %v16152_v10  ;;  %v11612_v53 = vld [vmem:[%s16062_s1 + $0x1c0] sm:$0xff] }
 0x6c1   : > { %v1968_v41 = vpop.permute.xlu1 %1967  ;;  %11605 = vmatprep.subr.msk.mxu0 %vm364_vm0, %v1796_v37  ;;  %v1966_v45 = vpop.permute.xlu0 %1965  ;;  %v2362_v37 = vld [vmem:[%s16221_s6 + $0xd8] sm:$0xff] }
 0x6c2   : > { %v1969_v46 = vsel %vm16107_vm9, %v1966_v45, %v1968_v41  ;;  %v1970_v51 = vsel %vm16107_vm9, %v1968_v41, %v1966_v45  ;;  %11606 = vmatpush1.msk.msra.mxu0 %vm364_vm0, %v1795_v36  ;;  %v2347_v36 = vld [vmem:[%s16221_s6 + $0x60] sm:$0xff]  ;;  %v2345_v41 = vld [vmem:[%s16221_s6 + $0x50] sm:$0xff]  ;;  %v2360_v45 = vld [vmem:[%s16221_s6 + $0xc8] sm:$0xff]  ;;  %vm4373_vm9 = vcmask 130048  }
 0x6c3   : > { %v1971_v47 = vmul.f32 %v1969_v46, %v13274_v23  ;;  %v1972_v52 = vmul.f32 %v1970_v51, %v13278_v24  ;;  %11607 = vmatmul.mubr.msk.f32.vlgmr.msra.gmra.mxu0 %vm382_vm3, %v11604_v39  ;;  %11611 = vmatmul.mubr.msk.f32.vlgmr.msra.gmra.mxu1 %vm382_vm3, %v11608_v40  ;;  %v2346_v39 = vld [vmem:[%s16221_s6 + $0x58] sm:$0xff]  ;;  %v2361_v40 = vld [vmem:[%s16221_s6 + $0xd0] sm:$0xff]  ;;  %v2344_v46 = vld [vmem:[%s16221_s6 + $0x48] sm:$0xff] }
 0x6c4   : > { %2048 = vmatprep.mubr.f32.mxu0 %v16152_v10  ;;  %2140 = vmatprep.mubr.f32.mxu1 %v16152_v10  ;;  %v2359_v51 = vld [vmem:[%s16221_s6 + $0xc0] sm:$0xff] }
 0x6c5   : > { %v2060_v55 = vpop.permute.xlu1 %2059  ;;  %11613 = vmatprep.subr.msk.mxu0 %vm364_vm0, %v1972_v52  ;;  %v2058_v61 = vpop.permute.xlu0 %2057  ;;  %v2358_v52 = vld [vmem:[%s16221_s6 + $0xb8] sm:$0xff] }
 0x6c6   : > { %v2061_v62 = vsel %vm16090_vm7, %v2058_v61, %v2060_v55  ;;  %v2062_v63 = vsel %vm16090_vm7, %v2060_v55, %v2058_v61  ;;  %11614 = vmatpush1.msk.msra.mxu0 %vm364_vm0, %v1971_v47  ;;  %v2343_v47 = vld [vmem:[%s16221_s6 + $0x40] sm:$0xff]  ;;  %v2357_v55 = vld [vmem:[%s16221_s6 + $0xb0] sm:$0xff]  ;;  %vm16144_vm7 = vcmask 449536  }
 0x6c7   : > { %v2063_v1 = vmul.f32 %v2061_v62, %v13269_v21  ;;  %v2064_v2 = vmul.f32 %v2062_v63, %v13242_v8  ;;  %11615 = vmatmul.mubr.msk.f32.vlgmr.msra.gmra.mxu0 %vm382_vm3, %v11612_v53  ;;  %v2342_v53 = vld [vmem:[%s16221_s6 + $0x38] sm:$0xff]  ;;  %v2341_v61 = vld [vmem:[%s16221_s6 + $0x30] sm:$0xff]  ;;  %v2356_v62 = vld [vmem:[%s16221_s6 + $0xa8] sm:$0xff] }
 0x6c8   : > { %2232 = vmatprep.mubr.f32.mxu0 %v16152_v10  ;;  %v2340_v63 = vld [vmem:[%s16221_s6 + $0x28] sm:$0xff] }
 0x6c9   : > { %v2152_v6 = vpop.permute.xlu1 %2151  ;;  %11617 = vmatprep.subr.msk.mxu1 %vm364_vm0, %v2064_v2  ;;  %v2150_v9 = vpop.permute.xlu0 %2149  ;;  %v2339_v2 = vld [vmem:[%s16221_s6 + $0x20] sm:$0xff] }
 0x6ca   : > { %v2153_v11 = vsel %vm16089_vm10, %v2150_v9, %v2152_v6  ;;  %v2154_v12 = vsel %vm16089_vm10, %v2152_v6, %v2150_v9  ;;  %11618 = vmatpush1.msk.msra.mxu1 %vm364_vm0, %v2063_v1  ;;  %v2355_v1 = vld [vmem:[%s16221_s6 + $0xa0] sm:$0xff]  ;;  %v2338_v6 = vld [vmem:[%s16221_s6 + $0x18] sm:$0xff]  ;;  %v2353_v9 = vld [vmem:[%s16221_s6 + $0x90] sm:$0xff]  ;;  %vm3163_vm10 = vcmask 457728  }
 0x6cb   : > { %v2155_v13 = vmul.f32 %v2153_v11, %v13318_v38  ;;  %v2156_v14 = vmul.f32 %v2154_v12, %v13327_v42  ;;  %11619 = vmatmul.mubr.msk.f32.vlgmr.msra.gmra.mxu1 %vm382_vm3, %v11616_v5  ;;  %v2354_v5 = vld [vmem:[%s16221_s6 + $0x98] sm:$0xff]  ;;  %v2337_v11 = vld [vmem:[%s16221_s6 + $0x10] sm:$0xff]  ;;  %v2352_v12 = vld [vmem:[%s16221_s6 + $0x88] sm:$0xff] }
 0x6cc   : > { %2324 = vmatprep.mubr.f32.mxu1 %v16152_v10 }
 0x6cd   : > { %v2244_v22 = vpop.permute.xlu1 %2243  ;;  %11621 = vmatprep.subr.msk.mxu0 %vm364_vm0, %v2156_v14  ;;  %v2242_v25 = vpop.permute.xlu0 %2241  ;;  %v2351_v14 = vld [vmem:[%s16221_s6 + $0x80] sm:$0xff] }
 0x6ce   : > { %v2245_v27 = vsel %vm16088_vm11, %v2242_v25, %v2244_v22  ;;  %v2246_v30 = vsel %vm16088_vm11, %v2244_v22, %v2242_v25  ;;  %11622 = vmatpush1.msk.msra.mxu0 %vm364_vm0, %v2155_v13  ;;  %v2336_v13 = vld [vmem:[%s16221_s6 + $0x8] sm:$0xff]  ;;  %vm3074_vm11 = vcmask 465920  }
 0x6cf   : > { %v2247_v32 = vmul.f32 %v13352_v58, %v2245_v27  ;;  %v2248_v29 = vmul.f32 %v13357_v59, %v2246_v30  ;;  %11623 = vmatmul.mubr.msk.f32.vlgmr.msra.gmra.mxu0 %vm382_vm3, %v11620_v18  ;;  %11977 = vmatprep.subr.mxu0 %v2366_v20  ;;  %v2348_v58 = vld [vmem:[%s16221_s6 + $0x68] sm:$0xff]  ;;  %v2363_v59 = vld [vmem:[%s16221_s6 + $0xe0] sm:$0xff] }
 0x6d0   : > { %11978 = vmatpush3.msra.mxu0 %v2350_v26  ;;  %v2335_v18 = vld [vmem:[%s16221_s6] sm:$0xff]  ;;  %v11591_v25 = vld [vmem:[%s16063_s2 + $0x48] sm:$0xff]  ;;  %s16246_s6 = smov 11  }
 0x6d1   : > { %11625 = vmatprep.subr.msk.mxu1 %vm364_vm0, %v2248_v29  ;;  %11979 = vmatprep.subr.mxu0 %v2365_v31  ;;  %v11590_v20 = vld [vmem:[%s16063_s2 + $0x40] sm:$0xff] }
 0x6d2   : > { %11626 = vmatpush1.msk.msra.mxu1 %vm364_vm0, %v2247_v32  ;;  %11980 = vmatpush3.msra.mxu0 %v2349_v33  ;;  %vm2985_vm0 = vcmask 515072  }
 0x6d3   : > { %11627 = vmatmul.mubr.msk.f32.vlgmr.msra.gmra.mxu1 %vm382_vm3, %v11624_v34  ;;  %11981 = vmatprep.subr.mxu0 %v2364_v35 }
 0x6d4   : > { %11982 = vmatpush3.msra.mxu0 %v2348_v58  ;;  %12317 = vmatprep.subr.mxu1 %v16152_v10 }
 0x6d5   : > { %12319 = vmatprep.mubr.msk.f32.mxu1 %vm16142_vm1, %v16152_v10  ;;  %11983 = vmatprep.subr.mxu0 %v2363_v59 }
 0x6d6   : > { %11984 = vmatpush3.msra.mxu0 %v2347_v36 }
 0x6d7   : > { %11985 = vmatprep.subr.mxu0 %v2362_v37 }
 0x6d8   : > { %11986 = vmatpush3.msra.mxu0 %v2346_v39 }
 0x6d9   : > { %11987 = vmatprep.subr.mxu0 %v2361_v40 }
 0x6da   : > { %11988 = vmatpush3.msra.mxu0 %v2345_v41 }
 0x6db   : > { %11989 = vmatprep.subr.mxu0 %v2360_v45 }
 0x6dc   : > { %11990 = vmatpush3.msra.mxu0 %v2344_v46 }
 0x6dd   : > { %11991 = vmatprep.subr.mxu0 %v2359_v51 }
 0x6de   : > { %11992 = vmatpush3.msra.mxu0 %v2343_v47 }
 0x6df   : > { %11993 = vmatprep.subr.mxu0 %v2358_v52 }
 0x6e0   : > { %11994 = vmatpush3.msra.mxu0 %v2342_v53 }
 0x6e1   : > { %11995 = vmatprep.subr.mxu0 %v2357_v55 }
 0x6e2   : > { %11996 = vmatpush3.msra.mxu0 %v2341_v61 }
 0x6e3   : > { %11997 = vmatprep.subr.mxu0 %v2356_v62 }
 0x6e4   : > { %11998 = vmatpush3.msra.mxu0 %v2340_v63 }
 0x6e5   : > { %11999 = vmatprep.subr.mxu0 %v2355_v1 }
 0x6e6   : > { %12000 = vmatpush3.msra.mxu0 %v2339_v2 }
 0x6e7   : > { %12001 = vmatprep.subr.mxu0 %v2354_v5 }
 0x6e8   : > { %12002 = vmatpush3.msra.mxu0 %v2338_v6 }
 0x6e9   : > { %12003 = vmatprep.subr.mxu0 %v2353_v9 }
 0x6ea   : > { %12004 = vmatpush3.msra.mxu0 %v2337_v11 }
 0x6eb   : > { %12005 = vmatprep.subr.mxu0 %v2352_v12 }
 0x6ec   : > { %12006 = vmatpush3.msra.mxu0 %v2336_v13 }
 0x6ed   : > { %12007 = vmatprep.subr.mxu0 %v2351_v14 }
 0x6ee   : > { %12008 = vmatpush3.msra.mxu0 %v2335_v18 }
 0x6ef   : > { %12357 = vmatprep.subr.mxu0 %v16152_v10 }
 0x777   : > { %v1598_v22 = vpop.f32.mrf.mxu1 }
 0x778   : > { %v1603_v26 = vadd.f32 %v11590_v20, %v1598_v22 }
 0x779   : > { %v1600_v27 = vpop.f32.mrf.mxu1 }
 0x77a   : > { %v1604_v30 = vadd.f32 %v11591_v25, %v1600_v27 }
 0x77b   : > { %v1690_v31 = vpop.f32.mrf.mxu0 }
 0x77c   : > { %v1695_v32 = vadd.f32 %v1690_v31, %v1603_v26 }
 0x77d   : > { %v1692_v29 = vpop.f32.mrf.mxu0 }
 0x77e   : > { %v1696_v33 = vadd.f32 %v1692_v29, %v1604_v30 }
 0x77f   : > { %v1782_v34 = vpop.f32.mrf.mxu1 }
 0x780   : > { %v1787_v35 = vadd.f32 %v1782_v34, %v1695_v32 }
 0x781   : > { %v1784_v58 = vpop.f32.mrf.mxu1 }
 0x782   : > { %v1788_v59 = vadd.f32 %v1784_v58, %v1696_v33  ;;  %v11628_v33 = vld [vmem:[%s16064_s3 + $0x60] sm:$0xff] }
 0x783   : > { %v1874_v36 = vpop.f32.mrf.mxu0  ;;  %v1958_v37 = vpop.f32.mrf.mxu1 }
 0x784   : > { %v1879_v39 = vadd.f32 %v1874_v36, %v1787_v35 }
 0x785   : > { %v1876_v40 = vpop.f32.mrf.mxu0  ;;  %v1960_v41 = vpop.f32.mrf.mxu1 }
 0x786   : > { %v1880_v45 = vadd.f32 %v1876_v40, %v1788_v59  ;;  %v1963_v46 = vadd.f32 %v1958_v37, %v1879_v39 }
 0x787   : > { %v2050_v51 = vpop.f32.mrf.mxu0 }
 0x788   : > { %v1964_v47 = vadd.f32 %v1960_v41, %v1880_v45  ;;  %v2055_v52 = vadd.f32 %v2050_v51, %v1963_v46 }
 0x789   : > { %v2052_v53 = vpop.f32.mrf.mxu0 }
 0x78a   : > { %v2056_v61 = vadd.f32 %v2052_v53, %v1964_v47 }
 0x78b   : > { %v2142_v55 = vpop.f32.mrf.mxu1 }
 0x78c   : > { %v2147_v62 = vadd.f32 %v2142_v55, %v2055_v52  ;;  %v11630_v52 = vld [vmem:[%s16065_s4 + $0x20] sm:$0xff] }
 0x78d   : > { %v2144_v63 = vpop.f32.mrf.mxu1  ;;  %v13691_v53 = vrot.slane %v11630_v52, %v13160_v43 }
 0x78e   : > { %v2148_v2 = vadd.f32 %v2144_v63, %v2056_v61  ;;  %v13695_v63 = vrot.slane %v11630_v52, %v13180_v49 }
 0x78f   : > { %v2234_v1 = vpop.f32.mrf.mxu0 }
 0x790   : > { %v2239_v5 = vadd.f32 %v2234_v1, %v2147_v62 }
 0x791   : > { %v2236_v6 = vpop.f32.mrf.mxu0 }
 0x792   : > { %v2240_v11 = vadd.f32 %v2236_v6, %v2148_v2  ;;  %v11633_v2 = vld [vmem:[%s16062_s1 + $0x240] sm:$0xff] }
 0x793   : > { %v2326_v9 = vpop.f32.mrf.mxu1 }
 0x794   : > { %v2331_v12 = vadd.f32 %v2326_v9, %v2239_v5 }
 0x795   : > { %v2328_v13 = vpop.f32.mrf.mxu1 }
 0x796   : > { %v2332_v14 = vadd.f32 %v2328_v13, %v2240_v11  ;;  %v13636_v20 = vmax.f32 %v2331_v12, 0.0  ;;  %v13705_v11 = vrot.slane %v11630_v52, %v13192_v54  ;;  %v11635_v13 = vld [vmem:[%s16062_s1 + $0x260] sm:$0xff] }
 0x798   : > { %v13634_v18 = vmax.f32 %v2332_v14, 0.0  ;;  %16223 = vst [vmem:[#allocation19_spill] sm:$0xff] %v13636_v20 }
 0x79a   : > { %16222 = vst [vmem:[#allocation18_spill] sm:$0xff] %v13634_v18  ;;  %2431 = vmatprep.mubr.f32.mxu0 %v13634_v18 }
 0x79b   : > { %2432 = vmatmul.mubr.f32.vlgmr.msra.gmra.mxu0 %v13636_v20 }
 0x79c   : > { %12359 = vmatprep.mubr.msk.f32.mxu0 %vm16142_vm1, %v16152_v10 }
 0x85b   : > { %v12009_v22 = vpop.f32.mrf.mxu0 }
 0x85d   : > { %v12010_v25 = vpop.f32.mrf.mxu0 }
 0x85e   : > { %v12011_v26 = vadd.f32 %v12010_v25, %v12009_v22 }
 0x860   : > { %v2438_v27 = vsel %vm2437_vm12, %v12011_v26, 0.0  ;;  %v2441_v30 = vmul.f32 %v12011_v26, %v12011_v26 }
 0x861   : > { %2439 = vadd.xlane.f32.xlu0 %v2438_v27 }
 0x862   : > { %v2442_v31 = vsel %vm2437_vm12, %v2441_v30, 0.0  ;;  %v11637_v30 = vld [vmem:[%s16062_s1 + $0x280] sm:$0xff] }
 0x863   : > { %2443 = vadd.xlane.f32.xlu1 %v2442_v31 }
 0x8ea   : > { %v2440_v32 = vpop.xlane.xlu0 %2439 }
 0x8ec   : > { %v2444_v29 = vpop.xlane.xlu1 %2443 }
 0x8ed   : > { %v2445_v34 = vsel %vm379_vm2, %v2440_v32, %v2444_v29 }
 0x8ee   : > { %12318 = vmatpush3.msra.mxu1 %v2445_v34 }
 0x8ef   : > { %12320 = vmatmul.mubr.msk.f32.vlgmr.msra.gmra.mxu1 %vm2448_vm13, %v11628_v33  ;;  %12322 = vmatprep.subr.mxu1 %v16152_v10  ;;  %v13729_v33 = vrot.slane %v11630_v52, %v13238_v7 }
 0x8f0   : > { %12324 = vmatprep.mubr.msk.f32.mxu1 %vm16142_vm1, %v16152_v10 }
 0x9af   : > { %v2518_v35 = vpop.f32.mrf.mxu1 }
 0x9b0   : > { %v2522_v58 = vmul.f32 %v2518_v35, %v2518_v35  ;;  %2531 = vperm.xlu1 %12910, %v2518_v35  }
 0x9b1   : > { %v12321_v59 = vpop.f32.mrf.mxu1 }
 0x9b2   : > { %2524 = vrot.lane.b32.xlu0 %v2522_v58, %s16116_s21 }
 0xa24   : > { %v2525_v36 = vpop.permute.xlu0 %2524 }
 0xa25   : > { %v2527_v37 = vsub.f32 %v2518_v35, %v2525_v36  ;;  %v11639_v35 = vld [vmem:[%s16062_s1 + $0x2a0] sm:$0xff] }
 0xa27   : > { %v2528_v39 = vmax.f32 %v2527_v37, 0.0  ;;  %v13741_v37 = vrot.slane %v11630_v52, %v13208_v60 }
 0xa29   : > { %v2535_v40 = vadd.f32 1e-05, %v2528_v39  ;;  %16224 = vst [vmem:[#allocation20_spill] sm:$0xff] %v13741_v37 }
 0xa2b   : > { %12934 = vrsqrt.f32 %v2535_v40  ;;  %v2532_v45 = vpop.permute.xlu1 %2531  ;;  %v11641_v40 = vld [vmem:[%s16062_s1 + $0x2c0] sm:$0xff] }
 0xa2c   : > { %v2534_v46 = vsub.f32 %v12011_v26, %v2532_v45  ;;  %v13717_v26 = vrot.slane %v11630_v52, %v13229_v4 }
 0xa38   : > { %v12935_v41 = vpop.eup %12934 }
 0xa39   : > { %2539 = vperm.xlu0 %12908, %v12935_v41  }
 0xab4   : > { %v2540_v51 = vpop.permute.xlu0 %2539 }
 0xab5   : > { %v13653_v47 = vmul.f32 %v2540_v51, %v2534_v46  ;;  %v13754_v51 = vrot.slane %v11630_v52, %v13288_v28 }
 0xab7   : > { %2552 = vrot.lane.b32.xlu0 %v13653_v47, %s16112_s29  ;;  %2549 = vrot.lane.b32.xlu1 %v13653_v47, %s16114_s30  ;;  %16225 = vst [vmem:[#allocation21_spill] sm:$0xff] %v13754_v51 }
 0xabb   : > { %2641 = vrot.lane.b32.xlu0 %v13653_v47, %s16108_s11  ;;  %2638 = vrot.lane.b32.xlu1 %v13653_v47, %s16110_s12 }
 0xabf   : > { %2729 = vrot.lane.b32.xlu0 %v13653_v47, %s16103_s15  ;;  %2726 = vrot.lane.b32.xlu1 %v13653_v47, %s16105_s16 }
 0xac3   : > { %2818 = vrot.lane.b32.xlu0 %v13653_v47, %s16116_s21  ;;  %2815 = vrot.lane.b32.xlu1 %v13653_v47, %s16101_s17 }
 0xac7   : > { %2982 = vrot.lane.b32.xlu0 %v13653_v47, %s16099_s18  ;;  %2979 = vrot.lane.b32.xlu1 %v13653_v47, %s16132_s28 }
 0xacb   : > { %3071 = vrot.lane.b32.xlu0 %v13653_v47, %s16095_s19  ;;  %3068 = vrot.lane.b32.xlu1 %v13653_v47, %s16097_s20 }
 0xacf   : > { %3160 = vrot.lane.b32.xlu0 %v13653_v47, %s16093_s27  ;;  %3157 = vrot.lane.b32.xlu1 %v13653_v47, %s16086_s25  ;;  %s16228_s25 = smov 55   ;;  %s16128_s27 = smov 3  }
 0xad3   : > { %3249 = vrot.lane.b32.xlu0 %v13653_v47, %s16084_s24  ;;  %3246 = vrot.lane.b32.xlu1 %v13653_v47, %s16091_s22  ;;  %s16227_s24 = smov 120   ;;  %s16229_s22 = smov 119  }
 0xb29   : > { %v2553_v55 = vpop.permute.xlu0 %2552  ;;  %v2550_v61 = vpop.permute.xlu1 %2549 }
 0xb2a   : > { %v2556_v62 = vsel %vm2555_vm14, %v2550_v61, %v2553_v55  ;;  %v11643_v55 = vld [vmem:[%s16062_s1 + $0x2e0] sm:$0xff] }
 0xb2b   : > { %v2561_v1 = vmul.f32 %v13691_v53, %v2556_v62 }
 0xb2d   : > { %v2642_v5 = vpop.permute.xlu0 %2641  ;;  %12323 = vmatpush3.msra.mxu1 %v2561_v1  ;;  %v2639_v6 = vpop.permute.xlu1 %2638 }
 0xb2e   : > { %v2644_v9 = vsel %vm2448_vm13, %v2639_v6, %v2642_v5  ;;  %12325 = vmatmul.mubr.msk.f32.vlgmr.msra.gmra.mxu1 %vm2448_vm13, %v11633_v2  ;;  %12327 = vmatprep.subr.mxu1 %v16152_v10  ;;  %v11645_v2 = vld [vmem:[%s16062_s1 + $0x300] sm:$0xff]  ;;  %v13777_v6 = vld [vmem:[%s16065_s4 + $0x30] ss:$0 sm:$0xff] }
 0xb2f   : > { %v2649_v12 = vmul.f32 %v13695_v63, %v2644_v9  ;;  %12329 = vmatprep.mubr.msk.f32.mxu1 %vm16142_vm1, %v16152_v10  ;;  %v11647_v5 = vld [vmem:[%s16062_s1 + $0x320] sm:$0xff] }
 0xb31   : > { %v2730_v14 = vpop.permute.xlu0 %2729  ;;  %12328 = vmatpush3.msra.mxu1 %v2649_v12  ;;  %v2727_v22 = vpop.permute.xlu1 %2726 }
 0xb32   : > { %v2733_v25 = vsel %vm2732_vm15, %v2727_v22, %v2730_v14  ;;  %12330 = vmatmul.mubr.msk.f32.vlgmr.msra.gmra.mxu1 %vm2448_vm13, %v11635_v13  ;;  %12332 = vmatprep.subr.mxu1 %v16152_v10  ;;  %v11650_v22 = vld [vmem:[%s16062_s1 + $0x340] sm:$0xff] }
 0xb33   : > { %v2738_v27 = vmul.f32 %v13705_v11, %v2733_v25  ;;  %12334 = vmatprep.mubr.msk.f32.mxu1 %vm16142_vm1, %v16152_v10 }
 0xb35   : > { %v2819_v31 = vpop.permute.xlu0 %2818  ;;  %12333 = vmatpush3.msra.mxu1 %v2738_v27  ;;  %v2816_v32 = vpop.permute.xlu1 %2815 }
 0xb36   : > { %v2821_v29 = vsel %vm379_vm2, %v2816_v32, %v2819_v31  ;;  %12335 = vmatmul.mubr.msk.f32.vlgmr.msra.gmra.mxu1 %vm2448_vm13, %v11637_v30  ;;  %12337 = vmatprep.subr.mxu1 %v16152_v10 }
 0xb37   : > { %v2826_v34 = vmul.f32 %v13717_v26, %v2821_v29  ;;  %12339 = vmatprep.mubr.msk.f32.mxu1 %vm16142_vm1, %v16152_v10  ;;  %v11632_v29 = vld [vmem:[%s16063_s2 + $0x80] sm:$0xff] }
 0xb39   : > { %v2983_v58 = vpop.permute.xlu0 %2982  ;;  %12338 = vmatpush3.msra.mxu1 %v2826_v34  ;;  %v2980_v59 = vpop.permute.xlu1 %2979 }
 0xb3a   : > { %v2986_v36 = vsel %vm2985_vm0, %v2980_v59, %v2983_v58  ;;  %12340 = vmatmul.mubr.msk.f32.vlgmr.msra.gmra.mxu1 %vm2448_vm13, %v11639_v35  ;;  %12342 = vmatprep.subr.mxu1 %v16152_v10 }
 0xb3b   : > { %v2991_v39 = vmul.f32 %v13729_v33, %v2986_v36  ;;  %12343 = vmatpush3.msra.mxu1 %v13653_v47  ;;  %12344 = vmatprep.mubr.msk.f32.mxu1 %vm16142_vm1, %v16152_v10 }
 0xb3c   : > { %12347 = vmatprep.subr.mxu1 %v16152_v10 }
 0xb3d   : > { %v3072_v41 = vpop.permute.xlu0 %3071  ;;  %v3069_v45 = vpop.permute.xlu1 %3068 }
 0xb3e   : > { %v3075_v46 = vsel %vm3074_vm11, %v3069_v45, %v3072_v41  ;;  %12345 = vmatmul.mubr.msk.f32.vlgmr.msra.gmra.mxu1 %vm2448_vm13, %v11641_v40 }
 0xb3f   : > { %v3080_v47 = vmul.f32 %v13741_v37, %v3075_v46  ;;  %12348 = vmatpush3.msra.mxu1 %v2991_v39  ;;  %12349 = vmatprep.mubr.msk.f32.mxu1 %vm16142_vm1, %v16152_v10 }
 0xb40   : > { %12352 = vmatprep.subr.mxu1 %v16152_v10 }
 0xb41   : > { %v3161_v61 = vpop.permute.xlu0 %3160  ;;  %v3158_v62 = vpop.permute.xlu1 %3157 }
 0xb42   : > { %v3164_v1 = vsel %vm3163_vm10, %v3158_v62, %v3161_v61  ;;  %12350 = vmatmul.mubr.msk.f32.vlgmr.msra.gmra.mxu1 %vm2448_vm13, %v11643_v55 }
 0xb43   : > { %v3169_v52 = vmul.f32 %v13754_v51, %v3164_v1  ;;  %12353 = vmatpush3.msra.mxu1 %v3080_v47  ;;  %12354 = vmatprep.mubr.msk.f32.mxu1 %vm16142_vm1, %v16152_v10 }
 0xb44   : > { %12362 = vmatprep.subr.mxu1 %v16152_v10 }
 0xb45   : > { %v3250_v9 = vpop.permute.xlu0 %3249  ;;  %12358 = vmatpush3.msra.mxu0 %v3169_v52  ;;  %v3247_v12 = vpop.permute.xlu1 %3246 }
 0xb46   : > { %v3253_v13 = vsel %vm16144_vm7, %v3247_v12, %v3250_v9  ;;  %12355 = vmatmul.mubr.msk.f32.vlgmr.msra.gmra.mxu1 %vm2448_vm13, %v11645_v2  ;;  %12360 = vmatmul.mubr.msk.f32.vlgmr.msra.gmra.mxu0 %vm2448_vm13, %v11647_v5 }
 0xb47   : > { %v3258_v14 = vmul.f32 %v13777_v6, %v3253_v13  ;;  %12364 = vmatprep.mubr.msk.f32.mxu1 %vm16142_vm1, %v16152_v10  ;;  %12367 = vmatprep.subr.mxu0 %v16152_v10 }
 0xb48   : > { %12369 = vmatprep.mubr.msk.f32.mxu0 %vm16142_vm1, %v16152_v10  ;;  %vm5262_vm1 = vcmask 97280  }
 0xb49   : > { %12363 = vmatpush3.msra.mxu1 %v3258_v14 }
 0xb4a   : > { %12365 = vmatmul.mubr.msk.f32.vlgmr.msra.gmra.mxu1 %vm2448_vm13, %v11650_v22 }
 0xbee   : > { %v2633_v25 = vpop.f32.mrf.mxu1 }
 0xbef   : > { %v2637_v58 = vadd.f32 %v11632_v29, %v2633_v25  ;;  %v11652_v29 = vld [vmem:[%s16064_s3 + $0x90] sm:$0xff] }
 0xbf0   : > { %v12326_v27 = vpop.f32.mrf.mxu1 }
 0xbf2   : > { %v2721_v30 = vpop.f32.mrf.mxu1 }
 0xbf3   : > { %v2725_v36 = vadd.f32 %v2721_v30, %v2637_v58 }
 0xbf4   : > { %v12331_v31 = vpop.f32.mrf.mxu1 }
 0xbf6   : > { %v2810_v32 = vpop.f32.mrf.mxu1 }
 0xbf7   : > { %v2814_v40 = vadd.f32 %v2810_v32, %v2725_v36 }
 0xbf8   : > { %v12336_v34 = vpop.f32.mrf.mxu1 }
 0xbfa   : > { %v2898_v35 = vpop.f32.mrf.mxu1 }
 0xbfb   : > { %v2902_v45 = vadd.f32 %v2898_v35, %v2814_v40 }
 0xbfc   : > { %v12341_v59 = vpop.f32.mrf.mxu1 }
 0xbfe   : > { %v2974_v39 = vpop.f32.mrf.mxu1 }
 0xbff   : > { %v2978_v47 = vadd.f32 %v2974_v39, %v2902_v45 }
 0xc00   : > { %v12346_v41 = vpop.f32.mrf.mxu1 }
 0xc02   : > { %v3063_v46 = vpop.f32.mrf.mxu1 }
 0xc03   : > { %v3067_v61 = vadd.f32 %v3063_v46, %v2978_v47 }
 0xc04   : > { %v12351_v55 = vpop.f32.mrf.mxu1 }
 0xc05   : > { %v11656_v55 = vld [vmem:[%s16062_s1 + $0x360] sm:$0xff] }
 0xc06   : > { %v3152_v62 = vpop.f32.mrf.mxu1  ;;  %v3241_v1 = vpop.f32.mrf.mxu0  ;;  %12374 = vmatprep.mubr.msk.f32.mxu1 %vm2448_vm13, %v11656_v55 }
 0xc07   : > { %v3156_v52 = vadd.f32 %v3152_v62, %v3067_v61 }
 0xc08   : > { %v12356_v2 = vpop.f32.mrf.mxu1  ;;  %v12361_v5 = vpop.f32.mrf.mxu0 }
 0xc09   : > { %v3245_v9 = vadd.f32 %v3241_v1, %v3156_v52  ;;  %v11660_v1 = vld [vmem:[%s16062_s1 + $0x380] sm:$0xff] }
 0xc0a   : > { %v3330_v12 = vpop.f32.mrf.mxu1 }
 0xc0b   : > { %v3334_v13 = vadd.f32 %v3330_v12, %v3245_v9  ;;  %v11657_v12 = vld [vmem:[%s16062_s1 + $0x368] sm:$0xff] }
 0xc0c   : > { %v12366_v14 = vpop.f32.mrf.mxu1 }
 0xc0d   : > { %v3335_v22 = vmax.f32 %v3334_v13, 0.0 }
 0xc0f   : > { %v3336_v25 = vsel %vm2437_vm12, %v3335_v22, 0.0  ;;  %v3339_v27 = vmul.f32 %v3335_v22, %v3335_v22 }
 0xc10   : > { %3337 = vadd.xlane.f32.xlu1 %v3336_v25 }
 0xc11   : > { %v3340_v30 = vsel %vm2437_vm12, %v3339_v27, 0.0 }
 0xc12   : > { %3341 = vadd.xlane.f32.xlu0 %v3340_v30  ;;  %v11661_v30 = vld [vmem:[%s16062_s1 + $0x388] sm:$0xff] }
 0xc99   : > { %v3338_v31 = vpop.xlane.xlu1 %3337 }
 0xc9b   : > { %v3342_v32 = vpop.xlane.xlu0 %3341 }
 0xc9c   : > { %v3343_v34 = vsel %vm379_vm2, %v3338_v31, %v3342_v32 }
 0xc9d   : > { %12368 = vmatpush3.msra.mxu0 %v3343_v34 }
 0xc9e   : > { %12370 = vmatmul.mubr.msk.f32.vlgmr.msra.gmra.mxu0 %vm2448_vm13, %v11652_v29  ;;  %v11668_v29 = vld [vmem:[%s16062_s1 + $0x3c0] sm:$0xff] }
 0xc9f   : > { %12379 = vmatprep.mubr.msk.f32.mxu0 %vm2448_vm13, %v11660_v1 }
 0xd5e   : > { %v3415_v35 = vpop.f32.mrf.mxu0 }
 0xd5f   : > { %v3419_v58 = vmul.f32 %v3415_v35, %v3415_v35  ;;  %3428 = vperm.xlu1 %12910, %v3415_v35  }
 0xd60   : > { %v12371_v59 = vpop.f32.mrf.mxu0 }
 0xd61   : > { %3421 = vrot.lane.b32.xlu0 %v3419_v58, %s16116_s21  ;;  %v11665_v58 = vld [vmem:[%s16062_s1 + $0x3a8] sm:$0xff] }
 0xd63   : > { %12911 = vset.pattern.permute.xlu1 %v16156_v19 }
 0xdd3   : > { %v3422_v36 = vpop.permute.xlu0 %3421 }
 0xdd4   : > { %v3424_v39 = vsub.f32 %v3415_v35, %v3422_v36 }
 0xdd6   : > { %v3425_v40 = vmax.f32 %v3424_v39, 0.0  ;;  %v11672_v39 = vld [vmem:[%s16062_s1 + $0x3e0] sm:$0xff] }
 0xdd8   : > { %v3432_v41 = vadd.f32 1e-05, %v3425_v40 }
 0xdda   : > { %12936 = vrsqrt.f32 %v3432_v41  ;;  %v3429_v46 = vpop.permute.xlu1 %3428 }
 0xddb   : > { %v3431_v47 = vsub.f32 %v3335_v22, %v3429_v46  ;;  %v11664_v22 = vld [vmem:[%s16062_s1 + $0x3a0] sm:$0xff]  ;;  %v11673_v46 = vld [vmem:[%s16062_s1 + $0x3e8] sm:$0xff] }
 0xde7   : > { %v12937_v45 = vpop.eup %12936 }
 0xde8   : > { %3436 = vperm.xlu1 %12911, %v12937_v45   ;;  %v11669_v45 = vld [vmem:[%s16062_s1 + $0x3c8] sm:$0xff] }
 0xdec   : > { %12912 = vset.pattern.permute.xlu1 %v16154_v15 }
 0xe63   : > { %v3437_v61 = vpop.permute.xlu1 %3436 }
 0xe64   : > { %v3439_v62 = vmul.f32 %v3437_v61, %v3431_v47  ;;  %v11676_v61 = vld [vmem:[%s16062_s1 + $0x400] sm:$0xff] }
 0xe66   : > { %3447 = vrot.lane.b32.xlu1 %v3439_v62, %s16112_s29  ;;  %3444 = vrot.lane.b32.xlu0 %v3439_v62, %s16114_s30  ;;  %s16145_s29 = smov 12   ;;  %s16138_s30 = smov 124  }
 0xe6a   : > { %3541 = vrot.lane.b32.xlu1 %v3439_v62, %s16108_s11  ;;  %3538 = vrot.lane.b32.xlu0 %v3439_v62, %s16110_s12  ;;  %s16120_s11 = smov 13   ;;  %s16122_s12 = smov 125  }
 0xe6e   : > { %3635 = vrot.lane.b32.xlu1 %v3439_v62, %s16103_s15  ;;  %3632 = vrot.lane.b32.xlu0 %v3439_v62, %s16105_s16  ;;  %s16231_s15 = smov 113   ;;  %s16232_s16 = smov 15  }
 0xe72   : > { %3729 = vrot.lane.b32.xlu1 %v3439_v62, %s16116_s21  ;;  %3726 = vrot.lane.b32.xlu0 %v3439_v62, %s16101_s17  ;;  %s16147_s17 = smov 4  }
 0xe76   : > { %3909 = vrot.lane.b32.xlu1 %v3439_v62, %s16099_s18  ;;  %3906 = vrot.lane.b32.xlu0 %v3439_v62, %s16132_s28  ;;  %s16130_s18 = smov 116  }
 0xe7a   : > { %4003 = vrot.lane.b32.xlu1 %v3439_v62, %s16095_s19  ;;  %4000 = vrot.lane.b32.xlu0 %v3439_v62, %s16097_s20  ;;  %s16126_s19 = smov 5   ;;  %s16149_s20 = smov 117  }
 0xe7e   : > { %4097 = vrot.lane.b32.xlu1 %v3439_v62, %s16226_s23  ;;  %4094 = vrot.lane.b32.xlu0 %v3439_v62, %s16227_s24 }
 0xe82   : > { %4191 = vrot.lane.b32.xlu1 %v3439_v62, %s16228_s25  ;;  %4188 = vrot.lane.b32.xlu0 %v3439_v62, %s16229_s22 }
 0xed8   : > { %v3448_v52 = vpop.permute.xlu1 %3447  ;;  %v3445_v2 = vpop.permute.xlu0 %3444 }
 0xed9   : > { %v3450_v5 = vsel %vm2555_vm14, %v3445_v2, %v3448_v52  ;;  %v11677_v2 = vld [vmem:[%s16062_s1 + $0x408] sm:$0xff] }
 0xeda   : > { %v3451_v9 = vmul.f32 %v3450_v5, %v13691_v53 }
 0xedc   : > { %v3542_v13 = vpop.permute.xlu1 %3541  ;;  %12372 = vmatprep.subr.mxu1 %v3451_v9  ;;  %v3539_v14 = vpop.permute.xlu0 %3538 }
 0xedd   : > { %v3544_v25 = vsel %vm2448_vm13, %v3539_v14, %v3542_v13  ;;  %12373 = vmatpush3.msra.mxu1 %v3451_v9 }
 0xede   : > { %v3545_v27 = vmul.f32 %v3544_v25, %v13695_v63  ;;  %12375 = vmatmul.mubr.msk.f32.vlgmr.msra.gmra.mxu1 %vm2448_vm13, %v11657_v12  ;;  %v11684_v12 = vld [vmem:[%s16062_s1 + $0x440] sm:$0xff] }
 0xedf   : > { %12384 = vmatprep.mubr.msk.f32.mxu1 %vm2448_vm13, %v11664_v22  ;;  %v11681_v22 = vld [vmem:[%s16062_s1 + $0x428] sm:$0xff] }
 0xee0   : > { %v3636_v31 = vpop.permute.xlu1 %3635  ;;  %12377 = vmatprep.subr.mxu0 %v3545_v27  ;;  %v3633_v32 = vpop.permute.xlu0 %3632 }
 0xee1   : > { %v3638_v34 = vsel %vm2732_vm15, %v3633_v32, %v3636_v31  ;;  %12378 = vmatpush3.msra.mxu0 %v3545_v27 }
 0xee2   : > { %v3639_v35 = vmul.f32 %v3638_v34, %v13705_v11  ;;  %12380 = vmatmul.mubr.msk.f32.vlgmr.msra.gmra.mxu0 %vm2448_vm13, %v11661_v30  ;;  %v11688_v30 = vld [vmem:[%s16062_s1 + $0x460] sm:$0xff] }
 0xee3   : > { %12389 = vmatprep.mubr.msk.f32.mxu0 %vm2448_vm13, %v11668_v29  ;;  %v11685_v29 = vld [vmem:[%s16062_s1 + $0x448] sm:$0xff] }
 0xee4   : > { %v3730_v59 = vpop.permute.xlu1 %3729  ;;  %12382 = vmatprep.subr.mxu1 %v3639_v35  ;;  %v3727_v36 = vpop.permute.xlu0 %3726 }
 0xee5   : > { %v3732_v40 = vsel %vm379_vm2, %v3727_v36, %v3730_v59  ;;  %12383 = vmatpush3.msra.mxu1 %v3639_v35  ;;  %v11689_v36 = vld [vmem:[%s16062_s1 + $0x468] sm:$0xff] }
 0xee6   : > { %v3733_v41 = vmul.f32 %v3732_v40, %v13717_v26  ;;  %12392 = vmatprep.subr.mxu1 %v3439_v62  ;;  %12385 = vmatmul.mubr.msk.f32.vlgmr.msra.gmra.mxu1 %vm2448_vm13, %v11665_v58  ;;  %v4289_v40 = vld [vmem:[%s16230_s7 + $0x28] sm:$0xff] }
 0xee7   : > { %12393 = vmatpush3.msra.mxu1 %v3439_v62  ;;  %12394 = vmatprep.mubr.msk.f32.mxu1 %vm2448_vm13, %v11672_v39  ;;  %v11680_v62 = vld [vmem:[%s16062_s1 + $0x420] sm:$0xff]  ;;  %v4291_v39 = vld [vmem:[%s16230_s7 + $0x38] sm:$0xff] }
 0xee8   : > { %v3910_v47 = vpop.permute.xlu1 %3909  ;;  %12387 = vmatprep.subr.mxu0 %v3733_v41  ;;  %v3907_v55 = vpop.permute.xlu0 %3906 }
 0xee9   : > { %v3912_v1 = vsel %vm2985_vm0, %v3907_v55, %v3910_v47  ;;  %12388 = vmatpush3.msra.mxu0 %v3733_v41  ;;  %v4288_v41 = vld [vmem:[%s16230_s7 + $0x20] sm:$0xff]  ;;  %v4285_v47 = vld [vmem:[%s16230_s7 + $0x8] sm:$0xff] }
 0xeea   : > { %v3913_v52 = vmul.f32 %v3912_v1, %v13729_v33  ;;  %12390 = vmatmul.mubr.msk.f32.vlgmr.msra.gmra.mxu0 %vm2448_vm13, %v11669_v45  ;;  %12395 = vmatmul.mubr.msk.f32.vlgmr.msra.gmra.mxu1 %vm2448_vm13, %v11673_v46  ;;  %v4287_v45 = vld [vmem:[%s16230_s7 + $0x18] sm:$0xff]  ;;  %v4286_v46 = vld [vmem:[%s16230_s7 + $0x10] sm:$0xff]  ;;  %v4284_v55 = vld [vmem:[%s16230_s7] sm:$0xff] }
 0xeeb   : > { %12399 = vmatprep.mubr.msk.f32.mxu0 %vm2448_vm13, %v11676_v61  ;;  %12404 = vmatprep.mubr.msk.f32.mxu1 %vm2448_vm13, %v11680_v62  ;;  %v11655_v61 = vld [vmem:[%s16063_s2 + $0xd0] sm:$0xff]  ;;  %v11654_v1 = vld [vmem:[%s16063_s2 + $0xc0] sm:$0xff] }
 0xeec   : > { %v4004_v5 = vpop.permute.xlu1 %4003  ;;  %12397 = vmatprep.subr.mxu0 %v3913_v52  ;;  %v4001_v9 = vpop.permute.xlu0 %4000 }
 0xeed   : > { %v4006_v13 = vsel %vm3074_vm11, %v4001_v9, %v4004_v5  ;;  %12398 = vmatpush3.msra.mxu0 %v3913_v52 }
 0xeee   : > { %v4007_v14 = vmul.f32 %v4006_v13, %v13741_v37  ;;  %12400 = vmatmul.mubr.msk.f32.vlgmr.msra.gmra.mxu0 %vm2448_vm13, %v11677_v2 }
 0xeef   : > { %12409 = vmatprep.mubr.msk.f32.mxu0 %vm2448_vm13, %v11684_v12 }
 0xef0   : > { %v4098_v25 = vpop.permute.xlu1 %4097  ;;  %12402 = vmatprep.subr.mxu1 %v4007_v14  ;;  %v4095_v27 = vpop.permute.xlu0 %4094 }
 0xef1   : > { %v4100_v31 = vsel %vm3163_vm10, %v4095_v27, %v4098_v25  ;;  %12403 = vmatpush3.msra.mxu1 %v4007_v14 }
 0xef2   : > { %v4101_v32 = vmul.f32 %v4100_v31, %v13754_v51  ;;  %12405 = vmatmul.mubr.msk.f32.vlgmr.msra.gmra.mxu1 %vm2448_vm13, %v11681_v22 }
 0xef3   : > { %12414 = vmatprep.mubr.msk.f32.mxu1 %vm2448_vm13, %v11688_v30 }
 0xef4   : > { %v4192_v34 = vpop.permute.xlu1 %4191  ;;  %12407 = vmatprep.subr.mxu0 %v4101_v32  ;;  %v4189_v35 = vpop.permute.xlu0 %4188 }
 0xef5   : > { %v4194_v58 = vsel %vm16144_vm7, %v4189_v35, %v4192_v34  ;;  %12408 = vmatpush3.msra.mxu0 %v4101_v32  ;;  %vm5369_vm7 = vcmask 89088  }
 0xef6   : > { %v4195_v59 = vmul.f32 %v13777_v6, %v4194_v58  ;;  %12410 = vmatmul.mubr.msk.f32.vlgmr.msra.gmra.mxu0 %vm2448_vm13, %v11685_v29  ;;  %12417 = vmatprep.subr.mxu0 %v4291_v39  ;;  %v4290_v6 = vld [vmem:[%s16230_s7 + $0x30] sm:$0xff]  ;;  %s16256_s7 = smov 65  }
 0xef7   : > { %12418 = vmatpush3.msra.mxu0 %v4291_v39 }
 0xef8   : > { %12412 = vmatprep.subr.mxu1 %v4195_v59  ;;  %12419 = vmatprep.subr.mxu0 %v4290_v6 }
 0xef9   : > { %12413 = vmatpush3.msra.mxu1 %v4195_v59  ;;  %12420 = vmatpush3.msra.mxu0 %v4290_v6 }
 0xefa   : > { %12415 = vmatmul.mubr.msk.f32.vlgmr.msra.gmra.mxu1 %vm2448_vm13, %v11689_v36  ;;  %12421 = vmatprep.subr.mxu0 %v4289_v40 }
 0xefb   : > { %12422 = vmatpush3.msra.mxu0 %v4289_v40 }
 0xefc   : > { %12423 = vmatprep.subr.mxu0 %v4288_v41 }
 0xefd   : > { %12424 = vmatpush3.msra.mxu0 %v4288_v41 }
 0xefe   : > { %12425 = vmatprep.subr.mxu0 %v4287_v45 }
 0xeff   : > { %12426 = vmatpush3.msra.mxu0 %v4287_v45 }
 0xf00   : > { %12427 = vmatprep.subr.mxu0 %v4286_v46 }
 0xf01   : > { %12428 = vmatpush3.msra.mxu0 %v4286_v46 }
 0xf02   : > { %12429 = vmatprep.subr.mxu0 %v4285_v47 }
 0xf03   : > { %12430 = vmatpush3.msra.mxu0 %v4285_v47 }
 0xf04   : > { %12431 = vmatprep.subr.mxu0 %v4284_v55 }
 0xf05   : > { %12432 = vmatpush3.msra.mxu0 %v4284_v55 }
 0xf9e   : > { %v12376_v62 = vpop.f32.mrf.mxu1 }
 0xf9f   : > { %v3537_v52 = vadd.f32 %v12376_v62, %v11655_v61 }
 0xfa0   : > { %v3527_v2 = vpop.f32.mrf.mxu1 }
 0xfa1   : > { %v3536_v5 = vadd.f32 %v11654_v1, %v3527_v2 }
 0xfa2   : > { %v12381_v9 = vpop.f32.mrf.mxu0 }
 0xfa3   : > { %v3631_v12 = vadd.f32 %v12381_v9, %v3537_v52 }
 0xfa4   : > { %v3621_v13 = vpop.f32.mrf.mxu0 }
 0xfa5   : > { %v3630_v14 = vadd.f32 %v3621_v13, %v3536_v5 }
 0xfa6   : > { %v12386_v22 = vpop.f32.mrf.mxu1 }
 0xfa7   : > { %v3725_v25 = vadd.f32 %v12386_v22, %v3631_v12 }
 0xfa8   : > { %v3715_v27 = vpop.f32.mrf.mxu1 }
 0xfa9   : > { %v3724_v30 = vadd.f32 %v3715_v27, %v3630_v14 }
 0xfaa   : > { %v12391_v31 = vpop.f32.mrf.mxu0  ;;  %v12396_v32 = vpop.f32.mrf.mxu1 }
 0xfab   : > { %v3819_v29 = vadd.f32 %v12391_v31, %v3725_v25 }
 0xfac   : > { %v3809_v34 = vpop.f32.mrf.mxu0  ;;  %v3895_v35 = vpop.f32.mrf.mxu1 }
 0xfad   : > { %v3818_v58 = vadd.f32 %v3809_v34, %v3724_v30  ;;  %v3905_v59 = vadd.f32 %v12396_v32, %v3819_v29 }
 0xfae   : > { %v12401_v36 = vpop.f32.mrf.mxu0 }
 0xfaf   : > { %v3904_v39 = vadd.f32 %v3895_v35, %v3818_v58  ;;  %v3999_v6 = vadd.f32 %v12401_v36, %v3905_v59  ;;  %v11694_v35 = vld [vmem:[%s16064_s3 + $0xc0] sm:$0xff] }
 0xfb0   : > { %v3989_v40 = vpop.f32.mrf.mxu0  ;;  %12440 = vmatprep.mubr.msk.f32.mxu1 %vm4373_vm9, %v11694_v35  ;;  %v11702_v35 = vld [vmem:[%s16062_s1 + $0x480] sm:$0xff] }
 0xfb1   : > { %v3998_v45 = vadd.f32 %v3989_v40, %v3904_v39 }
 0xfb2   : > { %v12406_v41 = vpop.f32.mrf.mxu1 }
 0xfb3   : > { %v4093_v46 = vadd.f32 %v12406_v41, %v3999_v6  ;;  %v11695_v41 = vld [vmem:[%s16064_s3 + $0xc8] sm:$0xff] }
 0xfb4   : > { %v4083_v47 = vpop.f32.mrf.mxu1 }
 0xfb5   : > { %v4092_v61 = vadd.f32 %v4083_v47, %v3998_v45 }
 0xfb6   : > { %v12411_v55 = vpop.f32.mrf.mxu0 }
 0xfb7   : > { %v4187_v62 = vadd.f32 %v12411_v55, %v4093_v46 }
 0xfb8   : > { %v4177_v1 = vpop.f32.mrf.mxu0 }
 0xfb9   : > { %v4186_v2 = vadd.f32 %v4177_v1, %v4092_v61 }
 0xfba   : > { %v12416_v52 = vpop.f32.mrf.mxu1 }
 0xfbb   : > { %v4281_v5 = vadd.f32 %v12416_v52, %v4187_v62 }
 0xfbc   : > { %v4271_v9 = vpop.f32.mrf.mxu1 }
 0xfbd   : > { %v4280_v12 = vadd.f32 %v4271_v9, %v4186_v2  ;;  %v13942_v14 = vmax.f32 %v4281_v5, 0.0 }
 0xfbf   : > { %v13940_v13 = vmax.f32 %v4280_v12, 0.0 }
 0xfc1   : > { %12433 = vmatprep.mubr.msk.f32.mxu0 %vm2437_vm12, %v13940_v13 }
 0xfc2   : > { %12434 = vmatmul.mubr.msk.f32.vlgmr.msra.gmra.mxu0 %vm2437_vm12, %v13942_v14 }
0x1082   : > { %v12435_v22 = vpop.f32.mrf.mxu0 }
0x1083   : > { %v4377_v25 = vsel %vm4373_vm9, %v12435_v22, 0.0  ;;  %v4381_v27 = vmul.f32 %v12435_v22, %v12435_v22 }
0x1084   : > { %4378 = vadd.xlane.f32.xlu0 %v4377_v25  ;;  %v13949_v30 = vpop.f32.mrf.mxu0 }
0x1085   : > { %v4385_v31 = vsel %vm4373_vm9, %v4381_v27, 0.0  ;;  %v4374_v32 = vsel %vm4373_vm9, %v13949_v30, 0.0  ;;  %v4380_v29 = vmul.f32 %v13949_v30, %v13949_v30 }
0x1086   : > { %4386 = vadd.xlane.f32.xlu1 %v4385_v31 }
0x1087   : > { %v4382_v34 = vsel %vm4373_vm9, %v4380_v29, 0.0 }
0x1088   : > { %4375 = vadd.xlane.f32.xlu0 %v4374_v32 }
0x108c   : > { %4383 = vadd.xlane.f32.xlu0 %v4382_v34 }
0x110d   : > { %v4379_v58 = vpop.xlane.xlu0 %4378 }
0x110f   : > { %v4387_v59 = vpop.xlane.xlu1 %4386 }
0x1110   : > { %v4389_v36 = vsel %vm379_vm2, %v4379_v58, %v4387_v59 }
0x1111   : > { %12436 = vmatprep.subr.mxu1 %v4389_v36  ;;  %v4376_v39 = vpop.xlane.xlu0 %4375 }
0x1112   : > { %12437 = vmatpush3.msra.mxu1 %v4389_v36 }
0x1115   : > { %v4384_v6 = vpop.xlane.xlu0 %4383 }
0x1116   : > { %v4388_v40 = vsel %vm379_vm2, %v4376_v39, %v4384_v6  ;;  %v14051_v39 = vld [vmem:[%s16065_s4 + $0x40] sm:$0xff] }
0x1117   : > { %12438 = vmatprep.subr.mxu1 %v4388_v40  ;;  %v14055_v6 = vrot.slane %v14051_v39, %v13160_v43 }
0x1118   : > { %12439 = vmatpush3.msra.mxu1 %v4388_v40 }
0x1119   : > { %12441 = vmatmul.mubr.msk.f32.vlgmr.msra.gmra.mxu1 %vm4373_vm9, %v11695_v41 }
0x111a   : > { %12447 = vmatprep.mubr.msk.f32.mxu1 %vm4373_vm9, %v11702_v35 }
0x11d9   : > { %v12442_v45 = vpop.f32.mrf.mxu1 }
0x11da   : > { %v4475_v46 = vmul.f32 %v12442_v45, %v12442_v45 }
0x11db   : > { %v4465_v47 = vpop.f32.mrf.mxu1 }
0x11dc   : > { %v4474_v55 = vmul.f32 %v4465_v47, %v4465_v47  ;;  %4480 = vrot.lane.b32.xlu1 %v4475_v46, %s16116_s21 }
0x11de   : > { %4478 = vrot.lane.b32.xlu0 %v4474_v55, %s16116_s21 }
0x11e0   : > { %4495 = vperm.xlu1 %12912, %v12442_v45  }
0x11e4   : > { %4490 = vperm.xlu1 %12912, %v4465_v47  }
0x11e8   : > { %12913 = vset.pattern.permute.xlu1 %v16156_v19 }
0x124e   : > { %v4481_v61 = vpop.permute.xlu1 %4480 }
0x124f   : > { %v4485_v62 = vsub.f32 %v12442_v45, %v4481_v61 }
0x1250   : > { %v4479_v1 = vpop.permute.xlu0 %4478 }
0x1251   : > { %v4487_v52 = vmax.f32 %v4485_v62, 0.0  ;;  %v4484_v2 = vsub.f32 %v4465_v47, %v4479_v1  ;;  %v14061_v1 = vrot.slane %v14051_v39, %v13229_v4 }
0x1253   : > { %v4501_v5 = vadd.f32 1e-05, %v4487_v52  ;;  %v4486_v9 = vmax.f32 %v4484_v2, 0.0 }
0x1255   : > { %12938 = vrsqrt.f32 %v4501_v5  ;;  %v4500_v12 = vadd.f32 1e-05, %v4486_v9 }
0x1257   : > { %12940 = vrsqrt.f32 %v4500_v12 }
0x125b   : > { %v4496_v31 = vpop.permute.xlu1 %4495 }
0x125c   : > { %v4499_v32 = vsub.f32 %v12435_v22, %v4496_v31 }
0x125f   : > { %v4491_v22 = vpop.permute.xlu1 %4490 }
0x1260   : > { %v4498_v59 = vsub.f32 %v13949_v30, %v4491_v22  ;;  %v11714_v30 = vld [vmem:[%s16062_s1 + $0x4e0] sm:$0xff]  ;;  %v14075_v22 = vrot.slane %v14051_v39, %v13180_v49 }
0x1261   : > { %12468 = vmatprep.mubr.msk.f32.mxu0 %vm4373_vm9, %v11714_v30 }
0x1262   : > { %v12939_v25 = vpop.eup %12938 }
0x1263   : > { %4511 = vperm.xlu0 %12908, %v12939_v25  }
0x1264   : > { %v12941_v27 = vpop.eup %12940 }
0x1265   : > { %4506 = vperm.xlu1 %12913, %v12941_v27  }
0x1269   : > { %12914 = vset.pattern.permute.xlu1 %v16154_v15 }
0x12de   : > { %v4512_v29 = vpop.permute.xlu0 %4511 }
0x12df   : > { %v13971_v34 = vmul.f32 %v4512_v29, %v4499_v32 }
0x12e0   : > { %v4507_v58 = vpop.permute.xlu1 %4506 }
0x12e1   : > { %4532 = vrot.lane.b32.xlu1 %v13971_v34, %s16126_s19  ;;  %4526 = vrot.lane.b32.xlu0 %v13971_v34, %s16149_s20  ;;  %v14010_v36 = vmul.f32 %v4507_v58, %v4498_v59 }
0x12e5   : > { %4639 = vrot.lane.b32.xlu1 %v13971_v34, %s16147_s17  ;;  %4633 = vrot.lane.b32.xlu0 %v13971_v34, %s16130_s18 }
0x12e9   : > { %4745 = vrot.lane.b32.xlu1 %v13971_v34, %s16128_s27  ;;  %4739 = vrot.lane.b32.xlu0 %v13971_v34, %s16118_s26  ;;  %s16236_s26 = smov 125  }
0x12ed   : > { %4852 = vrot.lane.b32.xlu1 %v13971_v34, %s16116_s21  ;;  %4846 = vrot.lane.b32.xlu0 %v13971_v34, %s16231_s15  ;;  %s16235_s21 = smov 13  }
0x12f1   : > { %5044 = vrot.lane.b32.xlu1 %v13971_v34, %s16232_s16  ;;  %5038 = vrot.lane.b32.xlu0 %v13971_v34, %s16132_s28 }
0x12f5   : > { %5151 = vrot.lane.b32.xlu1 %v13971_v34, %s16120_s11  ;;  %5145 = vrot.lane.b32.xlu0 %v13971_v34, %s16122_s12  ;;  %s16136_s11 = smov 11   ;;  %s16124_s12 = smov 123  }
0x12f9   : > { %5258 = vrot.lane.b32.xlu1 %v13971_v34, %s16145_s29  ;;  %5252 = vrot.lane.b32.xlu0 %v13971_v34, %s16138_s30 }
0x12fd   : > { %5365 = vrot.lane.b32.xlu1 %v13971_v34, %s16136_s11  ;;  %5359 = vrot.lane.b32.xlu0 %v13971_v34, %s16124_s12  ;;  %s16233_s12 = smov 115  }
0x1301   : > { %4530 = vrot.lane.b32.xlu1 %v14010_v36, %s16126_s19  ;;  %4524 = vrot.lane.b32.xlu0 %v14010_v36, %s16149_s20  ;;  %s16234_s19 = smov 1   ;;  %s16243_s20 = smov 127  }
0x1305   : > { %4637 = vrot.lane.b32.xlu1 %v14010_v36, %s16147_s17  ;;  %4631 = vrot.lane.b32.xlu0 %v14010_v36, %s16130_s18  ;;  %s16242_s17 = smov 3   ;;  %s16253_s18 = smov 8  }
0x1309   : > { %4743 = vrot.lane.b32.xlu1 %v14010_v36, %s16128_s27  ;;  %4737 = vrot.lane.b32.xlu0 %v14010_v36, %s16233_s12  ;;  %s16237_s27 = smov 123  }
0x130d   : > { %4850 = vrot.lane.b32.xlu1 %v14010_v36, %s16234_s19  ;;  %4844 = vrot.lane.b32.xlu0 %v14010_v36, %s16231_s15 }
0x1311   : > { %5042 = vrot.lane.b32.xlu1 %v14010_v36, %s16232_s16  ;;  %5036 = vrot.lane.b32.xlu0 %v14010_v36, %s16132_s28  ;;  %s16240_s28 = smov 4  }
0x1315   : > { %5149 = vrot.lane.b32.xlu1 %v14010_v36, %s16235_s21  ;;  %5143 = vrot.lane.b32.xlu0 %v14010_v36, %s16236_s26 }
0x1319   : > { %5256 = vrot.lane.b32.xlu1 %v14010_v36, %s16145_s29  ;;  %5250 = vrot.lane.b32.xlu0 %v14010_v36, %s16138_s30  ;;  %s16238_s30 = smov 5   ;;  %s16241_s29 = smov 116  }
0x131d   : > { %5363 = vrot.lane.b32.xlu1 %v14010_v36, %s16136_s11  ;;  %5357 = vrot.lane.b32.xlu0 %v14010_v36, %s16237_s27  ;;  %s16239_s11 = smov 117  }
0x1353   : > { %v4533_v40 = vpop.permute.xlu1 %4532  ;;  %v4527_v41 = vpop.permute.xlu0 %4526 }
0x1354   : > { %v4538_v45 = vsel %vm4536_vm8, %v4527_v41, %v4533_v40  ;;  %v11703_v41 = vld [vmem:[%s16062_s1 + $0x488] sm:$0xff] }
0x1355   : > { %v4544_v46 = vmul.f32 %v14055_v6, %v4538_v45 }
0x1357   : > { %v4640_v47 = vpop.permute.xlu1 %4639  ;;  %12443 = vmatprep.subr.mxu1 %v4544_v46  ;;  %v4634_v55 = vpop.permute.xlu0 %4633 }
0x1358   : > { %12444 = vmatpush3.msra.mxu1 %v4544_v46  ;;  %v4644_v59 = vsel %vm382_vm3, %v4634_v55, %v4640_v47  ;;  %v14086_v46 = vrot.slane %v14051_v39, %v13192_v54  ;;  %v11706_v47 = vld [vmem:[%s16062_s1 + $0x4a0] sm:$0xff]  ;;  %v11707_v54 = vld [vmem:[%s16062_s1 + $0x4a8] sm:$0xff] }
0x1359   : > { %v4650_v45 = vmul.f32 %v14075_v22, %v4644_v59 }
0x135b   : > { %v4746_v61 = vpop.permute.xlu1 %4745  ;;  %v4740_v62 = vpop.permute.xlu0 %4739 }
0x135c   : > { %v4751_v55 = vsel %vm4749_vm6, %v4740_v62, %v4746_v61  ;;  %v11710_v62 = vld [vmem:[%s16062_s1 + $0x4c0] sm:$0xff] }
0x135f   : > { %v4853_v52 = vpop.permute.xlu1 %4852  ;;  %v4847_v2 = vpop.permute.xlu0 %4846 }
0x1360   : > { %v4857_v43 = vsel %vm379_vm2, %v4847_v2, %v4853_v52 }
0x1361   : > { %v4863_v5 = vmul.f32 %v14061_v1, %v4857_v43 }
0x1363   : > { %v5045_v9 = vpop.permute.xlu1 %5044  ;;  %12464 = vmatprep.subr.mxu0 %v4863_v5  ;;  %v5039_v12 = vpop.permute.xlu0 %5038 }
0x1364   : > { %12465 = vmatpush3.msra.mxu0 %v4863_v5  ;;  %v4757_v5 = vmul.f32 %v14086_v46, %v4751_v55 }
0x1367   : > { %v5152_v25 = vpop.permute.xlu1 %5151  ;;  %v5146_v27 = vpop.permute.xlu0 %5145 }
0x136b   : > { %v14065_v31 = vpop.permute.xlu1 %5258  ;;  %v14067_v32 = vpop.permute.xlu0 %5252 }
0x136f   : > { %v14069_v29 = vpop.permute.xlu1 %5365  ;;  %v14071_v4 = vpop.permute.xlu0 %5359 }
0x1373   : > { %v4531_v35 = vpop.permute.xlu1 %4530  ;;  %v4525_v58 = vpop.permute.xlu0 %4524 }
0x1374   : > { %v4537_v30 = vsel %vm4536_vm8, %v4525_v58, %v4531_v35 }
0x1375   : > { %v4543_v40 = vmul.f32 %v14055_v6, %v4537_v30  ;;  %v11711_v30 = vld [vmem:[%s16062_s1 + $0x4c8] sm:$0xff] }
0x1377   : > { %v4638_v49 = vpop.permute.xlu1 %4637  ;;  %12445 = vmatprep.subr.mxu1 %v4543_v40  ;;  %v4632_v52 = vpop.permute.xlu0 %4631 }
0x1378   : > { %v4643_v2 = vsel %vm382_vm3, %v4632_v52, %v4638_v49  ;;  %12446 = vmatpush3.msra.mxu1 %v4543_v40  ;;  %v14112_v40 = vrot.slane %v14051_v39, %v13238_v7  ;;  %v11718_v49 = vld [vmem:[%s16062_s1 + $0x500] sm:$0xff]  ;;  %v5050_v52 = vsel %vm5048_vm5, %v5039_v12, %v5045_v9  ;;  %v11715_v9 = vld [vmem:[%s16062_s1 + $0x4e8] sm:$0xff] }
0x1379   : > { %v4649_v43 = vmul.f32 %v14075_v22, %v4643_v2  ;;  %12450 = vmatprep.subr.mxu1 %v4650_v45  ;;  %12448 = vmatmul.mubr.msk.f32.vlgmr.msra.gmra.mxu1 %vm4373_vm9, %v11703_v41  ;;  %v5157_v2 = vsel %vm5155_vm4, %v5146_v27, %v5152_v25  ;;  %v11719_v27 = vld [vmem:[%s16062_s1 + $0x508] sm:$0xff] }
0x137a   : > { %12451 = vmatpush3.msra.mxu1 %v4650_v45  ;;  %12454 = vmatprep.mubr.msk.f32.mxu1 %vm4373_vm9, %v11706_v47  ;;  %v14120_v47 = vrot.slane %v14051_v39, %v13208_v60  ;;  %v5056_v60 = vmul.f32 %v14112_v40, %v5050_v52  ;;  %v11735_v52 = vld [vmem:[%s16062_s1 + $0x580] sm:$0xff] }
0x137b   : > { %v4744_v35 = vpop.permute.xlu1 %4743  ;;  %12452 = vmatprep.subr.mxu1 %v4649_v43  ;;  %v4738_v61 = vpop.permute.xlu0 %4737 }
0x137c   : > { %v4750_v58 = vsel %vm4749_vm6, %v4738_v61, %v4744_v35  ;;  %12453 = vmatpush3.msra.mxu1 %v4649_v43  ;;  %v5163_v43 = vmul.f32 %v14120_v47, %v5157_v2 }
0x137d   : > { %v4756_v59 = vmul.f32 %v14086_v46, %v4750_v58  ;;  %12457 = vmatprep.subr.mxu1 %v4757_v5  ;;  %12455 = vmatmul.mubr.msk.f32.vlgmr.msra.gmra.mxu1 %vm4373_vm9, %v11707_v54  ;;  %v5371_v58 = vsel %vm5369_vm7, %v14071_v4, %v14069_v29  ;;  %v11727_v29 = vld [vmem:[%s16062_s1 + $0x548] sm:$0xff] }
0x137e   : > { %12458 = vmatpush3.msra.mxu1 %v4757_v5  ;;  %12461 = vmatprep.mubr.msk.f32.mxu1 %vm4373_vm9, %v11710_v62  ;;  %v5264_v5 = vsel %vm5262_vm1, %v14067_v32, %v14065_v31  ;;  %v11723_v32 = vld [vmem:[%s16062_s1 + $0x528] sm:$0xff]  ;;  %v14163_v62 = vld [vmem:[%s16065_s4 + $0x50] ss:$0 sm:$0xff] }
0x137f   : > { %v4851_v41 = vpop.permute.xlu1 %4850  ;;  %12459 = vmatprep.subr.mxu1 %v4756_v59  ;;  %v4845_v45 = vpop.permute.xlu0 %4844  ;;  %v5377_v4 = vmul.f32 %v14163_v62, %v5371_v58 }
0x1380   : > { %v4856_v55 = vsel %vm379_vm2, %v4845_v45, %v4851_v41  ;;  %12460 = vmatpush3.msra.mxu1 %v4756_v59  ;;  %v11730_v41 = vld [vmem:[%s16062_s1 + $0x560] sm:$0xff] }
0x1381   : > { %v4862_v7 = vmul.f32 %v14061_v1, %v4856_v55  ;;  %12471 = vmatprep.subr.mxu1 %v13971_v34  ;;  %12462 = vmatmul.mubr.msk.f32.vlgmr.msra.gmra.mxu1 %vm4373_vm9, %v11711_v30 }
0x1382   : > { %12472 = vmatpush3.msra.mxu1 %v13971_v34  ;;  %12475 = vmatprep.mubr.msk.f32.mxu1 %vm4373_vm9, %v11718_v49  ;;  %v14140_v34 = vrot.slane %v14051_v39, %v13288_v28  ;;  %v11722_v28 = vld [vmem:[%s16062_s1 + $0x520] sm:$0xff] }
0x1383   : > { %v5043_v12 = vpop.permute.xlu1 %5042  ;;  %12466 = vmatprep.subr.mxu0 %v4862_v7  ;;  %12473 = vmatprep.subr.mxu1 %v14010_v36  ;;  %v5037_v25 = vpop.permute.xlu0 %5036 }
0x1384   : > { %v5049_v54 = vsel %vm5048_vm5, %v5037_v25, %v5043_v12  ;;  %12467 = vmatpush3.msra.mxu0 %v4862_v7  ;;  %12474 = vmatpush3.msra.mxu1 %v14010_v36  ;;  %v11726_v36 = vld [vmem:[%s16062_s1 + $0x540] sm:$0xff]  ;;  %v5270_v61 = vmul.f32 %v14140_v34, %v5264_v5  ;;  %v11731_v7 = vld [vmem:[%s16062_s1 + $0x568] sm:$0xff] }
0x1385   : > { %v5055_v35 = vmul.f32 %v14112_v40, %v5049_v54  ;;  %12469 = vmatmul.mubr.msk.f32.vlgmr.msra.gmra.mxu0 %vm4373_vm9, %v11715_v9  ;;  %12478 = vmatprep.subr.mxu0 %v5056_v60 }
0x1386   : > { %12485 = vmatprep.subr.mxu1 %v5163_v43  ;;  %12476 = vmatmul.mubr.msk.f32.vlgmr.msra.gmra.mxu1 %vm4373_vm9, %v11719_v27  ;;  %v11736_v27 = vld [vmem:[%s16062_s1 + $0x588] sm:$0xff] }
0x1387   : > { %12479 = vmatpush3.msra.mxu0 %v5056_v60  ;;  %12486 = vmatpush3.msra.mxu1 %v5163_v43  ;;  %v5150_v39 = vpop.permute.xlu1 %5149  ;;  %v5144_v31 = vpop.permute.xlu0 %5143  ;;  %v11701_v43 = vld [vmem:[%s16063_s2 + $0x110] sm:$0xff] }
0x1388   : > { %12480 = vmatprep.subr.mxu0 %v5055_v35  ;;  %v5156_v59 = vsel %vm5155_vm4, %v5144_v31, %v5150_v39  ;;  %12482 = vmatprep.mubr.msk.f32.mxu0 %vm4373_vm9, %v11722_v28 }
0x1389   : > { %v5162_v30 = vmul.f32 %v14120_v47, %v5156_v59  ;;  %12481 = vmatpush3.msra.mxu0 %v5055_v35  ;;  %12489 = vmatprep.mubr.msk.f32.mxu1 %vm4373_vm9, %v11726_v36  ;;  %v11700_v35 = vld [vmem:[%s16063_s2 + $0x100] sm:$0xff] }
0x138a   : > { %12483 = vmatmul.mubr.msk.f32.vlgmr.msra.gmra.mxu0 %vm4373_vm9, %v11723_v32  ;;  %12492 = vmatprep.subr.mxu0 %v5270_v61 }
0x138b   : > { %12493 = vmatpush3.msra.mxu0 %v5270_v61  ;;  %v5257_v45 = vpop.permute.xlu1 %5256  ;;  %12487 = vmatprep.subr.mxu1 %v5162_v30  ;;  %v5251_v49 = vpop.permute.xlu0 %5250 }
0x138c   : > { %v5263_v55 = vsel %vm5262_vm1, %v5251_v49, %v5257_v45  ;;  %12488 = vmatpush3.msra.mxu1 %v5162_v30  ;;  %12496 = vmatprep.mubr.msk.f32.mxu0 %vm4373_vm9, %v11730_v41 }
0x138d   : > { %v5269_v2 = vmul.f32 %v14140_v34, %v5263_v55  ;;  %12490 = vmatmul.mubr.msk.f32.vlgmr.msra.gmra.mxu1 %vm4373_vm9, %v11727_v29  ;;  %12499 = vmatprep.subr.mxu1 %v5377_v4 }
0x138e   : > { %12500 = vmatpush3.msra.mxu1 %v5377_v4  ;;  %12503 = vmatprep.mubr.msk.f32.mxu1 %vm4373_vm9, %v11735_v52 }
0x138f   : > { %v5364_v9 = vpop.permute.xlu1 %5363  ;;  %12494 = vmatprep.subr.mxu0 %v5269_v2  ;;  %v5358_v60 = vpop.permute.xlu0 %5357 }
0x1390   : > { %v5370_v12 = vsel %vm5369_vm7, %v5358_v60, %v5364_v9  ;;  %12495 = vmatpush3.msra.mxu0 %v5269_v2 }
0x1391   : > { %v5376_v25 = vmul.f32 %v14163_v62, %v5370_v12  ;;  %12497 = vmatmul.mubr.msk.f32.vlgmr.msra.gmra.mxu0 %vm4373_vm9, %v11731_v7 }
0x1393   : > { %12501 = vmatprep.subr.mxu1 %v5376_v25 }
0x1394   : > { %12502 = vmatpush3.msra.mxu1 %v5376_v25 }
0x1395   : > { %12504 = vmatmul.mubr.msk.f32.vlgmr.msra.gmra.mxu1 %vm4373_vm9, %v11736_v27 }
0x1439   : > { %v12449_v54 = vpop.f32.mrf.mxu1 }
0x143a   : > { %v4630_v5 = vadd.f32 %v12449_v54, %v11701_v43 }
0x143b   : > { %v4620_v28 = vpop.f32.mrf.mxu1 }
0x143c   : > { %v4629_v39 = vadd.f32 %v11700_v35, %v4620_v28 }
0x143d   : > { %v12456_v36 = vpop.f32.mrf.mxu1 }
0x143e   : > { %v4736_v31 = vadd.f32 %v12456_v36, %v4630_v5 }
0x143f   : > { %v4726_v32 = vpop.f32.mrf.mxu1 }
0x1440   : > { %v4735_v58 = vadd.f32 %v4726_v32, %v4629_v39 }
0x1441   : > { %v12463_v61 = vpop.f32.mrf.mxu1 }
0x1442   : > { %v4843_v59 = vadd.f32 %v12463_v61, %v4736_v31 }
0x1443   : > { %v4833_v30 = vpop.f32.mrf.mxu1 }
0x1444   : > { %v4842_v29 = vadd.f32 %v4833_v30, %v4735_v58 }
0x1445   : > { %v12470_v41 = vpop.f32.mrf.mxu0 }
0x1446   : > { %v4949_v4 = vadd.f32 %v12470_v41, %v4843_v59  ;;  %v12477_v49 = vpop.f32.mrf.mxu1 }
0x1447   : > { %v4939_v45 = vpop.f32.mrf.mxu0 }
0x1448   : > { %v4948_v52 = vadd.f32 %v4939_v45, %v4842_v29  ;;  %v5035_v55 = vadd.f32 %v12477_v49, %v4949_v4  ;;  %v5025_v2 = vpop.f32.mrf.mxu1 }
0x144a   : > { %v12484_v7 = vpop.f32.mrf.mxu0  ;;  %v5034_v60 = vadd.f32 %v5025_v2, %v4948_v52 }
0x144b   : > { %v5142_v12 = vadd.f32 %v12484_v7, %v5035_v55  ;;  %v11739_v55 = vld [vmem:[%s16064_s3 + $0xf0] sm:$0xff] }
0x144c   : > { %v5132_v25 = vpop.f32.mrf.mxu0  ;;  %12510 = vmatprep.mubr.msk.f32.mxu0 %vm4373_vm9, %v11739_v55 }
0x144d   : > { %v12491_v9 = vpop.f32.mrf.mxu1  ;;  %v5141_v54 = vadd.f32 %v5132_v25, %v5034_v60 }
0x144e   : > { %v5249_v5 = vadd.f32 %v12491_v9, %v5142_v12 }
0x144f   : > { %v5239_v27 = vpop.f32.mrf.mxu1 }
0x1450   : > { %v5248_v28 = vadd.f32 %v5239_v27, %v5141_v54  ;;  %v11740_v27 = vld [vmem:[%s16064_s3 + $0xf8] sm:$0xff] }
0x1451   : > { %v12498_v43 = vpop.f32.mrf.mxu0 }
0x1452   : > { %v5356_v36 = vadd.f32 %v12498_v43, %v5249_v5 }
0x1453   : > { %v5346_v35 = vpop.f32.mrf.mxu0 }
0x1454   : > { %v5355_v31 = vadd.f32 %v5346_v35, %v5248_v28 }
0x1455   : > { %v12505_v39 = vpop.f32.mrf.mxu1 }
0x1456   : > { %v5463_v32 = vadd.f32 %v12505_v39, %v5356_v36 }
0x1457   : > { %v5453_v61 = vpop.f32.mrf.mxu1 }
0x1458   : > { %v5465_v58 = vmax.f32 %v5463_v32, 0.0  ;;  %v5462_v59 = vadd.f32 %v5453_v61, %v5355_v31 }
0x145a   : > { %v14204_v30 = vmax.f32 %v5462_v59, 0.0  ;;  %v5469_v41 = vsel %vm4373_vm9, %v5465_v58, 0.0  ;;  %v5473_v29 = vmul.f32 %v5465_v58, %v5465_v58 }
0x145b   : > { %5470 = vadd.xlane.f32.xlu0 %v5469_v41 }
0x145c   : > { %v5477_v4 = vsel %vm4373_vm9, %v5473_v29, 0.0  ;;  %v5466_v45 = vsel %vm4373_vm9, %v14204_v30, 0.0  ;;  %v5472_v49 = vmul.f32 %v14204_v30, %v14204_v30 }
0x145d   : > { %5478 = vadd.xlane.f32.xlu1 %v5477_v4 }
0x145e   : > { %v5474_v52 = vsel %vm4373_vm9, %v5472_v49, 0.0 }
0x145f   : > { %5467 = vadd.xlane.f32.xlu0 %v5466_v45 }
0x1463   : > { %5475 = vadd.xlane.f32.xlu0 %v5474_v52 }
0x14e4   : > { %v5471_v2 = vpop.xlane.xlu0 %5470 }
0x14e6   : > { %v5479_v7 = vpop.xlane.xlu1 %5478 }
0x14e7   : > { %v5481_v9 = vsel %vm379_vm2, %v5471_v2, %v5479_v7  ;;  %v11747_v2 = vld [vmem:[%s16062_s1 + $0x5a0] sm:$0xff] }
0x14e8   : > { %12506 = vmatprep.subr.mxu0 %v5481_v9  ;;  %v5468_v60 = vpop.xlane.xlu0 %5467  ;;  %12517 = vmatprep.mubr.msk.f32.mxu1 %vm4373_vm9, %v11747_v2 }
0x14e9   : > { %12507 = vmatpush3.msra.mxu0 %v5481_v9  ;;  %v11755_v9 = vld [vmem:[%s16062_s1 + $0x5c0] sm:$0xff] }
0x14ec   : > { %v5476_v12 = vpop.xlane.xlu0 %5475 }
0x14ed   : > { %v5480_v25 = vsel %vm379_vm2, %v5468_v60, %v5476_v12 }
0x14ee   : > { %12508 = vmatprep.subr.mxu0 %v5480_v25 }
0x14ef   : > { %12509 = vmatpush3.msra.mxu0 %v5480_v25 }
0x14f0   : > { %12511 = vmatmul.mubr.msk.f32.vlgmr.msra.gmra.mxu0 %vm4373_vm9, %v11740_v27 }
0x14f1   : > { %12527 = vmatprep.mubr.msk.f32.mxu0 %vm4373_vm9, %v11755_v9  ;;  %v11748_v9 = vld [vmem:[%s16062_s1 + $0x5a8] sm:$0xff] }
0x15b0   : > { %v12512_v43 = vpop.f32.mrf.mxu0 }
0x15b1   : > { %v5567_v54 = vmul.f32 %v12512_v43, %v12512_v43 }
0x15b2   : > { %v5557_v5 = vpop.f32.mrf.mxu0 }
0x15b3   : > { %v5566_v35 = vmul.f32 %v5557_v5, %v5557_v5  ;;  %5572 = vrot.lane.b32.xlu1 %v5567_v54, %s16234_s19 }
0x15b5   : > { %5570 = vrot.lane.b32.xlu0 %v5566_v35, %s16234_s19 }
0x15b7   : > { %5587 = vperm.xlu1 %12914, %v12512_v43  }
0x15bb   : > { %5582 = vperm.xlu1 %12914, %v5557_v5  }
0x15bf   : > { %12915 = vset.pattern.permute.xlu1 %v16156_v19 }
0x1625   : > { %v5573_v28 = vpop.permute.xlu1 %5572 }
0x1626   : > { %v5577_v36 = vsub.f32 %v12512_v43, %v5573_v28 }
0x1627   : > { %v5571_v39 = vpop.permute.xlu0 %5570 }
0x1628   : > { %v5579_v31 = vmax.f32 %v5577_v36, 0.0  ;;  %v5576_v32 = vsub.f32 %v5557_v5, %v5571_v39 }
0x162a   : > { %v5593_v61 = vadd.f32 1e-05, %v5579_v31  ;;  %v5578_v59 = vmax.f32 %v5576_v32, 0.0 }
0x162c   : > { %12942 = vrsqrt.f32 %v5593_v61  ;;  %v5592_v41 = vadd.f32 1e-05, %v5578_v59 }
0x162e   : > { %12944 = vrsqrt.f32 %v5592_v41 }
0x1632   : > { %v5588_v45 = vpop.permute.xlu1 %5587 }
0x1633   : > { %v5591_v49 = vsub.f32 %v5465_v58, %v5588_v45 }
0x1636   : > { %v5583_v58 = vpop.permute.xlu1 %5582 }
0x1637   : > { %v5590_v60 = vsub.f32 %v14204_v30, %v5583_v58 }
0x1639   : > { %v12943_v29 = vpop.eup %12942 }
0x163a   : > { %5603 = vperm.xlu0 %12908, %v12943_v29  }
0x163b   : > { %v12945_v4 = vpop.eup %12944 }
0x163c   : > { %5598 = vperm.xlu1 %12915, %v12945_v4  }
0x163e   : > { %12916 = vset.pattern.permute.xlu0 %v16154_v15 }
0x1640   : > { %12917 = vset.pattern.permute.xlu1 %v16154_v15 }
0x16b5   : > { %v5604_v52 = vpop.permute.xlu0 %5603 }
0x16b6   : > { %v14228_v55 = vmul.f32 %v5604_v52, %v5591_v49 }
0x16b7   : > { %v5599_v7 = vpop.permute.xlu1 %5598 }
0x16b8   : > { %5623 = vrot.lane.b32.xlu1 %v14228_v55, %s16238_s30  ;;  %5617 = vrot.lane.b32.xlu0 %v14228_v55, %s16239_s11  ;;  %v14267_v12 = vmul.f32 %v5599_v7, %v5590_v60 }
0x16bc   : > { %5745 = vrot.lane.b32.xlu1 %v14228_v55, %s16240_s28  ;;  %5739 = vrot.lane.b32.xlu0 %v14228_v55, %s16241_s29 }
0x16c0   : > { %5867 = vrot.lane.b32.xlu1 %v14228_v55, %s16242_s17  ;;  %5861 = vrot.lane.b32.xlu0 %v14228_v55, %s16233_s12 }
0x16c4   : > { %5989 = vrot.lane.b32.xlu1 %v14228_v55, %s16234_s19  ;;  %5983 = vrot.lane.b32.xlu0 %v14228_v55, %s16231_s15 }
0x16c8   : > { %6217 = vrot.lane.b32.xlu1 %v14228_v55, %s16232_s16  ;;  %6211 = vrot.lane.b32.xlu0 %v14228_v55, %s16243_s20 }
0x16cc   : > { %6339 = vrot.lane.b32.xlu1 %v14228_v55, %s16235_s21  ;;  %6333 = vrot.lane.b32.xlu0 %v14228_v55, %s16236_s26 }
0x16d0   : > { %6461 = vrot.lane.b32.xlu1 %v14228_v55, %s16244_s13  ;;  %6455 = vrot.lane.b32.xlu0 %v14228_v55, %s16245_s0 }
0x16d4   : > { %5621 = vrot.lane.b32.xlu1 %v14267_v12, %s16238_s30  ;;  %5615 = vrot.lane.b32.xlu0 %v14267_v12, %s16239_s11  ;;  %s16322_s30 = smov 112   ;;  %s16323_s11 = smov 111  }
0x16d8   : > { %5743 = vrot.lane.b32.xlu1 %v14267_v12, %s16240_s28  ;;  %5737 = vrot.lane.b32.xlu0 %v14267_v12, %s16241_s29  ;;  %s16250_s28 = smov 73   ;;  %s16251_s29 = smov 9  }
0x16dc   : > { %5865 = vrot.lane.b32.xlu1 %v14267_v12, %s16242_s17  ;;  %5859 = vrot.lane.b32.xlu0 %v14267_v12, %s16233_s12  ;;  %s16252_s17 = smov 72   ;;  %s16258_s12 = smov 121  }
0x16e0   : > { %5987 = vrot.lane.b32.xlu1 %v14267_v12, %s16234_s19  ;;  %5981 = vrot.lane.b32.xlu0 %v14267_v12, %s16231_s15 }
0x16e4   : > { %6583 = vrot.lane.b32.xlu1 %v14228_v55, %s16246_s6  ;;  %6577 = vrot.lane.b32.xlu0 %v14228_v55, %s16237_s27 }
0x16e8   : > { %6215 = vrot.lane.b32.xlu1 %v14267_v12, %s16232_s16  ;;  %6209 = vrot.lane.b32.xlu0 %v14267_v12, %s16243_s20 }
0x16ec   : > { %6337 = vrot.lane.b32.xlu1 %v14267_v12, %s16235_s21  ;;  %6331 = vrot.lane.b32.xlu0 %v14267_v12, %s16236_s26  ;;  %s16320_s21 = smov 17   ;;  %s16321_s26 = smov 16  }
0x16f0   : > { %6459 = vrot.lane.b32.xlu1 %v14267_v12, %s16244_s13  ;;  %6453 = vrot.lane.b32.xlu0 %v14267_v12, %s16245_s0  ;;  %s16254_s0 = smov 71   ;;  %s16257_s13 = smov 63  }
0x16f4   : > { %6581 = vrot.lane.b32.xlu1 %v14267_v12, %s16246_s6  ;;  %6575 = vrot.lane.b32.xlu0 %v14267_v12, %s16237_s27  ;;  %s16255_s6 = smov 7   ;;  %s16259_s27 = smov 57  }
0x172a   : > { %v5624_v30 = vpop.permute.xlu1 %5623  ;;  %v5618_v25 = vpop.permute.xlu0 %5617 }
0x172b   : > { %v5628_v27 = vsel %vm4536_vm8, %v5618_v25, %v5624_v30 }
0x172c   : > { %v5630_v43 = vmul.f32 %v5628_v27, %v14055_v6  ;;  %v11749_v27 = vld [vmem:[%s16062_s1 + $0x5b0] sm:$0xff] }
0x172e   : > { %v5746_v54 = vpop.permute.xlu1 %5745  ;;  %12513 = vmatprep.subr.mxu1 %v5630_v43  ;;  %v5740_v5 = vpop.permute.xlu0 %5739 }
0x172f   : > { %v5750_v35 = vsel %vm382_vm3, %v5740_v5, %v5746_v54  ;;  %12514 = vmatpush3.msra.mxu1 %v5630_v43  ;;  %v11750_v5 = vld [vmem:[%s16062_s1 + $0x5b8] sm:$0xff] }
0x1730   : > { %v5752_v28 = vmul.f32 %v5750_v35, %v14075_v22  ;;  %v11756_v35 = vld [vmem:[%s16062_s1 + $0x5c8] sm:$0xff] }
0x1732   : > { %v5868_v36 = vpop.permute.xlu1 %5867  ;;  %12523 = vmatprep.subr.mxu0 %v5752_v28  ;;  %v5862_v39 = vpop.permute.xlu0 %5861 }
0x1733   : > { %12524 = vmatpush3.msra.mxu0 %v5752_v28  ;;  %v5872_v58 = vsel %vm4749_vm6, %v5862_v39, %v5868_v36 }
0x1734   : > { %v5874_v60 = vmul.f32 %v5872_v58, %v14086_v46  ;;  %v11764_v58 = vld [vmem:[%s16062_s1 + $0x5e8] sm:$0xff] }
0x1736   : > { %v5990_v31 = vpop.permute.xlu1 %5989  ;;  %v5984_v32 = vpop.permute.xlu0 %5983 }
0x1737   : > { %v5994_v54 = vsel %vm379_vm2, %v5984_v32, %v5990_v31 }
0x1738   : > { %v5996_v39 = vmul.f32 %v5994_v54, %v14061_v1  ;;  %v11766_v54 = vld [vmem:[%s16062_s1 + $0x5f8] sm:$0xff] }
0x173a   : > { %v6218_v61 = vpop.permute.xlu1 %6217  ;;  %v6212_v59 = vpop.permute.xlu0 %6211 }
0x173e   : > { %v6340_v41 = vpop.permute.xlu1 %6339  ;;  %v6334_v29 = vpop.permute.xlu0 %6333 }
0x1742   : > { %v14309_v4 = vpop.permute.xlu1 %6461  ;;  %v14311_v45 = vpop.permute.xlu0 %6455 }
0x1746   : > { %v5622_v49 = vpop.permute.xlu1 %5621  ;;  %v5616_v52 = vpop.permute.xlu0 %5615 }
0x1747   : > { %v5627_v2 = vsel %vm4536_vm8, %v5616_v52, %v5622_v49  ;;  %v11763_v49 = vld [vmem:[%s16062_s1 + $0x5e0] sm:$0xff]  ;;  %v11758_v52 = vld [vmem:[%s16062_s1 + $0x5d8] sm:$0xff] }
0x1748   : > { %v5629_v7 = vmul.f32 %v5627_v2, %v14055_v6 }
0x174a   : > { %v5744_v30 = vpop.permute.xlu1 %5743  ;;  %12515 = vmatprep.subr.mxu1 %v5629_v7  ;;  %v5738_v25 = vpop.permute.xlu0 %5737 }
0x174b   : > { %v5749_v43 = vsel %vm382_vm3, %v5738_v25, %v5744_v30  ;;  %12516 = vmatpush3.msra.mxu1 %v5629_v7  ;;  %v11765_v7 = vld [vmem:[%s16062_s1 + $0x5f0] sm:$0xff]  ;;  %v6222_v30 = vsel %vm5048_vm5, %v6212_v59, %v6218_v61  ;;  %v6344_v25 = vsel %vm5155_vm4, %v6334_v29, %v6340_v41  ;;  %v11772_v61 = vld [vmem:[%s16062_s1 + $0x608] sm:$0xff]  ;;  %v11779_v29 = vld [vmem:[%s16062_s1 + $0x620] sm:$0xff]  ;;  %vm16305_vm3 = vcmask 449536  }
0x174c   : > { %v5751_v6 = vmul.f32 %v5749_v43, %v14075_v22  ;;  %12518 = vmatmul.mubr.msk.f32.vlgmr.msra.gmra.mxu1 %vm4373_vm9, %v11748_v9  ;;  %12533 = vmatprep.subr.mxu1 %v5874_v60  ;;  %v11757_v22 = vld [vmem:[%s16062_s1 + $0x5d0] sm:$0xff]  ;;  %v6224_v59 = vmul.f32 %v6222_v30, %v14112_v40  ;;  %v6346_v41 = vmul.f32 %v6344_v25, %v14120_v47  ;;  %v11790_v30 = vld [vmem:[%s16062_s1 + $0x658] sm:$0xff]  ;;  %v11796_v25 = vld [vmem:[%s16062_s1 + $0x668] sm:$0xff] }
0x174d   : > { %12534 = vmatpush3.msra.mxu1 %v5874_v60  ;;  %12520 = vmatprep.mubr.msk.f32.mxu1 %vm4373_vm9, %v11749_v27  ;;  %v11771_v27 = vld [vmem:[%s16062_s1 + $0x600] sm:$0xff]  ;;  %vm16311_vm8 = vmmov %vm16305_vm3 }
0x174e   : > { %v5866_v28 = vpop.permute.xlu1 %5865  ;;  %12525 = vmatprep.subr.mxu0 %v5751_v6  ;;  %v5860_v36 = vpop.permute.xlu0 %5859 }
0x174f   : > { %v5871_v31 = vsel %vm4749_vm6, %v5860_v36, %v5866_v28  ;;  %12526 = vmatpush3.msra.mxu0 %v5751_v6  ;;  %v6466_v28 = vsel %vm5262_vm1, %v14311_v45, %v14309_v4  ;;  %v11787_v4 = vld [vmem:[%s16062_s1 + $0x640] sm:$0xff]  ;;  %vm16309_vm6 = vmmov %vm16305_vm3 }
0x1750   : > { %v5873_v32 = vmul.f32 %v5871_v31, %v14086_v46  ;;  %12521 = vmatmul.mubr.msk.f32.gmra.mxu1 %vm4373_vm9, %v11750_v5  ;;  %12528 = vmatmul.mubr.msk.f32.vlgmr.msra.gmra.mxu0 %vm4373_vm9, %v11756_v35  ;;  %v11780_v35 = vld [vmem:[%s16062_s1 + $0x628] sm:$0xff]  ;;  %v6468_v45 = vmul.f32 %v6466_v28, %v14140_v34  ;;  %v11814_v28 = vld [vmem:[%s16062_s1 + $0x6b8] sm:$0xff] }
0x1751   : > { %12543 = vmatprep.subr.mxu0 %v5996_v39  ;;  %12530 = vmatprep.mubr.msk.f32.mxu0 %vm4373_vm9, %v11757_v22 }
0x1752   : > { %12544 = vmatpush3.msra.mxu0 %v5996_v39  ;;  %v5988_v46 = vpop.permute.xlu1 %5987  ;;  %12535 = vmatprep.subr.mxu1 %v5873_v32  ;;  %v5982_v2 = vpop.permute.xlu0 %5981  ;;  %v11781_v39 = vld [vmem:[%s16062_s1 + $0x630] sm:$0xff] }
0x1753   : > { %v5993_v9 = vsel %vm379_vm2, %v5982_v2, %v5988_v46  ;;  %12536 = vmatpush3.msra.mxu1 %v5873_v32  ;;  %12537 = vmatprep.mubr.msk.f32.mxu1 %vm4373_vm9, %v11763_v49  ;;  %v11782_v32 = vld [vmem:[%s16062_s1 + $0x638] sm:$0xff]  ;;  %v11788_v49 = vld [vmem:[%s16062_s1 + $0x648] sm:$0xff]  ;;  %v11789_v2 = vld [vmem:[%s16062_s1 + $0x650] sm:$0xff] }
0x1754   : > { %v5995_v60 = vmul.f32 %v5993_v9, %v14061_v1  ;;  %12531 = vmatmul.mubr.msk.f32.gmra.mxu0 %vm4373_vm9, %v11758_v52  ;;  %12538 = vmatmul.mubr.msk.f32.vlgmr.msra.gmra.mxu1 %vm4373_vm9, %v11764_v58 }
0x1755   : > { %12553 = vmatprep.subr.mxu1 %v14228_v55  ;;  %12540 = vmatprep.mubr.msk.f32.mxu1 %vm4373_vm9, %v11765_v7  ;;  %v11795_v7 = vld [vmem:[%s16062_s1 + $0x660] sm:$0xff] }
0x1756   : > { %12554 = vmatpush3.msra.mxu1 %v14228_v55  ;;  %v6584_v43 = vpop.permute.xlu1 %6583  ;;  %12545 = vmatprep.subr.mxu0 %v5995_v60  ;;  %v6578_v1 = vpop.permute.xlu0 %6577  ;;  %v11773_v55 = vld [vmem:[%s16062_s1 + $0x610] sm:$0xff] }
0x1757   : > { %12555 = vmatprep.subr.mxu1 %v14267_v12  ;;  %12546 = vmatpush3.msra.mxu0 %v5995_v60  ;;  %v6588_v52 = vsel %vm5369_vm7, %v6578_v1, %v6584_v43  ;;  %v11797_v1 = vld [vmem:[%s16062_s1 + $0x670] sm:$0xff] }
0x1758   : > { %12547 = vmatprep.mubr.msk.f32.mxu0 %vm4373_vm9, %v11771_v27  ;;  %12556 = vmatpush3.msra.mxu1 %v14267_v12  ;;  %v11774_v12 = vld [vmem:[%s16062_s1 + $0x618] sm:$0xff]  ;;  %v6590_v9 = vmul.f32 %v14163_v62, %v6588_v52 }
0x1759   : > { %12541 = vmatmul.mubr.msk.f32.gmra.mxu1 %vm4373_vm9, %v11766_v54  ;;  %12548 = vmatmul.mubr.msk.f32.vlgmr.msra.gmra.mxu0 %vm4373_vm9, %v11772_v61  ;;  %v11803_v54 = vld [vmem:[%s16062_s1 + $0x680] sm:$0xff] }
0x175a   : > { %12563 = vmatprep.subr.mxu0 %v6224_v59  ;;  %12573 = vmatprep.subr.mxu1 %v6346_v41  ;;  %v6216_v6 = vpop.permute.xlu1 %6215  ;;  %v6210_v5 = vpop.permute.xlu0 %6209 }
0x175b   : > { %12564 = vmatpush3.msra.mxu0 %v6224_v59  ;;  %v6221_v36 = vsel %vm5048_vm5, %v6210_v5, %v6216_v6  ;;  %12550 = vmatprep.mubr.msk.f32.mxu0 %vm4373_vm9, %v11773_v55  ;;  %v11811_v5 = vld [vmem:[%s16062_s1 + $0x6a0] sm:$0xff]  ;;  %vm16308_vm5 = vmmov %vm16305_vm3 }
0x175c   : > { %v6223_v22 = vmul.f32 %v6221_v36, %v14112_v40  ;;  %12557 = vmatprep.mubr.msk.f32.mxu1 %vm4373_vm9, %v11779_v29  ;;  %v11805_v29 = vld [vmem:[%s16062_s1 + $0x690] sm:$0xff]  ;;  %v6702_v36 = vld [vmem:[%s16247_s8 + $0x8] sm:$0xff] }
0x175d   : > { %12551 = vmatmul.mubr.msk.f32.gmra.mxu0 %vm4373_vm9, %v11774_v12  ;;  %12558 = vmatmul.mubr.msk.f32.vlgmr.msra.gmra.mxu1 %vm4373_vm9, %v11780_v35  ;;  %v11806_v12 = vld [vmem:[%s16062_s1 + $0x698] sm:$0xff]  ;;  %v11813_v35 = vld [vmem:[%s16062_s1 + $0x6b0] sm:$0xff] }
0x175e   : > { %12574 = vmatpush3.msra.mxu1 %v6346_v41  ;;  %v6338_v31 = vpop.permute.xlu1 %6337  ;;  %12565 = vmatprep.subr.mxu0 %v6223_v22  ;;  %v6332_v40 = vpop.permute.xlu0 %6331  ;;  %v11804_v41 = vld [vmem:[%s16062_s1 + $0x688] sm:$0xff] }
0x175f   : > { %v6343_v58 = vsel %vm5155_vm4, %v6332_v40, %v6338_v31  ;;  %12560 = vmatprep.mubr.msk.f32.mxu1 %vm4373_vm9, %v11781_v39  ;;  %12566 = vmatpush3.msra.mxu0 %v6223_v22  ;;  %v6701_v22 = vld [vmem:[%s16247_s8] sm:$0xff]  ;;  %vm16306_vm4 = vmmov %vm16305_vm3 }
0x1760   : > { %v6345_v46 = vmul.f32 %v6343_v58, %v14120_v47  ;;  %12567 = vmatprep.mubr.msk.f32.mxu0 %vm4373_vm9, %v11787_v4  ;;  %12583 = vmatprep.subr.mxu0 %v6468_v45 }
0x1761   : > { %12561 = vmatmul.mubr.msk.f32.gmra.mxu1 %vm4373_vm9, %v11782_v32  ;;  %12568 = vmatmul.mubr.msk.f32.vlgmr.msra.gmra.mxu0 %vm4373_vm9, %v11788_v49 }
0x1762   : > { %12584 = vmatpush3.msra.mxu0 %v6468_v45  ;;  %v6460_v60 = vpop.permute.xlu1 %6459  ;;  %12575 = vmatprep.subr.mxu1 %v6345_v46  ;;  %v6454_v47 = vpop.permute.xlu0 %6453 }
0x1763   : > { %v6465_v27 = vsel %vm5262_vm1, %v6454_v47, %v6460_v60  ;;  %12570 = vmatprep.mubr.msk.f32.mxu0 %vm4373_vm9, %v11789_v2  ;;  %12576 = vmatpush3.msra.mxu1 %v6345_v46  ;;  %v11744_v47 = vld [vmem:[%s16063_s2 + $0x150] sm:$0xff]  ;;  %vm6855_vm1 = vcmask 392192  }
0x1764   : > { %v6467_v43 = vmul.f32 %v6465_v27, %v14140_v34  ;;  %12577 = vmatprep.mubr.msk.f32.mxu1 %vm4373_vm9, %v11795_v7  ;;  %12593 = vmatprep.subr.mxu1 %v6590_v9  ;;  %v11798_v34 = vld [vmem:[%s16062_s1 + $0x678] sm:$0xff] }
0x1765   : > { %12571 = vmatmul.mubr.msk.f32.gmra.mxu0 %vm4373_vm9, %v11790_v30  ;;  %12578 = vmatmul.mubr.msk.f32.vlgmr.msra.gmra.mxu1 %vm4373_vm9, %v11796_v25  ;;  %v11743_v30 = vld [vmem:[%s16063_s2 + $0x140] sm:$0xff] }
0x1766   : > { %12594 = vmatpush3.msra.mxu1 %v6590_v9  ;;  %v6582_v61 = vpop.permute.xlu1 %6581  ;;  %12585 = vmatprep.subr.mxu0 %v6467_v43  ;;  %v6576_v59 = vpop.permute.xlu0 %6575 }
0x1767   : > { %v6587_v55 = vsel %vm5369_vm7, %v6576_v59, %v6582_v61  ;;  %12580 = vmatprep.mubr.msk.f32.mxu1 %vm4373_vm9, %v11797_v1  ;;  %12586 = vmatpush3.msra.mxu0 %v6467_v43  ;;  %v11746_v59 = vld [vmem:[%s16063_s2 + $0x170] sm:$0xff]  ;;  %vm16310_vm7 = vmmov %vm16305_vm3 }
0x1768   : > { %v6589_v6 = vmul.f32 %v14163_v62, %v6587_v55  ;;  %12587 = vmatprep.mubr.msk.f32.mxu0 %vm4373_vm9, %v11803_v54  ;;  %v11812_v62 = vld [vmem:[%s16062_s1 + $0x6a8] sm:$0xff]  ;;  %12603 = vmatprep.subr.mxu0 %v6702_v36 }
0x1769   : > { %12581 = vmatmul.mubr.msk.f32.gmra.mxu1 %vm4373_vm9, %v11798_v34  ;;  %12588 = vmatmul.mubr.msk.f32.vlgmr.msra.gmra.mxu0 %vm4373_vm9, %v11804_v41  ;;  %v11745_v41 = vld [vmem:[%s16063_s2 + $0x160] sm:$0xff] }
0x176a   : > { %12595 = vmatprep.subr.mxu1 %v6589_v6  ;;  %12590 = vmatprep.mubr.msk.f32.mxu0 %vm4373_vm9, %v11805_v29 }
0x176b   : > { %12596 = vmatpush3.msra.mxu1 %v6589_v6  ;;  %12597 = vmatprep.mubr.msk.f32.mxu1 %vm4373_vm9, %v11811_v5 }
0x176c   : > { %12604 = vmatpush3.msra.mxu0 %v6702_v36 }
0x176d   : > { %12591 = vmatmul.mubr.msk.f32.gmra.mxu0 %vm4373_vm9, %v11806_v12  ;;  %12598 = vmatmul.mubr.msk.f32.vlgmr.msra.gmra.mxu1 %vm4373_vm9, %v11812_v62 }
0x176e   : > { %12600 = vmatprep.mubr.msk.f32.mxu1 %vm4373_vm9, %v11813_v35  ;;  %12605 = vmatprep.subr.mxu0 %v6701_v22 }
0x176f   : > { %12606 = vmatpush3.msra.mxu0 %v6701_v22 }
0x1771   : > { %12601 = vmatmul.mubr.msk.f32.gmra.mxu1 %vm4373_vm9, %v11814_v28 }
0x180c   : > { %v12519_v39 = vpop.f32.mrf.mxu1 }
0x180d   : > { %v5734_v43 = vadd.f32 %v12519_v39, %v11744_v47 }
0x180e   : > { %v5714_v4 = vpop.f32.mrf.mxu1 }
0x180f   : > { %v5733_v61 = vadd.f32 %v11743_v30, %v5714_v4 }
0x1810   : > { %v12522_v45 = vpop.f32.mrf.mxu1  ;;  %v12529_v31 = vpop.f32.mrf.mxu0 }
0x1811   : > { %v5856_v34 = vadd.f32 %v12529_v31, %v5734_v43  ;;  %v5736_v5 = vadd.f32 %v12522_v45, %v11746_v59 }
0x1812   : > { %v5724_v40 = vpop.f32.mrf.mxu1  ;;  %v5836_v32 = vpop.f32.mrf.mxu0 }
0x1813   : > { %v5855_v6 = vadd.f32 %v5836_v32, %v5733_v61  ;;  %v5735_v28 = vadd.f32 %v11745_v41, %v5724_v40 }
0x1814   : > { %v12532_v49 = vpop.f32.mrf.mxu0  ;;  %v12539_v52 = vpop.f32.mrf.mxu1 }
0x1815   : > { %v5978_v12 = vadd.f32 %v12539_v52, %v5856_v34  ;;  %v5858_v22 = vadd.f32 %v12532_v49, %v5736_v5 }
0x1816   : > { %v5846_v58 = vpop.f32.mrf.mxu0  ;;  %v5958_v46 = vpop.f32.mrf.mxu1 }
0x1817   : > { %v5977_v36 = vadd.f32 %v5958_v46, %v5855_v6  ;;  %v5857_v30 = vadd.f32 %v5846_v58, %v5735_v28 }
0x1819   : > { %v12542_v2 = vpop.f32.mrf.mxu1  ;;  %v12549_v7 = vpop.f32.mrf.mxu0 }
0x181a   : > { %v6100_v39 = vadd.f32 %v12549_v7, %v5978_v12  ;;  %v5980_v31 = vadd.f32 %v12542_v2, %v5858_v22 }
0x181b   : > { %v5968_v9 = vpop.f32.mrf.mxu1  ;;  %v6080_v60 = vpop.f32.mrf.mxu0 }
0x181c   : > { %v6099_v10 = vadd.f32 %v6080_v60, %v5977_v36  ;;  %v5979_v38 = vadd.f32 %v5968_v9, %v5857_v30 }
0x181d   : > { %v12552_v25 = vpop.f32.mrf.mxu0  ;;  %v12559_v27 = vpop.f32.mrf.mxu1 }
0x181e   : > { %v6206_v43 = vadd.f32 %v12559_v27, %v6100_v39  ;;  %v6102_v21 = vadd.f32 %v12552_v25, %v5980_v31 }
0x181f   : > { %v6090_v1 = vpop.f32.mrf.mxu0  ;;  %v6186_v54 = vpop.f32.mrf.mxu1 }
0x1820   : > { %v6205_v42 = vadd.f32 %v6186_v54, %v6099_v10  ;;  %v6101_v61 = vadd.f32 %v6090_v1, %v5979_v38 }
0x1821   : > { %v12562_v55 = vpop.f32.mrf.mxu1  ;;  %v12569_v29 = vpop.f32.mrf.mxu0 }
0x1822   : > { %v6328_v32 = vadd.f32 %v12569_v29, %v6206_v43  ;;  %v6208_v40 = vadd.f32 %v12562_v55, %v6102_v21 }
0x1823   : > { %v6196_v62 = vpop.f32.mrf.mxu1  ;;  %v6308_v35 = vpop.f32.mrf.mxu0 }
0x1824   : > { %v6327_v59 = vadd.f32 %v6308_v35, %v6205_v42  ;;  %v6207_v34 = vadd.f32 %v6196_v62, %v6101_v61 }
0x1825   : > { %v12572_v4 = vpop.f32.mrf.mxu0  ;;  %v12579_v47 = vpop.f32.mrf.mxu1 }
0x1826   : > { %v6450_v46 = vadd.f32 %v12579_v47, %v6328_v32  ;;  %v6330_v58 = vadd.f32 %v12572_v4, %v6208_v40 }
0x1827   : > { %v6318_v15 = vpop.f32.mrf.mxu0  ;;  %v6430_v19 = vpop.f32.mrf.mxu1 }
0x1828   : > { %v6449_v41 = vadd.f32 %v6430_v19, %v6327_v59  ;;  %v6329_v6 = vadd.f32 %v6318_v15, %v6207_v34 }
0x1829   : > { %v12582_v45 = vpop.f32.mrf.mxu1  ;;  %v12589_v52 = vpop.f32.mrf.mxu0 }
0x182a   : > { %v6572_v60 = vadd.f32 %v12589_v52, %v6450_v46  ;;  %v6452_v9 = vadd.f32 %v12582_v45, %v6330_v58  ;;  %v6803_v46 = vsel %vm2437_vm12, %v13942_v14, 0.0 }
0x182b   : > { %v6440_v49 = vpop.f32.mrf.mxu1  ;;  %v6552_v7 = vpop.f32.mrf.mxu0 }
0x182c   : > { %v6571_v5 = vadd.f32 %v6552_v7, %v6449_v41  ;;  %v6451_v29 = vadd.f32 %v6440_v49, %v6329_v6  ;;  %v6800_v7 = vsel %vm2437_vm12, %v13940_v13, 0.0  ;;  %v6819_v41 = vmul.f32 %v13942_v14, %v13942_v14 }
0x182d   : > { %v12592_v2 = vpop.f32.mrf.mxu0  ;;  %v12599_v27 = vpop.f32.mrf.mxu1 }
0x182e   : > { %v6694_v10 = vadd.f32 %v12599_v27, %v6572_v60  ;;  %v6574_v38 = vadd.f32 %v12592_v2, %v6452_v9  ;;  %v6827_v58 = vsel %vm2437_vm12, %v6819_v41, 0.0  ;;  %v6818_v60 = vmul.f32 %v13940_v13, %v13940_v13  ;;  %v11823_v27 = vld [vmem:[%s16064_s3 + $0x120] sm:$0xff] }
0x182f   : > { %v6562_v25 = vpop.f32.mrf.mxu0  ;;  %v6674_v54 = vpop.f32.mrf.mxu1  ;;  %12625 = vmatprep.mubr.msk.f32.mxu1 %vm6855_vm1, %v11823_v27 }
0x1830   : > { %v6693_v12 = vadd.f32 %v6674_v54, %v6571_v5  ;;  %v6573_v21 = vadd.f32 %v6562_v25, %v6451_v29  ;;  %v6698_v55 = vmax.f32 %v6694_v10, 0.0  ;;  %v6824_v2 = vsel %vm2437_vm12, %v6818_v60, 0.0 }
0x1831   : > { %v12602_v42 = vpop.f32.mrf.mxu1 }
0x1832   : > { %v6697_v1 = vmax.f32 %v6693_v12, 0.0  ;;  %v6696_v35 = vadd.f32 %v12602_v42, %v6574_v38 }
0x1833   : > { %v6684_v62 = vpop.f32.mrf.mxu1 }
0x1834   : > { %v6695_v19 = vadd.f32 %v6684_v62, %v6573_v21  ;;  %12607 = vmatprep.mubr.msk.f32.mxu0 %vm4373_vm9, %v6697_v1  ;;  %v6700_v28 = vmax.f32 %v6696_v35, 0.0 }
0x1835   : > { %12608 = vmatmul.mubr.msk.f32.vlgmr.msra.gmra.mxu0 %vm4373_vm9, %v6698_v55 }
0x1836   : > { %v6699_v15 = vmax.f32 %v6695_v19, 0.0 }
0x1838   : > { %12610 = vmatprep.mubr.msk.f32.mxu0 %vm4373_vm9, %v6699_v15 }
0x1839   : > { %12611 = vmatmul.mubr.msk.f32.gmra.mxu0 %vm4373_vm9, %v6700_v28 }
0x18f5   : > { %v14505_v36 = vpop.f32.mrf.mxu0 }
0x18f6   : > { %v6821_v22 = vmul.f32 %v14505_v36, %v14505_v36  ;;  %v6809_v39 = vsel %vm2437_vm12, %v14505_v36, 0.0 }
0x18f7   : > { %6810 = vadd.xlane.f32.xlu1 %v6809_v39  ;;  %v14511_v4 = vpop.f32.mrf.mxu0  ;;  %v11825_v39 = vld [vmem:[%s16064_s3 + $0x130] sm:$0xff] }
0x18f8   : > { %v6833_v47 = vsel %vm2437_vm12, %v6821_v22, 0.0  ;;  %v6820_v43 = vmul.f32 %v14511_v4, %v14511_v4  ;;  %v6806_v52 = vsel %vm2437_vm12, %v14511_v4, 0.0  ;;  %v11824_v22 = vld [vmem:[%s16064_s3 + $0x128] sm:$0xff] }
0x18f9   : > { %6834 = vadd.xlane.f32.xlu0 %v6833_v47  ;;  %v14514_v30 = vpop.f32.mrf.mxu0  ;;  %v11826_v47 = vld [vmem:[%s16064_s3 + $0x138] sm:$0xff] }
0x18fa   : > { %v6823_v31 = vmul.f32 %v14514_v30, %v14514_v30  ;;  %v6815_v45 = vsel %vm2437_vm12, %v14514_v30, 0.0  ;;  %v6830_v61 = vsel %vm2437_vm12, %v6820_v43, 0.0  ;;  %v11828_v43 = vld [vmem:[%s16064_s3 + $0x148] sm:$0xff] }
0x18fb   : > { %v14526_v59 = vpop.f32.mrf.mxu0 }
0x18fc   : > { %v6839_v32 = vsel %vm2437_vm12, %v6823_v31, 0.0  ;;  %v6822_v40 = vmul.f32 %v14526_v59, %v14526_v59  ;;  %v6812_v49 = vsel %vm2437_vm12, %v14526_v59, 0.0  ;;  %v11827_v31 = vld [vmem:[%s16064_s3 + $0x140] sm:$0xff] }
0x18fd   : > { %6840 = vadd.xlane.f32.xlu1 %v6839_v32  ;;  %6816 = vadd.xlane.f32.xlu0 %v6815_v45 }
0x18fe   : > { %v6836_v34 = vsel %vm2437_vm12, %v6822_v40, 0.0 }
0x1901   : > { %6807 = vadd.xlane.f32.xlu1 %v6806_v52  ;;  %6831 = vadd.xlane.f32.xlu0 %v6830_v61 }
0x1905   : > { %6804 = vadd.xlane.f32.xlu1 %v6803_v46  ;;  %6813 = vadd.xlane.f32.xlu0 %v6812_v49 }
0x1909   : > { %6801 = vadd.xlane.f32.xlu1 %v6800_v7  ;;  %6837 = vadd.xlane.f32.xlu0 %v6836_v34 }
0x190d   : > { %6828 = vadd.xlane.f32.xlu0 %v6827_v58 }
0x1911   : > { %6825 = vadd.xlane.f32.xlu0 %v6824_v2  ;;  %v16248_v2 = vmov 1  }
0x1980   : > { %v6811_v6 = vpop.xlane.xlu1 %6810 }
0x1982   : > { %v6835_v5 = vpop.xlane.xlu0 %6834 }
0x1983   : > { %v6845_v1 = vsel %vm379_vm2, %v6811_v6, %v6835_v5 }
0x1986   : > { %v6841_v9 = vpop.xlane.xlu1 %6840  ;;  %v6817_v10 = vpop.xlane.xlu0 %6816 }
0x1987   : > { %v6847_v25 = vsel %vm379_vm2, %v6817_v10, %v6841_v9 }
0x1988   : > { %12613 = vmatprep.subr.mxu1 %v6847_v25 }
0x1989   : > { %12614 = vmatpush3.msra.mxu1 %v6847_v25 }
0x198a   : > { %v6832_v54 = vpop.xlane.xlu0 %6831  ;;  %v6808_v29 = vpop.xlane.xlu1 %6807 }
0x198b   : > { %v6844_v35 = vsel %vm379_vm2, %v6808_v29, %v6832_v54 }
0x198e   : > { %v6814_v12 = vpop.xlane.xlu0 %6813  ;;  %v6805_v21 = vpop.xlane.xlu1 %6804 }
0x1992   : > { %v6838_v38 = vpop.xlane.xlu0 %6837  ;;  %v6802_v19 = vpop.xlane.xlu1 %6801 }
0x1993   : > { %v6846_v42 = vsel %vm379_vm2, %v6814_v12, %v6838_v38 }
0x1994   : > { %12615 = vmatprep.subr.mxu1 %v6846_v42 }
0x1995   : > { %12616 = vmatpush3.msra.mxu1 %v6846_v42 }
0x1996   : > { %12617 = vmatprep.subr.mxu1 %v6845_v1  ;;  %v6829_v55 = vpop.xlane.xlu0 %6828 }
0x1997   : > { %12618 = vmatpush3.msra.mxu1 %v6845_v1  ;;  %v6843_v62 = vsel %vm379_vm2, %v6805_v21, %v6829_v55 }
0x1998   : > { %12619 = vmatprep.subr.mxu1 %v6844_v35 }
0x1999   : > { %12620 = vmatpush3.msra.mxu1 %v6844_v35 }
0x199a   : > { %12621 = vmatprep.subr.mxu1 %v6843_v62  ;;  %v6826_v15 = vpop.xlane.xlu0 %6825 }
0x199b   : > { %12622 = vmatpush3.msra.mxu1 %v6843_v62  ;;  %v6842_v28 = vsel %vm379_vm2, %v6802_v19, %v6826_v15 }
0x199c   : > { %12623 = vmatprep.subr.mxu1 %v6842_v28 }
0x199d   : > { %12624 = vmatpush3.msra.mxu1 %v6842_v28 }
0x199e   : > { %12626 = vmatmul.mubr.msk.f32.vlgmr.msra.gmra.mxu1 %vm6855_vm1, %v11824_v22 }
0x199f   : > { %12628 = vmatprep.mubr.msk.f32.mxu1 %vm6855_vm1, %v11825_v39 }
0x19a2   : > { %12629 = vmatmul.mubr.msk.f32.gmra.mxu1 %vm6855_vm1, %v11826_v47 }
0x19a3   : > { %12631 = vmatprep.mubr.msk.f32.mxu1 %vm6855_vm1, %v11827_v31 }
0x19a6   : > { %12632 = vmatmul.mubr.msk.f32.gmra.mxu1 %vm6855_vm1, %v11828_v43 }
0x1a5e   : > { %v12627_v32 = vpop.f32.mrf.mxu1 }
0x1a5f   : > { %7018 = vperm.xlu0 %12916, %v12627_v32   ;;  %v6970_v52 = vmul.f32 %v12627_v32, %v12627_v32 }
0x1a60   : > { %v6940_v45 = vpop.f32.mrf.mxu1 }
0x1a61   : > { %v6969_v61 = vmul.f32 %v6940_v45, %v6940_v45 }
0x1a62   : > { %v12630_v40 = vpop.f32.mrf.mxu1 }
0x1a63   : > { %6983 = vrot.lane.b32.xlu0 %v6970_v52, %s16234_s19  ;;  %6981 = vrot.lane.b32.xlu1 %v6969_v61, %s16234_s19  ;;  %v6972_v46 = vmul.f32 %v12630_v40, %v12630_v40 }
0x1a64   : > { %v6950_v49 = vpop.f32.mrf.mxu1 }
0x1a65   : > { %v6971_v7 = vmul.f32 %v6950_v49, %v6950_v49 }
0x1a66   : > { %v12633_v34 = vpop.f32.mrf.mxu1 }
0x1a67   : > { %7028 = vperm.xlu0 %12916, %v12630_v40   ;;  %6987 = vrot.lane.b32.xlu1 %v6972_v46, %s16234_s19  ;;  %v6974_v41 = vmul.f32 %v12633_v34, %v12633_v34 }
0x1a68   : > { %v6960_v58 = vpop.f32.mrf.mxu1 }
0x1a69   : > { %v6973_v60 = vmul.f32 %v6960_v58, %v6960_v58 }
0x1a6b   : > { %7023 = vperm.xlu0 %12916, %v6950_v49   ;;  %6985 = vrot.lane.b32.xlu1 %v6971_v7, %s16234_s19 }
0x1a6f   : > { %7038 = vperm.xlu0 %12916, %v12633_v34   ;;  %6991 = vrot.lane.b32.xlu1 %v6974_v41, %s16234_s19 }
0x1a73   : > { %7033 = vperm.xlu1 %12917, %v6960_v58   ;;  %6989 = vrot.lane.b32.xlu0 %v6973_v60, %s16234_s19  ;;  %v16249_v60 = vmov 0  }
0x1a77   : > { %7013 = vperm.xlu0 %12916, %v6940_v45   ;;  %12918 = vset.pattern.permute.xlu1 %v16248_v2 }
0x1a7b   : > { %12919 = vset.pattern.permute.xlu0 %v16248_v2 }
0x1ad5   : > { %v6982_v27 = vpop.permute.xlu1 %6981 }
0x1ad6   : > { %v6999_v6 = vsub.f32 %v6940_v45, %v6982_v27 }
0x1ad8   : > { %v7005_v5 = vmax.f32 %v6999_v6, 0.0 }
0x1ad9   : > { %v6988_v9 = vpop.permute.xlu1 %6987 }
0x1ada   : > { %v7047_v10 = vadd.f32 1e-05, %v7005_v5  ;;  %v7019_v25 = vpop.permute.xlu0 %7018  ;;  %v7002_v54 = vsub.f32 %v12630_v40, %v6988_v9 }
0x1adc   : > { %12946 = vrsqrt.f32 %v7047_v10  ;;  %v7008_v42 = vmax.f32 %v7002_v54, 0.0 }
0x1add   : > { %v6986_v29 = vpop.permute.xlu1 %6985 }
0x1ade   : > { %v6984_v12 = vpop.permute.xlu0 %6983  ;;  %v7001_v21 = vsub.f32 %v6950_v49, %v6986_v29  ;;  %v7050_v19 = vadd.f32 1e-05, %v7008_v42 }
0x1adf   : > { %v7000_v38 = vsub.f32 %v12627_v32, %v6984_v12 }
0x1ae0   : > { %v7007_v15 = vmax.f32 %v7001_v21, 0.0 }
0x1ae1   : > { %v7006_v1 = vmax.f32 %v7000_v38, 0.0  ;;  %v6992_v55 = vpop.permute.xlu1 %6991 }
0x1ae2   : > { %v14581_v35 = vpop.permute.xlu0 %7028  ;;  %v7004_v28 = vsub.f32 %v12633_v34, %v6992_v55  ;;  %v7049_v47 = vadd.f32 1e-05, %v7007_v15 }
0x1ae3   : > { %v7048_v62 = vadd.f32 1e-05, %v7006_v1  ;;  %v7044_v54 = vsub.f32 %v14505_v36, %v14581_v35 }
0x1ae4   : > { %v7010_v31 = vmax.f32 %v7004_v28, 0.0 }
0x1ae5   : > { %12948 = vrsqrt.f32 %v7048_v62 }
0x1ae6   : > { %v14583_v22 = vpop.permute.xlu0 %7023  ;;  %12950 = vrsqrt.f32 %v7050_v19  ;;  %v7052_v32 = vadd.f32 1e-05, %v7010_v31 }
0x1ae7   : > { %12952 = vrsqrt.f32 %v7049_v47  ;;  %v7043_v12 = vsub.f32 %v14511_v4, %v14583_v22 }
0x1ae8   : > { %12954 = vrsqrt.f32 %v7052_v32 }
0x1ae9   : > { %v12947_v39 = vpop.eup %12946 }
0x1aea   : > { %v14585_v43 = vpop.permute.xlu0 %7038  ;;  %7061 = vperm.xlu0 %12919, %v12947_v39  }
0x1aeb   : > { %v7046_v42 = vsub.f32 %v14514_v30, %v14585_v43 }
0x1aee   : > { %v6990_v45 = vpop.permute.xlu0 %6989  ;;  %v14588_v27 = vpop.permute.xlu1 %7033 }
0x1aef   : > { %v7003_v52 = vsub.f32 %v6960_v58, %v6990_v45  ;;  %v7042_v58 = vsub.f32 %v13942_v14, %v7019_v25  ;;  %v7045_v28 = vsub.f32 %v14526_v59, %v14588_v27  ;;  %v11837_v45 = vld [vmem:[%s16062_s1 + $0x6c0] sm:$0xff] }
0x1af0   : > { %12646 = vmatprep.mubr.msk.f32.mxu0 %vm6855_vm1, %v11837_v45 }
0x1af1   : > { %v7009_v61 = vmax.f32 %v7003_v52, 0.0 }
0x1af2   : > { %v12949_v40 = vpop.eup %12948  ;;  %v7014_v14 = vpop.permute.xlu0 %7013 }
0x1af3   : > { %v7051_v46 = vadd.f32 1e-05, %v7009_v61  ;;  %7066 = vperm.xlu1 %12918, %v12949_v40   ;;  %v12951_v49 = vpop.eup %12950  ;;  %v7041_v10 = vsub.f32 %v13940_v13, %v7014_v14 }
0x1af4   : > { %v12953_v7 = vpop.eup %12952 }
0x1af5   : > { %12956 = vrsqrt.f32 %v7051_v46  ;;  %v12955_v34 = vpop.eup %12954 }
0x1af7   : > { %7076 = vperm.xlu1 %12918, %v12951_v49   ;;  %v11841_v49 = vld [vmem:[%s16062_s1 + $0x6e0] sm:$0xff] }
0x1af8   : > { %12661 = vmatprep.mubr.msk.f32.mxu1 %vm6855_vm1, %v11841_v49 }
0x1afb   : > { %7071 = vperm.xlu1 %12918, %v12953_v7  }
0x1aff   : > { %7086 = vperm.xlu1 %12918, %v12955_v34  }
0x1b02   : > { %v12957_v41 = vpop.eup %12956 }
0x1b03   : > { %7081 = vperm.xlu1 %12918, %v12957_v41  }
0x1b07   : > { %12920 = vset.pattern.permute.xlu1 %v16249_v60 }
0x1b65   : > { %v7062_v9 = vpop.permute.xlu0 %7061 }
0x1b66   : > { %v14618_v25 = vmul.f32 %v7062_v9, %v7041_v10 }
0x1b68   : > { %16260 = vst [vmem:[#allocation22_spill] sm:$0xff] %v14618_v25 }
0x1b6e   : > { %v7067_v6 = vpop.permute.xlu1 %7066 }
0x1b6f   : > { %v14591_v5 = vmul.f32 %v7067_v6, %v7042_v58 }
0x1b71   : > { %7106 = vrot.lane.b32.xlu0 %v14591_v5, %s16250_s28  ;;  %7124 = vrot.lane.b32.xlu1 %v14591_v5, %s16251_s29 }
0x1b72   : > { %v7077_v13 = vpop.permute.xlu1 %7076 }
0x1b73   : > { %v14646_v29 = vmul.f32 %v7077_v13, %v7044_v54 }
0x1b75   : > { %7240 = vrot.lane.b32.xlu0 %v14591_v5, %s16252_s17  ;;  %7258 = vrot.lane.b32.xlu1 %v14591_v5, %s16253_s18 }
0x1b76   : > { %v7072_v36 = vpop.permute.xlu1 %7071 }
0x1b77   : > { %v14678_v38 = vmul.f32 %v7072_v36, %v7043_v12 }
0x1b79   : > { %7374 = vrot.lane.b32.xlu0 %v14591_v5, %s16254_s0  ;;  %7392 = vrot.lane.b32.xlu1 %v14591_v5, %s16255_s6 }
0x1b7a   : > { %v7087_v4 = vpop.permute.xlu1 %7086 }
0x1b7b   : > { %v14706_v21 = vmul.f32 %v7087_v4, %v7046_v42 }
0x1b7d   : > { %7508 = vrot.lane.b32.xlu0 %v14591_v5, %s16256_s7  ;;  %7526 = vrot.lane.b32.xlu1 %v14591_v5, %s16234_s19 }
0x1b7e   : > { %v7082_v30 = vpop.permute.xlu1 %7081 }
0x1b7f   : > { %v14750_v22 = vmul.f32 %v7082_v30, %v7045_v28 }
0x1b81   : > { %7728 = vrot.lane.b32.xlu0 %v14591_v5, %s16243_s20  ;;  %7746 = vrot.lane.b32.xlu1 %v14591_v5, %s16257_s13 }
0x1b85   : > { %7862 = vrot.lane.b32.xlu0 %v14591_v5, %s16258_s12  ;;  %7880 = vrot.lane.b32.xlu1 %v14591_v5, %s16259_s27 }
0x1b89   : > { %7122 = vrot.lane.b32.xlu1 %v14618_v25, %s16251_s29  ;;  %7104 = vrot.lane.b32.xlu0 %v14618_v25, %s16250_s28 }
0x1b8d   : > { %7256 = vrot.lane.b32.xlu1 %v14618_v25, %s16253_s18  ;;  %7238 = vrot.lane.b32.xlu0 %v14618_v25, %s16252_s17 }
0x1b91   : > { %7390 = vrot.lane.b32.xlu1 %v14618_v25, %s16255_s6  ;;  %7372 = vrot.lane.b32.xlu0 %v14618_v25, %s16254_s0 }
0x1b95   : > { %7524 = vrot.lane.b32.xlu1 %v14618_v25, %s16234_s19  ;;  %7506 = vrot.lane.b32.xlu0 %v14618_v25, %s16256_s7 }
0x1b99   : > { %7744 = vrot.lane.b32.xlu1 %v14618_v25, %s16257_s13  ;;  %7726 = vrot.lane.b32.xlu0 %v14618_v25, %s16243_s20 }
0x1b9d   : > { %7878 = vrot.lane.b32.xlu1 %v14618_v25, %s16259_s27  ;;  %7860 = vrot.lane.b32.xlu0 %v14618_v25, %s16258_s12 }
0x1ba1   : > { %7128 = vrot.lane.b32.xlu1 %v14646_v29, %s16251_s29  ;;  %7110 = vrot.lane.b32.xlu0 %v14646_v29, %s16250_s28 }
0x1ba5   : > { %7262 = vrot.lane.b32.xlu1 %v14646_v29, %s16253_s18  ;;  %7244 = vrot.lane.b32.xlu0 %v14646_v29, %s16252_s17 }
0x1ba9   : > { %7396 = vrot.lane.b32.xlu1 %v14646_v29, %s16255_s6  ;;  %7378 = vrot.lane.b32.xlu0 %v14646_v29, %s16254_s0 }
0x1bad   : > { %7530 = vrot.lane.b32.xlu1 %v14646_v29, %s16234_s19  ;;  %7512 = vrot.lane.b32.xlu0 %v14646_v29, %s16256_s7 }
0x1bb1   : > { %7750 = vrot.lane.b32.xlu1 %v14646_v29, %s16257_s13  ;;  %7732 = vrot.lane.b32.xlu0 %v14646_v29, %s16243_s20 }
0x1bb5   : > { %7884 = vrot.lane.b32.xlu1 %v14646_v29, %s16259_s27  ;;  %7866 = vrot.lane.b32.xlu0 %v14646_v29, %s16258_s12 }
0x1bb9   : > { %8018 = vrot.lane.b32.xlu1 %v14646_v29, %s16226_s23  ;;  %8000 = vrot.lane.b32.xlu0 %v14646_v29, %s16227_s24 }
0x1bbd   : > { %7126 = vrot.lane.b32.xlu1 %v14678_v38, %s16251_s29  ;;  %7108 = vrot.lane.b32.xlu0 %v14678_v38, %s16250_s28 }
0x1bc1   : > { %7260 = vrot.lane.b32.xlu1 %v14678_v38, %s16253_s18  ;;  %7242 = vrot.lane.b32.xlu0 %v14678_v38, %s16252_s17 }
0x1bc5   : > { %7394 = vrot.lane.b32.xlu1 %v14678_v38, %s16255_s6  ;;  %7376 = vrot.lane.b32.xlu0 %v14678_v38, %s16254_s0 }
0x1bc9   : > { %7528 = vrot.lane.b32.xlu1 %v14678_v38, %s16234_s19  ;;  %7510 = vrot.lane.b32.xlu0 %v14678_v38, %s16256_s7 }
0x1bcd   : > { %7748 = vrot.lane.b32.xlu1 %v14678_v38, %s16257_s13  ;;  %7730 = vrot.lane.b32.xlu0 %v14678_v38, %s16243_s20 }
0x1bd1   : > { %7882 = vrot.lane.b32.xlu1 %v14678_v38, %s16259_s27  ;;  %7864 = vrot.lane.b32.xlu0 %v14678_v38, %s16258_s12 }
0x1bd5   : > { %7114 = vrot.lane.b32.xlu1 %v14706_v21, %s16250_s28  ;;  %7248 = vrot.lane.b32.xlu0 %v14706_v21, %s16252_s17 }
0x1bd9   : > { %7132 = vrot.lane.b32.xlu1 %v14706_v21, %s16251_s29  ;;  %7382 = vrot.lane.b32.xlu0 %v14706_v21, %s16254_s0 }
0x1bdd   : > { %7266 = vrot.lane.b32.xlu1 %v14706_v21, %s16253_s18  ;;  %7516 = vrot.lane.b32.xlu0 %v14706_v21, %s16256_s7 }
0x1be1   : > { %7400 = vrot.lane.b32.xlu1 %v14706_v21, %s16255_s6  ;;  %7736 = vrot.lane.b32.xlu0 %v14706_v21, %s16243_s20 }
0x1be3   : > { %v14724_v1 = vpop.permute.xlu1 %7124  ;;  %v14726_v55 = vpop.permute.xlu0 %7106 }
0x1be5   : > { %7534 = vrot.lane.b32.xlu1 %v14706_v21, %s16234_s19  ;;  %7870 = vrot.lane.b32.xlu0 %v14706_v21, %s16258_s12 }
0x1be7   : > { %v14732_v35 = vpop.permute.xlu1 %7258  ;;  %v14734_v62 = vpop.permute.xlu0 %7240 }
0x1be9   : > { %7754 = vrot.lane.b32.xlu1 %v14706_v21, %s16257_s13  ;;  %8004 = vrot.lane.b32.xlu0 %v14706_v21, %s16227_s24 }
0x1beb   : > { %v14740_v19 = vpop.permute.xlu1 %7392  ;;  %v14742_v15 = vpop.permute.xlu0 %7374 }
0x1bed   : > { %7888 = vrot.lane.b32.xlu1 %v14706_v21, %s16259_s27  ;;  %8138 = vrot.lane.b32.xlu0 %v14706_v21, %s16229_s22 }
0x1bef   : > { %v14752_v39 = vpop.permute.xlu1 %7526  ;;  %v14754_v47 = vpop.permute.xlu0 %7508 }
0x1bf1   : > { %8022 = vrot.lane.b32.xlu1 %v14706_v21, %s16226_s23  ;;  %7112 = vrot.lane.b32.xlu0 %v14750_v22, %s16250_s28 }
0x1bf3   : > { %v14760_v31 = vpop.permute.xlu1 %7746  ;;  %v14762_v59 = vpop.permute.xlu0 %7728 }
0x1bf4   : > { %16261 = vst [vmem:[#allocation23_spill] sm:$0xff] %v14760_v31  ;;  %16262 = vst [vmem:[#allocation24_spill] sm:$0xff] %v14762_v59 }
0x1bf5   : > { %8156 = vrot.lane.b32.xlu1 %v14706_v21, %s16228_s25  ;;  %7998 = vrot.lane.b32.xlu0 %v14678_v38, %s16227_s24 }
0x1bf7   : > { %v14768_v43 = vpop.permute.xlu1 %7880  ;;  %v14770_v32 = vpop.permute.xlu0 %7862 }
0x1bf8   : > { %16263 = vst [vmem:[#allocation25_spill] sm:$0xff] %v14768_v43  ;;  %16264 = vst [vmem:[#allocation26_spill] sm:$0xff] %v14770_v32 }
0x1bf9   : > { %7130 = vrot.lane.b32.xlu1 %v14750_v22, %s16251_s29  ;;  %7246 = vrot.lane.b32.xlu0 %v14750_v22, %s16252_s17 }
0x1bfb   : > { %v14780_v52 = vpop.permute.xlu1 %7122  ;;  %v14782_v61 = vpop.permute.xlu0 %7104 }
0x1bfd   : > { %8016 = vrot.lane.b32.xlu1 %v14678_v38, %s16226_s23  ;;  %7380 = vrot.lane.b32.xlu0 %v14750_v22, %s16254_s0 }
0x1bff   : > { %v14788_v40 = vpop.permute.xlu1 %7256  ;;  %v14790_v46 = vpop.permute.xlu0 %7238 }
0x1c01   : > { %7264 = vrot.lane.b32.xlu1 %v14750_v22, %s16253_s18  ;;  %8134 = vrot.lane.b32.xlu0 %v14646_v29, %s16229_s22 }
0x1c03   : > { %v14800_v7 = vpop.permute.xlu1 %7390  ;;  %v14802_v34 = vpop.permute.xlu0 %7372 }
0x1c05   : > { %7398 = vrot.lane.b32.xlu1 %v14750_v22, %s16255_s6  ;;  %7514 = vrot.lane.b32.xlu0 %v14750_v22, %s16256_s7 }
0x1c07   : > { %v14808_v41 = vpop.permute.xlu1 %7524  ;;  %v14810_v27 = vpop.permute.xlu0 %7506 }
0x1c09   : > { %8152 = vrot.lane.b32.xlu1 %v14646_v29, %s16228_s25  ;;  %7996 = vrot.lane.b32.xlu0 %v14591_v5, %s16227_s24 }
0x1c0b   : > { %v14816_v58 = vpop.permute.xlu1 %7744  ;;  %v14818_v6 = vpop.permute.xlu0 %7726 }
0x1c0c   : > { %16265 = vst [vmem:[#allocation27_spill] sm:$0xff] %v14816_v58  ;;  %16266 = vst [vmem:[#allocation28_spill] sm:$0xff] %v14818_v6 }
0x1c0d   : > { %7532 = vrot.lane.b32.xlu1 %v14750_v22, %s16234_s19  ;;  %8132 = vrot.lane.b32.xlu0 %v14678_v38, %s16229_s22 }
0x1c0f   : > { %v14824_v14 = vpop.permute.xlu1 %7878  ;;  %v14826_v9 = vpop.permute.xlu0 %7860 }
0x1c10   : > { %16267 = vst [vmem:[#allocation29_spill] sm:$0xff] %v14824_v14  ;;  %16268 = vst [vmem:[#allocation30_spill] sm:$0xff] %v14826_v9 }
0x1c11   : > { %8014 = vrot.lane.b32.xlu1 %v14591_v5, %s16226_s23  ;;  %7734 = vrot.lane.b32.xlu0 %v14750_v22, %s16243_s20 }
0x1c13   : > { %v14832_v10 = vpop.permute.xlu1 %7128  ;;  %v14834_v13 = vpop.permute.xlu0 %7110 }
0x1c14   : > { %v7143_v37 = vsel %vm2555_vm14, %v14834_v13, %v14832_v10 }
0x1c15   : > { %8150 = vrot.lane.b32.xlu1 %v14678_v38, %s16228_s25  ;;  %7868 = vrot.lane.b32.xlu0 %v14750_v22, %s16258_s12 }
0x1c17   : > { %v14840_v54 = vpop.permute.xlu1 %7262  ;;  %v14842_v36 = vpop.permute.xlu0 %7244 }
0x1c18   : > { %v7277_v10 = vsel %vm2448_vm13, %v14842_v36, %v14840_v54 }
0x1c19   : > { %7752 = vrot.lane.b32.xlu1 %v14750_v22, %s16257_s13  ;;  %7994 = vrot.lane.b32.xlu0 %v14618_v25, %s16227_s24  ;;  %v7283_v13 = vmul.f32 %v7277_v10, %v13695_v63 }
0x1c1b   : > { %v14848_v12 = vpop.permute.xlu1 %7396  ;;  %v14850_v4 = vpop.permute.xlu0 %7378 }
0x1c1d   : > { %7886 = vrot.lane.b32.xlu1 %v14750_v22, %s16259_s27  ;;  %8002 = vrot.lane.b32.xlu0 %v14750_v22, %s16227_s24 }
0x1c1f   : > { %v14856_v42 = vpop.permute.xlu1 %7530  ;;  %v14858_v30 = vpop.permute.xlu0 %7512 }
0x1c21   : > { %8012 = vrot.lane.b32.xlu1 %v14618_v25, %s16226_s23  ;;  %8136 = vrot.lane.b32.xlu0 %v14750_v22, %s16229_s22 }
0x1c23   : > { %v14864_v28 = vpop.permute.xlu1 %7750  ;;  %v14866_v45 = vpop.permute.xlu0 %7732 }
0x1c25   : > { %8020 = vrot.lane.b32.xlu1 %v14750_v22, %s16226_s23  ;;  %8130 = vrot.lane.b32.xlu0 %v14591_v5, %s16229_s22 }
0x1c27   : > { %v14872_v49 = vpop.permute.xlu1 %7884  ;;  %v14874_v23 = vpop.permute.xlu0 %7866 }
0x1c28   : > { %16269 = vst [vmem:[#allocation31_spill] sm:$0xff] %v14872_v49  ;;  %16270 = vst [vmem:[#allocation32_spill] sm:$0xff] %v14874_v23 }
0x1c29   : > { %8154 = vrot.lane.b32.xlu1 %v14750_v22, %s16228_s25  ;;  %8128 = vrot.lane.b32.xlu0 %v14618_v25, %s16229_s22 }
0x1c2b   : > { %v14880_v8 = vpop.permute.xlu1 %8018  ;;  %v14882_v24 = vpop.permute.xlu0 %8000 }
0x1c2c   : > { %16271 = vst [vmem:[#allocation33_spill] sm:$0xff] %v14880_v8  ;;  %16272 = vst [vmem:[#allocation34_spill] sm:$0xff] %v14882_v24 }
0x1c2d   : > { %8148 = vrot.lane.b32.xlu1 %v14591_v5, %s16228_s25 }
0x1c2f   : > { %v7127_v17 = vpop.permute.xlu1 %7126  ;;  %v7109_v16 = vpop.permute.xlu0 %7108 }
0x1c31   : > { %8146 = vrot.lane.b32.xlu1 %v14618_v25, %s16228_s25 }
0x1c33   : > { %v14888_v3 = vpop.permute.xlu1 %7260  ;;  %v14890_v0 = vpop.permute.xlu0 %7242 }
0x1c37   : > { %v14892_v57 = vpop.permute.xlu1 %7394  ;;  %v14894_v56 = vpop.permute.xlu0 %7376 }
0x1c3b   : > { %v14896_v48 = vpop.permute.xlu1 %7528  ;;  %v14898_v50 = vpop.permute.xlu0 %7510 }
0x1c3f   : > { %v14900_v44 = vpop.permute.xlu1 %7748  ;;  %v14902_v20 = vpop.permute.xlu0 %7730 }
0x1c40   : > { %16273 = vst [vmem:[#allocation35_spill] sm:$0xff] %v14900_v44  ;;  %16274 = vst [vmem:[#allocation36_spill] sm:$0xff] %v14902_v20  ;;  %v7142_v20 = vsel %vm2555_vm14, %v7109_v16, %v7127_v17 }
0x1c41   : > { %v7148_v44 = vmul.f32 %v7142_v20, %v13691_v53 }
0x1c43   : > { %v14904_v18 = vpop.permute.xlu1 %7882  ;;  %v14906_v60 = vpop.permute.xlu0 %7864 }
0x1c44   : > { %16275 = vst [vmem:[#allocation37_spill] sm:$0xff] %v14904_v18  ;;  %16276 = vst [vmem:[#allocation38_spill] sm:$0xff] %v14906_v60 }
0x1c47   : > { %v7115_v2 = vpop.permute.xlu1 %7114  ;;  %v7249_v24 = vpop.permute.xlu0 %7248 }
0x1c4b   : > { %v7133_v8 = vpop.permute.xlu1 %7132  ;;  %v7383_v51 = vpop.permute.xlu0 %7382 }
0x1c4c   : > { %v7145_v9 = vsel %vm2555_vm14, %v7115_v2, %v7133_v8 }
0x1c4d   : > { %v7151_v14 = vmul.f32 %v7145_v9, %v13691_v53 }
0x1c4f   : > { %12634 = vmatprep.subr.mxu0 %v7151_v14  ;;  %v7267_v32 = vpop.permute.xlu1 %7266  ;;  %v14910_v43 = vpop.permute.xlu0 %7516 }
0x1c50   : > { %v7279_v6 = vsel %vm2448_vm13, %v7249_v24, %v7267_v32  ;;  %12635 = vmatpush3.msra.mxu0 %v7151_v14 }
0x1c51   : > { %v7285_v58 = vmul.f32 %v7279_v6, %v13695_v63 }
0x1c53   : > { %v7401_v18 = vpop.permute.xlu1 %7400  ;;  %12649 = vmatprep.subr.mxu1 %v7285_v58  ;;  %v14914_v60 = vpop.permute.xlu0 %7736 }
0x1c54   : > { %12650 = vmatpush3.msra.mxu1 %v7285_v58 }
0x1c57   : > { %v14916_v23 = vpop.permute.xlu1 %7534  ;;  %v14918_v49 = vpop.permute.xlu0 %7870 }
0x1c5b   : > { %v14920_v8 = vpop.permute.xlu1 %7754  ;;  %v14922_v2 = vpop.permute.xlu0 %8004 }
0x1c5c   : > { %16277 = vst [vmem:[#allocation39_spill] sm:$0xff] %v14922_v2 }
0x1c5f   : > { %v14924_v9 = vpop.permute.xlu1 %7888  ;;  %v14926_v59 = vpop.permute.xlu0 %8138 }
0x1c60   : > { %16278 = vst [vmem:[#allocation40_spill] sm:$0xff] %v14926_v59  ;;  %v7149_v59 = vmul.f32 %v7143_v37, %v13691_v53 }
0x1c63   : > { %v14928_v24 = vpop.permute.xlu1 %8022  ;;  %v7113_v32 = vpop.permute.xlu0 %7112 }
0x1c64   : > { %16279 = vst [vmem:[#allocation41_spill] sm:$0xff] %v14928_v24 }
0x1c67   : > { %v14930_v6 = vpop.permute.xlu1 %8156  ;;  %v14932_v14 = vpop.permute.xlu0 %7998 }
0x1c68   : > { %16280 = vst [vmem:[#allocation42_spill] sm:$0xff] %v14930_v6  ;;  %16281 = vst [vmem:[#allocation43_spill] sm:$0xff] %v14932_v14  ;;  %v7141_v14 = vsel %vm2555_vm14, %v14726_v55, %v14724_v1  ;;  %v7413_v55 = vsel %vm2732_vm15, %v7383_v51, %v7401_v18  ;;  %v7275_v18 = vsel %vm2448_vm13, %v14734_v62, %v14732_v35 }
0x1c69   : > { %v7147_v16 = vmul.f32 %v7141_v14, %v13691_v53  ;;  %v7419_v51 = vmul.f32 %v7413_v55, %v13705_v11  ;;  %v7274_v35 = vsel %vm2448_vm13, %v14790_v46, %v14788_v40  ;;  %v7281_v62 = vmul.f32 %v7275_v18, %v13695_v63  ;;  %v16283_v18 = vld [vmem:[#allocation36_spill] sm:$0xff] }
0x1c6a   : > { %v7409_v40 = vsel %vm2732_vm15, %v14742_v15, %v14740_v19  ;;  %v7280_v46 = vmul.f32 %v7274_v35, %v13695_v63  ;;  %v7408_v19 = vsel %vm2732_vm15, %v14802_v34, %v14800_v7  ;;  %v7545_v34 = vsel %vm379_vm2, %v14858_v30, %v14856_v42  ;;  %v16287_v35 = vld [vmem:[#allocation24_spill] sm:$0xff] }
0x1c6b   : > { %v7131_v58 = vpop.permute.xlu1 %7130  ;;  %v7247_v31 = vpop.permute.xlu0 %7246  ;;  %v7414_v7 = vmul.f32 %v7408_v19, %v13705_v11  ;;  %v7551_v42 = vmul.f32 %v7545_v34, %v13717_v26  ;;  %v7543_v30 = vsel %vm379_vm2, %v14754_v47, %v14752_v39  ;;  %v16294_v34 = vld [vmem:[#allocation25_spill] sm:$0xff] }
0x1c6c   : > { %v7144_v25 = vsel %vm2555_vm14, %v7113_v32, %v7131_v58  ;;  %v7549_v39 = vmul.f32 %v7543_v30, %v13717_v26  ;;  %v16297_v30 = vld [vmem:[#allocation39_spill] sm:$0xff] }
0x1c6d   : > { %v7150_v2 = vmul.f32 %v7144_v25, %v13691_v53  ;;  %v7140_v25 = vsel %vm2555_vm14, %v14782_v61, %v14780_v52  ;;  %v11838_v61 = vld [vmem:[%s16062_s1 + $0x6c8] sm:$0xff] }
0x1c6e   : > { %v7146_v20 = vmul.f32 %v7140_v25, %v13691_v53 }
0x1c6f   : > { %v14941_v24 = vpop.permute.xlu1 %8016  ;;  %12636 = vmatprep.subr.mxu0 %v7150_v2  ;;  %v7381_v6 = vpop.permute.xlu0 %7380 }
0x1c70   : > { %12637 = vmatpush3.msra.mxu0 %v7150_v2  ;;  %v7410_v2 = vsel %vm2732_vm15, %v14894_v56, %v14892_v57  ;;  %v7547_v56 = vsel %vm379_vm2, %v14910_v43, %v14916_v23  ;;  %v7415_v23 = vmul.f32 %v7409_v40, %v13705_v11 }
0x1c71   : > { %12638 = vmatprep.subr.mxu0 %v7149_v59  ;;  %v7416_v57 = vmul.f32 %v7410_v2, %v13705_v11  ;;  %v7553_v43 = vmul.f32 %v7547_v56, %v13717_v26  ;;  %v16288_v2 = vld [vmem:[#allocation31_spill] sm:$0xff] }
0x1c72   : > { %12639 = vmatpush3.msra.mxu0 %v7149_v59  ;;  %v7276_v59 = vsel %vm2448_vm13, %v14890_v0, %v14888_v3  ;;  %v7411_v0 = vsel %vm2732_vm15, %v14850_v4, %v14848_v12  ;;  %v16290_v56 = vld [vmem:[#allocation27_spill] sm:$0xff] }
0x1c73   : > { %v7265_v17 = vpop.permute.xlu1 %7264  ;;  %12640 = vmatprep.subr.mxu0 %v7148_v44  ;;  %v14951_v37 = vpop.permute.xlu0 %8134  ;;  %v7282_v3 = vmul.f32 %v7276_v59, %v13695_v63  ;;  %v7417_v32 = vmul.f32 %v7411_v0, %v13705_v11  ;;  %v7767_v59 = vsel %vm2985_vm0, %v14914_v60, %v14920_v8 }
0x1c74   : > { %v7278_v1 = vsel %vm2448_vm13, %v7247_v31, %v7265_v17  ;;  %12641 = vmatpush3.msra.mxu0 %v7148_v44  ;;  %v7773_v60 = vmul.f32 %v7767_v59, %v13729_v33 }
0x1c75   : > { %v7284_v52 = vmul.f32 %v7278_v1, %v13695_v63  ;;  %12642 = vmatprep.subr.mxu0 %v7147_v16  ;;  %v11846_v1 = vld [vmem:[%s16062_s1 + $0x708] sm:$0xff] }
0x1c76   : > { %12643 = vmatpush3.msra.mxu0 %v7147_v16  ;;  %v11845_v16 = vld [vmem:[%s16062_s1 + $0x700] sm:$0xff] }
0x1c77   : > { %v7399_v31 = vpop.permute.xlu1 %7398  ;;  %12644 = vmatprep.subr.mxu0 %v7146_v20  ;;  %12651 = vmatprep.subr.mxu1 %v7284_v52  ;;  %v7515_v44 = vpop.permute.xlu0 %7514 }
0x1c78   : > { %v7412_v54 = vsel %vm2732_vm15, %v7381_v6, %v7399_v31  ;;  %12645 = vmatpush3.msra.mxu0 %v7146_v20  ;;  %12652 = vmatpush3.msra.mxu1 %v7284_v52  ;;  %v11842_v6 = vld [vmem:[%s16062_s1 + $0x6e8] sm:$0xff]  ;;  %v7544_v20 = vsel %vm379_vm2, %v14898_v50, %v14896_v48  ;;  %v7542_v50 = vsel %vm379_vm2, %v14810_v27, %v14808_v41 }
0x1c79   : > { %v7418_v36 = vmul.f32 %v7412_v54, %v13705_v11  ;;  %12647 = vmatmul.mubr.msk.f32.vlgmr.msra.gmra.mxu0 %vm6855_vm1, %v11838_v61  ;;  %12653 = vmatprep.subr.mxu1 %v7283_v13  ;;  %v7550_v55 = vmul.f32 %v7544_v20, %v13717_v26  ;;  %v7548_v47 = vmul.f32 %v7542_v50, %v13717_v26  ;;  %v16285_v54 = vld [vmem:[#allocation20_spill] sm:$0xff] }
0x1c7a   : > { %12664 = vmatprep.subr.mxu0 %v7419_v51  ;;  %12654 = vmatpush3.msra.mxu1 %v7283_v13  ;;  %v7765_v13 = vsel %vm2985_vm0, %v14866_v45, %v14864_v28  ;;  %v7901_v31 = vsel %vm3074_vm11, %v14918_v49, %v14924_v9  ;;  %v11854_v28 = vld [vmem:[%s16062_s1 + $0x748] sm:$0xff]  ;;  %v16282_v45 = vld [vmem:[#allocation35_spill] sm:$0xff]  ;;  %v16284_v9 = vld [vmem:[#allocation22_spill] sm:$0xff] }
0x1c7b   : > { %12665 = vmatpush3.msra.mxu0 %v7419_v51  ;;  %v14985_v12 = vpop.permute.xlu1 %8152  ;;  %12655 = vmatprep.subr.mxu1 %v7282_v3  ;;  %v14987_v4 = vpop.permute.xlu0 %7996  ;;  %v7764_v49 = vsel %vm2985_vm0, %v16283_v18, %v16282_v45  ;;  %v7771_v51 = vmul.f32 %v7765_v13, %v13729_v33  ;;  %v7907_v0 = vmul.f32 %v7901_v31, %v16285_v54  ;;  %v16301_v31 = vld [vmem:[#allocation33_spill] sm:$0xff]  ;;  %v16304_v45 = vld [vmem:[#allocation40_spill] sm:$0xff] }
0x1c7c   : > { %12666 = vmatprep.subr.mxu0 %v7418_v36  ;;  %12656 = vmatpush3.msra.mxu1 %v7282_v3  ;;  %v7770_v19 = vmul.f32 %v7764_v49, %v13729_v33 }
0x1c7d   : > { %12667 = vmatpush3.msra.mxu0 %v7418_v36  ;;  %12657 = vmatprep.subr.mxu1 %v7281_v62  ;;  %v16286_v36 = vld [vmem:[#allocation23_spill] sm:$0xff] }
0x1c7e   : > { %12668 = vmatprep.subr.mxu0 %v7417_v32  ;;  %12658 = vmatpush3.msra.mxu1 %v7281_v62  ;;  %v7763_v62 = vsel %vm2985_vm0, %v16287_v35, %v16286_v36 }
0x1c7f   : > { %12669 = vmatpush3.msra.mxu0 %v7417_v32  ;;  %v7533_v15 = vpop.permute.xlu1 %7532  ;;  %12659 = vmatprep.subr.mxu1 %v7280_v46  ;;  %v15004_v14 = vpop.permute.xlu0 %8132  ;;  %v16289_v32 = vld [vmem:[#allocation32_spill] sm:$0xff] }
0x1c80   : > { %v7546_v58 = vsel %vm379_vm2, %v7515_v44, %v7533_v15  ;;  %12670 = vmatprep.subr.mxu0 %v7416_v57  ;;  %12660 = vmatpush3.msra.mxu1 %v7280_v46  ;;  %v7899_v40 = vsel %vm3074_vm11, %v16289_v32, %v16288_v2  ;;  %v16292_v15 = vld [vmem:[#allocation37_spill] sm:$0xff] }
0x1c81   : > { %v7552_v25 = vmul.f32 %v7546_v58, %v13717_v26  ;;  %12671 = vmatpush3.msra.mxu0 %v7416_v57  ;;  %12662 = vmatmul.mubr.msk.f32.vlgmr.msra.gmra.mxu1 %vm6855_vm1, %v11842_v6  ;;  %v16291_v57 = vld [vmem:[#allocation28_spill] sm:$0xff]  ;;  %v7769_v58 = vmul.f32 %v7763_v62, %v13729_v33  ;;  %v15150_v2 = vld [vmem:[%s16065_s4 + $0x30] ss:$0 sm:$0xff] }
0x1c82   : > { %12672 = vmatprep.subr.mxu0 %v7415_v23  ;;  %12679 = vmatprep.subr.mxu1 %v7553_v43  ;;  %v7762_v6 = vsel %vm2985_vm0, %v16291_v57, %v16290_v56 }
0x1c83   : > { %12673 = vmatpush3.msra.mxu0 %v7415_v23  ;;  %12680 = vmatpush3.msra.mxu1 %v7553_v43  ;;  %v15018_v17 = vpop.permute.xlu1 %8014  ;;  %v7735_v10 = vpop.permute.xlu0 %7734  ;;  %v16293_v23 = vld [vmem:[#allocation38_spill] sm:$0xff] }
0x1c84   : > { %12674 = vmatprep.subr.mxu0 %v7414_v7  ;;  %12681 = vmatprep.subr.mxu1 %v7552_v25  ;;  %v7898_v43 = vsel %vm3074_vm11, %v16293_v23, %v16292_v15  ;;  %v11866_v15 = vld [vmem:[%s16062_s1 + $0x7a8] sm:$0xff]  ;;  %v11869_v23 = vld [vmem:[%s16062_s1 + $0x7c0] sm:$0xff] }
0x1c85   : > { %12675 = vmatpush3.msra.mxu0 %v7414_v7  ;;  %12676 = vmatprep.mubr.msk.f32.mxu0 %vm6855_vm1, %v11845_v16  ;;  %v16295_v16 = vld [vmem:[#allocation26_spill] sm:$0xff]  ;;  %v7904_v20 = vmul.f32 %v7898_v43, %v16285_v54 }
0x1c86   : > { %12682 = vmatpush3.msra.mxu1 %v7552_v25  ;;  %12677 = vmatmul.mubr.msk.f32.vlgmr.msra.gmra.mxu0 %vm6855_vm1, %v11846_v1  ;;  %v7905_v25 = vmul.f32 %v7899_v40, %v16285_v54  ;;  %v7768_v1 = vmul.f32 %v7762_v6, %v13729_v33 }
0x1c87   : > { %12683 = vmatprep.subr.mxu1 %v7551_v42  ;;  %12694 = vmatprep.subr.mxu0 %v14706_v21  ;;  %v15034_v48 = vpop.permute.xlu1 %8150  ;;  %v7869_v52 = vpop.permute.xlu0 %7868 }
0x1c88   : > { %12684 = vmatpush3.msra.mxu1 %v7551_v42  ;;  %12695 = vmatpush3.msra.mxu0 %v14706_v21  ;;  %v11849_v21 = vld [vmem:[%s16062_s1 + $0x720] sm:$0xff]  ;;  %v16296_v42 = vld [vmem:[#allocation41_spill] sm:$0xff]  ;;  %v8166_v57 = vsel %vm16309_vm6, %v15004_v14, %v15034_v48 }
0x1c89   : > { %12685 = vmatprep.subr.mxu1 %v7550_v55  ;;  %12696 = vmatprep.subr.mxu0 %v14750_v22 }
0x1c8a   : > { %12686 = vmatpush3.msra.mxu1 %v7550_v55  ;;  %12697 = vmatpush3.msra.mxu0 %v14750_v22  ;;  %v11850_v22 = vld [vmem:[%s16062_s1 + $0x728] sm:$0xff]  ;;  %v8035_v55 = vsel %vm3163_vm10, %v16297_v30, %v16296_v42  ;;  %v11835_v30 = vld [vmem:[%s16063_s2 + $0x180] sm:$0xff] }
0x1c8b   : > { %12687 = vmatprep.subr.mxu1 %v7549_v39  ;;  %12698 = vmatprep.subr.mxu0 %v14646_v29  ;;  %v7753_v41 = vpop.permute.xlu1 %7752  ;;  %v15059_v61 = vpop.permute.xlu0 %7994 }
0x1c8c   : > { %12688 = vmatpush3.msra.mxu1 %v7549_v39  ;;  %12699 = vmatpush3.msra.mxu0 %v14646_v29  ;;  %v7766_v27 = vsel %vm2985_vm0, %v7735_v10, %v7753_v41  ;;  %v7897_v10 = vsel %vm3074_vm11, %v16295_v16, %v16294_v34  ;;  %v16298_v39 = vld [vmem:[#allocation29_spill] sm:$0xff] }
0x1c8d   : > { %12689 = vmatprep.subr.mxu1 %v7548_v47  ;;  %12700 = vmatprep.subr.mxu0 %v14678_v38  ;;  %v7772_v8 = vmul.f32 %v7766_v27, %v13729_v33 }
0x1c8e   : > { %12690 = vmatpush3.msra.mxu1 %v7548_v47  ;;  %12691 = vmatprep.mubr.msk.f32.mxu1 %vm6855_vm1, %v11849_v21  ;;  %v16299_v47 = vld [vmem:[#allocation30_spill] sm:$0xff]  ;;  %v11858_v21 = vld [vmem:[%s16062_s1 + $0x768] sm:$0xff] }
0x1c8f   : > { %12701 = vmatpush3.msra.mxu0 %v14678_v38  ;;  %12692 = vmatmul.mubr.msk.f32.vlgmr.msra.gmra.mxu1 %vm6855_vm1, %v11850_v22  ;;  %v7887_v29 = vpop.permute.xlu1 %7886  ;;  %v11853_v38 = vld [vmem:[%s16062_s1 + $0x740] sm:$0xff]  ;;  %v8003_v46 = vpop.permute.xlu0 %8002  ;;  %v7896_v59 = vsel %vm3074_vm11, %v16299_v47, %v16298_v39  ;;  %v7903_v22 = vmul.f32 %v7897_v10, %v16285_v54 }
0x1c90   : > { %12702 = vmatprep.subr.mxu0 %v14591_v5  ;;  %12709 = vmatprep.subr.mxu1 %v7773_v60  ;;  %v7900_v44 = vsel %vm3074_vm11, %v7869_v52, %v7887_v29  ;;  %v11857_v52 = vld [vmem:[%s16062_s1 + $0x760] sm:$0xff]  ;;  %v7902_v13 = vmul.f32 %v7896_v59, %v16285_v54 }
0x1c91   : > { %12703 = vmatpush3.msra.mxu0 %v14591_v5  ;;  %12710 = vmatpush3.msra.mxu1 %v7773_v60  ;;  %v7906_v3 = vmul.f32 %v7900_v44, %v16285_v54  ;;  %v16300_v60 = vld [vmem:[#allocation21_spill] sm:$0xff]  ;;  %v16302_v44 = vld [vmem:[#allocation34_spill] sm:$0xff] }
0x1c92   : > { %12704 = vmatprep.subr.mxu0 %v16284_v9  ;;  %12711 = vmatprep.subr.mxu1 %v7772_v8 }
0x1c93   : > { %12705 = vmatpush3.msra.mxu0 %v16284_v9  ;;  %12706 = vmatprep.mubr.msk.f32.mxu0 %vm6855_vm1, %v11853_v38  ;;  %v15088_v5 = vpop.permute.xlu1 %8012  ;;  %v8137_v41 = vpop.permute.xlu0 %8136  ;;  %v8033_v38 = vsel %vm3163_vm10, %v16302_v44, %v16301_v31  ;;  %v11861_v9 = vld [vmem:[%s16062_s1 + $0x780] sm:$0xff] }
0x1c94   : > { %12712 = vmatpush3.msra.mxu1 %v7772_v8  ;;  %12707 = vmatmul.mubr.msk.f32.vlgmr.msra.gmra.mxu0 %vm6855_vm1, %v11854_v28  ;;  %v8041_v8 = vmul.f32 %v8035_v55, %v16300_v60  ;;  %v16303_v28 = vld [vmem:[#allocation42_spill] sm:$0xff]  ;;  %v8039_v62 = vmul.f32 %v8033_v38, %v16300_v60  ;;  %v8030_v6 = vsel %vm3163_vm10, %v15059_v61, %v15088_v5  ;;  %v11865_v5 = vld [vmem:[%s16062_s1 + $0x7a0] sm:$0xff] }
0x1c95   : > { %12713 = vmatprep.subr.mxu1 %v7771_v51  ;;  %12724 = vmatprep.subr.mxu0 %v7907_v0  ;;  %v8169_v18 = vsel %vm16305_vm3, %v16304_v45, %v16303_v28  ;;  %v8036_v14 = vmul.f32 %v8030_v6, %v16300_v60 }
0x1c96   : > { %12714 = vmatpush3.msra.mxu1 %v7771_v51  ;;  %12725 = vmatpush3.msra.mxu0 %v7907_v0  ;;  %v11862_v51 = vld [vmem:[%s16062_s1 + $0x788] sm:$0xff]  ;;  %v8175_v32 = vmul.f32 %v15150_v2, %v8169_v18 }
0x1c97   : > { %12715 = vmatprep.subr.mxu1 %v7770_v19  ;;  %12726 = vmatprep.subr.mxu0 %v7906_v3  ;;  %v8021_v7 = vpop.permute.xlu1 %8020  ;;  %v8131_v35 = vpop.permute.xlu0 %8130 }
0x1c98   : > { %12716 = vmatpush3.msra.mxu1 %v7770_v19  ;;  %12727 = vmatpush3.msra.mxu0 %v7906_v3  ;;  %v8034_v50 = vsel %vm3163_vm10, %v8003_v46, %v8021_v7  ;;  %v16307_v3 = vld [vmem:[#allocation43_spill] sm:$0xff]  ;;  %v8031_v46 = vsel %vm3163_vm10, %v14987_v4, %v15018_v17  ;;  %v8172_v17 = vmul.f32 %v15150_v2, %v8166_v57 }
0x1c99   : > { %12717 = vmatprep.subr.mxu1 %v7769_v58  ;;  %12728 = vmatprep.subr.mxu0 %v7905_v25  ;;  %v8040_v29 = vmul.f32 %v8034_v50, %v16300_v60  ;;  %v8032_v36 = vsel %vm3163_vm10, %v16307_v3, %v14941_v24  ;;  %v8167_v24 = vsel %vm16308_vm5, %v14951_v37, %v14985_v12 }
0x1c9a   : > { %12718 = vmatpush3.msra.mxu1 %v7769_v58  ;;  %12729 = vmatpush3.msra.mxu0 %v7905_v25  ;;  %v8038_v56 = vmul.f32 %v8032_v36, %v16300_v60  ;;  %v8173_v12 = vmul.f32 %v15150_v2, %v8167_v24  ;;  %v8037_v4 = vmul.f32 %v8031_v46, %v16300_v60  ;;  %v11870_v25 = vld [vmem:[%s16062_s1 + $0x7c8] sm:$0xff] }
0x1c9b   : > { %12719 = vmatprep.subr.mxu1 %v7768_v1  ;;  %12730 = vmatprep.subr.mxu0 %v7904_v20  ;;  %v8155_v27 = vpop.permute.xlu1 %8154  ;;  %v8129_v19 = vpop.permute.xlu0 %8128 }
0x1c9c   : > { %12720 = vmatpush3.msra.mxu1 %v7768_v1  ;;  %12721 = vmatprep.mubr.msk.f32.mxu1 %vm6855_vm1, %v11857_v52  ;;  %v8168_v49 = vsel %vm16306_vm4, %v8137_v41, %v8155_v27 }
0x1c9d   : > { %12731 = vmatpush3.msra.mxu0 %v7904_v20  ;;  %12722 = vmatmul.mubr.msk.f32.vlgmr.msra.gmra.mxu1 %vm6855_vm1, %v11858_v21  ;;  %v8174_v40 = vmul.f32 %v15150_v2, %v8168_v49  ;;  %v11836_v20 = vld [vmem:[%s16063_s2 + $0x190] sm:$0xff] }
0x1c9e   : > { %12732 = vmatprep.subr.mxu0 %v7903_v22  ;;  %12739 = vmatprep.subr.mxu1 %v8041_v8 }
0x1c9f   : > { %12733 = vmatpush3.msra.mxu0 %v7903_v22  ;;  %12740 = vmatpush3.msra.mxu1 %v8041_v8  ;;  %v8149_v0 = vpop.permute.xlu1 %8148 }
0x1ca0   : > { %12734 = vmatprep.subr.mxu0 %v7902_v13  ;;  %12741 = vmatprep.subr.mxu1 %v8040_v29  ;;  %v8165_v48 = vsel %vm16310_vm7, %v8131_v35, %v8149_v0 }
0x1ca1   : > { %12735 = vmatpush3.msra.mxu0 %v7902_v13  ;;  %12736 = vmatprep.mubr.msk.f32.mxu0 %vm6855_vm1, %v11861_v9  ;;  %v8171_v43 = vmul.f32 %v15150_v2, %v8165_v48 }
0x1ca2   : > { %12742 = vmatpush3.msra.mxu1 %v8040_v29  ;;  %12737 = vmatmul.mubr.msk.f32.vlgmr.msra.gmra.mxu0 %vm6855_vm1, %v11862_v51 }
0x1ca3   : > { %12743 = vmatprep.subr.mxu1 %v8039_v62  ;;  %12754 = vmatprep.subr.mxu0 %v8175_v32  ;;  %v8147_v37 = vpop.permute.xlu1 %8146 }
0x1ca4   : > { %12744 = vmatpush3.msra.mxu1 %v8039_v62  ;;  %12755 = vmatpush3.msra.mxu0 %v8175_v32  ;;  %v8164_v61 = vsel %vm16311_vm8, %v8129_v19, %v8147_v37  ;;  %v11873_v19 = vld [vmem:[%s16064_s3 + $0x150] sm:$0xff] }
0x1ca5   : > { %12745 = vmatprep.subr.mxu1 %v8038_v56  ;;  %12756 = vmatprep.subr.mxu0 %v8174_v40  ;;  %v8170_v58 = vmul.f32 %v15150_v2, %v8164_v61 }
0x1ca6   : > { %12746 = vmatpush3.msra.mxu1 %v8038_v56  ;;  %12757 = vmatpush3.msra.mxu0 %v8174_v40 }
0x1ca7   : > { %12747 = vmatprep.subr.mxu1 %v8037_v4  ;;  %12758 = vmatprep.subr.mxu0 %v8173_v12 }
0x1ca8   : > { %12748 = vmatpush3.msra.mxu1 %v8037_v4  ;;  %12759 = vmatpush3.msra.mxu0 %v8173_v12 }
0x1ca9   : > { %12749 = vmatprep.subr.mxu1 %v8036_v14  ;;  %12760 = vmatprep.subr.mxu0 %v8172_v17 }
0x1caa   : > { %12750 = vmatpush3.msra.mxu1 %v8036_v14  ;;  %12751 = vmatprep.mubr.msk.f32.mxu1 %vm6855_vm1, %v11865_v5 }
0x1cab   : > { %12761 = vmatpush3.msra.mxu0 %v8172_v17  ;;  %12752 = vmatmul.mubr.msk.f32.vlgmr.msra.gmra.mxu1 %vm6855_vm1, %v11866_v15 }
0x1cac   : > { %12762 = vmatprep.subr.mxu0 %v8171_v43  ;;  %12766 = vmatprep.mubr.msk.f32.mxu0 %vm6855_vm1, %v11869_v23 }
0x1cad   : > { %12763 = vmatpush3.msra.mxu0 %v8171_v43  ;;  %12773 = vmatprep.mubr.msk.f32.mxu1 %vm4373_vm9, %v11873_v19  ;;  %v11874_v43 = vld [vmem:[%s16064_s3 + $0x158] sm:$0xff] }
0x1cae   : > { %12764 = vmatprep.subr.mxu0 %v8170_v58 }
0x1caf   : > { %12765 = vmatpush3.msra.mxu0 %v8170_v58 }
0x1cb0   : > { %12767 = vmatmul.mubr.msk.f32.vlgmr.msra.gmra.mxu0 %vm6855_vm1, %v11870_v25 }
0x1d39   : > { %v12648_v7 = vpop.f32.mrf.mxu0 }
0x1d3a   : > { %v7237_v50 = vadd.f32 %v12648_v7, %v11836_v20 }
0x1d3b   : > { %v7227_v16 = vpop.f32.mrf.mxu0 }
0x1d3c   : > { %v7236_v39 = vadd.f32 %v11835_v30, %v7227_v16  ;;  %v16312_v16 = vmov 1  }
0x1d41   : > { %v12663_v34 = vpop.f32.mrf.mxu1 }
0x1d42   : > { %v7371_v47 = vadd.f32 %v12663_v34, %v7237_v50 }
0x1d43   : > { %v7361_v1 = vpop.f32.mrf.mxu1 }
0x1d44   : > { %v7370_v41 = vadd.f32 %v7361_v1, %v7236_v39 }
0x1d46   : > { %v12678_v10 = vpop.f32.mrf.mxu0 }
0x1d47   : > { %v7505_v21 = vadd.f32 %v12678_v10, %v7371_v47 }
0x1d48   : > { %v7495_v55 = vpop.f32.mrf.mxu0 }
0x1d49   : > { %v7504_v8 = vadd.f32 %v7495_v55, %v7370_v41 }
0x1d4f   : > { %v12693_v42 = vpop.f32.mrf.mxu1 }
0x1d50   : > { %v7639_v29 = vadd.f32 %v12693_v42, %v7505_v21 }
0x1d51   : > { %v7629_v59 = vpop.f32.mrf.mxu1 }
0x1d52   : > { %v7638_v31 = vadd.f32 %v7629_v59, %v7504_v8  ;;  %v16313_v59 = vmov 0  }
0x1d54   : > { %v12708_v52 = vpop.f32.mrf.mxu0 }
0x1d55   : > { %v7725_v44 = vadd.f32 %v12708_v52, %v7639_v29  ;;  %v11879_v29 = vld [vmem:[%s16062_s1 + $0x7e0] sm:$0xff] }
0x1d56   : > { %v7715_v22 = vpop.f32.mrf.mxu0  ;;  %12780 = vmatprep.mubr.msk.f32.mxu0 %vm4373_vm9, %v11879_v29 }
0x1d57   : > { %v7724_v28 = vadd.f32 %v7715_v22, %v7638_v31  ;;  %v11883_v31 = vld [vmem:[%s16062_s1 + $0x800] sm:$0xff] }
0x1d5d   : > { %v12723_v27 = vpop.f32.mrf.mxu1 }
0x1d5e   : > { %v7859_v45 = vadd.f32 %v12723_v27, %v7725_v44 }
0x1d5f   : > { %v7849_v38 = vpop.f32.mrf.mxu1 }
0x1d60   : > { %v7858_v9 = vadd.f32 %v7849_v38, %v7724_v28 }
0x1d62   : > { %v12738_v13 = vpop.f32.mrf.mxu0 }
0x1d63   : > { %v7993_v51 = vadd.f32 %v12738_v13, %v7859_v45 }
0x1d64   : > { %v7983_v49 = vpop.f32.mrf.mxu0 }
0x1d65   : > { %v7992_v3 = vadd.f32 %v7983_v49, %v7858_v9 }
0x1d6b   : > { %v12753_v18 = vpop.f32.mrf.mxu1 }
0x1d6c   : > { %v8127_v36 = vadd.f32 %v12753_v18, %v7993_v51 }
0x1d6d   : > { %v8117_v0 = vpop.f32.mrf.mxu1 }
0x1d6e   : > { %v8126_v62 = vadd.f32 %v8117_v0, %v7992_v3 }
0x1d70   : > { %v12768_v35 = vpop.f32.mrf.mxu0 }
0x1d71   : > { %v8261_v32 = vadd.f32 %v12768_v35, %v8127_v36 }
0x1d72   : > { %v8251_v40 = vpop.f32.mrf.mxu0 }
0x1d73   : > { %v8263_v24 = vmax.f32 %v8261_v32, 0.0  ;;  %v8260_v46 = vadd.f32 %v8251_v40, %v8126_v62 }
0x1d75   : > { %v15199_v56 = vmax.f32 %v8260_v46, 0.0  ;;  %v8267_v57 = vsel %vm2437_vm12, %v8263_v24, 0.0  ;;  %v8271_v6 = vmul.f32 %v8263_v24, %v8263_v24 }
0x1d76   : > { %8268 = vadd.xlane.f32.xlu0 %v8267_v57 }
0x1d77   : > { %v8275_v37 = vsel %vm2437_vm12, %v8271_v6, 0.0  ;;  %v8264_v12 = vsel %vm2437_vm12, %v15199_v56, 0.0  ;;  %v8270_v4 = vmul.f32 %v15199_v56, %v15199_v56 }
0x1d78   : > { %8276 = vadd.xlane.f32.xlu1 %v8275_v37 }
0x1d79   : > { %v8272_v17 = vsel %vm2437_vm12, %v8270_v4, 0.0 }
0x1d7a   : > { %8265 = vadd.xlane.f32.xlu0 %v8264_v12 }
0x1d7e   : > { %8273 = vadd.xlane.f32.xlu0 %v8272_v17 }
0x1dff   : > { %v8269_v14 = vpop.xlane.xlu0 %8268 }
0x1e01   : > { %v8277_v48 = vpop.xlane.xlu1 %8276 }
0x1e02   : > { %v8279_v61 = vsel %vm379_vm2, %v8269_v14, %v8277_v48 }
0x1e03   : > { %12769 = vmatprep.subr.mxu1 %v8279_v61  ;;  %v8266_v5 = vpop.xlane.xlu0 %8265 }
0x1e04   : > { %12770 = vmatpush3.msra.mxu1 %v8279_v61  ;;  %v11880_v61 = vld [vmem:[%s16062_s1 + $0x7e8] sm:$0xff] }
0x1e07   : > { %v8274_v15 = vpop.xlane.xlu0 %8273 }
0x1e08   : > { %v8278_v23 = vsel %vm379_vm2, %v8266_v5, %v8274_v15 }
0x1e09   : > { %12771 = vmatprep.subr.mxu1 %v8278_v23 }
0x1e0a   : > { %12772 = vmatpush3.msra.mxu1 %v8278_v23 }
0x1e0b   : > { %12774 = vmatmul.mubr.msk.f32.vlgmr.msra.gmra.mxu1 %vm4373_vm9, %v11874_v43  ;;  %v11887_v43 = vld [vmem:[%s16062_s1 + $0x820] sm:$0xff] }
0x1e0c   : > { %12787 = vmatprep.mubr.msk.f32.mxu1 %vm4373_vm9, %v11883_v31 }
0x1ecb   : > { %v12775_v58 = vpop.f32.mrf.mxu1 }
0x1ecc   : > { %v8365_v25 = vmul.f32 %v12775_v58, %v12775_v58 }
0x1ecd   : > { %v8355_v7 = vpop.f32.mrf.mxu1 }
0x1ece   : > { %v8364_v34 = vmul.f32 %v8355_v7, %v8355_v7  ;;  %8370 = vrot.lane.b32.xlu1 %v8365_v25, %s16234_s19 }
0x1ed0   : > { %8368 = vrot.lane.b32.xlu0 %v8364_v34, %s16234_s19 }
0x1ed2   : > { %8385 = vperm.xlu1 %12920, %v12775_v58  }
0x1ed6   : > { %8380 = vperm.xlu1 %12920, %v8355_v7  }
0x1eda   : > { %12921 = vset.pattern.permute.xlu1 %v16312_v16 }
0x1f40   : > { %v8371_v10 = vpop.permute.xlu1 %8370 }
0x1f41   : > { %v8375_v1 = vsub.f32 %v12775_v58, %v8371_v10 }
0x1f42   : > { %v8369_v20 = vpop.permute.xlu0 %8368 }
0x1f43   : > { %v8377_v42 = vmax.f32 %v8375_v1, 0.0  ;;  %v8374_v30 = vsub.f32 %v8355_v7, %v8369_v20  ;;  %v11884_v7 = vld [vmem:[%s16062_s1 + $0x808] sm:$0xff]  ;;  %v11891_v20 = vld [vmem:[%s16062_s1 + $0x840] sm:$0xff] }
0x1f45   : > { %v8391_v55 = vadd.f32 1e-05, %v8377_v42  ;;  %v8376_v50 = vmax.f32 %v8374_v30, 0.0  ;;  %v11888_v30 = vld [vmem:[%s16062_s1 + $0x828] sm:$0xff] }
0x1f47   : > { %12958 = vrsqrt.f32 %v8391_v55  ;;  %v8390_v52 = vadd.f32 1e-05, %v8376_v50 }
0x1f49   : > { %12960 = vrsqrt.f32 %v8390_v52  ;;  %v11895_v52 = vld [vmem:[%s16062_s1 + $0x860] sm:$0xff] }
0x1f4d   : > { %v8386_v41 = vpop.permute.xlu1 %8385 }
0x1f4e   : > { %v8389_v21 = vsub.f32 %v8263_v24, %v8386_v41 }
0x1f51   : > { %v8381_v8 = vpop.permute.xlu1 %8380 }
0x1f52   : > { %v8388_v44 = vsub.f32 %v15199_v56, %v8381_v8 }
0x1f54   : > { %v12959_v39 = vpop.eup %12958 }
0x1f55   : > { %8401 = vperm.xlu0 %12919, %v12959_v39  }
0x1f56   : > { %v12961_v47 = vpop.eup %12960 }
0x1f57   : > { %8396 = vperm.xlu1 %12921, %v12961_v47  }
0x1f59   : > { %12923 = vset.pattern.permute.xlu0 %v16313_v59 }
0x1f5b   : > { %12922 = vset.pattern.permute.xlu1 %v16313_v59 }
0x1fd0   : > { %v8402_v27 = vpop.permute.xlu0 %8401 }
0x1fd1   : > { %v15223_v22 = vmul.f32 %v8402_v27, %v8389_v21 }
0x1fd2   : > { %v8397_v13 = vpop.permute.xlu1 %8396 }
0x1fd3   : > { %8419 = vrot.lane.b32.xlu1 %v15223_v22, %s16251_s29  ;;  %8413 = vrot.lane.b32.xlu0 %v15223_v22, %s16250_s28  ;;  %v15266_v38 = vmul.f32 %v8397_v13, %v8388_v44  ;;  %v11896_v13 = vld [vmem:[%s16062_s1 + $0x868] sm:$0xff] }
0x1fd7   : > { %8521 = vrot.lane.b32.xlu1 %v15223_v22, %s16253_s18  ;;  %8515 = vrot.lane.b32.xlu0 %v15223_v22, %s16252_s17 }
0x1fdb   : > { %8623 = vrot.lane.b32.xlu1 %v15223_v22, %s16255_s6  ;;  %8617 = vrot.lane.b32.xlu0 %v15223_v22, %s16254_s0 }
0x1fdf   : > { %8725 = vrot.lane.b32.xlu1 %v15223_v22, %s16234_s19  ;;  %8719 = vrot.lane.b32.xlu0 %v15223_v22, %s16256_s7 }
0x1fe3   : > { %8913 = vrot.lane.b32.xlu1 %v15223_v22, %s16257_s13  ;;  %8907 = vrot.lane.b32.xlu0 %v15223_v22, %s16243_s20 }
0x1fe7   : > { %9015 = vrot.lane.b32.xlu1 %v15223_v22, %s16259_s27  ;;  %9009 = vrot.lane.b32.xlu0 %v15223_v22, %s16258_s12 }
0x1feb   : > { %9117 = vrot.lane.b32.xlu1 %v15223_v22, %s16226_s23  ;;  %9111 = vrot.lane.b32.xlu0 %v15223_v22, %s16227_s24 }
0x1fef   : > { %9219 = vrot.lane.b32.xlu1 %v15223_v22, %s16228_s25  ;;  %9213 = vrot.lane.b32.xlu0 %v15223_v22, %s16229_s22 }
0x1ff3   : > { %8417 = vrot.lane.b32.xlu1 %v15266_v38, %s16251_s29  ;;  %8411 = vrot.lane.b32.xlu0 %v15266_v38, %s16250_s28 }
0x1ff7   : > { %8519 = vrot.lane.b32.xlu1 %v15266_v38, %s16253_s18  ;;  %8513 = vrot.lane.b32.xlu0 %v15266_v38, %s16252_s17 }
0x1ffb   : > { %8621 = vrot.lane.b32.xlu1 %v15266_v38, %s16255_s6  ;;  %8615 = vrot.lane.b32.xlu0 %v15266_v38, %s16254_s0 }
0x1fff   : > { %8723 = vrot.lane.b32.xlu1 %v15266_v38, %s16234_s19  ;;  %8717 = vrot.lane.b32.xlu0 %v15266_v38, %s16256_s7 }
0x2003   : > { %8911 = vrot.lane.b32.xlu1 %v15266_v38, %s16257_s13  ;;  %8905 = vrot.lane.b32.xlu0 %v15266_v38, %s16243_s20 }
0x2007   : > { %9013 = vrot.lane.b32.xlu1 %v15266_v38, %s16259_s27  ;;  %9007 = vrot.lane.b32.xlu0 %v15266_v38, %s16258_s12 }
0x200b   : > { %9115 = vrot.lane.b32.xlu1 %v15266_v38, %s16226_s23  ;;  %9109 = vrot.lane.b32.xlu0 %v15266_v38, %s16227_s24 }
0x200f   : > { %9217 = vrot.lane.b32.xlu1 %v15266_v38, %s16228_s25  ;;  %9211 = vrot.lane.b32.xlu0 %v15266_v38, %s16229_s22 }
0x2045   : > { %v8420_v28 = vpop.permute.xlu1 %8419  ;;  %v8414_v45 = vpop.permute.xlu0 %8413 }
0x2046   : > { %v8424_v18 = vsel %vm2555_vm14, %v8414_v45, %v8420_v28  ;;  %v11899_v28 = vld [vmem:[%s16062_s1 + $0x880] sm:$0xff] }
0x2047   : > { %v8426_v49 = vmul.f32 %v8424_v18, %v13691_v53  ;;  %v11903_v45 = vld [vmem:[%s16062_s1 + $0x8a0] sm:$0xff] }
0x2049   : > { %v8522_v9 = vpop.permute.xlu1 %8521  ;;  %12776 = vmatprep.subr.mxu0 %v8426_v49  ;;  %v8516_v51 = vpop.permute.xlu0 %8515 }
0x204a   : > { %v8526_v0 = vsel %vm2448_vm13, %v8516_v51, %v8522_v9  ;;  %12777 = vmatpush3.msra.mxu0 %v8426_v49 }
0x204b   : > { %v8528_v3 = vmul.f32 %v8526_v0, %v13695_v63 }
0x204d   : > { %v8624_v36 = vpop.permute.xlu1 %8623  ;;  %12783 = vmatprep.subr.mxu1 %v8528_v3  ;;  %v8618_v35 = vpop.permute.xlu0 %8617 }
0x204e   : > { %12784 = vmatpush3.msra.mxu1 %v8528_v3  ;;  %v8628_v19 = vsel %vm2732_vm15, %v8618_v35, %v8624_v36  ;;  %v11907_v3 = vld [vmem:[%s16062_s1 + $0x8c0] sm:$0xff]  ;;  %v11904_v36 = vld [vmem:[%s16062_s1 + $0x8a8] sm:$0xff] }
0x204f   : > { %v8630_v5 = vmul.f32 %v8628_v19, %v13705_v11  ;;  %v9327_v19 = vld [vmem:[%s16070_s9 + $0x60] sm:$0xff] }
0x2051   : > { %v8726_v62 = vpop.permute.xlu1 %8725  ;;  %v8720_v32 = vpop.permute.xlu0 %8719 }
0x2052   : > { %v8730_v58 = vsel %vm379_vm2, %v8720_v32, %v8726_v62  ;;  %v11911_v32 = vld [vmem:[%s16062_s1 + $0x8e0] sm:$0xff] }
0x2053   : > { %v8732_v34 = vmul.f32 %v8730_v58, %v13717_v26  ;;  %v9319_v58 = vld [vmem:[%s16070_s9 + $0x20] sm:$0xff] }
0x2055   : > { %v8914_v40 = vpop.permute.xlu1 %8913  ;;  %v8908_v24 = vpop.permute.xlu0 %8907 }
0x2056   : > { %v8918_v39 = vsel %vm2985_vm0, %v8908_v24, %v8914_v40 }
0x2057   : > { %v8920_v21 = vmul.f32 %v8918_v39, %v13729_v33 }
0x2059   : > { %v9016_v46 = vpop.permute.xlu1 %9015  ;;  %v9010_v56 = vpop.permute.xlu0 %9009 }
0x205d   : > { %v9118_v57 = vpop.permute.xlu1 %9117  ;;  %v9112_v6 = vpop.permute.xlu0 %9111 }
0x205e   : > { %v9122_v31 = vsel %vm3163_vm10, %v9112_v6, %v9118_v57 }
0x205f   : > { %v9124_v49 = vmul.f32 %v9122_v31, %v16300_v60 }
0x2061   : > { %v15304_v37 = vpop.permute.xlu1 %9219  ;;  %v15306_v12 = vpop.permute.xlu0 %9213 }
0x2065   : > { %v8418_v4 = vpop.permute.xlu1 %8417  ;;  %v8412_v17 = vpop.permute.xlu0 %8411 }
0x2066   : > { %v8423_v14 = vsel %vm2555_vm14, %v8412_v17, %v8418_v4  ;;  %vm16314_vm14 = vmmov %vm16305_vm3  ;;  %v9329_v4 = vld [vmem:[%s16070_s9 + $0x70] sm:$0xff]  ;;  %v9328_v17 = vld [vmem:[%s16070_s9 + $0x68] sm:$0xff] }
0x2067   : > { %v8425_v48 = vmul.f32 %v8423_v14, %v13691_v53  ;;  %v9224_v9 = vsel %vm16314_vm14, %v15306_v12, %v15304_v37  ;;  %v16316_v12 = vmov 0.0   ;;  %v9326_v14 = vld [vmem:[%s16070_s9 + $0x58] sm:$0xff] }
0x2068   : > { %v9226_v35 = vmul.f32 %v15150_v2, %v9224_v9 }
0x2069   : > { %v8520_v15 = vpop.permute.xlu1 %8519  ;;  %12778 = vmatprep.subr.mxu0 %v8425_v48  ;;  %v8514_v23 = vpop.permute.xlu0 %8513 }
0x206a   : > { %v8525_v25 = vsel %vm2448_vm13, %v8514_v23, %v8520_v15  ;;  %12779 = vmatpush3.msra.mxu0 %v8425_v48  ;;  %v9325_v48 = vld [vmem:[%s16070_s9 + $0x50] sm:$0xff]  ;;  %v9322_v15 = vld [vmem:[%s16070_s9 + $0x38] sm:$0xff] }
0x206b   : > { %v8527_v53 = vmul.f32 %v8525_v25, %v13695_v63  ;;  %12790 = vmatprep.subr.mxu0 %v8630_v5  ;;  %12781 = vmatmul.mubr.msk.f32.vlgmr.msra.gmra.mxu0 %vm4373_vm9, %v11880_v61  ;;  %v9324_v61 = vld [vmem:[%s16070_s9 + $0x48] sm:$0xff]  ;;  %v9321_v23 = vld [vmem:[%s16070_s9 + $0x30] sm:$0xff]  ;;  %v9318_v25 = vld [vmem:[%s16070_s9 + $0x18] sm:$0xff] }
0x206c   : > { %12791 = vmatpush3.msra.mxu0 %v8630_v5  ;;  %12794 = vmatprep.mubr.msk.f32.mxu0 %vm4373_vm9, %v11887_v43  ;;  %v9323_v5 = vld [vmem:[%s16070_s9 + $0x40] sm:$0xff]  ;;  %v9320_v43 = vld [vmem:[%s16070_s9 + $0x28] sm:$0xff] }
0x206d   : > { %v8622_v10 = vpop.permute.xlu1 %8621  ;;  %12785 = vmatprep.subr.mxu1 %v8527_v53  ;;  %v8616_v1 = vpop.permute.xlu0 %8615 }
0x206e   : > { %v8627_v63 = vsel %vm2732_vm15, %v8616_v1, %v8622_v10  ;;  %12786 = vmatpush3.msra.mxu1 %v8527_v53  ;;  %v9317_v53 = vld [vmem:[%s16070_s9 + $0x10] sm:$0xff] }
0x206f   : > { %v8629_v42 = vmul.f32 %v8627_v63, %v13705_v11  ;;  %12797 = vmatprep.subr.mxu1 %v8732_v34  ;;  %12788 = vmatmul.mubr.msk.f32.vlgmr.msra.gmra.mxu1 %vm4373_vm9, %v11884_v7  ;;  %v9020_v11 = vsel %vm3074_vm11, %v9010_v56, %v9016_v46  ;;  %v11908_v46 = vld [vmem:[%s16062_s1 + $0x8c8] sm:$0xff]  ;;  %v11878_v10 = vld [vmem:[%s16063_s2 + $0x1d0] sm:$0xff] }
0x2070   : > { %12798 = vmatpush3.msra.mxu1 %v8732_v34  ;;  %12801 = vmatprep.mubr.msk.f32.mxu1 %vm4373_vm9, %v11891_v20  ;;  %v9022_v27 = vmul.f32 %v9020_v11, %v16285_v54  ;;  %v9316_v7 = vld [vmem:[%s16070_s9 + $0x8] sm:$0xff]  ;;  %v9315_v34 = vld [vmem:[%s16070_s9] sm:$0xff] }
0x2071   : > { %v8724_v55 = vpop.permute.xlu1 %8723  ;;  %12792 = vmatprep.subr.mxu0 %v8629_v42  ;;  %v8718_v50 = vpop.permute.xlu0 %8717  ;;  %v11877_v20 = vld [vmem:[%s16063_s2 + $0x1c0] sm:$0xff] }
0x2072   : > { %v8729_v47 = vsel %vm379_vm2, %v8718_v50, %v8724_v55  ;;  %12793 = vmatpush3.msra.mxu0 %v8629_v42 }
0x2073   : > { %v8731_v41 = vmul.f32 %v8729_v47, %v13717_v26  ;;  %12804 = vmatprep.subr.mxu0 %v15223_v22  ;;  %12795 = vmatmul.mubr.msk.f32.vlgmr.msra.gmra.mxu0 %vm4373_vm9, %v11888_v30  ;;  %v11892_v26 = vld [vmem:[%s16062_s1 + $0x848] sm:$0xff] }
0x2074   : > { %12805 = vmatpush3.msra.mxu0 %v15223_v22  ;;  %12808 = vmatprep.mubr.msk.f32.mxu0 %vm4373_vm9, %v11895_v52 }
0x2075   : > { %v8912_v8 = vpop.permute.xlu1 %8911  ;;  %12799 = vmatprep.subr.mxu1 %v8731_v41  ;;  %12806 = vmatprep.subr.mxu0 %v15266_v38  ;;  %v8906_v29 = vpop.permute.xlu0 %8905 }
0x2076   : > { %v8917_v22 = vsel %vm2985_vm0, %v8906_v29, %v8912_v8  ;;  %12800 = vmatpush3.msra.mxu1 %v8731_v41  ;;  %12807 = vmatpush3.msra.mxu0 %v15266_v38 }
0x2077   : > { %v8919_v44 = vmul.f32 %v8917_v22, %v13729_v33  ;;  %12811 = vmatprep.subr.mxu1 %v8920_v21  ;;  %12818 = vmatprep.subr.mxu0 %v9022_v27  ;;  %v11900_v33 = vld [vmem:[%s16062_s1 + $0x888] sm:$0xff] }
0x2078   : > { %12802 = vmatmul.mubr.msk.f32.vlgmr.msra.gmra.mxu1 %vm4373_vm9, %v11892_v26  ;;  %12809 = vmatmul.mubr.msk.f32.vlgmr.msra.gmra.mxu0 %vm4373_vm9, %v11896_v13 }
0x2079   : > { %12812 = vmatpush3.msra.mxu1 %v8920_v21  ;;  %12819 = vmatpush3.msra.mxu0 %v9022_v27  ;;  %v9014_v38 = vpop.permute.xlu1 %9013  ;;  %v9008_v18 = vpop.permute.xlu0 %9007 }
0x207a   : > { %12813 = vmatprep.subr.mxu1 %v8919_v44  ;;  %v9019_v51 = vsel %vm3074_vm11, %v9008_v18, %v9014_v38  ;;  %12815 = vmatprep.mubr.msk.f32.mxu1 %vm4373_vm9, %v11899_v28  ;;  %vm16315_vm11 = vmmov %vm16305_vm3 }
0x207b   : > { %v9021_v0 = vmul.f32 %v9019_v51, %v16285_v54  ;;  %12814 = vmatpush3.msra.mxu1 %v8919_v44  ;;  %12822 = vmatprep.mubr.msk.f32.mxu0 %vm4373_vm9, %v11903_v45 }
0x207c   : > { %12825 = vmatprep.subr.mxu1 %v9124_v49  ;;  %12816 = vmatmul.mubr.msk.f32.vlgmr.msra.gmra.mxu1 %vm4373_vm9, %v11900_v33 }
0x207d   : > { %12826 = vmatpush3.msra.mxu1 %v9124_v49  ;;  %v9116_v62 = vpop.permute.xlu1 %9115  ;;  %12820 = vmatprep.subr.mxu0 %v9021_v0  ;;  %v9110_v54 = vpop.permute.xlu0 %9109 }
0x207e   : > { %v9121_v40 = vsel %vm3163_vm10, %v9110_v54, %v9116_v62  ;;  %12821 = vmatpush3.msra.mxu0 %v9021_v0  ;;  %12829 = vmatprep.mubr.msk.f32.mxu1 %vm4373_vm9, %v11907_v3  ;;  %vm16317_vm10 = vmmov 0  }
0x207f   : > { %v9123_v24 = vmul.f32 %v9121_v40, %v16300_v60  ;;  %12832 = vmatprep.subr.mxu0 %v9226_v35  ;;  %12823 = vmatmul.mubr.msk.f32.vlgmr.msra.gmra.mxu0 %vm4373_vm9, %v11904_v36  ;;  %v11912_v60 = vld [vmem:[%s16062_s1 + $0x8e8] sm:$0xff] }
0x2080   : > { %12833 = vmatpush3.msra.mxu0 %v9226_v35  ;;  %12836 = vmatprep.mubr.msk.f32.mxu0 %vm4373_vm9, %v11911_v32 }
0x2081   : > { %v9218_v56 = vpop.permute.xlu1 %9217  ;;  %12827 = vmatprep.subr.mxu1 %v9123_v24  ;;  %v9212_v57 = vpop.permute.xlu0 %9211 }
0x2082   : > { %v9223_v6 = vsel %vm16315_vm11, %v9212_v57, %v9218_v56  ;;  %12828 = vmatpush3.msra.mxu1 %v9123_v24 }
0x2083   : > { %v9225_v37 = vmul.f32 %v15150_v2, %v9223_v6  ;;  %12830 = vmatmul.mubr.msk.f32.vlgmr.msra.gmra.mxu1 %vm4373_vm9, %v11908_v46  ;;  %v9330_v2 = vld [vmem:[%s16070_s9 + $0x78] sm:$0xff] }
0x2084   : > { %9401 = vmatprep.mubr.f32.mxu1 %v16316_v12  ;;  %9353 = vmatprep.subr.mxu1 %v9330_v2 }
0x2085   : > { %12834 = vmatprep.subr.mxu0 %v9225_v37  ;;  %9354 = vmatpush1.msra.mxu1 %v9329_v4 }
0x2086   : > { %12835 = vmatpush3.msra.mxu0 %v9225_v37  ;;  %9355 = vmatprep.subr.mxu1 %v9328_v17 }
0x2087   : > { %12837 = vmatmul.mubr.msk.f32.vlgmr.msra.gmra.mxu0 %vm4373_vm9, %v11912_v60  ;;  %12839 = vmatprep.subr.mxu0 %v16316_v12  ;;  %vm9445_vm9 = vcmask 195584  }
0x2088   : > { %12845 = vmatprep.mubr.msk.f32.mxu0 %vm16317_vm10, %v16316_v12  ;;  %9356 = vmatpush1.msra.mxu1 %v9327_v19 }
0x2089   : > { %9357 = vmatprep.subr.mxu1 %v9326_v14 }
0x208a   : > { %9358 = vmatpush1.msra.mxu1 %v9325_v48 }
0x208b   : > { %9359 = vmatprep.subr.mxu1 %v9324_v61 }
0x208c   : > { %9360 = vmatpush1.msra.mxu1 %v9323_v5  ;;  %v16318_v5 = vld [vmem:[#allocation18_spill] sm:$0xff] }
0x208d   : > { %9361 = vmatprep.subr.mxu1 %v9322_v15  ;;  %v9424_v15 = vmul.f32 %v16318_v5, %v16318_v5 }
0x208e   : > { %9362 = vmatpush1.msra.mxu1 %v9321_v23  ;;  %v16319_v23 = vld [vmem:[#allocation19_spill] sm:$0xff] }
0x208f   : > { %9363 = vmatprep.subr.mxu1 %v9320_v43  ;;  %v9414_v43 = vadd.f32 %v16318_v5, %v16319_v23 }
0x2090   : > { %9364 = vmatpush1.msra.mxu1 %v9319_v58  ;;  %v9423_v58 = vmul.f32 %v16319_v23, %v16319_v23 }
0x2091   : > { %9365 = vmatprep.subr.mxu1 %v9318_v25 }
0x2092   : > { %9366 = vmatpush1.msra.mxu1 %v9317_v53  ;;  %v9429_v25 = vadd.f32 %v9424_v15, %v9423_v58 }
0x2093   : > { %9367 = vmatprep.subr.mxu1 %v9316_v7 }
0x2094   : > { %9368 = vmatpush1.msra.mxu1 %v9315_v34 }
0x212b   : > { %v12782_v1 = vpop.f32.mrf.mxu0 }
0x212c   : > { %v8512_v63 = vadd.f32 %v12782_v1, %v11878_v10 }
0x212d   : > { %v8502_v42 = vpop.f32.mrf.mxu0 }
0x212e   : > { %v8511_v30 = vadd.f32 %v11877_v20, %v8502_v42 }
0x212f   : > { %v12789_v55 = vpop.f32.mrf.mxu1 }
0x2130   : > { %v8614_v50 = vadd.f32 %v12789_v55, %v8512_v63 }
0x2131   : > { %v8604_v52 = vpop.f32.mrf.mxu1 }
0x2132   : > { %v8613_v39 = vadd.f32 %v8604_v52, %v8511_v30  ;;  %v11917_v30 = vld [vmem:[%s16064_s3 + $0x180] sm:$0xff]  ;;  %v11919_v52 = vld [vmem:[%s16064_s3 + $0x190] sm:$0xff] }
0x2133   : > { %v12796_v11 = vpop.f32.mrf.mxu0 }
0x2134   : > { %v8716_v47 = vadd.f32 %v12796_v11, %v8614_v50  ;;  %v11918_v50 = vld [vmem:[%s16064_s3 + $0x188] sm:$0xff] }
0x2135   : > { %v8706_v41 = vpop.f32.mrf.mxu0 }
0x2136   : > { %v8715_v21 = vadd.f32 %v8706_v41, %v8613_v39 }
0x2138   : > { %v12803_v27 = vpop.f32.mrf.mxu1  ;;  %v12810_v8 = vpop.f32.mrf.mxu0 }
0x2139   : > { %v8818_v29 = vadd.f32 %v12803_v27, %v8716_v47 }
0x213a   : > { %v8808_v26 = vpop.f32.mrf.mxu1  ;;  %v8894_v13 = vpop.f32.mrf.mxu0 }
0x213b   : > { %v8817_v22 = vadd.f32 %v8808_v26, %v8715_v21  ;;  %v8904_v31 = vadd.f32 %v12810_v8, %v8818_v29 }
0x213c   : > { %v12817_v44 = vpop.f32.mrf.mxu1 }
0x213d   : > { %v8903_v28 = vadd.f32 %v8894_v13, %v8817_v22  ;;  %v9006_v18 = vadd.f32 %v12817_v44, %v8904_v31 }
0x213e   : > { %v8996_v45 = vpop.f32.mrf.mxu1 }
0x213f   : > { %v12824_v38 = vpop.f32.mrf.mxu0  ;;  %v9005_v33 = vadd.f32 %v8996_v45, %v8903_v28 }
0x2140   : > { %v9108_v51 = vadd.f32 %v12824_v38, %v9006_v18 }
0x2141   : > { %v9098_v49 = vpop.f32.mrf.mxu0 }
0x2142   : > { %v9107_v0 = vadd.f32 %v9098_v49, %v9005_v33 }
0x2143   : > { %v12831_v9 = vpop.f32.mrf.mxu1 }
0x2144   : > { %v9210_v35 = vadd.f32 %v12831_v9, %v9108_v51 }
0x2145   : > { %v9200_v3 = vpop.f32.mrf.mxu1 }
0x2146   : > { %v9209_v62 = vadd.f32 %v9200_v3, %v9107_v0 }
0x2147   : > { %v12838_v36 = vpop.f32.mrf.mxu0 }
0x2148   : > { %v9312_v40 = vadd.f32 %v12838_v36, %v9210_v35 }
0x2149   : > { %v9302_v54 = vpop.f32.mrf.mxu0 }
0x214a   : > { %v9311_v32 = vadd.f32 %v9302_v54, %v9209_v62  ;;  %v9314_v46 = vmax.f32 %v9312_v40, 0.0 }
0x214c   : > { %v9313_v24 = vmax.f32 %v9311_v32, 0.0 }
0x214e   : > { %11915 = vmatmul.mubr.msk.f32.vlgmr.msra.gmra.mxu1 %vm2437_vm12, %v9313_v24 }
0x214f   : > { %9407 = vmatprep.mubr.f32.mxu1 %v16316_v12 }
0x2152   : > { %11916 = vmatmul.mubr.msk.f32.gmra.mxu1 %vm2437_vm12, %v9314_v46 }
0x2153   : > { %9802 = vmatprep.mubr.f32.mxu1 %v16316_v12 }
0x220e   : > { %v15468_v56 = vpop.f32.mrf.mxu1 }
0x220f   : > { %v9425_v2 = vmul.f32 %v15468_v56, %v15468_v56 }
0x2210   : > { %v15470_v57 = vpop.f32.mrf.mxu1 }
0x2211   : > { %v9417_v6 = vadd.f32 %v15470_v57, %v15468_v56  ;;  %v9426_v37 = vmul.f32 %v15470_v57, %v15470_v57 }
0x2212   : > { %v15476_v60 = vpop.f32.mrf.mxu1 }
0x2213   : > { %9418 = vadd.xlane.f32.xlu0 %v9417_v6  ;;  %v9427_v17 = vmul.f32 %v15476_v60, %v15476_v60  ;;  %v9432_v14 = vadd.f32 %v9426_v37, %v9425_v2 }
0x2214   : > { %v15480_v4 = vpop.f32.mrf.mxu1 }
0x2215   : > { %v9428_v19 = vmul.f32 %v15480_v4, %v15480_v4  ;;  %v9420_v61 = vadd.f32 %v15480_v4, %v15476_v60 }
0x2217   : > { %9433 = vadd.xlane.f32.xlu0 %v9432_v14  ;;  %v9435_v48 = vadd.f32 %v9428_v19, %v9427_v17 }
0x2219   : > { %9436 = vadd.xlane.f32.xlu1 %v9435_v48 }
0x221b   : > { %9421 = vadd.xlane.f32.xlu0 %v9420_v61 }
0x221d   : > { %9415 = vadd.xlane.f32.xlu1 %v9414_v43 }
0x221f   : > { %9430 = vadd.xlane.f32.xlu0 %v9429_v25 }
0x229c   : > { %v9419_v53 = vpop.xlane.xlu0 %9418 }
0x22a0   : > { %v9434_v7 = vpop.xlane.xlu0 %9433 }
0x22a1   : > { %v9439_v20 = vsel %vm379_vm2, %v9419_v53, %v9434_v7 }
0x22a2   : > { %v9437_v34 = vpop.xlane.xlu1 %9436 }
0x22a4   : > { %v9422_v10 = vpop.xlane.xlu0 %9421 }
0x22a5   : > { %v9440_v1 = vsel %vm379_vm2, %v9422_v10, %v9437_v34 }
0x22a6   : > { %12840 = vmatpush3.msra.mxu0 %v9440_v1  ;;  %v9416_v63 = vpop.xlane.xlu1 %9415 }
0x22a7   : > { %12841 = vmatprep.subr.mxu0 %v16316_v12 }
0x22a8   : > { %12842 = vmatpush3.msra.mxu0 %v9439_v20  ;;  %v9431_v42 = vpop.xlane.xlu0 %9430 }
0x22a9   : > { %v9438_v55 = vsel %vm379_vm2, %v9416_v63, %v9431_v42  ;;  %12843 = vmatprep.subr.mxu0 %v16316_v12 }
0x22aa   : > { %12844 = vmatpush3.msra.mxu0 %v9438_v55 }
0x22ab   : > { %12846 = vmatmul.mubr.msk.f32.vlgmr.msra.gmra.mxu0 %vm9445_vm9, %v11917_v30 }
0x22ac   : > { %12848 = vmatprep.mubr.msk.f32.mxu0 %vm16317_vm10, %v16316_v12 }
0x22af   : > { %12849 = vmatmul.mubr.msk.f32.gmra.mxu0 %vm9445_vm9, %v11918_v50 }
0x22b0   : > { %12851 = vmatprep.mubr.msk.f32.mxu0 %vm16317_vm10, %v16316_v12 }
0x22b3   : > { %12852 = vmatmul.mubr.msk.f32.gmra.mxu0 %vm9445_vm9, %v11919_v52 }
0x22b4   : > { %9700 = vmatprep.mubr.f32.mxu0 %v16316_v12 }
0x236b   : > { %v9521_v39 = vpop.f32.mrf.mxu0 }
0x236c   : > { %v9535_v26 = vmul.f32 %v9521_v39, %v9521_v39 }
0x236d   : > { %v12847_v11 = vpop.f32.mrf.mxu0 }
0x236f   : > { %v9526_v47 = vpop.f32.mrf.mxu0 }
0x2370   : > { %v9536_v41 = vmul.f32 %v9526_v47, %v9526_v47 }
0x2371   : > { %v12850_v21 = vpop.f32.mrf.mxu0 }
0x2372   : > { %9543 = vrot.lane.b32.xlu0 %v9536_v41, %s16234_s19 }
0x2373   : > { %v9531_v27 = vpop.f32.mrf.mxu0 }
0x2374   : > { %v9537_v8 = vmul.f32 %v9531_v27, %v9531_v27 }
0x2375   : > { %v12853_v29 = vpop.f32.mrf.mxu0 }
0x2376   : > { %9563 = vperm.xlu0 %12923, %v9526_v47   ;;  %9545 = vrot.lane.b32.xlu1 %v9537_v8, %s16234_s19 }
0x237a   : > { %9541 = vrot.lane.b32.xlu1 %v9535_v26, %s16234_s19  ;;  %12925 = vset.pattern.permute.xlu0 %v16312_v16 }
0x237e   : > { %9568 = vperm.xlu1 %12922, %v9531_v27  }
0x2382   : > { %9558 = vperm.xlu1 %12922, %v9521_v39  }
0x2386   : > { %12924 = vset.pattern.permute.xlu1 %v16312_v16 }
0x23e4   : > { %v9544_v13 = vpop.permute.xlu0 %9543 }
0x23e5   : > { %v9551_v22 = vsub.f32 %v9526_v47, %v9544_v13 }
0x23e7   : > { %v9554_v31 = vmax.f32 %v9551_v22, 0.0 }
0x23e8   : > { %v9546_v44 = vpop.permute.xlu1 %9545 }
0x23e9   : > { %v9578_v28 = vadd.f32 1e-05, %v9554_v31  ;;  %v9552_v45 = vsub.f32 %v9531_v27, %v9546_v44 }
0x23eb   : > { %12962 = vrsqrt.f32 %v9578_v28  ;;  %v9555_v33 = vmax.f32 %v9552_v45, 0.0 }
0x23ec   : > { %v9542_v38 = vpop.permute.xlu1 %9541 }
0x23ed   : > { %v9550_v18 = vsub.f32 %v9521_v39, %v9542_v38  ;;  %v9579_v51 = vadd.f32 1e-05, %v9555_v33 }
0x23ef   : > { %v9553_v49 = vmax.f32 %v9550_v18, 0.0 }
0x23f1   : > { %v9577_v9 = vadd.f32 1e-05, %v9553_v49 }
0x23f3   : > { %12964 = vrsqrt.f32 %v9577_v9 }
0x23f4   : > { %12966 = vrsqrt.f32 %v9579_v51 }
0x23f8   : > { %v12963_v0 = vpop.eup %12962 }
0x23f9   : > { %9590 = vperm.xlu0 %12925, %v12963_v0   ;;  %v9569_v35 = vpop.permute.xlu1 %9568 }
0x23fa   : > { %v9576_v14 = vsub.f32 %v15480_v4, %v9569_v35 }
0x23fd   : > { %v9559_v62 = vpop.permute.xlu1 %9558 }
0x23fe   : > { %v9571_v54 = vsub.f32 %v16319_v23, %v9559_v62  ;;  %v9572_v32 = vsub.f32 %v16318_v5, %v9559_v62  ;;  %v16324_v5 = vld [vmem:[#allocation3_spill] sm:$0xff] }
0x23ff   : > { %vm16325_vm12 = vcmp.lt.s32.totalorder %v16324_v5, 17  ;;  %vm16327_vm0 = vcmp.lt.s32.totalorder %v16324_v5, 16  ;;  %vm16329_vm3 = vcmp.lt.s32.totalorder %v16324_v5, 15  ;;  %vm16331_vm5 = vcmp.lt.s32.totalorder %v16324_v5, 1 }
0x2400   : > { %v12965_v3 = vpop.eup %12964  ;;  %vm16326_vm15 = vmmov %vm16325_vm12  ;;  %vm16333_vm7 = vcmp.lt.s32.totalorder %v16324_v5, 127  ;;  %vm16335_vm14 = vcmp.lt.s32.totalorder %v16324_v5, 113 }
0x2401   : > { %9585 = vperm.xlu1 %12924, %v12965_v3   ;;  %v12967_v36 = vpop.eup %12966  ;;  %vm16328_vm1 = vmmov %vm16327_vm0 }
0x2402   : > { %vm16330_vm4 = vmmov %vm16329_vm3 }
0x2403   : > { %vm16332_vm6 = vmmov %vm16331_vm5 }
0x2404   : > { %vm16334_vm8 = vmmov %vm16333_vm7 }
0x2405   : > { %9595 = vperm.xlu1 %12924, %v12967_v36   ;;  %vm16336_vm11 = vmmov %vm16335_vm14 }
0x2409   : > { %12926 = vset.pattern.permute.xlu1 %v16313_v59  ;;  %v9564_v59 = vpop.permute.xlu0 %9563 }
0x240a   : > { %v9573_v37 = vsub.f32 %v15468_v56, %v9564_v59  ;;  %v9574_v2 = vsub.f32 %v15470_v57, %v9564_v59  ;;  %v9575_v57 = vsub.f32 %v15476_v60, %v9569_v35 }
0x2474   : > { %v9591_v6 = vpop.permute.xlu0 %9590 }
0x2475   : > { %v15558_v17 = vmul.f32 %v9591_v6, %v9573_v37  ;;  %v15560_v19 = vmul.f32 %v9591_v6, %v9574_v2  ;;  %v16343_v37 = vld [vmem:[#allocation5_spill] sm:$0xff] }
0x247c   : > { %v9586_v40 = vpop.permute.xlu1 %9585 }
0x247d   : > { %v15524_v24 = vmul.f32 %v9586_v40, %v9571_v54  ;;  %v15526_v46 = vmul.f32 %v9586_v40, %v9572_v32 }
0x247f   : > { %9613 = vrot.lane.b32.xlu0 %v15526_v46, %s16320_s21  ;;  %9607 = vrot.lane.b32.xlu1 %v15524_v24, %s16320_s21 }
0x2480   : > { %v9596_v56 = vpop.permute.xlu1 %9595 }
0x2481   : > { %v15596_v48 = vmul.f32 %v9596_v56, %v9575_v57  ;;  %v15598_v61 = vmul.f32 %v9596_v56, %v9576_v14  ;;  %v16344_v56 = vld [vmem:[#allocation4_spill] sm:$0xff] }
0x2483   : > { %9715 = vrot.lane.b32.xlu0 %v15526_v46, %s16321_s26  ;;  %9709 = vrot.lane.b32.xlu1 %v15524_v24, %s16321_s26 }
0x2487   : > { %9817 = vrot.lane.b32.xlu0 %v15526_v46, %s16232_s16  ;;  %9811 = vrot.lane.b32.xlu1 %v15524_v24, %s16232_s16 }
0x248b   : > { %9919 = vrot.lane.b32.xlu0 %v15526_v46, %s16234_s19  ;;  %9913 = vrot.lane.b32.xlu1 %v15524_v24, %s16234_s19 }
0x248f   : > { %10099 = vrot.lane.b32.xlu0 %v15526_v46, %s16243_s20  ;;  %10093 = vrot.lane.b32.xlu1 %v15524_v24, %s16243_s20 }
0x2493   : > { %10201 = vrot.lane.b32.xlu0 %v15526_v46, %s16231_s15  ;;  %10195 = vrot.lane.b32.xlu1 %v15524_v24, %s16231_s15 }
0x2497   : > { %10303 = vrot.lane.b32.xlu0 %v15526_v46, %s16322_s30  ;;  %10297 = vrot.lane.b32.xlu1 %v15524_v24, %s16322_s30 }
0x249b   : > { %9615 = vrot.lane.b32.xlu0 %v15560_v19, %s16320_s21  ;;  %9609 = vrot.lane.b32.xlu1 %v15558_v17, %s16320_s21 }
0x249f   : > { %9717 = vrot.lane.b32.xlu0 %v15560_v19, %s16321_s26  ;;  %9711 = vrot.lane.b32.xlu1 %v15558_v17, %s16321_s26 }
0x24a3   : > { %9819 = vrot.lane.b32.xlu0 %v15560_v19, %s16232_s16  ;;  %9813 = vrot.lane.b32.xlu1 %v15558_v17, %s16232_s16 }
0x24a7   : > { %9921 = vrot.lane.b32.xlu0 %v15560_v19, %s16234_s19  ;;  %9915 = vrot.lane.b32.xlu1 %v15558_v17, %s16234_s19 }
0x24ab   : > { %10101 = vrot.lane.b32.xlu0 %v15560_v19, %s16243_s20  ;;  %10095 = vrot.lane.b32.xlu1 %v15558_v17, %s16243_s20 }
0x24af   : > { %10203 = vrot.lane.b32.xlu0 %v15560_v19, %s16231_s15  ;;  %10197 = vrot.lane.b32.xlu1 %v15558_v17, %s16231_s15 }
0x24b3   : > { %10305 = vrot.lane.b32.xlu0 %v15560_v19, %s16322_s30  ;;  %10299 = vrot.lane.b32.xlu1 %v15558_v17, %s16322_s30 }
0x24b7   : > { %10407 = vrot.lane.b32.xlu0 %v15560_v19, %s16323_s11  ;;  %10401 = vrot.lane.b32.xlu1 %v15558_v17, %s16323_s11 }
0x24bb   : > { %9617 = vrot.lane.b32.xlu0 %v15598_v61, %s16320_s21  ;;  %9611 = vrot.lane.b32.xlu1 %v15596_v48, %s16320_s21 }
0x24bf   : > { %9719 = vrot.lane.b32.xlu0 %v15598_v61, %s16321_s26  ;;  %9713 = vrot.lane.b32.xlu1 %v15596_v48, %s16321_s26 }
0x24c3   : > { %9821 = vrot.lane.b32.xlu0 %v15598_v61, %s16232_s16  ;;  %9815 = vrot.lane.b32.xlu1 %v15596_v48, %s16232_s16 }
0x24c7   : > { %9923 = vrot.lane.b32.xlu0 %v15598_v61, %s16234_s19  ;;  %9917 = vrot.lane.b32.xlu1 %v15596_v48, %s16234_s19 }
0x24cb   : > { %10103 = vrot.lane.b32.xlu0 %v15598_v61, %s16243_s20  ;;  %10097 = vrot.lane.b32.xlu1 %v15596_v48, %s16243_s20 }
0x24cf   : > { %10205 = vrot.lane.b32.xlu0 %v15598_v61, %s16231_s15  ;;  %10199 = vrot.lane.b32.xlu1 %v15596_v48, %s16231_s15 }
0x24d3   : > { %10307 = vrot.lane.b32.xlu0 %v15598_v61, %s16322_s30  ;;  %10301 = vrot.lane.b32.xlu1 %v15596_v48, %s16322_s30 }
0x24d7   : > { %10409 = vrot.lane.b32.xlu0 %v15598_v61, %s16323_s11  ;;  %10403 = vrot.lane.b32.xlu1 %v15596_v48, %s16323_s11 }
0x24db   : > { %10405 = vrot.lane.b32.xlu0 %v15526_v46, %s16323_s11  ;;  %10399 = vrot.lane.b32.xlu1 %v15524_v24, %s16323_s11 }
0x24f1   : > { %v9614_v60 = vpop.permute.xlu0 %9613  ;;  %v9608_v4 = vpop.permute.xlu1 %9607 }
0x24f2   : > { %v9619_v15 = vsel %vm16325_vm12, %v9608_v4, %v9614_v60  ;;  %v15640_v23 = vsel %vm16326_vm15, %v9614_v60, %v9608_v4  ;;  %vm16337_vm12 = vcmp.lt.s32.totalorder %v16324_v5, 112 }
0x24f3   : > { %vm16338_vm15 = vmmov %vm16337_vm12 }
0x24f5   : > { %v9716_v43 = vpop.permute.xlu0 %9715  ;;  %v9710_v58 = vpop.permute.xlu1 %9709 }
0x24f6   : > { %v15644_v25 = vsel %vm16327_vm0, %v9710_v58, %v9716_v43  ;;  %v15648_v53 = vsel %vm16328_vm1, %v9716_v43, %v9710_v58  ;;  %vm16339_vm0 = vcmp.lt.s32.totalorder %v16324_v5, 17 }
0x24f7   : > { %vm16340_vm1 = vmmov %vm16339_vm0 }
0x24f9   : > { %v9818_v7 = vpop.permute.xlu0 %9817  ;;  %v9812_v34 = vpop.permute.xlu1 %9811 }
0x24fa   : > { %v15652_v10 = vsel %vm16329_vm3, %v9812_v34, %v9818_v7  ;;  %v15656_v1 = vsel %vm16330_vm4, %v9818_v7, %v9812_v34  ;;  %vm16341_vm3 = vmmov %vm16339_vm0 }
0x24fb   : > { %vm16342_vm4 = vmmov %vm16339_vm0 }
0x24fd   : > { %v9920_v20 = vpop.permute.xlu0 %9919  ;;  %v9914_v63 = vpop.permute.xlu1 %9913 }
0x24fe   : > { %v15660_v42 = vsel %vm16331_vm5, %v9914_v63, %v9920_v20  ;;  %v15664_v30 = vsel %vm16332_vm6, %v9920_v20, %v9914_v63  ;;  %vm16345_vm5 = vcmp.lt.s32.totalorder %v16324_v5, 16  ;;  %v9626_v63 = vmul.f32 %v9619_v15, %v16344_v56 }
0x24ff   : > { %vm16346_vm6 = vmmov %vm16345_vm5 }
0x2501   : > { %v10100_v55 = vpop.permute.xlu0 %10099  ;;  %v10094_v50 = vpop.permute.xlu1 %10093 }
0x2502   : > { %v15668_v52 = vsel %vm16333_vm7, %v10094_v50, %v10100_v55  ;;  %v15672_v39 = vsel %vm16334_vm8, %v10100_v55, %v10094_v50  ;;  %vm16347_vm7 = vmmov %vm16345_vm5  ;;  %v16349_v55 = vld [vmem:[#allocation6_spill] sm:$0xff] }
0x2503   : > { %vm16348_vm8 = vmmov %vm16345_vm5 }
0x2505   : > { %v10202_v11 = vpop.permute.xlu0 %10201  ;;  %v10196_v47 = vpop.permute.xlu1 %10195 }
0x2506   : > { %v15676_v41 = vsel %vm16335_vm14, %v10196_v47, %v10202_v11  ;;  %v15680_v21 = vsel %vm16336_vm11, %v10202_v11, %v10196_v47  ;;  %v16350_v11 = vld [vmem:[#allocation7_spill] sm:$0xff]  ;;  %vm16351_vm14 = vcmp.lt.s32.totalorder %v16324_v5, 15 }
0x2507   : > { %vm16352_vm11 = vmmov %vm16351_vm14 }
0x2509   : > { %v10304_v27 = vpop.permute.xlu0 %10303  ;;  %v10298_v8 = vpop.permute.xlu1 %10297 }
0x250a   : > { %v15684_v29 = vsel %vm16337_vm12, %v10298_v8, %v10304_v27  ;;  %v15688_v26 = vsel %vm16338_vm15, %v10304_v27, %v10298_v8  ;;  %v9625_v27 = vmul.f32 %v15640_v23, %v16343_v37  ;;  %v11925_v8 = vld [vmem:[%s16062_s1 + $0x900] sm:$0xff]  ;;  %vm16353_vm12 = vmmov %vm16352_vm11 }
0x250b   : > { %vm16354_vm15 = vmmov %vm16352_vm11 }
0x250d   : > { %v9616_v13 = vpop.permute.xlu0 %9615  ;;  %v9610_v22 = vpop.permute.xlu1 %9609 }
0x250e   : > { %v9620_v32 = vsel %vm16339_vm0, %v9610_v22, %v9616_v13  ;;  %v9623_v40 = vsel %vm16340_vm1, %v9616_v13, %v9610_v22  ;;  %vm16357_vm0 = vcmp.lt.s32.totalorder %v16324_v5, 1 }
0x250f   : > { %v9627_v14 = vmul.f32 %v9623_v40, %v16343_v37  ;;  %v9628_v60 = vmul.f32 %v9620_v32, %v16344_v56  ;;  %v9728_v32 = vmul.f32 %v15644_v25, %v16350_v11  ;;  %v16355_v40 = vld [vmem:[#allocation8_spill] sm:$0xff]  ;;  %vm16358_vm1 = vmmov %vm16357_vm0 }
0x2511   : > { %v9718_v31 = vpop.permute.xlu0 %9717  ;;  %v9712_v44 = vpop.permute.xlu1 %9711 }
0x2512   : > { %v9722_v58 = vsel %vm16345_vm5, %v9712_v44, %v9718_v31  ;;  %v9725_v7 = vsel %vm16346_vm6, %v9718_v31, %v9712_v44  ;;  %vm16363_vm5 = vcmp.lt.s32.totalorder %v16324_v5, 127 }
0x2513   : > { %v9729_v13 = vmul.f32 %v9725_v7, %v16349_v55  ;;  %v9730_v22 = vmul.f32 %v9722_v58, %v16350_v11  ;;  %v16361_v7 = vld [vmem:[#allocation11_spill] sm:$0xff]  ;;  %vm16364_vm6 = vmmov %vm16363_vm5 }
0x2515   : > { %v9820_v28 = vpop.permute.xlu0 %9819  ;;  %v9814_v45 = vpop.permute.xlu1 %9813 }
0x2516   : > { %v9824_v15 = vsel %vm16351_vm14, %v9814_v45, %v9820_v28 }
0x2519   : > { %v15690_v38 = vpop.permute.xlu0 %9921  ;;  %v15692_v18 = vpop.permute.xlu1 %9915 }
0x251d   : > { %v15694_v33 = vpop.permute.xlu0 %10101  ;;  %v15696_v49 = vpop.permute.xlu1 %10095 }
0x2521   : > { %v15698_v9 = vpop.permute.xlu0 %10203  ;;  %v15700_v51 = vpop.permute.xlu1 %10197 }
0x2525   : > { %v15702_v0 = vpop.permute.xlu0 %10305  ;;  %v15704_v3 = vpop.permute.xlu1 %10299 }
0x2529   : > { %v15706_v36 = vpop.permute.xlu0 %10407  ;;  %v15708_v35 = vpop.permute.xlu1 %10401 }
0x252d   : > { %v9618_v62 = vpop.permute.xlu0 %9617  ;;  %v9612_v54 = vpop.permute.xlu1 %9611 }
0x252e   : > { %v9621_v59 = vsel %vm16341_vm3, %v9612_v54, %v9618_v62  ;;  %v9624_v6 = vsel %vm16342_vm4, %v9618_v62, %v9612_v54  ;;  %v9827_v62 = vsel %vm16352_vm11, %v9820_v28, %v9814_v45  ;;  %v9727_v28 = vmul.f32 %v15648_v53, %v16349_v55  ;;  %v11927_v45 = vld [vmem:[%s16062_s1 + $0x920] sm:$0xff]  ;;  %vm16359_vm3 = vmmov %vm16357_vm0 }
0x252f   : > { %v9629_v2 = vmul.f32 %v9624_v6, %v16343_v37  ;;  %v9630_v57 = vmul.f32 %v9621_v59, %v16344_v56  ;;  %v16356_v6 = vld [vmem:[#allocation9_spill] sm:$0xff]  ;;  %v9926_v53 = vsel %vm16357_vm0, %v15692_v18, %v15690_v38  ;;  %vm16360_vm4 = vmmov %vm16357_vm0  ;;  %vm16375_vm0 = vcmp.lt.s32.totalorder %v16324_v5, 112 }
0x2530   : > { %v9830_v25 = vmul.f32 %v15652_v10, %v16356_v6  ;;  %v9929_v10 = vsel %vm16360_vm4, %v15690_v38, %v15692_v18  ;;  %vm16369_vm11 = vmmov %vm16363_vm5 }
0x2531   : > { %v9720_v4 = vpop.permute.xlu0 %9719  ;;  %9662 = vmatprep.subr.mxu0 %v9630_v57  ;;  %v9714_v43 = vpop.permute.xlu1 %9713  ;;  %v9831_v57 = vmul.f32 %v9827_v62, %v16355_v40  ;;  %v16366_v62 = vld [vmem:[#allocation15_spill] sm:$0xff]  ;;  %vm16379_vm4 = vmmov %vm16375_vm0 }
0x2532   : > { %v9723_v34 = vsel %vm16347_vm7, %v9714_v43, %v9720_v4  ;;  %v9726_v20 = vsel %vm16348_vm8, %v9720_v4, %v9714_v43  ;;  %9663 = vmatpush1.msra.mxu0 %v9629_v2  ;;  %vm16365_vm7 = vmmov %vm16363_vm5  ;;  %vm16367_vm8 = vcmp.lt.s32.totalorder %v16324_v5, 113 }
0x2533   : > { %v9731_v50 = vmul.f32 %v9726_v20, %v16349_v55  ;;  %v9732_v47 = vmul.f32 %v9723_v34, %v16350_v11  ;;  %9664 = vmatprep.subr.mxu0 %v9628_v60  ;;  %v16362_v20 = vld [vmem:[#allocation12_spill] sm:$0xff]  ;;  %vm16368_vm14 = vmmov %vm16367_vm8 }
0x2534   : > { %9665 = vmatpush1.msra.mxu0 %v9627_v14  ;;  %v9832_v14 = vmul.f32 %v9824_v15, %v16356_v6  ;;  %v11931_v15 = vld [vmem:[%s16062_s1 + $0x960] sm:$0xff] }
0x2535   : > { %v9822_v31 = vpop.permute.xlu0 %9821  ;;  %9666 = vmatprep.subr.mxu0 %v9626_v63  ;;  %9764 = vmatprep.subr.mxu1 %v9732_v47  ;;  %v9816_v44 = vpop.permute.xlu1 %9815  ;;  %v11929_v47 = vld [vmem:[%s16062_s1 + $0x940] sm:$0xff] }
0x2536   : > { %v9825_v23 = vsel %vm16353_vm12, %v9816_v44, %v9822_v31  ;;  %v9828_v54 = vsel %vm16354_vm15, %v9822_v31, %v9816_v44  ;;  %9667 = vmatpush1.msra.mxu0 %v9625_v27  ;;  %9765 = vmatpush1.msra.mxu1 %v9731_v50  ;;  %v9829_v50 = vmul.f32 %v15656_v1, %v16355_v40  ;;  %vm16371_vm12 = vmmov %vm16367_vm8 }
0x2537   : > { %v9833_v59 = vmul.f32 %v9828_v54, %v16355_v40  ;;  %v9834_v2 = vmul.f32 %v9825_v23, %v16356_v6  ;;  %9766 = vmatprep.subr.mxu1 %v9730_v22  ;;  %11926 = vmatmul.mubr.msk.f32.vlgmr.msra.gmra.mxu0 %vm9445_vm9, %v11925_v8  ;;  %v9934_v27 = vmul.f32 %v9926_v53, %v16362_v20  ;;  %vm16374_vm15 = vmmov %vm16367_vm8 }
0x2538   : > { %9767 = vmatpush1.msra.mxu1 %v9729_v13  ;;  %9904 = vmatprep.mubr.f32.mxu0 %v16316_v12  ;;  %v9933_v8 = vmul.f32 %v9929_v10, %v16361_v7  ;;  %v9932_v1 = vmul.f32 %v15660_v42, %v16362_v20  ;;  %v9931_v22 = vmul.f32 %v15664_v30, %v16361_v7 }
0x2539   : > { %v9924_v60 = vpop.permute.xlu0 %9923  ;;  %9768 = vmatprep.subr.mxu1 %v9728_v32  ;;  %9866 = vmatprep.subr.mxu0 %v9834_v2  ;;  %v9918_v4 = vpop.permute.xlu1 %9917  ;;  %v10109_v42 = vsel %vm16364_vm6, %v15694_v33, %v15696_v49  ;;  %v10106_v32 = vsel %vm16369_vm11, %v15696_v49, %v15694_v33  ;;  %v10211_v2 = vsel %vm16371_vm12, %v15698_v9, %v15700_v51 }
0x253a   : > { %v9927_v43 = vsel %vm16358_vm1, %v9918_v4, %v9924_v60  ;;  %v9930_v58 = vsel %vm16359_vm3, %v9924_v60, %v9918_v4  ;;  %9769 = vmatpush1.msra.mxu1 %v9727_v28  ;;  %9867 = vmatpush1.msra.mxu0 %v9833_v59  ;;  %v16372_v28 = vld [vmem:[#allocation14_spill] sm:$0xff]  ;;  %v10208_v60 = vsel %vm16374_vm15, %v15700_v51, %v15698_v9  ;;  %vm16376_vm1 = vmmov %vm16375_vm0  ;;  %v16377_v51 = vld [vmem:[#allocation17_spill] sm:$0xff]  ;;  %vm16391_vm15 = vcmp.lt.s32.totalorder %v16324_v5, 15 }
0x253b   : > { %v9935_v34 = vmul.f32 %v9930_v58, %v16361_v7  ;;  %v9936_v63 = vmul.f32 %v9927_v43, %v16362_v20  ;;  %9868 = vmatprep.subr.mxu0 %v9832_v14  ;;  %11928 = vmatmul.mubr.msk.f32.vlgmr.msra.gmra.mxu1 %vm9445_vm9, %v11927_v45  ;;  %v10113_v14 = vmul.f32 %v10106_v32, %v16372_v28  ;;  %vm16378_vm3 = vmmov %vm16375_vm0 }
0x253c   : > { %9869 = vmatpush1.msra.mxu0 %v9831_v57  ;;  %10006 = vmatprep.mubr.f32.mxu1 %v16316_v12  ;;  %v10111_v43 = vmul.f32 %v15668_v52, %v16372_v28  ;;  %v10313_v52 = vsel %vm16379_vm4, %v15702_v0, %v15704_v3  ;;  %vm16395_vm4 = vcmp.lt.s32.totalorder %v16324_v5, 127 }
0x253d   : > { %v10104_v38 = vpop.permute.xlu0 %10103  ;;  %9870 = vmatprep.subr.mxu0 %v9830_v25  ;;  %9968 = vmatprep.subr.mxu1 %v9936_v63  ;;  %v10098_v18 = vpop.permute.xlu1 %10097  ;;  %v16373_v25 = vld [vmem:[#allocation13_spill] sm:$0xff] }
0x253e   : > { %9871 = vmatpush1.msra.mxu0 %v9829_v50  ;;  %9969 = vmatpush1.msra.mxu1 %v9935_v34  ;;  %v10110_v13 = vsel %vm16363_vm5, %v10104_v38, %v10098_v18  ;;  %v10107_v31 = vsel %vm16365_vm7, %v10098_v18, %v10104_v38  ;;  %v10215_v10 = vmul.f32 %v10208_v60, %v16373_v25  ;;  %v16380_v50 = vld [vmem:[#allocation16_spill] sm:$0xff]  ;;  %vm16381_vm5 = vcmp.lt.s32.totalorder %v16324_v5, 111 }
0x253f   : > { %11930 = vmatmul.mubr.msk.f32.vlgmr.msra.gmra.mxu0 %vm9445_vm9, %v11929_v47  ;;  %9970 = vmatprep.subr.mxu1 %v9934_v27  ;;  %v10115_v45 = vmul.f32 %v10107_v31, %v16372_v28  ;;  %v10310_v34 = vsel %vm16378_vm3, %v15704_v3, %v15702_v0  ;;  %vm16382_vm6 = vmmov %vm16381_vm5  ;;  %v10213_v18 = vmul.f32 %v15676_v41, %v16373_v25  ;;  %v15872_v0 = vld [vmem:[%s16065_s4 + $0x18] ss:$0 sm:$0xff] }
0x2540   : > { %10046 = vmatprep.subr.mxu0 %v15598_v61  ;;  %9971 = vmatpush1.msra.mxu1 %v9933_v8  ;;  %v10116_v61 = vmul.f32 %v10110_v13, %v16366_v62  ;;  %v11937_v8 = vld [vmem:[%s16062_s1 + $0x9c0] sm:$0xff]  ;;  %v10318_v41 = vmul.f32 %v10313_v52, %v16377_v51  ;;  %vm16383_vm7 = vmmov %vm16381_vm5 }
0x2541   : > { %10047 = vmatpush1.msra.mxu0 %v15596_v48  ;;  %v10206_v44 = vpop.permute.xlu0 %10205  ;;  %9972 = vmatprep.subr.mxu1 %v9932_v1  ;;  %v10200_v30 = vpop.permute.xlu1 %10199  ;;  %v16370_v48 = vld [vmem:[#allocation10_spill] sm:$0xff]  ;;  %v10317_v1 = vmul.f32 %v10310_v34, %v16380_v50  ;;  %v10415_v13 = vsel %vm16383_vm7, %v15706_v36, %v15708_v35  ;;  %vm16386_vm11 = vmmov %vm16381_vm5 }
0x2542   : > { %10048 = vmatprep.subr.mxu0 %v15560_v19  ;;  %v10209_v23 = vsel %vm16367_vm8, %v10200_v30, %v10206_v44  ;;  %v10212_v54 = vsel %vm16368_vm14, %v10206_v44, %v10200_v30  ;;  %9973 = vmatpush1.msra.mxu1 %v9931_v22  ;;  %v11933_v19 = vld [vmem:[%s16062_s1 + $0x980] sm:$0xff]  ;;  %v10216_v4 = vmul.f32 %v10211_v2, %v16370_v48  ;;  %v15887_v22 = vld [vmem:[%s16065_s4 + $0x10] ss:$0 sm:$0xff]  ;;  %vm16384_vm8 = vmmov %vm16381_vm5 }
0x2543   : > { %v10218_v59 = vmul.f32 %v10212_v54, %v16370_v48  ;;  %10049 = vmatpush1.msra.mxu0 %v15558_v17  ;;  %11932 = vmatmul.mubr.msk.f32.vlgmr.msra.gmra.mxu1 %vm9445_vm9, %v11931_v15  ;;  %v10217_v57 = vmul.f32 %v10209_v23, %v16373_v25  ;;  %v10114_v17 = vmul.f32 %v10109_v42, %v16366_v62  ;;  %vm16385_vm14 = vmmov %vm16381_vm5 }
0x2544   : > { %10050 = vmatprep.subr.mxu0 %v15526_v46  ;;  %10148 = vmatprep.subr.mxu1 %v10116_v61  ;;  %v10214_v9 = vmul.f32 %v15680_v21, %v16370_v48  ;;  %v10412_v44 = vsel %vm16384_vm8, %v15708_v35, %v15706_v36  ;;  %v10316_v23 = vmul.f32 %v15688_v26, %v16377_v51  ;;  %v11939_v35 = vld [vmem:[%s16062_s1 + $0x9e0] sm:$0xff]  ;;  %vm16399_vm8 = vcmp.lt.s32.totalorder %v16324_v5, 112 }
0x2545   : > { %10051 = vmatpush1.msra.mxu0 %v15524_v24  ;;  %10084 = vmatprep.mubr.f32.mxu0 %v16316_v12  ;;  %v10308_v33 = vpop.permute.xlu0 %10307  ;;  %v10302_v49 = vpop.permute.xlu1 %10301  ;;  %v10112_v24 = vmul.f32 %v15672_v39, %v16366_v62  ;;  %v11935_v39 = vld [vmem:[%s16062_s1 + $0x9a0] sm:$0xff]  ;;  %v10315_v54 = vmul.f32 %v15684_v29, %v16380_v50  ;;  %v10420_v32 = vmul.f32 %v15872_v0, %v10415_v13 }
0x2546   : > { %10149 = vmatpush1.msra.mxu1 %v10115_v45  ;;  %11934 = vmatmul.mubr.msk.f32.vlgmr.msra.gmra.mxu0 %vm9445_vm9, %v11933_v19  ;;  %v10314_v46 = vsel %vm16375_vm0, %v10308_v33, %v10302_v49  ;;  %v10311_v53 = vsel %vm16376_vm1, %v10302_v49, %v10308_v33  ;;  %v11941_v29 = vld [vmem:[%s16062_s1 + $0xa00] sm:$0xff]  ;;  %vm16392_vm0 = vmmov %vm16391_vm15  ;;  %vm16393_vm1 = vcmp.lt.s32.totalorder %v16324_v5, 1 }
0x2547   : > { %10150 = vmatprep.subr.mxu1 %v10114_v17  ;;  %10250 = vmatprep.subr.mxu0 %v10218_v59  ;;  %v10320_v58 = vmul.f32 %v10314_v46, %v16377_v51  ;;  %v10319_v47 = vmul.f32 %v10311_v53, %v16380_v50  ;;  %v10419_v59 = vmul.f32 %v15887_v22, %v10412_v44  ;;  %v11923_v19 = vld [vmem:[%s16063_s2 + $0x200] sm:$0xff]  ;;  %vm16394_vm3 = vmmov %vm16393_vm1 }
0x2548   : > { %10151 = vmatpush1.msra.mxu1 %v10113_v14  ;;  %10251 = vmatpush1.msra.mxu0 %v10217_v57  ;;  %v11924_v57 = vld [vmem:[%s16063_s2 + $0x208] sm:$0xff] }
0x2549   : > { %10152 = vmatprep.subr.mxu1 %v10112_v24  ;;  %10252 = vmatprep.subr.mxu0 %v10216_v4  ;;  %v10410_v21 = vpop.permute.xlu0 %10409  ;;  %v10404_v63 = vpop.permute.xlu1 %10403 }
0x254a   : > { %10153 = vmatpush1.msra.mxu1 %v10111_v43  ;;  %10186 = vmatprep.mubr.f32.mxu1 %v16316_v12  ;;  %v10413_v27 = vsel %vm16381_vm5, %v10404_v63, %v10410_v21  ;;  %v10416_v38 = vsel %vm16382_vm6, %v10410_v21, %v10404_v63  ;;  %vm16396_vm5 = vmmov %vm16395_vm4  ;;  %vm16397_vm6 = vcmp.lt.s32.totalorder %v16324_v5, 113 }
0x254b   : > { %10253 = vmatpush1.msra.mxu0 %v10215_v10  ;;  %11936 = vmatmul.mubr.msk.f32.vlgmr.msra.gmra.mxu1 %vm9445_vm9, %v11935_v39  ;;  %v10422_v3 = vmul.f32 %v15872_v0, %v10416_v38  ;;  %v10421_v15 = vmul.f32 %v15887_v22, %v10413_v27  ;;  %vm16398_vm7 = vmmov %vm16397_vm6 }
0x254c   : > { %10254 = vmatprep.subr.mxu0 %v10214_v9  ;;  %10352 = vmatprep.subr.mxu1 %v10320_v58 }
0x254d   : > { %10255 = vmatpush1.msra.mxu0 %v10213_v18  ;;  %10288 = vmatprep.mubr.f32.mxu0 %v16316_v12  ;;  %v10406_v42 = vpop.permute.xlu0 %10405  ;;  %v10400_v31 = vpop.permute.xlu1 %10399 }
0x254e   : > { %10353 = vmatpush1.msra.mxu1 %v10319_v47  ;;  %11938 = vmatmul.mubr.msk.f32.vlgmr.msra.gmra.mxu0 %vm9445_vm9, %v11937_v8  ;;  %v10411_v30 = vsel %vm16385_vm14, %v10400_v31, %v10406_v42  ;;  %v10414_v61 = vsel %vm16386_vm11, %v10406_v42, %v10400_v31  ;;  %vm16400_vm14 = vmmov %vm16399_vm8 }
0x254f   : > { %10354 = vmatprep.subr.mxu1 %v10318_v41  ;;  %10454 = vmatprep.subr.mxu0 %v10422_v3  ;;  %v10418_v36 = vmul.f32 %v15872_v0, %v10414_v61  ;;  %v10417_v26 = vmul.f32 %v15887_v22, %v10411_v30 }
0x2550   : > { %10355 = vmatpush1.msra.mxu1 %v10317_v1  ;;  %10390 = vmatprep.mubr.f32.mxu1 %v16316_v12 }
0x2551   : > { %10356 = vmatprep.subr.mxu1 %v10316_v23  ;;  %10455 = vmatpush1.msra.mxu0 %v10421_v15 }
0x2552   : > { %10357 = vmatpush1.msra.mxu1 %v10315_v54  ;;  %10456 = vmatprep.subr.mxu0 %v10420_v32 }
0x2553   : > { %11940 = vmatmul.mubr.msk.f32.vlgmr.msra.gmra.mxu1 %vm9445_vm9, %v11939_v35  ;;  %10457 = vmatpush1.msra.mxu0 %v10419_v59 }
0x2554   : > { %10458 = vmatprep.subr.mxu0 %v10418_v36  ;;  %10492 = vmatprep.mubr.f32.mxu0 %v16316_v12 }
0x2555   : > { %10459 = vmatpush1.msra.mxu0 %v10417_v26  ;;  %12854 = vmatprep.subr.mxu1 %v16316_v12 }
0x2556   : > { %11942 = vmatmul.mubr.msk.f32.vlgmr.msra.gmra.mxu0 %vm9445_vm9, %v11941_v29  ;;  %12856 = vmatprep.mubr.msk.f32.mxu1 %vm16317_vm10, %v16316_v12  ;;  %vm16389_vm9 = vcmp.lt.s32.totalorder %v16324_v5, 16 }
0x2557   : > { %10690 = vmatprep.mubr.f32.mxu0 %v16316_v12  ;;  %vm16390_vm12 = vmmov %vm16389_vm9 }
0x25f7   : > { %v9702_v2 = vpop.f32.mrf.mxu0 }
0x25f8   : > { %v9707_v45 = vadd.f32 %v11923_v19, %v9702_v2  ;;  %v11943_v2 = vld [vmem:[%s16064_s3 + $0x1b0] sm:$0xff] }
0x25f9   : > { %v9704_v17 = vpop.f32.mrf.mxu0 }
0x25fa   : > { %v9708_v49 = vadd.f32 %v11924_v57, %v9704_v17 }
0x25fb   : > { %v9804_v33 = vpop.f32.mrf.mxu1 }
0x25fc   : > { %v9809_v14 = vadd.f32 %v9804_v33, %v9707_v45 }
0x25fd   : > { %v9806_v60 = vpop.f32.mrf.mxu1 }
0x25fe   : > { %v9810_v4 = vadd.f32 %v9806_v60, %v9708_v49 }
0x25ff   : > { %v9906_v46 = vpop.f32.mrf.mxu0 }
0x2600   : > { %v9911_v53 = vadd.f32 %v9906_v46, %v9809_v14 }
0x2601   : > { %v9908_v43 = vpop.f32.mrf.mxu0 }
0x2602   : > { %v9912_v39 = vadd.f32 %v9908_v43, %v9810_v4 }
0x2603   : > { %v10008_v24 = vpop.f32.mrf.mxu1 }
0x2604   : > { %v10013_v10 = vadd.f32 %v10008_v24, %v9911_v53 }
0x2605   : > { %v10010_v9 = vpop.f32.mrf.mxu1 }
0x2606   : > { %v10086_v58 = vpop.f32.mrf.mxu0  ;;  %v10014_v34 = vadd.f32 %v10010_v9, %v9912_v39 }
0x2607   : > { %v10091_v63 = vadd.f32 %v10086_v58, %v10013_v10 }
0x2608   : > { %v10088_v21 = vpop.f32.mrf.mxu0 }
0x2609   : > { %v10092_v38 = vadd.f32 %v10088_v21, %v10014_v34 }
0x260b   : > { %v10188_v52 = vpop.f32.mrf.mxu1 }
0x260c   : > { %v10193_v18 = vadd.f32 %v10188_v52, %v10091_v63 }
0x260d   : > { %v10190_v47 = vpop.f32.mrf.mxu1 }
0x260e   : > { %v10290_v27 = vpop.f32.mrf.mxu0  ;;  %v10194_v3 = vadd.f32 %v10190_v47, %v10092_v38  ;;  %v11947_v47 = vld [vmem:[%s16062_s1 + $0xa20] sm:$0xff] }
0x260f   : > { %v10295_v1 = vadd.f32 %v10290_v27, %v10193_v18 }
0x2610   : > { %v10292_v8 = vpop.f32.mrf.mxu0 }
0x2611   : > { %v10296_v13 = vadd.f32 %v10292_v8, %v10194_v3 }
0x2613   : > { %v10392_v41 = vpop.f32.mrf.mxu1 }
0x2614   : > { %v10397_v15 = vadd.f32 %v10392_v41, %v10295_v1 }
0x2615   : > { %v10394_v42 = vpop.f32.mrf.mxu1 }
0x2616   : > { %v10494_v31 = vpop.f32.mrf.mxu0  ;;  %v10398_v44 = vadd.f32 %v10394_v42, %v10296_v13  ;;  %v11951_v42 = vld [vmem:[%s16062_s1 + $0xa60] sm:$0xff] }
0x2617   : > { %v10499_v30 = vadd.f32 %v10494_v31, %v10397_v15 }
0x2618   : > { %v10496_v61 = vpop.f32.mrf.mxu0 }
0x2619   : > { %v10501_v23 = vmax.f32 %v10499_v30, 0.0  ;;  %v10500_v54 = vadd.f32 %v10496_v61, %v10398_v44 }
0x261b   : > { %v10502_v32 = vmax.f32 %v10500_v54, 0.0  ;;  %v10506_v36 = vmul.f32 %v10501_v23, %v10501_v23  ;;  %v11955_v54 = vld [vmem:[%s16062_s1 + $0xaa0] sm:$0xff] }
0x261d   : > { %v10507_v35 = vmul.f32 %v10502_v32, %v10502_v32  ;;  %v10503_v59 = vadd.f32 %v10502_v32, %v10501_v23 }
0x261f   : > { %10504 = vadd.xlane.f32.xlu1 %v10503_v59  ;;  %v10508_v26 = vadd.f32 %v10507_v35, %v10506_v36 }
0x2621   : > { %10509 = vadd.xlane.f32.xlu0 %v10508_v26  ;;  %v11957_v26 = vld [vmem:[%s16062_s1 + $0xac0] sm:$0xff] }
0x26a8   : > { %v10505_v29 = vpop.xlane.xlu1 %10504 }
0x26aa   : > { %v10510_v19 = vpop.xlane.xlu0 %10509 }
0x26ab   : > { %v10511_v45 = vsel %vm379_vm2, %v10505_v29, %v10510_v19  ;;  %vm16387_vm2 = vcmp.lt.s32.totalorder %v16324_v5, 17  ;;  %v11381_v5 = vld [vmem:[%s16066_s5] sm:$0x3] }
0x26ac   : > { %12855 = vmatpush3.msra.mxu1 %v10511_v45  ;;  %vm16388_vm10 = vmmov %vm16387_vm2 }
0x26ad   : > { %12857 = vmatmul.mubr.msk.f32.vlgmr.msra.gmra.mxu1 %vm2448_vm13, %v11943_v2 }
0x26ae   : > { %10776 = vmatprep.mubr.f32.mxu1 %v16316_v12 }
0x276d   : > { %v10583_v57 = vpop.f32.mrf.mxu1 }
0x276e   : > { %v10587_v17 = vmul.f32 %v10583_v57, %v10583_v57  ;;  %10596 = vperm.xlu1 %12926, %v10583_v57  }
0x276f   : > { %v12858_v33 = vpop.f32.mrf.mxu1 }
0x2770   : > { %10589 = vrot.lane.b32.xlu0 %v10587_v17, %s16234_s19 }
0x2772   : > { %12927 = vset.pattern.permute.xlu1 %v16312_v16 }
0x27e2   : > { %v10590_v49 = vpop.permute.xlu0 %10589 }
0x27e3   : > { %v10592_v14 = vsub.f32 %v10583_v57, %v10590_v49  ;;  %v11959_v57 = vld [vmem:[%s16062_s1 + $0xae0] sm:$0xff] }
0x27e5   : > { %v10593_v60 = vmax.f32 %v10592_v14, 0.0 }
0x27e7   : > { %v10601_v46 = vadd.f32 1e-05, %v10593_v60  ;;  %v11961_v60 = vld [vmem:[%s16062_s1 + $0xb00] sm:$0xff] }
0x27e9   : > { %12968 = vrsqrt.f32 %v10601_v46  ;;  %v10597_v4 = vpop.permute.xlu1 %10596 }
0x27ea   : > { %v10599_v53 = vsub.f32 %v10501_v23, %v10597_v4  ;;  %v10600_v43 = vsub.f32 %v10502_v32, %v10597_v4  ;;  %v11953_v23 = vld [vmem:[%s16062_s1 + $0xa80] sm:$0xff] }
0x27f6   : > { %v12969_v24 = vpop.eup %12968 }
0x27f7   : > { %10605 = vperm.xlu1 %12927, %v12969_v24  }
0x2872   : > { %v10606_v9 = vpop.permute.xlu1 %10605 }
0x2873   : > { %v10608_v58 = vmul.f32 %v10606_v9, %v10599_v53  ;;  %v10609_v39 = vmul.f32 %v10606_v9, %v10600_v43  ;;  %v11963_v43 = vld [vmem:[%s16062_s1 + $0xb20] sm:$0xff]  ;;  %v13028_v9 = vmov 8  }
0x2874   : > { %12928 = vset.pattern.permute.xlu0 %v13028_v9 }
0x2875   : > { %10615 = vrot.lane.b32.xlu1 %v10609_v39, %s16320_s21  ;;  %10613 = vrot.lane.b32.xlu0 %v10608_v58, %s16320_s21 }
0x2879   : > { %10701 = vrot.lane.b32.xlu1 %v10609_v39, %s16321_s26  ;;  %10699 = vrot.lane.b32.xlu0 %v10608_v58, %s16321_s26 }
0x287d   : > { %10787 = vrot.lane.b32.xlu1 %v10609_v39, %s16232_s16  ;;  %10785 = vrot.lane.b32.xlu0 %v10608_v58, %s16232_s16 }
0x2881   : > { %10873 = vrot.lane.b32.xlu1 %v10609_v39, %s16234_s19  ;;  %10871 = vrot.lane.b32.xlu0 %v10608_v58, %s16234_s19  ;;  %s11972_s19 = sshll.u32 %s16405_s14, 2 }
0x2885   : > { %11037 = vrot.lane.b32.xlu1 %v10609_v39, %s16243_s20  ;;  %11035 = vrot.lane.b32.xlu0 %v10608_v58, %s16243_s20  ;;  %s16402_s20 = sld [smem:[#allocation48_spill]] }
0x2889   : > { %11123 = vrot.lane.b32.xlu1 %v10609_v39, %s16231_s15  ;;  %11121 = vrot.lane.b32.xlu0 %v10608_v58, %s16231_s15 }
0x288b   : > { %s359_s21 = scalar_lea.vmem %s16402_s20, %s11972_s19 }
0x288d   : > { %11209 = vrot.lane.b32.xlu1 %v10609_v39, %s16322_s30  ;;  %11207 = vrot.lane.b32.xlu0 %v10608_v58, %s16322_s30 }
0x2891   : > { %11295 = vrot.lane.b32.xlu1 %v10609_v39, %s16323_s11  ;;  %11293 = vrot.lane.b32.xlu0 %v10608_v58, %s16323_s11 }
0x2895   : > { %11384 = vperm.xlu0 %12928, %v11381_v5  }
0x28e7   : > { %v10616_v16 = vpop.permute.xlu1 %10615  ;;  %v10614_v10 = vpop.permute.xlu0 %10613 }
0x28e8   : > { %v10617_v34 = vsel %vm16387_vm2, %v10614_v10, %v10616_v16  ;;  %v10618_v52 = vsel %vm16388_vm10, %v10616_v16, %v10614_v10  ;;  %vm16401_vm2 = vmmov %vm16386_vm11 }
0x28e9   : > { %v10619_v21 = vmul.f32 %v10618_v52, %v16343_v37  ;;  %v10620_v63 = vmul.f32 %v10617_v34, %v16344_v56  ;;  %v11949_v56 = vld [vmem:[%s16062_s1 + $0xa40] sm:$0xff] }
0x28eb   : > { %v10702_v27 = vpop.permute.xlu1 %10701  ;;  %10656 = vmatprep.subr.mxu0 %v10620_v63  ;;  %v10700_v38 = vpop.permute.xlu0 %10699 }
0x28ec   : > { %v10703_v18 = vsel %vm16389_vm9, %v10700_v38, %v10702_v27  ;;  %v10704_v3 = vsel %vm16390_vm12, %v10702_v27, %v10700_v38  ;;  %10657 = vmatpush1.msra.mxu0 %v10619_v21 }
0x28ed   : > { %v10705_v8 = vmul.f32 %v10704_v3, %v16349_v55  ;;  %v10706_v37 = vmul.f32 %v10703_v18, %v16350_v11  ;;  %11948 = vmatmul.mubr.msk.f32.vlgmr.msra.gmra.mxu0 %vm2448_vm13, %v11947_v47 }
0x28ee   : > { %10862 = vmatprep.mubr.f32.mxu0 %v16316_v12 }
0x28ef   : > { %v10788_v1 = vpop.permute.xlu1 %10787  ;;  %10742 = vmatprep.subr.mxu1 %v10706_v37  ;;  %v10786_v41 = vpop.permute.xlu0 %10785 }
0x28f0   : > { %v10789_v13 = vsel %vm16391_vm15, %v10786_v41, %v10788_v1  ;;  %v10790_v15 = vsel %vm16392_vm0, %v10788_v1, %v10786_v41  ;;  %10743 = vmatpush1.msra.mxu1 %v10705_v8 }
0x28f1   : > { %v10791_v55 = vmul.f32 %v10790_v15, %v16355_v40  ;;  %v10792_v11 = vmul.f32 %v10789_v13, %v16356_v6  ;;  %11950 = vmatmul.mubr.msk.f32.vlgmr.msra.gmra.mxu1 %vm2448_vm13, %v11949_v56 }
0x28f2   : > { %10948 = vmatprep.mubr.f32.mxu1 %v16316_v12 }
0x28f3   : > { %v10874_v31 = vpop.permute.xlu1 %10873  ;;  %10828 = vmatprep.subr.mxu0 %v10792_v11  ;;  %v10872_v44 = vpop.permute.xlu0 %10871 }
0x28f4   : > { %v10875_v30 = vsel %vm16393_vm1, %v10872_v44, %v10874_v31  ;;  %v10876_v61 = vsel %vm16394_vm3, %v10874_v31, %v10872_v44  ;;  %10829 = vmatpush1.msra.mxu0 %v10791_v55 }
0x28f5   : > { %v10877_v40 = vmul.f32 %v10876_v61, %v16361_v7  ;;  %v10878_v6 = vmul.f32 %v10875_v30, %v16362_v20  ;;  %10992 = vmatprep.subr.mxu0 %v10609_v39  ;;  %11952 = vmatmul.mubr.msk.f32.vlgmr.msra.gmra.mxu0 %vm2448_vm13, %v11951_v42 }
0x28f6   : > { %10993 = vmatpush1.msra.mxu0 %v10608_v58  ;;  %11026 = vmatprep.mubr.f32.mxu0 %v16316_v12 }
0x28f7   : > { %v11038_v32 = vpop.permute.xlu1 %11037  ;;  %10914 = vmatprep.subr.mxu1 %v10878_v6  ;;  %v11036_v36 = vpop.permute.xlu0 %11035 }
0x28f8   : > { %v11039_v7 = vsel %vm16395_vm4, %v11036_v36, %v11038_v32  ;;  %v11040_v20 = vsel %vm16396_vm5, %v11038_v32, %v11036_v36  ;;  %10915 = vmatpush1.msra.mxu1 %v10877_v40 }
0x28f9   : > { %v11041_v35 = vmul.f32 %v11039_v7, %v16372_v28  ;;  %v11042_v59 = vmul.f32 %v11040_v20, %v16366_v62  ;;  %11954 = vmatmul.mubr.msk.f32.vlgmr.msra.gmra.mxu1 %vm2448_vm13, %v11953_v23  ;;  %11956 = vmatmul.mubr.msk.f32.vlgmr.msra.gmra.mxu0 %vm2448_vm13, %v11955_v54 }
0x28fa   : > { %11112 = vmatprep.mubr.f32.mxu1 %v16316_v12  ;;  %11198 = vmatprep.mubr.f32.mxu0 %v16316_v12 }
0x28fb   : > { %v11124_v29 = vpop.permute.xlu1 %11123  ;;  %11078 = vmatprep.subr.mxu1 %v11042_v59  ;;  %v11122_v19 = vpop.permute.xlu0 %11121 }
0x28fc   : > { %v11125_v28 = vsel %vm16397_vm6, %v11122_v19, %v11124_v29  ;;  %v11126_v62 = vsel %vm16398_vm7, %v11124_v29, %v11122_v19  ;;  %11079 = vmatpush1.msra.mxu1 %v11041_v35 }
0x28fd   : > { %v11127_v2 = vmul.f32 %v11125_v28, %v16373_v25  ;;  %v11128_v45 = vmul.f32 %v11126_v62, %v16370_v48  ;;  %11958 = vmatmul.mubr.msk.f32.vlgmr.msra.gmra.mxu1 %vm2448_vm13, %v11957_v26 }
0x28fe   : > { %11284 = vmatprep.mubr.f32.mxu1 %v16316_v12 }
0x28ff   : > { %v11210_v17 = vpop.permute.xlu1 %11209  ;;  %11164 = vmatprep.subr.mxu0 %v11128_v45  ;;  %v11208_v33 = vpop.permute.xlu0 %11207 }
0x2900   : > { %v11211_v49 = vsel %vm16399_vm8, %v11208_v33, %v11210_v17  ;;  %v11212_v14 = vsel %vm16400_vm14, %v11210_v17, %v11208_v33  ;;  %11165 = vmatpush1.msra.mxu0 %v11127_v2 }
0x2901   : > { %v11213_v48 = vmul.f32 %v11211_v49, %v16380_v50  ;;  %v11214_v25 = vmul.f32 %v11212_v14, %v16377_v51  ;;  %11960 = vmatmul.mubr.msk.f32.vlgmr.msra.gmra.mxu0 %vm2448_vm13, %v11959_v57 }
0x2902   : > { %11370 = vmatprep.mubr.f32.mxu0 %v16316_v12 }
0x2903   : > { %v11296_v46 = vpop.permute.xlu1 %11295  ;;  %11250 = vmatprep.subr.mxu1 %v11214_v25  ;;  %v11294_v24 = vpop.permute.xlu0 %11293 }
0x2904   : > { %v11297_v4 = vsel %vm16386_vm11, %v11294_v24, %v11296_v46  ;;  %v11298_v53 = vsel %vm16401_vm2, %v11296_v46, %v11294_v24  ;;  %11251 = vmatpush1.msra.mxu1 %v11213_v48 }
0x2905   : > { %v11299_v51 = vmul.f32 %v15887_v22, %v11297_v4  ;;  %v11300_v50 = vmul.f32 %v15872_v0, %v11298_v53  ;;  %11962 = vmatmul.mubr.msk.f32.vlgmr.msra.gmra.mxu1 %vm2448_vm13, %v11961_v60  ;;  %v11945_v0 = vld [vmem:[%s16063_s2 + $0x240] sm:$0xff] }
0x2906   : > { %11453 = vmatprep.mubr.f32.mxu1 %v16316_v12  ;;  %v11946_v12 = vld [vmem:[%s16063_s2 + $0x248] sm:$0xff] }
0x2907   : > { %11336 = vmatprep.subr.mxu0 %v11300_v50 }
0x2908   : > { %11337 = vmatpush1.msra.mxu0 %v11299_v51 }
0x2909   : > { %11964 = vmatmul.mubr.msk.f32.vlgmr.msra.gmra.mxu0 %vm2448_vm13, %v11963_v43 }
0x2910   : > { %v11385_v26 = vpop.permute.xlu0 %11384 }
0x29ad   : > { %v10692_v22 = vpop.f32.mrf.mxu0 }
0x29ae   : > { %v10697_v58 = vadd.f32 %v11945_v0, %v10692_v22 }
0x29af   : > { %v10694_v39 = vpop.f32.mrf.mxu0 }
0x29b0   : > { %v10698_v16 = vadd.f32 %v11946_v12, %v10694_v39 }
0x29b1   : > { %v10778_v10 = vpop.f32.mrf.mxu1 }
0x29b2   : > { %v10783_v34 = vadd.f32 %v10778_v10, %v10697_v58 }
0x29b3   : > { %v10780_v52 = vpop.f32.mrf.mxu1 }
0x29b4   : > { %v10784_v21 = vadd.f32 %v10780_v52, %v10698_v16 }
0x29b5   : > { %v10864_v63 = vpop.f32.mrf.mxu0 }
0x29b6   : > { %v10869_v47 = vadd.f32 %v10864_v63, %v10783_v34 }
0x29b7   : > { %v10866_v27 = vpop.f32.mrf.mxu0 }
0x29b8   : > { %v10870_v38 = vadd.f32 %v10866_v27, %v10784_v21 }
0x29b9   : > { %v10950_v18 = vpop.f32.mrf.mxu1  ;;  %v11028_v3 = vpop.f32.mrf.mxu0 }
0x29ba   : > { %v10955_v8 = vadd.f32 %v10950_v18, %v10869_v47 }
0x29bb   : > { %v10952_v37 = vpop.f32.mrf.mxu1  ;;  %v11030_v56 = vpop.f32.mrf.mxu0 }
0x29bc   : > { %v10956_v1 = vadd.f32 %v10952_v37, %v10870_v38  ;;  %v11033_v41 = vadd.f32 %v11028_v3, %v10955_v8 }
0x29bd   : > { %v11114_v13 = vpop.f32.mrf.mxu1 }
0x29be   : > { %v11034_v15 = vadd.f32 %v11030_v56, %v10956_v1  ;;  %v11119_v55 = vadd.f32 %v11114_v13, %v11033_v41 }
0x29bf   : > { %v11116_v11 = vpop.f32.mrf.mxu1 }
0x29c0   : > { %v11120_v31 = vadd.f32 %v11116_v11, %v11034_v15 }
0x29c1   : > { %v11200_v42 = vpop.f32.mrf.mxu0 }
0x29c2   : > { %v11205_v44 = vadd.f32 %v11200_v42, %v11119_v55 }
0x29c3   : > { %v11202_v30 = vpop.f32.mrf.mxu0 }
0x29c4   : > { %v11206_v40 = vadd.f32 %v11202_v30, %v11120_v31 }
0x29c5   : > { %v11286_v61 = vpop.f32.mrf.mxu1 }
0x29c6   : > { %v11291_v6 = vadd.f32 %v11286_v61, %v11205_v44 }
0x29c7   : > { %v11288_v23 = vpop.f32.mrf.mxu1 }
0x29c8   : > { %v11292_v32 = vadd.f32 %v11288_v23, %v11206_v40 }
0x29c9   : > { %v11372_v54 = vpop.f32.mrf.mxu0 }
0x29ca   : > { %v11377_v36 = vadd.f32 %v11372_v54, %v11291_v6 }
0x29cb   : > { %v11374_v7 = vpop.f32.mrf.mxu0 }
0x29cc   : > { %v11378_v20 = vadd.f32 %v11374_v7, %v11292_v32  ;;  %v11379_v59 = vmax.f32 %v11377_v36, 0.0 }
0x29ce   : > { %v11380_v35 = vmax.f32 %v11378_v20, 0.0 }
0x29d0   : > { %11419 = vmatprep.subr.mxu1 %v11380_v35 }
0x29d1   : > { %11420 = vmatpush1.msra.mxu1 %v11379_v59 }
0x29d2   : > { %11965 = vmatmul.mubr.msk.f32.vlgmr.msra.gmra.mxu1 %vm2448_vm13, %v11381_v5 }
0x2a92   : > { %v11455_v29 = vpop.f32.mrf.mxu1 }
0x2a93   : > { %v11456_v19 = vadd.f32 %v11455_v29, %v11385_v26 }
0x2a94   : > { %v11457_v28 = vpop.f32.mrf.mxu1 }
0x2a95   : > { %v11966_v62 = vmul.f32 -1.442695, %v11456_v19  ;;  %v11458_v2 = vadd.f32 %v11457_v28, %v11385_v26 }
0x2a97   : > { %12970 = vpow2.f32 %v11966_v62  ;;  %v11967_v45 = vmul.f32 -1.442695, %v11458_v2 }
0x2a99   : > { %12972 = vpow2.f32 %v11967_v45 }
0x2aa4   : > { %v12971_v57 = vpop.eup %12970 }
0x2aa5   : > { %v11466_v17 = vadd.f32 1.0, %v12971_v57 }
0x2aa6   : > { %v12973_v33 = vpop.eup %12972 }
0x2aa7   : > { %v11467_v49 = vadd.f32 1.0, %v12973_v33  ;;  %12974 = vrcp.f32 %v11466_v17 }
0x2aa9   : > { %12976 = vrcp.f32 %v11467_v49 }
0x2ab4   : > { %v12975_v14 = vpop.eup %12974 }
0x2ab6   : > { %v12977_v48 = vpop.eup %12976 }
0x2ab7   : > { %v11474_v25 = vcombine.low %v12975_v14, %v12977_v48 }
0x2ab9   : > { %11968 = vst.sshfl [vmem:[%s359_s21] sm:$0x33 pattern:$0x76325410] %v11474_v25 }
0x2aba PF: > { %s16403_s26 = sld [smem:[#allocation2_spill]] }
0x2ac0   : > { %s20_s13 = sadd.s32 1, %s16403_s26  }
0x2ac1   : > { %p17_p4 = scmp.ge.s32.totalorder %s20_s13, 4  }
0x2ac3   :  { %19 = sbr.rel (!%p17_p4) target bundleno = 6 (0x6), region = 199 }

</bundles_post_ra>
